<compile_context>
chip_gen: v5e
topology: v5e:2x2
jax: 0.10.0
libtpu: 0.0.40
codegen_flags: <defaults>
</compile_context>

<pallas_src>
import math
import functools

import jax
import jax.numpy as jnp
from jax import lax
from jax.experimental import pallas as pl
from jax.experimental.pallas import tpu as pltpu


_PARAM_ORDER = ("ln1_g", "ln1_b", "wqkv", "bqkv", "wp", "bp",
                "ln2_g", "ln2_b", "w1", "b1", "w2", "b2")


def _param_shapes(C):
    f32, bf16 = jnp.float32, jnp.bfloat16
    return {
        "ln1_g": ((1, C), f32), "ln1_b": ((1, C), f32),
        "wqkv": ((C, 3 * C), bf16), "bqkv": ((1, 3 * C), f32),
        "wp": ((C, C), bf16), "bp": ((1, C), f32),
        "ln2_g": ((1, C), f32), "ln2_b": ((1, C), f32),
        "w1": ((C, 4 * C), bf16), "b1": ((1, 4 * C), f32),
        "w2": ((4 * C, C), bf16), "b2": ((1, C), f32),
    }


# ----------------------------- kernel -------------------------------------
def _block_kernel(x_ref,
                  ln1_g_ref, ln1_b_ref,
                  wqkv_ref, bqkv_ref, wp_ref, bp_ref,
                  ln2_g_ref, ln2_b_ref,
                  w1_ref, b1_ref, w2_ref, b2_ref,
                  o_ref,
                  qkv_sc,                      # (bb*T, 3C) bf16 VMEM scratch
                  *, n_head: int, bb: int, T: int, C: int):
    M = bb * T
    hd = C // n_head
    f32, bf16 = jnp.float32, jnp.bfloat16

    def layernorm(z, g, b):                    # f32 elementwise (v5e-safe)
        mu = jnp.mean(z, axis=-1, keepdims=True)
        d = z - mu
        var = jnp.mean(d * d, axis=-1, keepdims=True)
        return d * lax.rsqrt(var + 1e-5) * g + b

    # ---------------- attention branch ----------------
    h = layernorm(x_ref[...].reshape(M, C).astype(f32),
                  ln1_g_ref[0], ln1_b_ref[0]).astype(bf16)

    # fused q/k/v projection; 1/sqrt(hd) already folded into the q columns of
    # wqkv/bqkv by the wrapper.  One bf16 cast of the whole (M, 3C) tensor,
    # staged in VMEM so per-head access is a plain static ref slice.
    qkv_sc[...] = (jnp.dot(h, wqkv_ref[...], preferred_element_type=f32)
                   + bqkv_ref[0]).astype(bf16)

    # additive causal bias built ONCE per grid step (shared by all heads and
    # all batch rows of this step)
    rows = lax.broadcasted_iota(jnp.int32, (T, T), 0)
    cols = lax.broadcasted_iota(jnp.int32, (T, T), 1)
    causal_bias = jnp.where(rows >= cols, 0.0, -1e30)            # (T, T) f32

    batch_outs = []
    for b in range(bb):                         # attention is per batch element
        r0 = b * T
        head_outs = []
        for hh in range(n_head):
            lo = hh * hd
            qh = qkv_sc[r0:r0 + T, lo:lo + hd]                   # pre-scaled q
            kh = qkv_sc[r0:r0 + T, C + lo:C + lo + hd]
            vh = qkv_sc[r0:r0 + T, 2 * C + lo:2 * C + lo + hd]

            s = jnp.dot(qh, kh.T, preferred_element_type=f32) + causal_bias
            m = jnp.max(s, axis=-1, keepdims=True)
            p = jnp.exp(s - m)                                   # f32 exp (EUP)
            l = jnp.sum(p, axis=-1, keepdims=True)
            oh = jnp.dot(p.astype(bf16), vh, preferred_element_type=f32)
            # normalize after PV; approx reciprocal uses the (free) EUP slot
            oh = oh * pl.reciprocal(l, approx=True)
            head_outs.append(oh.astype(bf16))
        # lane-dense (T, C) value — no 32-lane masked vst.msk scratch stores
        batch_outs.append(jnp.concatenate(head_outs, axis=-1))
    y_heads = batch_outs[0] if bb == 1 else jnp.concatenate(batch_outs, axis=0)

    y = jnp.dot(y_heads, wp_ref[...], preferred_element_type=f32) + bp_ref[0]
    # re-read x from VMEM for the residual (cheap; shortens x's live range)
    x1 = x_ref[...].reshape(M, C).astype(f32) + y

    # ---------------- MLP branch ----------------
    h2 = layernorm(x1, ln2_g_ref[0], ln2_b_ref[0]).astype(bf16)
    m1 = jnp.dot(h2, w1_ref[...], preferred_element_type=f32) + b1_ref[0]
    # exact (erf) GELU in f32 — matches F.gelu default
    g1 = 0.5 * m1 * (1.0 + lax.erf(m1 * (1.0 / math.sqrt(2.0))))
    m2 = jnp.dot(g1.astype(bf16), w2_ref[...], preferred_element_type=f32) + b2_ref[0]

    o_ref[...] = (x1 + m2).reshape(bb, T, C).astype(o_ref.dtype)


# ----------------------------- wrapper -------------------------------------
def _vmem_capacity_bytes():
    try:
        cap = getattr(pltpu.get_tpu_info(), "vmem_capacity_bytes", None)
        if cap:
            return int(cap)
    except Exception:
        pass
    return 64 * 1024 * 1024      # conservative (v7x per-TC VMEM)


def _rows_per_step(B, T):
    """Batch rows folded per grid step: target M=bb*T >= 256 (256-wide MXU on
    v6e/v7x) but keep >= 2 grid steps so both v7x TensorCores stay busy."""
    target = max(1, 256 // T) if T < 256 else 1
    bb = max(1, min(B, target))
    if B >= 2:
        bb = min(bb, max(1, B // 2))
    while B % bb:
        bb -= 1
    return bb


@functools.lru_cache(maxsize=None)
def _build_call(n_steps, bb, T, C, n_head, out_dtype_name):
    out_dtype = jnp.dtype(out_dtype_name)
    shapes = _param_shapes(C)
    M = bb * T

    in_specs = [pl.BlockSpec((bb, T, C), lambda g: (g, 0, 0))]
    for name in _PARAM_ORDER:
        shp, _ = shapes[name]
        in_specs.append(pl.BlockSpec(shp, lambda g: (0, 0)))

    # VMEM budget: double-buffered params + in/out blocks + qkv scratch + a
    # rough live-value peak (one (T,T) score block at a time), clamped to the
    # chip's real capacity minus headroom.
    param_bytes = sum(math.prod(shp) * jnp.dtype(dt).itemsize
                      for shp, dt in shapes.values())
    io_bytes = 2 * 2 * M * C * out_dtype.itemsize          # x + o, double-buffered
    scratch_bytes = M * 3 * C * 2                           # qkv_sc (bf16)
    live_bytes = (M * 3 * C * 4 + 2 * T * T * 4
                  + 2 * M * 4 * C * 4 + 4 * M * C * 4)
    want = 2 * param_bytes + io_bytes + scratch_bytes + live_bytes + (8 << 20)
    cap = _vmem_capacity_bytes()
    vmem_limit = int(max(32 << 20, min(want, cap - (16 << 20))))

    return pl.pallas_call(
        functools.partial(_block_kernel, n_head=n_head, bb=bb, T=T, C=C),
        out_shape=jax.ShapeDtypeStruct((n_steps * bb, T, C), out_dtype),
        grid_spec=pltpu.PrefetchScalarGridSpec(
            num_scalar_prefetch=0,
            grid=(n_steps,),
            in_specs=in_specs,
            out_specs=pl.BlockSpec((bb, T, C), lambda g: (g, 0, 0)),
            scratch_shapes=[pltpu.VMEM((M, 3 * C), jnp.bfloat16)],
        ),
        compiler_params=pltpu.CompilerParams(
            dimension_semantics=("parallel",),     # batch axis -> megacore / 2 TCs
            vmem_limit_bytes=vmem_limit),
    )


def prepare_params(params, n_head):
    """One-time weight fusion / bf16 cast / scale folding (do this OUTSIDE the
    per-step call; the result can be reused for every forward pass)."""
    f32, bf16 = jnp.float32, jnp.bfloat16
    C = params["wq"].shape[0]
    scale = 1.0 / math.sqrt(C // n_head)
    return {
        "ln1_g": params["ln1_g"].astype(f32),
        "ln1_b": params["ln1_b"].astype(f32),
        # fused q/k/v weight (C,3C); 1/sqrt(hd) folded into the q columns
        "wqkv": jnp.concatenate([params["wq"] * scale, params["wk"],
                                 params["wv"]], axis=1).astype(bf16),
        "bqkv": jnp.concatenate([params["bq"] * scale, params["bk"],
                                 params["bv"]], axis=1).astype(f32),
        "wp": params["wp"].astype(bf16), "bp": params["bp"].astype(f32),
        "ln2_g": params["ln2_g"].astype(f32),
        "ln2_b": params["ln2_b"].astype(f32),
        "w1": params["w1"].astype(bf16), "b1": params["b1"].astype(f32),
        "w2": params["w2"].astype(bf16), "b2": params["b2"].astype(f32),
    }


@functools.partial(jax.jit, static_argnames=("n_head",))
def transformer_block(x, prepared, n_head):
    """Pallas forward pass of the Transformer Block (eval mode, no dropout)."""
    B, T, C = x.shape
    bb = _rows_per_step(B, T)
    fn = _build_call(B // bb, bb, T, C, n_head, jnp.dtype(x.dtype).name)
    args = [prepared[name] for name in _PARAM_ORDER]
    return fn(x, *args)


# ----------------------------- reference (pure JAX, f32) --------------------
def reference_block(x, params, n_head):
    def layernorm(z, g, b):
        mu = jnp.mean(z, axis=-1, keepdims=True)
        var = jnp.mean((z - mu) ** 2, axis=-1, keepdims=True)
        return (z - mu) / jnp.sqrt(var + 1e-5) * g + b

    B, T, C = x.shape
    hd = C // n_head

    h = layernorm(x, params["ln1_g"][0], params["ln1_b"][0])
    q = h @ params["wq"] + params["bq"][0]
    k = h @ params["wk"] + params["bk"][0]
    v = h @ params["wv"] + params["bv"][0]
    q = q.reshape(B, T, n_head, hd).transpose(0, 2, 1, 3)
    k = k.reshape(B, T, n_head, hd).transpose(0, 2, 1, 3)
    v = v.reshape(B, T, n_head, hd).transpose(0, 2, 1, 3)
    att = (q @ k.transpose(0, 1, 3, 2)) / math.sqrt(hd)
    mask = jnp.tril(jnp.ones((T, T), bool))
    att = jnp.where(mask[None, None], att, -jnp.inf)
    att = jax.nn.softmax(att, axis=-1)
    y = (att @ v).transpose(0, 2, 1, 3).reshape(B, T, C)
    y = y @ params["wp"] + params["bp"][0]
    x1 = x + y

    h2 = layernorm(x1, params["ln2_g"][0], params["ln2_b"][0])
    m = h2 @ params["w1"] + params["b1"][0]
    m = jax.nn.gelu(m, approximate=False)
    m = m @ params["w2"] + params["b2"][0]
    return x1 + m


# ----------------------------- main ----------------------------------------
if __name__ == "__main__":
    B, T, C, n_head = 2, 128, 128, 4     # block_size = T, head_dim = 32

    key = jax.random.PRNGKey(0)
    keys = jax.random.split(key, 8)

    def w(k, shape, scale=0.02):
        return (scale * jax.random.normal(k, shape)).astype(jnp.float32)

    params = {
        "ln1_g": jnp.ones((1, C), jnp.float32),
        "ln1_b": jnp.zeros((1, C), jnp.float32),
        "wq": w(keys[0], (C, C)), "bq": jnp.zeros((1, C), jnp.float32),
        "wk": w(keys[1], (C, C)), "bk": jnp.zeros((1, C), jnp.float32),
        "wv": w(keys[2], (C, C)), "bv": jnp.zeros((1, C), jnp.float32),
        "wp": w(keys[3], (C, C)), "bp": jnp.zeros((1, C), jnp.float32),
        "ln2_g": jnp.ones((1, C), jnp.float32),
        "ln2_b": jnp.zeros((1, C), jnp.float32),
        "w1": w(keys[4], (C, 4 * C)), "b1": jnp.zeros((1, 4 * C), jnp.float32),
        "w2": w(keys[5], (4 * C, C)), "b2": jnp.zeros((1, C), jnp.float32),
    }

    x = jax.random.normal(keys[6], (B, T, C), jnp.float32)

    prepared = prepare_params(params, n_head)          # one-time weight prep
    out = jax.block_until_ready(transformer_block(x, prepared, n_head))

    ref = reference_block(x, params, n_head)
    err = jnp.max(jnp.abs(out - ref))
    # bf16 MXU operands + pl.reciprocal(approx=True) -> relaxed tolerance vs
    # the pure-f32 reference (documented; use approx=False for tighter parity)
    assert jnp.allclose(out, ref, atol=2e-2, rtol=2e-2), f"max abs err {err}"

    print("KERNEL_OK")
</pallas_src>

<mosaic_0001>
module attributes {stable_mosaic.version = 11 : i64} {
  func.func @_block_kernel(%arg0: i32, %arg1: memref<1x128x128xf32, #tpu.memory_space<vmem>>, %arg2: memref<1x128xf32, #tpu.memory_space<vmem>>, %arg3: memref<1x128xf32, #tpu.memory_space<vmem>>, %arg4: memref<128x384xbf16, #tpu.memory_space<vmem>>, %arg5: memref<1x384xf32, #tpu.memory_space<vmem>>, %arg6: memref<128x128xbf16, #tpu.memory_space<vmem>>, %arg7: memref<1x128xf32, #tpu.memory_space<vmem>>, %arg8: memref<1x128xf32, #tpu.memory_space<vmem>>, %arg9: memref<1x128xf32, #tpu.memory_space<vmem>>, %arg10: memref<128x512xbf16, #tpu.memory_space<vmem>>, %arg11: memref<1x512xf32, #tpu.memory_space<vmem>>, %arg12: memref<512x128xbf16, #tpu.memory_space<vmem>>, %arg13: memref<1x128xf32, #tpu.memory_space<vmem>>, %arg14: memref<1x128x128xf32, #tpu.memory_space<vmem>>, %arg15: memref<128x384xbf16, #tpu.memory_space<vmem>>) attributes {dimension_semantics = [#tpu.dimension_semantics<parallel>], iteration_bounds = array<i64: 2>, scalar_prefetch = 0 : i64, scratch_operands = 1 : i64, tpu.core_type = #tpu.core_type<tc>, window_params = [{transform_indices = @transform_0, window_bounds = array<i64: 1, 128, 128>}, {pipeline_mode = #tpu.pipeline_mode<synchronous>, transform_indices = @transform_1, window_bounds = array<i64: 1, 128>}, {pipeline_mode = #tpu.pipeline_mode<synchronous>, transform_indices = @transform_2, window_bounds = array<i64: 1, 128>}, {pipeline_mode = #tpu.pipeline_mode<synchronous>, transform_indices = @transform_3, window_bounds = array<i64: 128, 384>}, {pipeline_mode = #tpu.pipeline_mode<synchronous>, transform_indices = @transform_4, window_bounds = array<i64: 1, 384>}, {pipeline_mode = #tpu.pipeline_mode<synchronous>, transform_indices = @transform_5, window_bounds = array<i64: 128, 128>}, {pipeline_mode = #tpu.pipeline_mode<synchronous>, transform_indices = @transform_6, window_bounds = array<i64: 1, 128>}, {pipeline_mode = #tpu.pipeline_mode<synchronous>, transform_indices = @transform_7, window_bounds = array<i64: 1, 128>}, {pipeline_mode = #tpu.pipeline_mode<synchronous>, transform_indices = @transform_8, window_bounds = array<i64: 1, 128>}, {pipeline_mode = #tpu.pipeline_mode<synchronous>, transform_indices = @transform_9, window_bounds = array<i64: 128, 512>}, {pipeline_mode = #tpu.pipeline_mode<synchronous>, transform_indices = @transform_10, window_bounds = array<i64: 1, 512>}, {pipeline_mode = #tpu.pipeline_mode<synchronous>, transform_indices = @transform_11, window_bounds = array<i64: 512, 128>}, {pipeline_mode = #tpu.pipeline_mode<synchronous>, transform_indices = @transform_12, window_bounds = array<i64: 1, 128>}, {transform_indices = @transform_13, window_bounds = array<i64: 1, 128, 128>}]} {
    %c0 = arith.constant 0 : index
    %c0_0 = arith.constant 0 : index
    %c0_1 = arith.constant 0 : index
    %0 = vector.load %arg1[%c0, %c0_0, %c0_1] : memref<1x128x128xf32, #tpu.memory_space<vmem>>, vector<1x128x128xf32>
    %1 = vector.shape_cast %0 : vector<1x128x128xf32> to vector<128x128xf32>
    %c0_2 = arith.constant 0 : index
    %c0_3 = arith.constant 0 : index
    %2 = vector.load %arg2[%c0_2, %c0_3] : memref<1x128xf32, #tpu.memory_space<vmem>>, vector<1x128xf32>
    %3 = vector.shape_cast %2 : vector<1x128xf32> to vector<128xf32>
    %c0_4 = arith.constant 0 : index
    %c0_5 = arith.constant 0 : index
    %4 = vector.load %arg3[%c0_4, %c0_5] : memref<1x128xf32, #tpu.memory_space<vmem>>, vector<1x128xf32>
    %5 = vector.shape_cast %4 : vector<1x128xf32> to vector<128xf32>
    %cst = arith.constant dense<0.000000e+00> : vector<128xf32>
    %6 = vector.multi_reduction <add>, %1, %cst [1] : vector<128x128xf32> to vector<128xf32>
    %7 = vector.shape_cast %6 : vector<128xf32> to vector<128x1xf32>
    %cst_6 = arith.constant 1.280000e+02 : f32
    %8 = vector.broadcast %cst_6 : f32 to vector<128x1xf32>
    %9 = arith.divf %7, %8 : vector<128x1xf32>
    %10 = vector.broadcast %9 : vector<128x1xf32> to vector<128x128xf32>
    %11 = arith.subf %1, %10 : vector<128x128xf32>
    %12 = arith.mulf %11, %11 : vector<128x128xf32>
    %cst_7 = arith.constant dense<0.000000e+00> : vector<128xf32>
    %13 = vector.multi_reduction <add>, %12, %cst_7 [1] : vector<128x128xf32> to vector<128xf32>
    %14 = vector.shape_cast %13 : vector<128xf32> to vector<128x1xf32>
    %cst_8 = arith.constant 1.280000e+02 : f32
    %15 = vector.broadcast %cst_8 : f32 to vector<128x1xf32>
    %16 = arith.divf %14, %15 : vector<128x1xf32>
    %cst_9 = arith.constant 9.99999974E-6 : f32
    %17 = vector.broadcast %cst_9 : f32 to vector<128x1xf32>
    %18 = arith.addf %16, %17 : vector<128x1xf32>
    %19 = math.rsqrt %18 : vector<128x1xf32>
    %20 = vector.broadcast %19 : vector<128x1xf32> to vector<128x128xf32>
    %21 = arith.mulf %11, %20 : vector<128x128xf32>
    %22 = vector.shape_cast %3 : vector<128xf32> to vector<1x128xf32>
    %23 = vector.broadcast %22 : vector<1x128xf32> to vector<128x128xf32>
    %24 = arith.mulf %21, %23 : vector<128x128xf32>
    %25 = vector.shape_cast %5 : vector<128xf32> to vector<1x128xf32>
    %26 = vector.broadcast %25 : vector<1x128xf32> to vector<128x128xf32>
    %27 = arith.addf %24, %26 : vector<128x128xf32>
    %28 = arith.truncf %27 : vector<128x128xf32> to vector<128x128xbf16>
    %c0_10 = arith.constant 0 : index
    %c0_11 = arith.constant 0 : index
    %29 = vector.load %arg4[%c0_10, %c0_11] : memref<128x384xbf16, #tpu.memory_space<vmem>>, vector<128x384xbf16>
    %cst_12 = arith.constant dense<0.000000e+00> : vector<128x384xf32>
    %30 = tpu.matmul %28, %29, %cst_12 {dimension_numbers = #tpu.dot_dimension_numbers<[1], [0], [0], [1], [0, 0, 1, 1], [], []>} : vector<128x128xbf16>, vector<128x384xbf16>, vector<128x384xf32> -> vector<128x384xf32>
    %c0_13 = arith.constant 0 : index
    %c0_14 = arith.constant 0 : index
    %31 = vector.load %arg5[%c0_13, %c0_14] : memref<1x384xf32, #tpu.memory_space<vmem>>, vector<1x384xf32>
    %32 = vector.shape_cast %31 : vector<1x384xf32> to vector<384xf32>
    %33 = vector.shape_cast %32 : vector<384xf32> to vector<1x384xf32>
    %34 = vector.broadcast %33 : vector<1x384xf32> to vector<128x384xf32>
    %35 = arith.addf %30, %34 : vector<128x384xf32>
    %36 = arith.truncf %35 : vector<128x384xf32> to vector<128x384xbf16>
    %c0_15 = arith.constant 0 : index
    %c0_16 = arith.constant 0 : index
    %37 = vector.load %arg15[%c0_15, %c0_16] : memref<128x384xbf16, #tpu.memory_space<vmem>>, vector<128x384xbf16>
    tpu.vector_store %arg15[%c0_15, %c0_16], %36 {strides = array<i32>} : memref<128x384xbf16, #tpu.memory_space<vmem>>, vector<128x384xbf16>,
    %38 = tpu.iota {dimensions = array<i32: 0>} : vector<128x128xi32>
    %39 = tpu.iota {dimensions = array<i32: 1>} : vector<128x128xi32>
    %40 = arith.cmpi sge, %38, %39 : vector<128x128xi32>
    %cst_17 = arith.constant 0.000000e+00 : f32
    %cst_18 = arith.constant -1.000000e+30 : f32
    %41 = vector.broadcast %cst_17 : f32 to vector<128x128xf32>
    %42 = vector.broadcast %cst_18 : f32 to vector<128x128xf32>
    %43 = arith.select %40, %41, %42 : vector<128x128xi1>, vector<128x128xf32>
    %c0_19 = arith.constant 0 : index
    %c0_20 = arith.constant 0 : index
    %44 = vector.load %arg15[%c0_19, %c0_20] : memref<128x384xbf16, #tpu.memory_space<vmem>>, vector<128x32xbf16>
    %c0_21 = arith.constant 0 : index
    %c128 = arith.constant 128 : index
    %45 = vector.load %arg15[%c0_21, %c128] : memref<128x384xbf16, #tpu.memory_space<vmem>>, vector<128x32xbf16>
    %c0_22 = arith.constant 0 : index
    %c256 = arith.constant 256 : index
    %46 = vector.load %arg15[%c0_22, %c256] : memref<128x384xbf16, #tpu.memory_space<vmem>>, vector<128x32xbf16>
    %47 = tpu.transpose %45, [1, 0] : vector<128x32xbf16> -> vector<32x128xbf16>
    %cst_23 = arith.constant dense<0.000000e+00> : vector<128x128xf32>
    %48 = tpu.matmul %44, %47, %cst_23 {dimension_numbers = #tpu.dot_dimension_numbers<[1], [0], [0], [1], [0, 0, 1, 1], [], []>} : vector<128x32xbf16>, vector<32x128xbf16>, vector<128x128xf32> -> vector<128x128xf32>
    %49 = arith.addf %48, %43 : vector<128x128xf32>
    %cst_24 = arith.constant dense<0xFF800000> : vector<128xf32>
    %50 = vector.multi_reduction <maximumf>, %49, %cst_24 [1] : vector<128x128xf32> to vector<128xf32>
    %51 = vector.shape_cast %50 : vector<128xf32> to vector<128x1xf32>
    %52 = vector.broadcast %51 : vector<128x1xf32> to vector<128x128xf32>
    %53 = arith.subf %49, %52 : vector<128x128xf32>
    %54 = math.exp %53 : vector<128x128xf32>
    %cst_25 = arith.constant dense<0.000000e+00> : vector<128xf32>
    %55 = vector.multi_reduction <add>, %54, %cst_25 [1] : vector<128x128xf32> to vector<128xf32>
    %56 = vector.shape_cast %55 : vector<128xf32> to vector<128x1xf32>
    %57 = arith.truncf %54 : vector<128x128xf32> to vector<128x128xbf16>
    %cst_26 = arith.constant dense<0.000000e+00> : vector<128x32xf32>
    %58 = tpu.matmul %57, %46, %cst_26 {dimension_numbers = #tpu.dot_dimension_numbers<[1], [0], [0], [1], [0, 0, 1, 1], [], []>} : vector<128x128xbf16>, vector<128x32xbf16>, vector<128x32xf32> -> vector<128x32xf32>
    %59 = tpu.reciprocal %56 {approx = true} : vector<128x1xf32> -> vector<128x1xf32>
    %60 = vector.broadcast %59 : vector<128x1xf32> to vector<128x32xf32>
    %61 = arith.mulf %58, %60 : vector<128x32xf32>
    %62 = arith.truncf %61 : vector<128x32xf32> to vector<128x32xbf16>
    %c0_27 = arith.constant 0 : index
    %c32 = arith.constant 32 : index
    %63 = vector.load %arg15[%c0_27, %c32] : memref<128x384xbf16, #tpu.memory_space<vmem>>, vector<128x32xbf16>
    %c0_28 = arith.constant 0 : index
    %c160 = arith.constant 160 : index
    %64 = vector.load %arg15[%c0_28, %c160] : memref<128x384xbf16, #tpu.memory_space<vmem>>, vector<128x32xbf16>
    %c0_29 = arith.constant 0 : index
    %c288 = arith.constant 288 : index
    %65 = vector.load %arg15[%c0_29, %c288] : memref<128x384xbf16, #tpu.memory_space<vmem>>, vector<128x32xbf16>
    %66 = tpu.transpose %64, [1, 0] : vector<128x32xbf16> -> vector<32x128xbf16>
    %cst_30 = arith.constant dense<0.000000e+00> : vector<128x128xf32>
    %67 = tpu.matmul %63, %66, %cst_30 {dimension_numbers = #tpu.dot_dimension_numbers<[1], [0], [0], [1], [0, 0, 1, 1], [], []>} : vector<128x32xbf16>, vector<32x128xbf16>, vector<128x128xf32> -> vector<128x128xf32>
    %68 = arith.addf %67, %43 : vector<128x128xf32>
    %cst_31 = arith.constant dense<0xFF800000> : vector<128xf32>
    %69 = vector.multi_reduction <maximumf>, %68, %cst_31 [1] : vector<128x128xf32> to vector<128xf32>
    %70 = vector.shape_cast %69 : vector<128xf32> to vector<128x1xf32>
    %71 = vector.broadcast %70 : vector<128x1xf32> to vector<128x128xf32>
    %72 = arith.subf %68, %71 : vector<128x128xf32>
    %73 = math.exp %72 : vector<128x128xf32>
    %cst_32 = arith.constant dense<0.000000e+00> : vector<128xf32>
    %74 = vector.multi_reduction <add>, %73, %cst_32 [1] : vector<128x128xf32> to vector<128xf32>
    %75 = vector.shape_cast %74 : vector<128xf32> to vector<128x1xf32>
    %76 = arith.truncf %73 : vector<128x128xf32> to vector<128x128xbf16>
    %cst_33 = arith.constant dense<0.000000e+00> : vector<128x32xf32>
    %77 = tpu.matmul %76, %65, %cst_33 {dimension_numbers = #tpu.dot_dimension_numbers<[1], [0], [0], [1], [0, 0, 1, 1], [], []>} : vector<128x128xbf16>, vector<128x32xbf16>, vector<128x32xf32> -> vector<128x32xf32>
    %78 = tpu.reciprocal %75 {approx = true} : vector<128x1xf32> -> vector<128x1xf32>
    %79 = vector.broadcast %78 : vector<128x1xf32> to vector<128x32xf32>
    %80 = arith.mulf %77, %79 : vector<128x32xf32>
    %81 = arith.truncf %80 : vector<128x32xf32> to vector<128x32xbf16>
    %c0_34 = arith.constant 0 : index
    %c64 = arith.constant 64 : index
    %82 = vector.load %arg15[%c0_34, %c64] : memref<128x384xbf16, #tpu.memory_space<vmem>>, vector<128x32xbf16>
    %c0_35 = arith.constant 0 : index
    %c192 = arith.constant 192 : index
    %83 = vector.load %arg15[%c0_35, %c192] : memref<128x384xbf16, #tpu.memory_space<vmem>>, vector<128x32xbf16>
    %c0_36 = arith.constant 0 : index
    %c320 = arith.constant 320 : index
    %84 = vector.load %arg15[%c0_36, %c320] : memref<128x384xbf16, #tpu.memory_space<vmem>>, vector<128x32xbf16>
    %85 = tpu.transpose %83, [1, 0] : vector<128x32xbf16> -> vector<32x128xbf16>
    %cst_37 = arith.constant dense<0.000000e+00> : vector<128x128xf32>
    %86 = tpu.matmul %82, %85, %cst_37 {dimension_numbers = #tpu.dot_dimension_numbers<[1], [0], [0], [1], [0, 0, 1, 1], [], []>} : vector<128x32xbf16>, vector<32x128xbf16>, vector<128x128xf32> -> vector<128x128xf32>
    %87 = arith.addf %86, %43 : vector<128x128xf32>
    %cst_38 = arith.constant dense<0xFF800000> : vector<128xf32>
    %88 = vector.multi_reduction <maximumf>, %87, %cst_38 [1] : vector<128x128xf32> to vector<128xf32>
    %89 = vector.shape_cast %88 : vector<128xf32> to vector<128x1xf32>
    %90 = vector.broadcast %89 : vector<128x1xf32> to vector<128x128xf32>
    %91 = arith.subf %87, %90 : vector<128x128xf32>
    %92 = math.exp %91 : vector<128x128xf32>
    %cst_39 = arith.constant dense<0.000000e+00> : vector<128xf32>
    %93 = vector.multi_reduction <add>, %92, %cst_39 [1] : vector<128x128xf32> to vector<128xf32>
    %94 = vector.shape_cast %93 : vector<128xf32> to vector<128x1xf32>
    %95 = arith.truncf %92 : vector<128x128xf32> to vector<128x128xbf16>
    %cst_40 = arith.constant dense<0.000000e+00> : vector<128x32xf32>
    %96 = tpu.matmul %95, %84, %cst_40 {dimension_numbers = #tpu.dot_dimension_numbers<[1], [0], [0], [1], [0, 0, 1, 1], [], []>} : vector<128x128xbf16>, vector<128x32xbf16>, vector<128x32xf32> -> vector<128x32xf32>
    %97 = tpu.reciprocal %94 {approx = true} : vector<128x1xf32> -> vector<128x1xf32>
    %98 = vector.broadcast %97 : vector<128x1xf32> to vector<128x32xf32>
    %99 = arith.mulf %96, %98 : vector<128x32xf32>
    %100 = arith.truncf %99 : vector<128x32xf32> to vector<128x32xbf16>
    %c0_41 = arith.constant 0 : index
    %c96 = arith.constant 96 : index
    %101 = vector.load %arg15[%c0_41, %c96] : memref<128x384xbf16, #tpu.memory_space<vmem>>, vector<128x32xbf16>
    %c0_42 = arith.constant 0 : index
    %c224 = arith.constant 224 : index
    %102 = vector.load %arg15[%c0_42, %c224] : memref<128x384xbf16, #tpu.memory_space<vmem>>, vector<128x32xbf16>
    %c0_43 = arith.constant 0 : index
    %c352 = arith.constant 352 : index
    %103 = vector.load %arg15[%c0_43, %c352] : memref<128x384xbf16, #tpu.memory_space<vmem>>, vector<128x32xbf16>
    %104 = tpu.transpose %102, [1, 0] : vector<128x32xbf16> -> vector<32x128xbf16>
    %cst_44 = arith.constant dense<0.000000e+00> : vector<128x128xf32>
    %105 = tpu.matmul %101, %104, %cst_44 {dimension_numbers = #tpu.dot_dimension_numbers<[1], [0], [0], [1], [0, 0, 1, 1], [], []>} : vector<128x32xbf16>, vector<32x128xbf16>, vector<128x128xf32> -> vector<128x128xf32>
    %106 = arith.addf %105, %43 : vector<128x128xf32>
    %cst_45 = arith.constant dense<0xFF800000> : vector<128xf32>
    %107 = vector.multi_reduction <maximumf>, %106, %cst_45 [1] : vector<128x128xf32> to vector<128xf32>
    %108 = vector.shape_cast %107 : vector<128xf32> to vector<128x1xf32>
    %109 = vector.broadcast %108 : vector<128x1xf32> to vector<128x128xf32>
    %110 = arith.subf %106, %109 : vector<128x128xf32>
    %111 = math.exp %110 : vector<128x128xf32>
    %cst_46 = arith.constant dense<0.000000e+00> : vector<128xf32>
    %112 = vector.multi_reduction <add>, %111, %cst_46 [1] : vector<128x128xf32> to vector<128xf32>
    %113 = vector.shape_cast %112 : vector<128xf32> to vector<128x1xf32>
    %114 = arith.truncf %111 : vector<128x128xf32> to vector<128x128xbf16>
    %cst_47 = arith.constant dense<0.000000e+00> : vector<128x32xf32>
    %115 = tpu.matmul %114, %103, %cst_47 {dimension_numbers = #tpu.dot_dimension_numbers<[1], [0], [0], [1], [0, 0, 1, 1], [], []>} : vector<128x128xbf16>, vector<128x32xbf16>, vector<128x32xf32> -> vector<128x32xf32>
    %116 = tpu.reciprocal %113 {approx = true} : vector<128x1xf32> -> vector<128x1xf32>
    %117 = vector.broadcast %116 : vector<128x1xf32> to vector<128x32xf32>
    %118 = arith.mulf %115, %117 : vector<128x32xf32>
    %119 = arith.truncf %118 : vector<128x32xf32> to vector<128x32xbf16>
    %120 = tpu.concatenate %62, %81, %100, %119 in 1 : vector<128x32xbf16>, vector<128x32xbf16>, vector<128x32xbf16>, vector<128x32xbf16> -> vector<128x128xbf16>
    %c0_48 = arith.constant 0 : index
    %c0_49 = arith.constant 0 : index
    %121 = vector.load %arg6[%c0_48, %c0_49] : memref<128x128xbf16, #tpu.memory_space<vmem>>, vector<128x128xbf16>
    %cst_50 = arith.constant dense<0.000000e+00> : vector<128x128xf32>
    %122 = tpu.matmul %120, %121, %cst_50 {dimension_numbers = #tpu.dot_dimension_numbers<[1], [0], [0], [1], [0, 0, 1, 1], [], []>} : vector<128x128xbf16>, vector<128x128xbf16>, vector<128x128xf32> -> vector<128x128xf32>
    %c0_51 = arith.constant 0 : index
    %c0_52 = arith.constant 0 : index
    %123 = vector.load %arg7[%c0_51, %c0_52] : memref<1x128xf32, #tpu.memory_space<vmem>>, vector<1x128xf32>
    %124 = vector.shape_cast %123 : vector<1x128xf32> to vector<128xf32>
    %125 = vector.shape_cast %124 : vector<128xf32> to vector<1x128xf32>
    %126 = vector.broadcast %125 : vector<1x128xf32> to vector<128x128xf32>
    %127 = arith.addf %122, %126 : vector<128x128xf32>
    %c0_53 = arith.constant 0 : index
    %c0_54 = arith.constant 0 : index
    %c0_55 = arith.constant 0 : index
    %128 = vector.load %arg1[%c0_53, %c0_54, %c0_55] : memref<1x128x128xf32, #tpu.memory_space<vmem>>, vector<1x128x128xf32>
    %129 = vector.shape_cast %128 : vector<1x128x128xf32> to vector<128x128xf32>
    %130 = arith.addf %129, %127 : vector<128x128xf32>
    %c0_56 = arith.constant 0 : index
    %c0_57 = arith.constant 0 : index
    %131 = vector.load %arg8[%c0_56, %c0_57] : memref<1x128xf32, #tpu.memory_space<vmem>>, vector<1x128xf32>
    %132 = vector.shape_cast %131 : vector<1x128xf32> to vector<128xf32>
    %c0_58 = arith.constant 0 : index
    %c0_59 = arith.constant 0 : index
    %133 = vector.load %arg9[%c0_58, %c0_59] : memref<1x128xf32, #tpu.memory_space<vmem>>, vector<1x128xf32>
    %134 = vector.shape_cast %133 : vector<1x128xf32> to vector<128xf32>
    %cst_60 = arith.constant dense<0.000000e+00> : vector<128xf32>
    %135 = vector.multi_reduction <add>, %130, %cst_60 [1] : vector<128x128xf32> to vector<128xf32>
    %136 = vector.shape_cast %135 : vector<128xf32> to vector<128x1xf32>
    %cst_61 = arith.constant 1.280000e+02 : f32
    %137 = vector.broadcast %cst_61 : f32 to vector<128x1xf32>
    %138 = arith.divf %136, %137 : vector<128x1xf32>
    %139 = vector.broadcast %138 : vector<128x1xf32> to vector<128x128xf32>
    %140 = arith.subf %130, %139 : vector<128x128xf32>
    %141 = arith.mulf %140, %140 : vector<128x128xf32>
    %cst_62 = arith.constant dense<0.000000e+00> : vector<128xf32>
    %142 = vector.multi_reduction <add>, %141, %cst_62 [1] : vector<128x128xf32> to vector<128xf32>
    %143 = vector.shape_cast %142 : vector<128xf32> to vector<128x1xf32>
    %cst_63 = arith.constant 1.280000e+02 : f32
    %144 = vector.broadcast %cst_63 : f32 to vector<128x1xf32>
    %145 = arith.divf %143, %144 : vector<128x1xf32>
    %cst_64 = arith.constant 9.99999974E-6 : f32
    %146 = vector.broadcast %cst_64 : f32 to vector<128x1xf32>
    %147 = arith.addf %145, %146 : vector<128x1xf32>
    %148 = math.rsqrt %147 : vector<128x1xf32>
    %149 = vector.broadcast %148 : vector<128x1xf32> to vector<128x128xf32>
    %150 = arith.mulf %140, %149 : vector<128x128xf32>
    %151 = vector.shape_cast %132 : vector<128xf32> to vector<1x128xf32>
    %152 = vector.broadcast %151 : vector<1x128xf32> to vector<128x128xf32>
    %153 = arith.mulf %150, %152 : vector<128x128xf32>
    %154 = vector.shape_cast %134 : vector<128xf32> to vector<1x128xf32>
    %155 = vector.broadcast %154 : vector<1x128xf32> to vector<128x128xf32>
    %156 = arith.addf %153, %155 : vector<128x128xf32>
    %157 = arith.truncf %156 : vector<128x128xf32> to vector<128x128xbf16>
    %c0_65 = arith.constant 0 : index
    %c0_66 = arith.constant 0 : index
    %158 = vector.load %arg10[%c0_65, %c0_66] : memref<128x512xbf16, #tpu.memory_space<vmem>>, vector<128x512xbf16>
    %cst_67 = arith.constant dense<0.000000e+00> : vector<128x512xf32>
    %159 = tpu.matmul %157, %158, %cst_67 {dimension_numbers = #tpu.dot_dimension_numbers<[1], [0], [0], [1], [0, 0, 1, 1], [], []>} : vector<128x128xbf16>, vector<128x512xbf16>, vector<128x512xf32> -> vector<128x512xf32>
    %c0_68 = arith.constant 0 : index
    %c0_69 = arith.constant 0 : index
    %160 = vector.load %arg11[%c0_68, %c0_69] : memref<1x512xf32, #tpu.memory_space<vmem>>, vector<1x512xf32>
    %161 = vector.shape_cast %160 : vector<1x512xf32> to vector<512xf32>
    %162 = vector.shape_cast %161 : vector<512xf32> to vector<1x512xf32>
    %163 = vector.broadcast %162 : vector<1x512xf32> to vector<128x512xf32>
    %164 = arith.addf %159, %163 : vector<128x512xf32>
    %cst_70 = arith.constant 5.000000e-01 : f32
    %165 = vector.broadcast %cst_70 : f32 to vector<128x512xf32>
    %166 = arith.mulf %165, %164 : vector<128x512xf32>
    %cst_71 = arith.constant 0.707106769 : f32
    %167 = vector.broadcast %cst_71 : f32 to vector<128x512xf32>
    %168 = arith.mulf %164, %167 : vector<128x512xf32>
    %169 = math.erf %168 : vector<128x512xf32>
    %cst_72 = arith.constant 1.000000e+00 : f32
    %170 = vector.broadcast %cst_72 : f32 to vector<128x512xf32>
    %171 = arith.addf %170, %169 : vector<128x512xf32>
    %172 = arith.mulf %166, %171 : vector<128x512xf32>
    %173 = arith.truncf %172 : vector<128x512xf32> to vector<128x512xbf16>
    %c0_73 = arith.constant 0 : index
    %c0_74 = arith.constant 0 : index
    %174 = vector.load %arg12[%c0_73, %c0_74] : memref<512x128xbf16, #tpu.memory_space<vmem>>, vector<512x128xbf16>
    %cst_75 = arith.constant dense<0.000000e+00> : vector<128x128xf32>
    %175 = tpu.matmul %173, %174, %cst_75 {dimension_numbers = #tpu.dot_dimension_numbers<[1], [0], [0], [1], [0, 0, 1, 1], [], []>} : vector<128x512xbf16>, vector<512x128xbf16>, vector<128x128xf32> -> vector<128x128xf32>
    %c0_76 = arith.constant 0 : index
    %c0_77 = arith.constant 0 : index
    %176 = vector.load %arg13[%c0_76, %c0_77] : memref<1x128xf32, #tpu.memory_space<vmem>>, vector<1x128xf32>
    %177 = vector.shape_cast %176 : vector<1x128xf32> to vector<128xf32>
    %178 = vector.shape_cast %177 : vector<128xf32> to vector<1x128xf32>
    %179 = vector.broadcast %178 : vector<1x128xf32> to vector<128x128xf32>
    %180 = arith.addf %175, %179 : vector<128x128xf32>
    %181 = arith.addf %130, %180 : vector<128x128xf32>
    %182 = vector.shape_cast %181 : vector<128x128xf32> to vector<1x128x128xf32>
    %c0_78 = arith.constant 0 : index
    %c0_79 = arith.constant 0 : index
    %c0_80 = arith.constant 0 : index
    %183 = vector.load %arg14[%c0_78, %c0_79, %c0_80] : memref<1x128x128xf32, #tpu.memory_space<vmem>>, vector<1x128x128xf32>
    tpu.vector_store %arg14[%c0_78, %c0_79, %c0_80], %182 {strides = array<i32>} : memref<1x128x128xf32, #tpu.memory_space<vmem>>, vector<1x128x128xf32>,
    return
  }
  func.func @transform_0(%arg0: i32) -> (i32, i32, i32) {
    %c0_i32 = arith.constant 0 : i32
    %c0_i32_0 = arith.constant 0 : i32
    %c0_i32_1 = arith.constant 0 : i32
    return %arg0, %c0_i32, %c0_i32_0 : i32, i32, i32
  }
  func.func @transform_1(%arg0: i32) -> (i32, i32) {
    %c0_i32 = arith.constant 0 : i32
    %c0_i32_0 = arith.constant 0 : i32
    %c0_i32_1 = arith.constant 0 : i32
    return %c0_i32, %c0_i32_0 : i32, i32
  }
  func.func @transform_2(%arg0: i32) -> (i32, i32) {
    %c0_i32 = arith.constant 0 : i32
    %c0_i32_0 = arith.constant 0 : i32
    %c0_i32_1 = arith.constant 0 : i32
    return %c0_i32, %c0_i32_0 : i32, i32
  }
  func.func @transform_3(%arg0: i32) -> (i32, i32) {
    %c0_i32 = arith.constant 0 : i32
    %c0_i32_0 = arith.constant 0 : i32
    %c0_i32_1 = arith.constant 0 : i32
    return %c0_i32, %c0_i32_0 : i32, i32
  }
  func.func @transform_4(%arg0: i32) -> (i32, i32) {
    %c0_i32 = arith.constant 0 : i32
    %c0_i32_0 = arith.constant 0 : i32
    %c0_i32_1 = arith.constant 0 : i32
    return %c0_i32, %c0_i32_0 : i32, i32
  }
  func.func @transform_5(%arg0: i32) -> (i32, i32) {
    %c0_i32 = arith.constant 0 : i32
    %c0_i32_0 = arith.constant 0 : i32
    %c0_i32_1 = arith.constant 0 : i32
    return %c0_i32, %c0_i32_0 : i32, i32
  }
  func.func @transform_6(%arg0: i32) -> (i32, i32) {
    %c0_i32 = arith.constant 0 : i32
    %c0_i32_0 = arith.constant 0 : i32
    %c0_i32_1 = arith.constant 0 : i32
    return %c0_i32, %c0_i32_0 : i32, i32
  }
  func.func @transform_7(%arg0: i32) -> (i32, i32) {
    %c0_i32 = arith.constant 0 : i32
    %c0_i32_0 = arith.constant 0 : i32
    %c0_i32_1 = arith.constant 0 : i32
    return %c0_i32, %c0_i32_0 : i32, i32
  }
  func.func @transform_8(%arg0: i32) -> (i32, i32) {
    %c0_i32 = arith.constant 0 : i32
    %c0_i32_0 = arith.constant 0 : i32
    %c0_i32_1 = arith.constant 0 : i32
    return %c0_i32, %c0_i32_0 : i32, i32
  }
  func.func @transform_9(%arg0: i32) -> (i32, i32) {
    %c0_i32 = arith.constant 0 : i32
    %c0_i32_0 = arith.constant 0 : i32
    %c0_i32_1 = arith.constant 0 : i32
    return %c0_i32, %c0_i32_0 : i32, i32
  }
  func.func @transform_10(%arg0: i32) -> (i32, i32) {
    %c0_i32 = arith.constant 0 : i32
    %c0_i32_0 = arith.constant 0 : i32
    %c0_i32_1 = arith.constant 0 : i32
    return %c0_i32, %c0_i32_0 : i32, i32
  }
  func.func @transform_11(%arg0: i32) -> (i32, i32) {
    %c0_i32 = arith.constant 0 : i32
    %c0_i32_0 = arith.constant 0 : i32
    %c0_i32_1 = arith.constant 0 : i32
    return %c0_i32, %c0_i32_0 : i32, i32
  }
  func.func @transform_12(%arg0: i32) -> (i32, i32) {
    %c0_i32 = arith.constant 0 : i32
    %c0_i32_0 = arith.constant 0 : i32
    %c0_i32_1 = arith.constant 0 : i32
    return %c0_i32, %c0_i32_0 : i32, i32
  }
  func.func @transform_13(%arg0: i32) -> (i32, i32, i32) {
    %c0_i32 = arith.constant 0 : i32
    %c0_i32_0 = arith.constant 0 : i32
    %c0_i32_1 = arith.constant 0 : i32
    return %arg0, %c0_i32, %c0_i32_0 : i32, i32, i32
  }
}

</mosaic_0001>

<bundles_post_ra>
// kernel: transformer_block.1
= control target key start
LH: loop header
LB: loop body
LE: loop exit
PB: predicated region body
PF: predicated region fallthrough
CT: control target
= control target key end

     0   :  { %s15353_s0 = inlined_call_operand.hbm [shape: f32[2,128,128], index: 0, kind: input, shape index: {}]   ;;  %s15354_s1 = inlined_call_operand.vmem [shape: f32[1,128], index: 1, kind: input, shape index: {}]   ;;  %s15355_s2 = inlined_call_operand.hbm [shape: f32[1,128], index: 2, kind: input, shape index: {}]   ;;  %s15356_s3 = inlined_call_operand.hbm [shape: bf16[128,384], index: 3, kind: input, shape index: {}]   ;;  %s15357_s4 = inlined_call_operand.vmem [shape: f32[1,384], index: 4, kind: input, shape index: {}]   ;;  %s15358_s5 = inlined_call_operand.hbm [shape: bf16[128,128], index: 5, kind: input, shape index: {}]   ;;  %s15359_s6 = inlined_call_operand.hbm [shape: f32[1,128], index: 6, kind: input, shape index: {}]   ;;  %s15360_s7 = inlined_call_operand.vmem [shape: f32[1,128], index: 7, kind: input, shape index: {}]   ;;  %s15361_s8 = inlined_call_operand.vmem [shape: f32[1,128], index: 8, kind: input, shape index: {}]   ;;  %s15362_s9 = inlined_call_operand.hbm [shape: bf16[128,512], index: 9, kind: input, shape index: {}]   ;;  %s15363_s10 = inlined_call_operand.hbm [shape: f32[1,512], index: 10, kind: input, shape index: {}]   ;;  %s15364_s11 = inlined_call_operand.hbm [shape: bf16[512,128], index: 11, kind: input, shape index: {}]   ;;  %s15365_s12 = inlined_call_operand.hbm [shape: f32[1,128], index: 12, kind: input, shape index: {}]   ;;  %s15366_s13 = inlined_call_operand.hbm [shape: f32[2,128,128], index: 13, kind: output, shape index: {}]  }
   0x1   :  { %15413 = sst [smem:[#allocation64_spill]] %s15355_s2 }
   0x2   :  { %15414 = sst [smem:[#allocation65_spill]] %s15356_s3 }
   0x3   :  { %15415 = sst [smem:[#allocation66_spill]] %s15358_s5 }
   0x4   :  { %15416 = sst [smem:[#allocation67_spill]] %s15360_s7 }
   0x5   :  { %15417 = sst [smem:[#allocation68_spill]] %s15361_s8 }
   0x6   :  { %15418 = sst [smem:[#allocation69_spill]] %s15362_s9 }
   0x7   :  { %15419 = sst [smem:[#allocation70_spill]] %s15364_s11 }
   0x8   :  { %15420 = sst [smem:[#allocation71_spill]] %s15366_s13 }
   0x9   :  { %18 = vsyncpa [#allocation4], 0 }
   0xa   :  { %20 = vsyncpa [#allocation4 + $0x1], 0 }
   0xb   :  { %21 = vsyncpa [#allocation7], 0 }
   0xc   :  { %22 = vsyncpa [#allocation10], 0 }
   0xd   :  { %23 = vsyncpa [#allocation13], 0 }
   0xe   :  { %24 = vsyncpa [#allocation16], 0 }
   0xf   :  { %25 = vsyncpa [#allocation5], 0 }
  0x10   :  { %27 = vsyncpa [#allocation5 + $0x1], 0  ;;  %s9484_s25 = smov 0   ;;  %s9486_s26 = smov 0  }
  0x11   :  { %s9488_s27 = smov 0   ;;  %s9490_s28 = smov 0  }
  0x12 LB: > { %s15421_s2 = sld [smem:[#allocation64_spill]]  ;;  %s9508_s15 = sadd.s32 4294967295, %s9389_s28   ;;  %s9389_s28 = sphi %s9490_s28, %s15794_s28   ;;  %s9385_s27 = sphi %s9488_s27, %s15793_s27   ;;  %s9381_s26 = sphi %s9486_s26, %s15792_s26   ;;  %s9377_s25 = sphi %s9484_s25, %s15791_s25  }
  0x13   : > { %p7698_p0 = scmp.ge.s32.totalorder %s9389_s28, 1  ;;  %p54_p1 = scmp.eq.s32.totalorder %s9508_s15, 0 }
  0x14   : > { %p342_p2 = scmp.lt.s32.totalorder %s9389_s28, 3  ;;  %s9391_s17 = smov [#allocation6]  }
  0x15   : > { %s359_s18 = sshll.u32 %s9391_s17, 4  ;;  %s15423_s5 = sld [smem:[#allocation66_spill]]  ;;  %s360_s18 = int_to_ptr.vmem [resolvable:$true] %s359_s18 }
  0x16   : > { %p9513_p3 = pnand %p7698_p0, %p342_p2  ;;  %s9392_s23 = smov [#allocation9]  }
  0x17   : > { %s387_s24 = sshll.u32 %s9392_s23, 4  ;;  %s9393_s29 = smov 64   ;;  %s388_s24 = int_to_ptr.vmem [resolvable:$true] %s387_s24 }
  0x18   : > { %s357_s14 = sshll.u32 %s15421_s2, 4  ;;  %p8469_p5 = pneg %p9513_p3  ;;  %s358_s14 = int_to_ptr.hbm [resolvable:$true] %s357_s14 }
  0x19   : > { %s9394_s30 = smov 4   ;;  %s15425_s9 = sld [smem:[#allocation69_spill]] }
  0x1a   : > { %p9525_p6 = pnand %p8469_p5, %p54_p1  ;;  %s9395_s2 = smov [#allocation12]  }
  0x1b   : > { %s385_s21 = sshll.u32 %s15423_s5, 4  ;;  %s419_s5 = sshll.u32 %s9395_s2, 4  ;;  %s386_s21 = int_to_ptr.hbm [resolvable:$true] %s385_s21  ;;  %s420_s5 = int_to_ptr.vmem [resolvable:$true] %s419_s5 }
  0x1c   : > { %8472 = dma.hbm_to_vmem [thread:$0]  (!%p9525_p6), %s358_s14, 16, %s360_s18, [#allocation7]  }
  0x1d   : > { %8478 = dma.hbm_to_vmem [thread:$0]  (!%p9525_p6), %s386_s21, 1024, %s388_s24, [#allocation10], %s9393_s29, %s9393_s29, %s9394_s30  }
  0x1e   : > { %s15426_s11 = sld [smem:[#allocation70_spill]]  ;;  %s9396_s7 = smov 256  }
  0x1f   : > { %s417_s20 = sshll.u32 %s15425_s9, 4  ;;  %s9397_s14 = smov 16   ;;  %s418_s20 = int_to_ptr.hbm [resolvable:$true] %s417_s20 }
  0x20   : > { %8484 = dma.hbm_to_vmem [thread:$0]  (!%p9525_p6), %s418_s20, 4096, %s420_s5, [#allocation13], %s9396_s7, %s9396_s7, %s9397_s14  }
  0x21   : > { %s9398_s18 = smov [#allocation15]   ;;  %s15427_s3 = sld [smem:[#allocation65_spill]] }
  0x22   : > { %s445_s21 = sshll.u32 %s9398_s18, 4  ;;  %s9399_s2 = smov [#allocation8]   ;;  %s446_s21 = int_to_ptr.vmem [resolvable:$true] %s445_s21 }
  0x23   : > { %s370_s8 = sshll.u32 %s9399_s2, 4  ;;  %s9400_s5 = smov 192   ;;  %s371_s8 = int_to_ptr.vmem [resolvable:$true] %s370_s8 }
  0x24   : > { %s443_s23 = sshll.u32 %s15426_s11, 4  ;;  %s400_s11 = sshll.u32 %s15359_s6, 4  ;;  %s444_s23 = int_to_ptr.hbm [resolvable:$true] %s443_s23  ;;  %s401_s11 = int_to_ptr.hbm [resolvable:$true] %s400_s11 }
  0x25   : > { %8490 = dma.hbm_to_vmem [thread:$0]  (!%p9525_p6), %s444_s23, 4096, %s446_s21, [#allocation16], %s9393_s29, %s9393_s29, %s9394_s30  }
  0x26   : > { %s9401_s7 = smov 12   ;;  %s9402_s20 = smov [#allocation11]  }
  0x27   : > { %s368_s19 = sshll.u32 %s15427_s3, 4  ;;  %s402_s14 = sshll.u32 %s9402_s20, 4  ;;  %s369_s19 = int_to_ptr.hbm [resolvable:$true] %s368_s19  ;;  %s403_s14 = int_to_ptr.vmem [resolvable:$true] %s402_s14 }
  0x28   : > { %8475 = dma.hbm_to_vmem [thread:$0]  (!%p9525_p6), %s369_s19, 3072, %s371_s8, [#allocation7], %s9400_s5, %s9400_s5, %s9401_s7  }
  0x29   : > { %s432_s29 = sshll.u32 %s15363_s10, 4  ;;  %s458_s23 = sshll.u32 %s15365_s12, 4  ;;  %s433_s29 = int_to_ptr.hbm [resolvable:$true] %s432_s29  ;;  %s459_s23 = int_to_ptr.hbm [resolvable:$true] %s458_s23 }
  0x2a   : > { %8481 = dma.hbm_to_vmem [thread:$0]  (!%p9525_p6), %s401_s11, 16, %s403_s14, [#allocation10]  }
  0x2b   : > { %s9403_s21 = smov [#allocation14]   ;;  %s9404_s19 = smov [#allocation17]  }
  0x2c   : > { %s434_s17 = sshll.u32 %s9403_s21, 4  ;;  %s460_s11 = sshll.u32 %s9404_s19, 4  ;;  %s435_s17 = int_to_ptr.vmem [resolvable:$true] %s434_s17  ;;  %s461_s11 = int_to_ptr.vmem [resolvable:$true] %s460_s11 }
  0x2d   : > { %8487 = dma.hbm_to_vmem [thread:$0]  (!%p9525_p6), %s433_s29, 64, %s435_s17, [#allocation13]  }
  0x2e   : > { %8493 = dma.hbm_to_vmem [thread:$0]  (!%p9525_p6), %s459_s23, 16, %s461_s11, [#allocation16]  }
  0x2f   : > { %s7697_s2 = sadd.s32 4294967294, %s9389_s28   ;;  %s9565_s8 = sadd.s32 1, %s9389_s28  }
  0x30   : > { %s37_s13 = ssub.s32 %s9389_s28, %s9565_s8  ;;  %s40_s5 = sadd.s32 1, %s9385_s27 }
  0x31   : > { %p38_p7 = scmp.eq.s32.totalorder %s37_s13, 0  ;;  %p47_p8 = scmp.ne.s32.totalorder %s9385_s27, %s9381_s26 }
  0x32   : > { %p48_p9 = scmp.eq.s32.totalorder %s9389_s28, 0  ;;  %p53_p10 = scmp.ne.s32.totalorder %s9381_s26, %s9377_s25 }
  0x33   : > { %s9576_s7 = scalar_select %p38_p7, %s9385_s27, %s40_s5  }
  0x34   : > { %p9578_p11 = por %p48_p9, %p47_p8  ;;  %p9584_p12 = por %p54_p1, %p53_p10 }
  0x35   : > { %p329_p13 = scmp.eq.s32.totalorder %s9508_s15, 1  ;;  %p335_p0 = scmp.eq.s32.totalorder %s7697_s2, 1 }
  0x36   : > { %p8510_p2 = scmp.lt.s32.totalorder %s9389_s28, 2  ;;  %s471_s14 = sand.u32 1, %s9385_s27  }
  0x37   : > { %p9591_p5 = por %p329_p13, %p47_p8  ;;  %p9595_p6 = por %p335_p0, %p53_p10 }
  0x38   : > { %s7708_s29 = sshll.u32 %s471_s14, 7  ;;  %s8303_s9 = sshll.u32 %s9389_s28, 7 }
  0x39   : > { %s480_s21 = scalar_lea.hbm %s15353_s0, %s8303_s9  ;;  %s475_s17 = scalar_lea.vmem [#allocation3], %s7708_s29 }
  0x3a   : > { %s483_s19 = sshll.u32 %s475_s17, 4  ;;  %s481_s11 = sshll.u32 %s480_s21, 4  ;;  %s484_s19 = int_to_ptr.vmem [resolvable:$true] %s483_s19  ;;  %s482_s11 = int_to_ptr.hbm [resolvable:$true] %s481_s11 }
  0x3b   : > { %p9605_p7 = pnand %p8510_p2, %p9578_p11  ;;  %s472_s13 = scalar_lea.sflag [#allocation4], %s471_s14 }
  0x3c   : > { %s9277_s5 = sshra.s32 %s482_s11, 4  ;;  %s9284_s30 = scalar_lea.hbm %s15353_s0, 256  ;;  %s9278_s5 = int_to_ptr.hbm [resolvable:$true] %s9277_s5 }
  0x3d   : > { %s9279_s3 = scalar_lea.hbm %s9278_s5, 128  ;;  %p9281_p9 = pneg %p9605_p7 }
  0x3e   : > { %p9280_p8 = scmp.ne.s32.totalorder %s9278_s5, %s9279_s3  ;;  %p9285_p11 = scmp.lt.s32.totalorder %s9278_s5, %s15353_s0 }
  0x3f   : > { %p9286_p0 = scmp.lt.s32.totalorder %s9284_s30, %s9279_s3 }
  0x40   : > { %p9282_p10 = pnand %p9281_p9, %p9280_p8 }
  0x41   : > { %p9287_p2 = por %p9286_p0, %p9285_p11 }
  0x42   : > { %p9283_p13 = pneg %p9282_p10 }
  0x44   : > { %p9288_p4 = pnand %p9287_p2, %p9283_p13 }
  0x46   : > { %9291 = shalt.err (!%p9288_p4)
}
  0x47   : > { %s9405_s14 = smov 128   ;;  %s9406_s21 = smov 8  }
  0x48   : > { %8497 = dma.hbm_to_vmem [thread:$0]  (!%p9605_p7), %s482_s11, 2048, %s484_s19, %s472_s13, %s9405_s14, %s9405_s14, %s9406_s21  }
  0x49   : > { %495 = sbr.rel (%p9513_p3) target bundleno = 3097 (0xc19), region = 72 }
  0x4e   : > { %s9622_s17 = sand.u32 1, %s9381_s26  }
  0x4f   : > { %s7712_s5 = sshll.u32 %s9622_s17, 7  ;;  %s498_s3 = scalar_lea.sflag [#allocation4], %s9622_s17 }
  0x50   : > { %s9628_s29 = scalar_lea.vmem [#allocation3], %s7712_s5 }
  0x51   : > { %9352 = dma.done.wait (%p9584_p12), %s498_s3, 2048  }
  0x52   : > { %9354 = vsyncadd (%p9584_p12), %s498_s3, 4294965248 }
  0x53   : > { %9356 = dma.done.wait (%p54_p1), [#allocation7], 3088  }
  0x54   : > { %9358 = vsyncadd (%p54_p1), [#allocation7], 4294964208 }
  0x55   : > { %9360 = dma.done.wait (%p54_p1), [#allocation10], 1040  }
  0x56   : > { %9362 = vsyncadd (%p54_p1), [#allocation10], 4294966256 }
  0x57   : > { %9364 = dma.done.wait (%p54_p1), [#allocation13], 4160  }
  0x58   : > { %9366 = vsyncadd (%p54_p1), [#allocation13], 4294963136 }
  0x59   : > { %9368 = dma.done.wait (%p54_p1), [#allocation16], 4112  }
  0x5a   : > { %9370 = vsyncadd (%p54_p1), [#allocation16], 4294963184  ;;  %v587_v0 = vld [vmem:[%s9628_s29 + $0x10] sm:$0xff]  ;;  %v585_v1 = vld [vmem:[%s9628_s29] sm:$0xff]  ;;  %v9407_v7 = vmov 128.0   ;;  %s9408_s2 = smov 64  }
  0x5b   : > { %607 = vadd.xlane.f32.xlu1 %v587_v0  ;;  %603 = vadd.xlane.f32.xlu0 %v585_v1  ;;  %v589_v2 = vld [vmem:[%s9628_s29 + $0x20] sm:$0xff]  ;;  %v588_v3 = vld [vmem:[%s9628_s29 + $0x18] sm:$0xff]  ;;  %v586_v4 = vld [vmem:[%s9628_s29 + $0x8] sm:$0xff]  ;;  %8581 = vrcp.f32 %v9407_v7  ;;  %s9409_s13 = smov 96   ;;  %s9410_s9 = smov 32  }
  0x5c   : > { %611 = vadd.xlane.f32.xlu2 %v589_v2  ;;  %v590_v5 = vld [vmem:[%s9628_s29 + $0x28] sm:$0xff]  ;;  %v591_v6 = vld [vmem:[%s9628_s29 + $0x30] sm:$0xff]  ;;  %v9673_v28 = vld [vmem:[%s9628_s29 + $0x38] sm:$0xff]  ;;  %s15490_s20 = sld [smem:[#allocation67_spill]]  ;;  %s15229_s30 = scalar_lea.vmem [#allocation18], %s7712_s5 }
  0x5d   : > { %v9688_v36 = vld [vmem:[%s9628_s29 + $0x40] sm:$0xff]  ;;  %v9699_v42 = vld [vmem:[%s9628_s29 + $0x58] sm:$0xff]  ;;  %v9702_v43 = vld [vmem:[%s9628_s29 + $0x48] sm:$0xff]  ;;  %s15492_s3 = sld [smem:[#allocation68_spill]]  ;;  %s8424_s5 = sshll.u32 %s9508_s15, 7 }
  0x5e   : > { %v9711_v46 = vld [vmem:[%s9628_s29 + $0x60] sm:$0xff]  ;;  %v9714_v47 = vld [vmem:[%s9628_s29 + $0x50] sm:$0xff]  ;;  %v9719_v48 = vld [vmem:[%s9628_s29 + $0x68] sm:$0xff]  ;;  %s15788_s21 = sld [smem:[#allocation71_spill]]  ;;  %s7545_s16 = sshll.u32 %s15229_s30, 4  ;;  %s7546_s16 = int_to_ptr.vmem [resolvable:$true] %s7545_s16 }
  0x5f   : > { %v9723_v49 = vld [vmem:[%s9628_s29 + $0x70] sm:$0xff]  ;;  %v7808_v50 = vld [vmem:[#allocation8 + $0xa8] sm:$0xf]  ;;  %v7810_v54 = vld [vmem:[#allocation8 + $0xb4] sm:$0xf0]  ;;  %s7533_s15 = scalar_lea.sflag [#allocation5], %s9622_s17 }
  0x60   : > { %v8326_v51 = vld [vmem:[#allocation8 + $0xb0] sm:$0xf0]  ;;  %v8325_v52 = vld [vmem:[#allocation8 + $0xac] sm:$0xf]  ;;  %v7816_v55 = vld [vmem:[#allocation8 + $0xb0] sm:$0xf] }
  0x61   : > { %v8582_v8 = vpop.eup %8581  ;;  %v7809_v53 = vor.u32 %v8326_v51, %v7808_v50  ;;  %v8327_v56 = vld [vmem:[#allocation8 + $0xb8] sm:$0xf0]  ;;  %v7813_v57 = vor.u32 %v8325_v52, %v7810_v54  ;;  %v7796_v59 = vld [vmem:[#allocation8 + $0x90] sm:$0xf]  ;;  %v8322_v61 = vld [vmem:[#allocation8 + $0x94] sm:$0xf] }
  0x62   : > { %v636_v9 = vmul.f32 128.0, %v8582_v8  ;;  %vm640_vm0 = vweird.f32 %v8582_v8  ;;  %v7817_v58 = vor.u32 %v8327_v56, %v7816_v55  ;;  %v8323_v60 = vld [vmem:[#allocation8 + $0x98] sm:$0xf0]  ;;  %v7798_v63 = vld [vmem:[#allocation8 + $0x9c] sm:$0xf0] }
  0x63   : > { %609 = vadd.xlane.f32.xlu1 %v588_v3  ;;  %605 = vadd.xlane.f32.xlu0 %v586_v4  ;;  %v7797_v62 = vor.u32 %v8323_v60, %v7796_v59  ;;  %v7750_v51 = vld [vmem:[#allocation8 + $0x3c] sm:$0xf0]  ;;  %v7756_v52 = vld [vmem:[#allocation8 + $0x38] sm:$0xf] }
  0x64   : > { %613 = vadd.xlane.f32.xlu2 %v590_v5  ;;  %v637_v10 = vsub.f32 1.0, %v636_v9  ;;  %1144 = vmatpush.bf16.msra.mxu0 %v7809_v53  ;;  %v7792_v9 = vld [vmem:[#allocation8 + $0x80] sm:$0xf]  ;;  %v8312_v53 = vld [vmem:[#allocation8 + $0x40] sm:$0xf0] }
  0x65   : > { %1193 = vmatpush.bf16.msra.mxu1 %v7813_v57  ;;  %1242 = vmatpush.bf16.msra.mxu2 %v7817_v58  ;;  %v7757_v55 = vor.u32 %v8312_v53, %v7756_v52  ;;  %v7736_v56 = vld [vmem:[#allocation8 + $0x18] sm:$0xf]  ;;  %v8308_v57 = vld [vmem:[#allocation8 + $0x20] sm:$0xf0]  ;;  %v8307_v58 = vld [vmem:[#allocation8 + $0x1c] sm:$0xf] }
  0x66   : > { %v638_v11 = vmul.f32 %v8582_v8, %v637_v10  ;;  %v8321_v10 = vld [vmem:[#allocation8 + $0x88] sm:$0xf0]  ;;  %v7737_v60 = vor.u32 %v8308_v57, %v7736_v56 }
  0x68   : > { %v639_v12 = vadd.f32 %v8582_v8, %v638_v11  ;;  %1145 = vmatpush.bf16.msra.mxu0 %v7797_v62  ;;  %v7744_v62 = vld [vmem:[#allocation8 + $0x20] sm:$0xf] }
  0x6a   : > { %v9657_v13 = vsel %vm640_vm0, %v8582_v8, %v639_v12  ;;  %v7786_v8 = vld [vmem:[#allocation8 + $0x84] sm:$0xf0]  ;;  %v7793_v12 = vor.u32 %v8321_v10, %v7792_v9 }
  0x6b   : > { %15433 = vst [vmem:[#allocation25_spill] sm:$0xff] %v9657_v13  ;;  %v7732_v9 = vld [vmem:[#allocation8 + $0x8] sm:$0xf] }
  0x6c   : > { %615 = vadd.xlane.f32.xlu2 %v591_v6 }
  0xce   : > { %v608_v14 = vpop.xlane.xlu1 %607  ;;  %v604_v15 = vpop.xlane.xlu0 %603 }
  0xcf   : > { %v642_v16 = vmul.f32 %v9657_v13, %v604_v15  ;;  %v612_v18 = vpop.xlane.xlu2 %611  ;;  %v644_v27 = vmul.f32 %v9657_v13, %v608_v14  ;;  %v7772_v14 = vld [vmem:[#allocation8 + $0x60] sm:$0xf]  ;;  %v8317_v15 = vld [vmem:[#allocation8 + $0x68] sm:$0xf0] }
  0xd0   : > { %v646_v26 = vmul.f32 %v9657_v13, %v612_v18  ;;  %v7773_v18 = vor.u32 %v8317_v15, %v7772_v14 }
  0xd1   : > { %v9660_v17 = vsub.f32 %v585_v1, %v642_v16  ;;  %v9682_v33 = vsub.f32 %v587_v0, %v644_v27  ;;  %v7804_v0 = vld [vmem:[#allocation8 + $0x98] sm:$0xf]  ;;  %v8324_v1 = vld [vmem:[#allocation8 + $0xa0] sm:$0xf0]  ;;  %v8314_v27 = vld [vmem:[#allocation8 + $0x50] sm:$0xf0] }
  0xd2   : > { %v9680_v32 = vsub.f32 %v589_v2, %v646_v26  ;;  %v7801_v2 = vor.u32 %v8322_v61, %v7798_v63  ;;  %v8316_v16 = vld [vmem:[#allocation8 + $0x64] sm:$0xf]  ;;  %v7760_v26 = vld [vmem:[#allocation8 + $0x48] sm:$0xf] }
  0xd3   : > { %v674_v19 = vmul.f32 %v9660_v17, %v9660_v17  ;;  %v676_v37 = vmul.f32 %v9682_v33, %v9682_v33  ;;  %v7738_v61 = vld [vmem:[#allocation8 + $0x24] sm:$0xf0] }
  0xd4   : > { %v678_v34 = vmul.f32 %v9680_v32, %v9680_v32  ;;  %1194 = vmatpush.bf16.msra.mxu1 %v7801_v2 }
  0xd5   : > { %690 = vadd.xlane.f32.xlu0 %v674_v19  ;;  %v7774_v19 = vld [vmem:[#allocation8 + $0x6c] sm:$0xf0] }
  0xd6   : > { %v610_v20 = vpop.xlane.xlu1 %609  ;;  %v606_v21 = vpop.xlane.xlu0 %605 }
  0xd7   : > { %v645_v22 = vmul.f32 %v9657_v13, %v610_v20  ;;  %v643_v23 = vmul.f32 %v9657_v13, %v606_v21  ;;  %v614_v31 = vpop.xlane.xlu2 %613  ;;  %v7780_v20 = vld [vmem:[#allocation8 + $0x68] sm:$0xf]  ;;  %v8318_v21 = vld [vmem:[#allocation8 + $0x70] sm:$0xf0] }
  0xd8   : > { %v647_v35 = vmul.f32 %v9657_v13, %v614_v31  ;;  %v7762_v31 = vld [vmem:[#allocation8 + $0x54] sm:$0xf0] }
  0xd9   : > { %v9666_v24 = vsub.f32 %v588_v3, %v645_v22  ;;  %v9668_v25 = vsub.f32 %v586_v4, %v643_v23  ;;  %v7805_v3 = vor.u32 %v8324_v1, %v7804_v0  ;;  %v7784_v4 = vld [vmem:[#allocation8 + $0x78] sm:$0xf]  ;;  %v7777_v22 = vor.u32 %v8316_v16, %v7774_v19  ;;  %v8309_v1 = vld [vmem:[#allocation8 + $0x28] sm:$0xf0] }
  0xda   : > { %v9693_v38 = vsub.f32 %v590_v5, %v647_v35  ;;  %v8320_v5 = vld [vmem:[#allocation8 + $0x80] sm:$0xf0]  ;;  %v7781_v23 = vor.u32 %v8318_v21, %v7780_v20  ;;  %v8315_v35 = vld [vmem:[#allocation8 + $0x58] sm:$0xf0]  ;;  %v7741_v0 = vor.u32 %v8307_v58, %v7738_v61  ;;  %v7745_v2 = vor.u32 %v8309_v1, %v7744_v62 }
  0xdb   : > { %v677_v29 = vmul.f32 %v9666_v24, %v9666_v24  ;;  %v675_v30 = vmul.f32 %v9668_v25, %v9668_v25  ;;  %1243 = vmatpush.bf16.msra.mxu2 %v7805_v3  ;;  %v7785_v7 = vor.u32 %v8320_v5, %v7784_v4  ;;  %v7724_v4 = vld [vmem:[#allocation8] sm:$0xf]  ;;  %v8305_v5 = vld [vmem:[#allocation8 + $0x8] sm:$0xf0] }
  0xdc   : > { %v679_v40 = vmul.f32 %v9693_v38, %v9693_v38 }
  0xdd   : > { %696 = vadd.xlane.f32.xlu2 %v677_v29  ;;  %617 = vadd.xlane.f32.xlu0 %v9673_v28  ;;  %v8313_v29 = vld [vmem:[#allocation8 + $0x4c] sm:$0xf] }
  0xde   : > { %692 = vadd.xlane.f32.xlu1 %v675_v30  ;;  %1146 = vmatpush.bf16.msra.mxu0 %v7785_v7  ;;  %v7761_v30 = vor.u32 %v8314_v27, %v7760_v26  ;;  %v8304_v7 = vld [vmem:[#allocation8 + $0x4] sm:$0xf] }
  0xdf   : > { %v616_v39 = vpop.xlane.xlu2 %615  ;;  %1244 = vmatpush.bf16.msra.mxu2 %v7793_v12 }
  0xe0   : > { %v648_v41 = vmul.f32 %v9657_v13, %v616_v39 }
  0xe2   : > { %v9705_v44 = vsub.f32 %v591_v6, %v648_v41  ;;  %v8319_v6 = vld [vmem:[#allocation8 + $0x7c] sm:$0xf]  ;;  %1147 = vmatpush.bf16.msra.mxu0 %v7773_v18 }
  0xe3   : > { %v7789_v11 = vor.u32 %v8319_v6, %v7786_v8  ;;  %1245 = vmatpush.bf16.msra.mxu2 %v7781_v23  ;;  %v8311_v41 = vld [vmem:[#allocation8 + $0x38] sm:$0xf0]  ;;  %v7725_v6 = vor.u32 %v8305_v5, %v7724_v4  ;;  %v7726_v8 = vld [vmem:[#allocation8 + $0xc] sm:$0xf0] }
  0xe4   : > { %v680_v45 = vmul.f32 %v9705_v44, %v9705_v44  ;;  %v7729_v10 = vor.u32 %v8304_v7, %v7726_v8 }
  0xe5   : > { %698 = vadd.xlane.f32.xlu2 %v678_v34  ;;  %619 = vadd.xlane.f32.xlu0 %v9688_v36  ;;  %v7768_v34 = vld [vmem:[#allocation8 + $0x50] sm:$0xf] }
  0xe6   : > { %694 = vadd.xlane.f32.xlu1 %v676_v37  ;;  %1195 = vmatpush.bf16.msra.mxu1 %v7789_v11  ;;  %v7765_v37 = vor.u32 %v8313_v29, %v7762_v31  ;;  %v7769_v39 = vor.u32 %v8315_v35, %v7768_v34  ;;  %v8306_v11 = vld [vmem:[#allocation8 + $0x10] sm:$0xf0] }
  0xe7   : > { %1148 = vmatpush.bf16.msra.mxu0 %v7761_v30  ;;  %v7733_v12 = vor.u32 %v8306_v11, %v7732_v9 }
  0xe8   : > { %1246 = vmatpush.bf16.msra.mxu2 %v7769_v39 }
  0xea   : > { %1196 = vmatpush.bf16.msra.mxu1 %v7777_v22 }
  0xec   : > { %1247 = vmatpush.bf16.msra.mxu2 %v7757_v55 }
  0xed   : > { %625 = vadd.xlane.f32.xlu2 %v9699_v42  ;;  %700 = vadd.xlane.f32.xlu0 %v679_v40  ;;  %v7748_v40 = vld [vmem:[#allocation8 + $0x30] sm:$0xf] }
  0xee   : > { %621 = vadd.xlane.f32.xlu1 %v9702_v43  ;;  %1197 = vmatpush.bf16.msra.mxu1 %v7765_v37  ;;  %v7749_v50 = vor.u32 %v8311_v41, %v7748_v40 }
  0xf0   : > { %1149 = vmatpush.bf16.msra.mxu0 %v7749_v50  ;;  %1248 = vmatpush.bf16.msra.mxu2 %v7745_v2 }
  0xf4   : > { %1150 = vmatpush.bf16.msra.mxu0 %v7737_v60  ;;  %1249 = vmatpush.bf16.msra.mxu2 %v7733_v12 }
  0xf5   : > { %627 = vadd.xlane.f32.xlu2 %v9711_v46  ;;  %702 = vadd.xlane.f32.xlu0 %v680_v45  ;;  %v8310_v45 = vld [vmem:[#allocation8 + $0x34] sm:$0xf] }
  0xf6   : > { %623 = vadd.xlane.f32.xlu1 %v9714_v47  ;;  %v7753_v54 = vor.u32 %v8310_v45, %v7750_v51 }
  0xf8   : > { %1198 = vmatpush.bf16.msra.mxu1 %v7753_v54  ;;  %1151 = vmatpush.bf16.msra.mxu0 %v7725_v6 }
  0xfc   : > { %1199 = vmatpush.bf16.msra.mxu1 %v7741_v0 }
  0xfd   : > { %629 = vadd.xlane.f32.xlu0 %v9719_v48 }
 0x100   : > { %1200 = vmatpush.bf16.msra.mxu1 %v7729_v10 }
 0x105   : > { %631 = vadd.xlane.f32.xlu0 %v9723_v49 }
 0x148   : > { %v691_v59 = vpop.xlane.xlu0 %690 }
 0x149   : > { %v722_v63 = vmul.f32 %v691_v59, %v9657_v13 }
 0x14b   : > { %v738_v3 = vadd.f32 1e-05, %v722_v63 }
 0x14d   : > { %8583 = vrsqrt.f32 %v738_v3  ;;  %vm760_vm2 = vweird.f32 %v738_v3 }
 0x150   : > { %v697_v14 = vpop.xlane.xlu2 %696  ;;  %v618_v15 = vpop.xlane.xlu0 %617 }
 0x151   : > { %v725_v16 = vmul.f32 %v697_v14, %v9657_v13  ;;  %v693_v18 = vpop.xlane.xlu1 %692  ;;  %v649_v19 = vmul.f32 %v9657_v13, %v618_v15 }
 0x152   : > { %v723_v20 = vmul.f32 %v693_v18, %v9657_v13 }
 0x153   : > { %v8584_v21 = vpop.eup %8583  ;;  %v9730_v22 = vadd.f32 1e-05, %v725_v16  ;;  %v9733_v23 = vsub.f32 %v9673_v28, %v649_v19 }
 0x154   : > { %v755_v26 = vmul.f32 %v8584_v21, %v738_v3  ;;  %v739_v27 = vadd.f32 1e-05, %v723_v20  ;;  %vm761_vm1 = vweird.f32 %v8584_v21 }
 0x155   : > { %8585 = vrsqrt.f32 %v9730_v22  ;;  %v681_v29 = vmul.f32 %v9733_v23, %v9733_v23  ;;  %vm9755_vm3 = vmor %vm760_vm2, %vm761_vm1  ;;  %vm790_vm7 = vweird.f32 %v9730_v22 }
 0x156   : > { %v756_v30 = vmul.f32 %v8584_v21, %v755_v26  ;;  %8587 = vrsqrt.f32 %v739_v27  ;;  %vm770_vm5 = vweird.f32 %v739_v27 }
 0x157   : > { %704 = vadd.xlane.f32.xlu1 %v681_v29 }
 0x158   : > { %v757_v31 = vmul.f32 0.5, %v756_v30  ;;  %v699_v34 = vpop.xlane.xlu2 %698  ;;  %v620_v35 = vpop.xlane.xlu0 %619  ;;  %v9799_v30 = vld [vmem:[#allocation6] ss:$0 sm:$0xff] }
 0x159   : > { %v695_v37 = vpop.xlane.xlu1 %694  ;;  %v650_v39 = vmul.f32 %v9657_v13, %v620_v35  ;;  %v726_v51 = vmul.f32 %v699_v34, %v9657_v13 }
 0x15a   : > { %v758_v40 = vsub.f32 1.5, %v757_v31  ;;  %v724_v28 = vmul.f32 %v695_v37, %v9657_v13 }
 0x15b   : > { %v9740_v41 = vpop.eup %8585  ;;  %v9743_v45 = vsub.f32 %v9688_v36, %v650_v39  ;;  %v9753_v36 = vadd.f32 1e-05, %v726_v51 }
 0x15c   : > { %v8588_v50 = vpop.eup %8587  ;;  %v9746_v52 = vadd.f32 1e-05, %v724_v28  ;;  %v759_v54 = vmul.f32 %v8584_v21, %v758_v40  ;;  %v785_v55 = vmul.f32 %v9740_v41, %v9730_v22  ;;  %vm791_vm8 = vweird.f32 %v9740_v41 }
 0x15d   : > { %v765_v53 = vmul.f32 %v8588_v50, %v739_v27  ;;  %v682_v57 = vmul.f32 %v9743_v45, %v9743_v45  ;;  %vm771_vm4 = vweird.f32 %v8588_v50  ;;  %vm9822_vm10 = vmor %vm790_vm7, %vm791_vm8  ;;  %vm800_vm15 = vweird.f32 %v9753_v36 }
 0x15e   : > { %8589 = vrsqrt.f32 %v9746_v52  ;;  %v763_v1 = vsel %vm9755_vm3, %v8584_v21, %v759_v54  ;;  %v786_v2 = vmul.f32 %v9740_v41, %v785_v55  ;;  %vm772_vm6 = vmor %vm770_vm5, %vm771_vm4  ;;  %vm780_vm11 = vweird.f32 %v9746_v52 }
 0x15f   : > { %v766_v56 = vmul.f32 %v8588_v50, %v765_v53  ;;  %706 = vadd.xlane.f32.xlu1 %v682_v57  ;;  %8591 = vrsqrt.f32 %v9753_v36  ;;  %v914_v11 = vmul.f32 %v763_v1, %v9660_v17 }
 0x160   : > { %v626_v58 = vpop.xlane.xlu2 %625  ;;  %v701_v59 = vpop.xlane.xlu0 %700  ;;  %v787_v12 = vmul.f32 0.5, %v786_v2 }
 0x161   : > { %v767_v61 = vmul.f32 0.5, %v766_v56  ;;  %v653_v62 = vmul.f32 %v9657_v13, %v626_v58  ;;  %v622_v63 = vpop.xlane.xlu1 %621  ;;  %v727_v0 = vmul.f32 %v701_v59, %v9657_v13 }
 0x162   : > { %v651_v3 = vmul.f32 %v9657_v13, %v622_v63  ;;  %v788_v34 = vsub.f32 1.5, %v787_v12 }
 0x163   : > { %v768_v4 = vsub.f32 1.5, %v767_v61  ;;  %v9765_v5 = vadd.f32 1e-05, %v727_v0  ;;  %v9768_v6 = vsub.f32 %v9699_v42, %v653_v62  ;;  %v9783_v42 = vld [vmem:[%s15354_s1] ss:$0 sm:$0xff] }
 0x164   : > { %v9770_v7 = vpop.eup %8589  ;;  %v9774_v8 = vsub.f32 %v9702_v43, %v651_v3  ;;  %v9788_v43 = vld [vmem:[%s9628_s29 + $0x78] sm:$0xff]  ;;  %v933_v29 = vmul.f32 %v9783_v42, %v914_v11  ;;  %v789_v54 = vmul.f32 %v9740_v41, %v788_v34 }
 0x165   : > { %v769_v9 = vmul.f32 %v8588_v50, %v768_v4  ;;  %v775_v10 = vmul.f32 %v9770_v7, %v9746_v52  ;;  %8593 = vrsqrt.f32 %v9765_v5  ;;  %v685_v14 = vmul.f32 %v9768_v6, %v9768_v6  ;;  %v9801_v31 = vpop.eup %8591 }
 0x166   : > { %v683_v18 = vmul.f32 %v9774_v8, %v9774_v8  ;;  %vm781_vm9 = vweird.f32 %v9770_v7  ;;  %v952_v53 = vadd.f32 %v9799_v30, %v933_v29  ;;  %v793_v52 = vsel %vm9822_vm10, %v9740_v41, %v789_v54 }
 0x167   : > { %v773_v15 = vsel %vm772_vm6, %v8588_v50, %v769_v9  ;;  %v776_v16 = vmul.f32 %v9770_v7, %v775_v10  ;;  %712 = vadd.xlane.f32.xlu0 %v685_v14  ;;  %633 = vadd.xlane.f32.xlu1 %v9788_v43  ;;  %vm782_vm12 = vmor %vm780_vm11, %vm781_vm9  ;;  %v917_v3 = vmul.f32 %v793_v52, %v9666_v24  ;;  %vm810_vm13 = vweird.f32 %v9765_v5 }
 0x168   : > { %v628_v17 = vpop.xlane.xlu2 %627  ;;  %v9793_v19 = vpop.xlane.xlu0 %702  ;;  %v915_v20 = vmul.f32 %v773_v15, %v9668_v25  ;;  %708 = vadd.xlane.f32.xlu2 %v683_v18  ;;  %vm801_vm0 = vweird.f32 %v9801_v31 }
 0x169   : > { %v777_v21 = vmul.f32 0.5, %v776_v16  ;;  %v654_v26 = vmul.f32 %v9657_v13, %v628_v17  ;;  %v624_v27 = vpop.xlane.xlu1 %623  ;;  %v936_v11 = vmul.f32 %v9783_v42, %v917_v3  ;;  %vm802_vm2 = vmor %vm800_vm15, %vm801_vm0 }
 0x16a   : > { %v652_v35 = vmul.f32 %v9657_v13, %v624_v27  ;;  %v934_v37 = vmul.f32 %v9783_v42, %v915_v20 }
 0x16b   : > { %v9805_v39 = vpop.eup %8593  ;;  %v778_v25 = vsub.f32 1.5, %v777_v21  ;;  %v9810_v40 = vsub.f32 %v9711_v46, %v654_v26  ;;  %v795_v46 = vmul.f32 %v9801_v31, %v9753_v36  ;;  %v955_v14 = vadd.f32 %v9799_v30, %v936_v11 }
 0x16c   : > { %v805_v28 = vmul.f32 %v9805_v39, %v9765_v5  ;;  %v9816_v50 = vsub.f32 %v9714_v47, %v652_v35  ;;  %v953_v22 = vadd.f32 %v9799_v30, %v934_v37  ;;  %vm811_vm14 = vweird.f32 %v9805_v39 }
 0x16d   : > { %v779_v51 = vmul.f32 %v9770_v7, %v778_v25  ;;  %v686_v57 = vmul.f32 %v9810_v40, %v9810_v40  ;;  %v796_v62 = vmul.f32 %v9801_v31, %v795_v46  ;;  %vm812_vm1 = vmor %vm810_vm13, %vm811_vm14 }
 0x16e   : > { %v684_v47 = vmul.f32 %v9816_v50, %v9816_v50  ;;  %v968_v56 = vpack.c.bf16 %v953_v22, %v952_v53  ;;  %v806_v59 = vmul.f32 %v9805_v39, %v805_v28 }
 0x16f   : > { %v783_v58 = vsel %vm782_vm12, %v9770_v7, %v779_v51  ;;  %714 = vadd.xlane.f32.xlu1 %v686_v57  ;;  %v797_v4 = vmul.f32 0.5, %v796_v62 }
 0x170   : > { %v630_v60 = vpop.xlane.xlu0 %629  ;;  %710 = vadd.xlane.f32.xlu2 %v684_v47  ;;  %1152 = vmatmul.bf16.vlgmr.msra.gmra.mxu0 %v968_v56  ;;  %v916_v0 = vmul.f32 %v783_v58, %v9682_v33  ;;  %v807_v1 = vmul.f32 0.5, %v806_v59 }
 0x171   : > { %v655_v61 = vmul.f32 %v9657_v13, %v630_v60  ;;  %1201 = vmatmul.bf16.vlgmr.msra.gmra.mxu1 %v968_v56  ;;  %1250 = vmatmul.bf16.vlgmr.msra.gmra.mxu2 %v968_v56 }
 0x172   : > { %v935_v7 = vmul.f32 %v9783_v42, %v916_v0  ;;  %v808_v41 = vsub.f32 1.5, %v807_v1 }
 0x173   : > { %v9841_v63 = vsub.f32 %v9719_v48, %v655_v61  ;;  %v798_v48 = vsub.f32 1.5, %v797_v4 }
 0x174   : > { %v954_v33 = vadd.f32 %v9799_v30, %v935_v7  ;;  %v809_v24 = vmul.f32 %v9805_v39, %v808_v41 }
 0x175   : > { %v687_v2 = vmul.f32 %v9841_v63, %v9841_v63  ;;  %v799_v5 = vmul.f32 %v9801_v31, %v798_v48 }
 0x176   : > { %v969_v16 = vpack.c.bf16 %v955_v14, %v954_v33 }
 0x177   : > { %v803_v36 = vsel %vm802_vm2, %v9801_v31, %v799_v5  ;;  %v728_v31 = vmul.f32 %v9793_v19, %v9657_v13 }
 0x178   : > { %v632_v9 = vpop.xlane.xlu0 %631  ;;  %716 = vadd.xlane.f32.xlu2 %v687_v2  ;;  %v918_v17 = vmul.f32 %v803_v36, %v9680_v32 }
 0x179   : > { %v656_v10 = vmul.f32 %v9657_v13, %v632_v9  ;;  %v744_v34 = vadd.f32 1e-05, %v728_v31 }
 0x17a   : > { %v937_v21 = vmul.f32 %v9783_v42, %v918_v17 }
 0x17b   : > { %v9854_v12 = vsub.f32 %v9723_v49, %v656_v10  ;;  %v813_v49 = vsel %vm812_vm1, %v9805_v39, %v809_v24  ;;  %8595 = vrsqrt.f32 %v744_v34  ;;  %vm820_vm3 = vweird.f32 %v744_v34 }
 0x17c   : > { %v919_v18 = vmul.f32 %v813_v49, %v9693_v38  ;;  %v956_v27 = vadd.f32 %v9799_v30, %v937_v21 }
 0x17d   : > { %v688_v15 = vmul.f32 %v9854_v12, %v9854_v12 }
 0x17e   : > { %v938_v20 = vmul.f32 %v9783_v42, %v919_v18 }
 0x17f   : > { %718 = vadd.xlane.f32.xlu0 %v688_v15 }
 0x180   : > { %1157 = vmatmul.bf16.gmra.mxu0 %v969_v16  ;;  %v957_v26 = vadd.f32 %v9799_v30, %v938_v20 }
 0x181   : > { %1206 = vmatmul.bf16.gmra.mxu1 %v969_v16  ;;  %1255 = vmatmul.bf16.gmra.mxu2 %v969_v16  ;;  %v8596_v38 = vpop.eup %8595 }
 0x182   : > { %v970_v29 = vpack.c.bf16 %v957_v26, %v956_v27  ;;  %v815_v35 = vmul.f32 %v8596_v38, %v744_v34  ;;  %vm821_vm4 = vweird.f32 %v8596_v38  ;;  %v1008_v34 = vld [vmem:[%s15357_s4] sm:$0x7] }
 0x183   : > { %vm9875_vm5 = vmor %vm820_vm3, %vm821_vm4 }
 0x184   : > { %v816_v37 = vmul.f32 %v8596_v38, %v815_v35 }
 0x186   : > { %v817_v28 = vmul.f32 0.5, %v816_v37  ;;  %v9916_v37 = vperm.slane %v1008_v34, 0 }
 0x188   : > { %v818_v51 = vsub.f32 1.5, %v817_v28 }
 0x18a   : > { %v819_v19 = vmul.f32 %v8596_v38, %v818_v51 }
 0x18c   : > { %v823_v58 = vsel %vm9875_vm5, %v8596_v38, %v819_v19 }
 0x18d   : > { %v920_v4 = vmul.f32 %v823_v58, %v9705_v44 }
 0x18f   : > { %v939_v14 = vmul.f32 %v9783_v42, %v920_v4 }
 0x190   : > { %1162 = vmatmul.bf16.gmra.mxu0 %v970_v29 }
 0x191   : > { %1211 = vmatmul.bf16.gmra.mxu1 %v970_v29  ;;  %1260 = vmatmul.bf16.gmra.mxu2 %v970_v29  ;;  %v958_v18 = vadd.f32 %v9799_v30, %v939_v14 }
 0x1ca   : > { %v705_v32 = vpop.xlane.xlu1 %704 }
 0x1cb   : > { %v729_v39 = vmul.f32 %v705_v32, %v9657_v13 }
 0x1cd   : > { %v745_v25 = vadd.f32 1e-05, %v729_v39 }
 0x1cf   : > { %8597 = vrsqrt.f32 %v745_v25  ;;  %vm830_vm7 = vweird.f32 %v745_v25 }
 0x1d2   : > { %v707_v53 = vpop.xlane.xlu1 %706 }
 0x1d3   : > { %v730_v54 = vmul.f32 %v707_v53, %v9657_v13  ;;  %v9921_v53 = vperm.slane %v1008_v34, 1 }
 0x1d5   : > { %v8598_v22 = vpop.eup %8597  ;;  %v746_v46 = vadd.f32 1e-05, %v730_v54 }
 0x1d6   : > { %v825_v55 = vmul.f32 %v8598_v22, %v745_v25  ;;  %vm831_vm6 = vweird.f32 %v8598_v22 }
 0x1d7   : > { %8599 = vrsqrt.f32 %v746_v46  ;;  %vm832_vm8 = vmor %vm830_vm7, %vm831_vm6  ;;  %vm840_vm9 = vweird.f32 %v746_v46 }
 0x1d8   : > { %v826_v56 = vmul.f32 %v8598_v22, %v825_v55 }
 0x1da   : > { %v827_v57 = vmul.f32 0.5, %v826_v56  ;;  %v713_v59 = vpop.xlane.xlu0 %712  ;;  %v634_v52 = vpop.xlane.xlu1 %633 }
 0x1db   : > { %v709_v61 = vpop.xlane.xlu2 %708  ;;  %v733_v62 = vmul.f32 %v713_v59, %v9657_v13  ;;  %v657_v1 = vmul.f32 %v9657_v13, %v634_v52 }
 0x1dc   : > { %v828_v60 = vsub.f32 1.5, %v827_v57  ;;  %v731_v0 = vmul.f32 %v709_v61, %v9657_v13 }
 0x1dd   : > { %v9884_v3 = vadd.f32 1e-05, %v733_v62  ;;  %v8600_v7 = vpop.eup %8599  ;;  %v9888_v9 = vsub.f32 %v9788_v43, %v657_v1 }
 0x1de   : > { %v829_v2 = vmul.f32 %v8598_v22, %v828_v60  ;;  %v747_v41 = vadd.f32 1e-05, %v731_v0  ;;  %v835_v11 = vmul.f32 %v8600_v7, %v746_v46  ;;  %vm841_vm10 = vweird.f32 %v8600_v7 }
 0x1df   : > { %8601 = vrsqrt.f32 %v9884_v3  ;;  %v689_v48 = vmul.f32 %v9888_v9, %v9888_v9  ;;  %vm9910_vm11 = vmor %vm840_vm9, %vm841_vm10  ;;  %v9932_v0 = vperm.slane %v1008_v34, 2  ;;  %vm870_vm15 = vweird.f32 %v9884_v3 }
 0x1e0   : > { %v833_v10 = vsel %vm832_vm8, %v8598_v22, %v829_v2  ;;  %8603 = vrsqrt.f32 %v747_v41  ;;  %v836_v33 = vmul.f32 %v8600_v7, %v835_v11  ;;  %vm850_vm12 = vweird.f32 %v747_v41 }
 0x1e1   : > { %v921_v24 = vmul.f32 %v833_v10, %v9733_v23  ;;  %720 = vadd.xlane.f32.xlu1 %v689_v48 }
 0x1e2   : > { %v837_v44 = vmul.f32 0.5, %v836_v33  ;;  %v715_v36 = vpop.xlane.xlu1 %714 }
 0x1e3   : > { %v711_v15 = vpop.xlane.xlu2 %710  ;;  %v940_v5 = vmul.f32 %v9783_v42, %v921_v24  ;;  %v734_v21 = vmul.f32 %v715_v36, %v9657_v13 }
 0x1e4   : > { %v732_v43 = vmul.f32 %v711_v15, %v9657_v13  ;;  %v838_v49 = vsub.f32 1.5, %v837_v44 }
 0x1e5   : > { %v9897_v16 = vpop.eup %8601  ;;  %v959_v17 = vadd.f32 %v9799_v30, %v940_v5  ;;  %v9914_v32 = vadd.f32 1e-05, %v734_v21 }
 0x1e6   : > { %v8604_v20 = vpop.eup %8603  ;;  %v9901_v23 = vadd.f32 1e-05, %v732_v43  ;;  %v839_v26 = vmul.f32 %v8600_v7, %v838_v49  ;;  %v865_v29 = vmul.f32 %v9897_v16, %v9884_v3  ;;  %vm871_vm0 = vweird.f32 %v9897_v16 }
 0x1e7   : > { %v845_v27 = vmul.f32 %v8604_v20, %v747_v41  ;;  %v971_v31 = vpack.c.bf16 %v959_v17, %v958_v18  ;;  %vm851_vm13 = vweird.f32 %v8604_v20  ;;  %vm9953_vm3 = vmor %vm870_vm15, %vm871_vm0  ;;  %vm880_vm7 = vweird.f32 %v9914_v32 }
 0x1e8   : > { %8605 = vrsqrt.f32 %v9901_v23  ;;  %v843_v39 = vsel %vm9910_vm11, %v8600_v7, %v839_v26  ;;  %v866_v28 = vmul.f32 %v9897_v16, %v865_v29  ;;  %vm852_vm14 = vmor %vm850_vm12, %vm851_vm13  ;;  %vm860_vm1 = vweird.f32 %v9901_v23 }
 0x1e9   : > { %v846_v38 = vmul.f32 %v8604_v20, %v845_v27  ;;  %1167 = vmatmul.bf16.gmra.mxu0 %v971_v31  ;;  %1216 = vmatmul.bf16.gmra.mxu1 %v971_v31  ;;  %8607 = vrsqrt.f32 %v9914_v32  ;;  %v922_v57 = vmul.f32 %v843_v39, %v9743_v45 }
 0x1ea   : > { %1265 = vmatmul.bf16.gmra.mxu2 %v971_v31  ;;  %v867_v59 = vmul.f32 0.5, %v866_v28 }
 0x1eb   : > { %v847_v25 = vmul.f32 0.5, %v846_v38  ;;  %v717_v51 = vpop.xlane.xlu2 %716  ;;  %v941_v4 = vmul.f32 %v9783_v42, %v922_v57 }
 0x1ec   : > { %v735_v22 = vmul.f32 %v717_v51, %v9657_v13  ;;  %v868_v7 = vsub.f32 1.5, %v867_v59 }
 0x1ed   : > { %v848_v54 = vsub.f32 1.5, %v847_v25  ;;  %v1153_v55 = vpop.f32.mrf.mxu0  ;;  %v960_v15 = vadd.f32 %v9799_v30, %v941_v4 }
 0x1ee   : > { %v8606_v19 = vpop.eup %8605  ;;  %v9925_v46 = vadd.f32 1e-05, %v735_v22  ;;  %v1154_v47 = vadd.f32 %v1153_v55, %v9916_v37  ;;  %v1202_v56 = vpop.f32.mrf.mxu1  ;;  %v869_v43 = vmul.f32 %v9897_v16, %v868_v7 }
 0x1ef   : > { %v849_v58 = vmul.f32 %v8604_v20, %v848_v54  ;;  %v855_v60 = vmul.f32 %v8606_v19, %v9901_v23  ;;  %v1203_v61 = vadd.f32 %v1202_v56, %v9921_v53  ;;  %v9936_v41 = vpop.eup %8607  ;;  %vm861_vm2 = vweird.f32 %v8606_v19 }
 0x1f0   : > { %8609 = vrsqrt.f32 %v9925_v46  ;;  %v875_v18 = vmul.f32 %v9936_v41, %v9914_v32  ;;  %vm862_vm4 = vmor %vm860_vm1, %vm861_vm2  ;;  %v873_v29 = vsel %vm9953_vm3, %v9897_v16, %v869_v43  ;;  %vm890_vm5 = vweird.f32 %v9925_v46 }
 0x1f1   : > { %v853_v52 = vsel %vm852_vm14, %v8604_v20, %v849_v58  ;;  %v856_v62 = vmul.f32 %v8606_v19, %v855_v60  ;;  %v1291_v1 = vpack.c.bf16 %v1203_v61, %v1154_v47  ;;  %v925_v22 = vmul.f32 %v873_v29, %v9768_v6 }
 0x1f2   : > { %v923_v2 = vmul.f32 %v853_v52, %v9774_v8  ;;  %v876_v31 = vmul.f32 %v9936_v41, %v875_v18  ;;  %vm881_vm8 = vweird.f32 %v9936_v41  ;;  %vm1534_vm1 = vcmask 261120  }
 0x1f3   : > { %v857_v45 = vmul.f32 0.5, %v856_v62  ;;  %1323 = vst [vmem:[#allocation2] sm:$0xff] %v1291_v1  ;;  %v944_v58 = vmul.f32 %v9783_v42, %v925_v22  ;;  %vm10003_vm10 = vmor %vm880_vm7, %vm881_vm8 }
 0x1f4   : > { %v1251_v10 = vpop.f32.mrf.mxu2  ;;  %v942_v11 = vmul.f32 %v9783_v42, %v923_v2  ;;  %v877_v54 = vmul.f32 0.5, %v876_v31 }
 0x1f5   : > { %v858_v48 = vsub.f32 1.5, %v857_v45  ;;  %v1252_v8 = vadd.f32 %v1251_v10, %v9932_v0  ;;  %v1155_v33 = vpop.f32.mrf.mxu0 }
 0x1f6   : > { %v9943_v24 = vpop.eup %8609  ;;  %v1156_v14 = vadd.f32 %v1155_v33, %v9916_v37  ;;  %v1204_v44 = vpop.f32.mrf.mxu1  ;;  %v961_v5 = vadd.f32 %v9799_v30, %v942_v11  ;;  %v878_v59 = vsub.f32 1.5, %v877_v54  ;;  %v963_v11 = vadd.f32 %v9799_v30, %v944_v58 }
 0x1f7   : > { %v859_v36 = vmul.f32 %v8606_v19, %v858_v48  ;;  %v885_v17 = vmul.f32 %v9943_v24, %v9925_v46  ;;  %v1292_v20 = vpack.c.bf16 %v1252_v8, %v1252_v8  ;;  %v1205_v23 = vadd.f32 %v1204_v44, %v9921_v53 }
 0x1f8   : > { %v972_v21 = vpack.c.bf16 %v961_v5, %v960_v15  ;;  %vm891_vm6 = vweird.f32 %v9943_v24  ;;  %v879_v48 = vmul.f32 %v9936_v41, %v878_v59 }
 0x1f9   : > { %v863_v26 = vsel %vm862_vm4, %v8606_v19, %v859_v36  ;;  %v886_v27 = vmul.f32 %v9943_v24, %v885_v17  ;;  %1324 = vst [vmem:[#allocation2 + $0x8] sm:$0xf] %v1292_v20  ;;  %v1293_v3 = vpack.c.bf16 %v1205_v23, %v1156_v14  ;;  %vm9985_vm9 = vmor %vm890_vm5, %vm891_vm6 }
 0x1fa   : > { %1172 = vmatmul.bf16.gmra.mxu0 %v972_v21  ;;  %1221 = vmatmul.bf16.gmra.mxu1 %v972_v21  ;;  %v924_v38 = vmul.f32 %v863_v26, %v9816_v50  ;;  %v7852_v57 = vld [vmem:[#allocation2 + $0x4] sm:$0xf]  ;;  %v7820_v50 = vld [vmem:[#allocation2] sm:$0xf]  ;;  %v883_v43 = vsel %vm10003_vm10, %v9936_v41, %v879_v48 }
 0x1fb   : > { %1270 = vmatmul.bf16.gmra.mxu2 %v972_v21  ;;  %1325 = vst [vmem:[#allocation2 + $0xc] sm:$0xff] %v1293_v3  ;;  %v887_v35 = vmul.f32 0.5, %v886_v27  ;;  %v926_v41 = vmul.f32 %v883_v43, %v9810_v40 }
 0x1fc   : > { %v1253_v34 = vpop.f32.mrf.mxu2  ;;  %v943_v19 = vmul.f32 %v9783_v42, %v924_v38 }
 0x1fd   : > { %v1254_v39 = vadd.f32 %v1253_v34, %v9932_v0  ;;  %v1158_v25 = vpop.f32.mrf.mxu0  ;;  %v888_v47 = vsub.f32 1.5, %v887_v35  ;;  %v945_v31 = vmul.f32 %v9783_v42, %v926_v41 }
 0x1fe   : > { %v1159_v28 = vadd.f32 %v1158_v25, %v9916_v37  ;;  %v1207_v51 = vpop.f32.mrf.mxu1  ;;  %v962_v1 = vadd.f32 %v9799_v30, %v943_v19 }
 0x1ff   : > { %v1294_v55 = vpack.c.bf16 %v1254_v39, %v1254_v39  ;;  %v1208_v16 = vadd.f32 %v1207_v51, %v9921_v53  ;;  %v889_v2 = vmul.f32 %v9943_v24, %v888_v47  ;;  %v964_v22 = vadd.f32 %v9799_v30, %v945_v31 }
 0x200   : > { %v973_v44 = vpack.c.bf16 %v963_v11, %v962_v1  ;;  %v719_v1 = vpop.xlane.xlu0 %718 }
 0x201   : > { %1326 = vst [vmem:[#allocation2 + $0x14] sm:$0xf] %v1294_v55  ;;  %v1295_v56 = vpack.c.bf16 %v1208_v16, %v1159_v28  ;;  %v893_v15 = vsel %vm9985_vm9, %v9943_v24, %v889_v2  ;;  %v736_v2 = vmul.f32 %v719_v1, %v9657_v13 }
 0x202   : > { %v8336_v6 = vld [vmem:[#allocation2 + $0xc] sm:$0xf0]  ;;  %v8328_v60 = vld [vmem:[#allocation2 + $0x8] sm:$0xf0]  ;;  %v927_v49 = vmul.f32 %v893_v15, %v9841_v63 }
 0x203   : > { %1327 = vst [vmem:[#allocation2 + $0x18] sm:$0xff] %v1295_v56  ;;  %v9976_v52 = vor.u32 %v8336_v6, %v7852_v57  ;;  %v9978_v62 = vor.u32 %v8328_v60, %v7820_v50 }
 0x204   : > { %v1256_v61 = vpop.f32.mrf.mxu2  ;;  %v946_v23 = vmul.f32 %v9783_v42, %v927_v49 }
 0x205   : > { %v1257_v46 = vadd.f32 %v1256_v61, %v9932_v0  ;;  %v1160_v4 = vpop.f32.mrf.mxu0  ;;  %2283 = vrot.lane.b32.xlu1 %v9976_v52, %s9408_s2  ;;  %1897 = vrot.lane.b32.xlu2 %v9978_v62, %s9409_s13 }
 0x206   : > { %v1161_v45 = vadd.f32 %v1160_v4, %v9916_v37  ;;  %v1209_v10 = vpop.f32.mrf.mxu1  ;;  %1913 = vrot.lane.b32.xlu0 %v9976_v52, %s9409_s13  ;;  %v965_v35 = vadd.f32 %v9799_v30, %v946_v23 }
 0x207   : > { %v1296_v8 = vpack.c.bf16 %v1257_v46, %v1257_v46  ;;  %v1210_v33 = vadd.f32 %v1209_v10, %v9921_v53  ;;  %v752_v46 = vadd.f32 1e-05, %v736_v2 }
 0x208   : > { %v974_v16 = vpack.c.bf16 %v965_v35, %v964_v22 }
 0x209   : > { %1328 = vst [vmem:[#allocation2 + $0x20] sm:$0xf] %v1296_v8  ;;  %v1297_v5 = vpack.c.bf16 %v1210_v33, %v1161_v45  ;;  %8611 = vrsqrt.f32 %v752_v46  ;;  %vm900_vm11 = vweird.f32 %v752_v46 }
 0x20a   : > { %1177 = vmatmul.bf16.gmra.mxu0 %v973_v44  ;;  %1226 = vmatmul.bf16.gmra.mxu1 %v973_v44  ;;  %v7856_v26 = vld [vmem:[#allocation2 + $0x1c] sm:$0xf]  ;;  %v7824_v3 = vld [vmem:[#allocation2 + $0x18] sm:$0xf] }
 0x20b   : > { %1329 = vst [vmem:[#allocation2 + $0x24] sm:$0xff] %v1297_v5  ;;  %1275 = vmatmul.bf16.gmra.mxu2 %v973_v44 }
 0x20c   : > { %v1258_v32 = vpop.f32.mrf.mxu2 }
 0x20d   : > { %v1259_v36 = vadd.f32 %v1258_v32, %v9932_v0  ;;  %v1163_v18 = vpop.f32.mrf.mxu0  ;;  %2637 = vrot.lane.b32.xlu1 %v9978_v62, %s9410_s9  ;;  %2267 = vrot.lane.b32.xlu2 %v9978_v62, %s9408_s2 }
 0x20e   : > { %v1164_v24 = vadd.f32 %v1163_v18, %v9916_v37  ;;  %v1212_v17 = vpop.f32.mrf.mxu1  ;;  %2653 = vrot.lane.b32.xlu0 %v9976_v52, %s9410_s9 }
 0x20f   : > { %v1298_v20 = vpack.c.bf16 %v1259_v36, %v1259_v36  ;;  %v1213_v63 = vadd.f32 %v1212_v17, %v9921_v53  ;;  %v8612_v4 = vpop.eup %8611 }
 0x210   : > { %v895_v7 = vmul.f32 %v8612_v4, %v752_v46  ;;  %vm901_vm12 = vweird.f32 %v8612_v4 }
 0x211   : > { %1330 = vst [vmem:[#allocation2 + $0x2c] sm:$0xf] %v1298_v20  ;;  %v1299_v21 = vpack.c.bf16 %v1213_v63, %v1164_v24  ;;  %vm902_vm13 = vmor %vm900_vm11, %vm901_vm12 }
 0x212   : > { %v8337_v27 = vld [vmem:[#allocation2 + $0x24] sm:$0xf0]  ;;  %v8329_v29 = vld [vmem:[#allocation2 + $0x20] sm:$0xf0]  ;;  %v896_v45 = vmul.f32 %v8612_v4, %v895_v7 }
 0x213   : > { %1331 = vst [vmem:[#allocation2 + $0x30] sm:$0xff] %v1299_v21  ;;  %v10026_v34 = vor.u32 %v8337_v27, %v7856_v26  ;;  %v10028_v40 = vor.u32 %v8329_v29, %v7824_v3 }
 0x214   : > { %v1261_v38 = vpop.f32.mrf.mxu2  ;;  %v897_v8 = vmul.f32 0.5, %v896_v45 }
 0x215   : > { %v1262_v39 = vadd.f32 %v1261_v38, %v9932_v0  ;;  %v1165_v25 = vpop.f32.mrf.mxu0  ;;  %1915 = vrot.lane.b32.xlu1 %v10026_v34, %s9409_s13  ;;  %2655 = vrot.lane.b32.xlu2 %v10026_v34, %s9410_s9 }
 0x216   : > { %v1166_v28 = vadd.f32 %v1165_v25, %v9916_v37  ;;  %v1214_v51 = vpop.f32.mrf.mxu1  ;;  %2269 = vrot.lane.b32.xlu0 %v10028_v40, %s9408_s2  ;;  %v898_v33 = vsub.f32 1.5, %v897_v8 }
 0x217   : > { %v1300_v54 = vpack.c.bf16 %v1262_v39, %v1262_v39  ;;  %v1215_v55 = vadd.f32 %v1214_v51, %v9921_v53 }
 0x218   : > { %v899_v44 = vmul.f32 %v8612_v4, %v898_v33 }
 0x219   : > { %1332 = vst [vmem:[#allocation2 + $0x38] sm:$0xf] %v1300_v54  ;;  %v1301_v19 = vpack.c.bf16 %v1215_v55, %v1166_v28 }
 0x21a   : > { %1182 = vmatmul.bf16.gmra.mxu0 %v974_v16  ;;  %1231 = vmatmul.bf16.gmra.mxu1 %v974_v16  ;;  %v7860_v50 = vld [vmem:[#allocation2 + $0x34] sm:$0xf]  ;;  %v7828_v59 = vld [vmem:[#allocation2 + $0x30] sm:$0xf]  ;;  %v903_v43 = vsel %vm902_vm13, %v8612_v4, %v899_v44 }
 0x21b   : > { %1333 = vst [vmem:[#allocation2 + $0x3c] sm:$0xff] %v1301_v19  ;;  %1280 = vmatmul.bf16.gmra.mxu2 %v974_v16  ;;  %v928_v41 = vmul.f32 %v903_v43, %v9854_v12 }
 0x21c   : > { %v1263_v47 = vpop.f32.mrf.mxu2 }
 0x21d   : > { %v1264_v56 = vadd.f32 %v1263_v47, %v9932_v0  ;;  %1899 = vrot.lane.b32.xlu1 %v10028_v40, %s9409_s13  ;;  %2639 = vrot.lane.b32.xlu2 %v10028_v40, %s9410_s9  ;;  %v947_v26 = vmul.f32 %v9783_v42, %v928_v41 }
 0x21f   : > { %v1302_v57 = vpack.c.bf16 %v1264_v56, %v1264_v56  ;;  %v966_v25 = vadd.f32 %v9799_v30, %v947_v26 }
 0x221   : > { %1334 = vst [vmem:[#allocation2 + $0x44] sm:$0xf] %v1302_v57 }
 0x222   : > { %v8338_v58 = vld [vmem:[#allocation2 + $0x3c] sm:$0xf0]  ;;  %v8330_v6 = vld [vmem:[#allocation2 + $0x38] sm:$0xf0] }
 0x223   : > { %v10046_v60 = vor.u32 %v8338_v58, %v7860_v50  ;;  %v10048_v61 = vor.u32 %v8330_v6, %v7828_v59 }
 0x225   : > { %1901 = vrot.lane.b32.xlu0 %v10048_v61, %s9409_s13  ;;  %2285 = vrot.lane.b32.xlu1 %v10026_v34, %s9408_s2 }
 0x226   : > { %1917 = vrot.lane.b32.xlu2 %v10046_v60, %s9409_s13 }
 0x22d   : > { %2287 = vrot.lane.b32.xlu0 %v10046_v60, %s9408_s2 }
 0x22e   : > { %2657 = vrot.lane.b32.xlu2 %v10046_v60, %s9410_s9 }
 0x235   : > { %2271 = vrot.lane.b32.xlu0 %v10048_v61, %s9408_s2 }
 0x254   : > { %v721_v10 = vpop.xlane.xlu1 %720 }
 0x255   : > { %v737_v11 = vmul.f32 %v721_v10, %v9657_v13 }
 0x257   : > { %v753_v48 = vadd.f32 1e-05, %v737_v11 }
 0x259   : > { %8613 = vrsqrt.f32 %v753_v48  ;;  %vm910_vm14 = vweird.f32 %v753_v48 }
 0x25f   : > { %v8614_v14 = vpop.eup %8613 }
 0x260   : > { %v905_v15 = vmul.f32 %v8614_v14, %v753_v48  ;;  %vm911_vm15 = vweird.f32 %v8614_v14 }
 0x261   : > { %vm912_vm0 = vmor %vm910_vm14, %vm911_vm15 }
 0x262   : > { %v906_v5 = vmul.f32 %v8614_v14, %v905_v15 }
 0x264   : > { %v907_v32 = vmul.f32 0.5, %v906_v5 }
 0x266   : > { %v1168_v49 = vpop.f32.mrf.mxu0  ;;  %v1217_v36 = vpop.f32.mrf.mxu1  ;;  %v908_v18 = vsub.f32 1.5, %v907_v32 }
 0x267   : > { %v1169_v24 = vadd.f32 %v1168_v49, %v9916_v37  ;;  %v1218_v17 = vadd.f32 %v1217_v36, %v9921_v53 }
 0x268   : > { %v909_v20 = vmul.f32 %v8614_v14, %v908_v18 }
 0x269   : > { %v1303_v63 = vpack.c.bf16 %v1218_v17, %v1169_v24 }
 0x26a   : > { %v913_v23 = vsel %vm912_vm0, %v8614_v14, %v909_v20 }
 0x26b   : > { %1335 = vst [vmem:[#allocation2 + $0x48] sm:$0xff] %v1303_v63  ;;  %v929_v21 = vmul.f32 %v913_v23, %v9888_v9 }
 0x26d   : > { %v1266_v27 = vpop.f32.mrf.mxu2  ;;  %v948_v38 = vmul.f32 %v9783_v42, %v929_v21 }
 0x26e   : > { %v1267_v3 = vadd.f32 %v1266_v27, %v9932_v0  ;;  %v1170_v29 = vpop.f32.mrf.mxu0  ;;  %v1219_v31 = vpop.f32.mrf.mxu1 }
 0x26f   : > { %v1171_v35 = vadd.f32 %v1170_v29, %v9916_v37  ;;  %v1220_v39 = vadd.f32 %v1219_v31, %v9921_v53  ;;  %v967_v28 = vadd.f32 %v9799_v30, %v948_v38 }
 0x270   : > { %v1304_v12 = vpack.c.bf16 %v1267_v3, %v1267_v3 }
 0x271   : > { %v1305_v51 = vpack.c.bf16 %v1220_v39, %v1171_v35  ;;  %v975_v9 = vpack.c.bf16 %v967_v28, %v966_v25 }
 0x272   : > { %1336 = vst [vmem:[#allocation2 + $0x50] sm:$0xf] %v1304_v12  ;;  %v7864_v56 = vld [vmem:[#allocation2 + $0x4c] sm:$0xf]  ;;  %v7832_v57 = vld [vmem:[#allocation2 + $0x48] sm:$0xf] }
 0x273   : > { %1337 = vst [vmem:[#allocation2 + $0x54] sm:$0xff] %v1305_v51  ;;  %1187 = vmatmul.bf16.gmra.mxu0 %v975_v9  ;;  %1236 = vmatmul.bf16.gmra.mxu1 %v975_v9 }
 0x274   : > { %1285 = vmatmul.bf16.gmra.mxu2 %v975_v9 }
 0x275   : > { %v1268_v22 = vpop.f32.mrf.mxu2 }
 0x276   : > { %v1269_v54 = vadd.f32 %v1268_v22, %v9932_v0 }
 0x277   : > { %v1173_v42 = vpop.f32.mrf.mxu0  ;;  %v1222_v55 = vpop.f32.mrf.mxu1 }
 0x278   : > { %v1306_v16 = vpack.c.bf16 %v1269_v54, %v1269_v54  ;;  %v1174_v19 = vadd.f32 %v1173_v42, %v9916_v37  ;;  %v1223_v47 = vadd.f32 %v1222_v55, %v9921_v53 }
 0x27a   : > { %1338 = vst [vmem:[#allocation2 + $0x5c] sm:$0xf] %v1306_v16  ;;  %v1307_v30 = vpack.c.bf16 %v1223_v47, %v1174_v19  ;;  %v8339_v50 = vld [vmem:[#allocation2 + $0x54] sm:$0xf0]  ;;  %v8331_v58 = vld [vmem:[#allocation2 + $0x50] sm:$0xf0] }
 0x27b   : > { %v10078_v59 = vor.u32 %v8339_v50, %v7864_v56  ;;  %v10080_v6 = vor.u32 %v8331_v58, %v7832_v57 }
 0x27c   : > { %1339 = vst [vmem:[#allocation2 + $0x60] sm:$0xff] %v1307_v30 }
 0x27d   : > { %2659 = vrot.lane.b32.xlu1 %v10078_v59, %s9410_s9  ;;  %1903 = vrot.lane.b32.xlu2 %v10080_v6, %s9409_s13 }
 0x27e   : > { %v1271_v1 = vpop.f32.mrf.mxu2  ;;  %1919 = vrot.lane.b32.xlu0 %v10078_v59, %s9409_s13 }
 0x27f   : > { %v1272_v2 = vadd.f32 %v1271_v1, %v9932_v0  ;;  %v1175_v46 = vpop.f32.mrf.mxu0  ;;  %v1224_v4 = vpop.f32.mrf.mxu1 }
 0x280   : > { %v1176_v7 = vadd.f32 %v1175_v46, %v9916_v37  ;;  %v1225_v45 = vadd.f32 %v1224_v4, %v9921_v53 }
 0x281   : > { %v1308_v10 = vpack.c.bf16 %v1272_v2, %v1272_v2 }
 0x282   : > { %v1309_v11 = vpack.c.bf16 %v1225_v45, %v1176_v7 }
 0x283   : > { %1340 = vst [vmem:[#allocation2 + $0x68] sm:$0xf] %v1308_v10  ;;  %v7868_v32 = vld [vmem:[#allocation2 + $0x64] sm:$0xf]  ;;  %v7836_v49 = vld [vmem:[#allocation2 + $0x60] sm:$0xf] }
 0x284   : > { %1341 = vst [vmem:[#allocation2 + $0x6c] sm:$0xff] %v1309_v11 }
 0x286   : > { %v1273_v48 = vpop.f32.mrf.mxu2  ;;  %2289 = vrot.lane.b32.xlu0 %v10078_v59, %s9408_s2 }
 0x287   : > { %v1274_v8 = vadd.f32 %v1273_v48, %v9932_v0  ;;  %v1178_v33 = vpop.f32.mrf.mxu0  ;;  %v1227_v14 = vpop.f32.mrf.mxu1 }
 0x288   : > { %v1179_v44 = vadd.f32 %v1178_v33, %v9916_v37  ;;  %v1228_v15 = vadd.f32 %v1227_v14, %v9921_v53 }
 0x289   : > { %v1310_v5 = vpack.c.bf16 %v1274_v8, %v1274_v8 }
 0x28a   : > { %v1311_v43 = vpack.c.bf16 %v1228_v15, %v1179_v44  ;;  %v8347_v15 = vld [vmem:[#allocation2 + $0x58] sm:$0xf0] }
 0x28b   : > { %1342 = vst [vmem:[#allocation2 + $0x74] sm:$0xf] %v1310_v5  ;;  %v8340_v36 = vld [vmem:[#allocation2 + $0x6c] sm:$0xf0]  ;;  %v8332_v18 = vld [vmem:[#allocation2 + $0x68] sm:$0xf0] }
 0x28c   : > { %1343 = vst [vmem:[#allocation2 + $0x78] sm:$0xff] %v1311_v43  ;;  %v10096_v24 = vor.u32 %v8340_v36, %v7868_v32  ;;  %v10098_v17 = vor.u32 %v8332_v18, %v7836_v49  ;;  %v7904_v32 = vld [vmem:[#allocation2 + $0x50] sm:$0xf]  ;;  %v8344_v36 = vld [vmem:[#allocation2 + $0x10] sm:$0xf0] }
 0x28d   : > { %v10148_v49 = vor.u32 %v8347_v15, %v7904_v32  ;;  %v7892_v18 = vld [vmem:[#allocation2 + $0x8] sm:$0xf]  ;;  %v10221_v15 = vpop.permute.xlu0 %1913 }
 0x28e   : > { %v1276_v41 = vpop.f32.mrf.mxu2  ;;  %2661 = vrot.lane.b32.xlu1 %v10096_v24, %s9410_s9  ;;  %1921 = vrot.lane.b32.xlu2 %v10096_v24, %s9409_s13 }
 0x28f   : > { %v1277_v20 = vadd.f32 %v1276_v41, %v9932_v0  ;;  %1905 = vrot.lane.b32.xlu0 %v10098_v17, %s9409_s13  ;;  %v1180_v63 = vpop.f32.mrf.mxu0  ;;  %v1229_v23 = vpop.f32.mrf.mxu1  ;;  %v10154_v41 = vor.u32 %v8344_v36, %v7892_v18 }
 0x290   : > { %v1181_v21 = vadd.f32 %v1180_v63, %v9916_v37  ;;  %v1230_v26 = vadd.f32 %v1229_v23, %v9921_v53  ;;  %v8346_v63 = vld [vmem:[#allocation2 + $0x40] sm:$0xf0]  ;;  %v7900_v23 = vld [vmem:[#allocation2 + $0x38] sm:$0xf] }
 0x291   : > { %v1312_v27 = vpack.c.bf16 %v1277_v20, %v1277_v20  ;;  %v10164_v20 = vpop.permute.xlu1 %2283 }
 0x292   : > { %v1313_v3 = vpack.c.bf16 %v1230_v26, %v1181_v21  ;;  %v10166_v21 = vor.u32 %v8346_v63, %v7900_v23 }
 0x293   : > { %1344 = vst [vmem:[#allocation2 + $0x80] sm:$0xf] %v1312_v27  ;;  %v7872_v51 = vld [vmem:[#allocation2 + $0x7c] sm:$0xf]  ;;  %v7840_v50 = vld [vmem:[#allocation2 + $0x78] sm:$0xf] }
 0x294   : > { %1345 = vst [vmem:[#allocation2 + $0x84] sm:$0xff] %v1313_v3 }
 0x295   : > { %v10237_v63 = vpop.permute.xlu0 %2653 }
 0x296   : > { %v1278_v29 = vpop.f32.mrf.mxu2  ;;  %2291 = vrot.lane.b32.xlu2 %v10096_v24, %s9408_s2 }
 0x297   : > { %v1279_v31 = vadd.f32 %v1278_v29, %v9932_v0  ;;  %v1183_v38 = vpop.f32.mrf.mxu0  ;;  %v1232_v39 = vpop.f32.mrf.mxu1 }
 0x298   : > { %v1184_v35 = vadd.f32 %v1183_v38, %v9916_v37  ;;  %v1233_v25 = vadd.f32 %v1232_v39, %v9921_v53 }
 0x299   : > { %v1314_v12 = vpack.c.bf16 %v1279_v31, %v1279_v31  ;;  %v10172_v26 = vpop.permute.xlu1 %2637 }
 0x29a   : > { %v1315_v28 = vpack.c.bf16 %v1233_v25, %v1184_v35  ;;  %v7912_v5 = vld [vmem:[#allocation2 + $0x80] sm:$0xf] }
 0x29b   : > { %1346 = vst [vmem:[#allocation2 + $0x8c] sm:$0xf] %v1314_v12  ;;  %v8341_v9 = vld [vmem:[#allocation2 + $0x84] sm:$0xf0]  ;;  %v8333_v57 = vld [vmem:[#allocation2 + $0x80] sm:$0xf0] }
 0x29c   : > { %v10114_v22 = vor.u32 %v8341_v9, %v7872_v51  ;;  %1347 = vst [vmem:[#allocation2 + $0x90] sm:$0xff] %v1315_v28  ;;  %v10125_v58 = vor.u32 %v8333_v57, %v7840_v50  ;;  %v8348_v50 = vld [vmem:[#allocation2 + $0x70] sm:$0xf0] }
 0x29e   : > { %v1281_v54 = vpop.f32.mrf.mxu2  ;;  %2663 = vrot.lane.b32.xlu0 %v10114_v22, %s9410_s9  ;;  %2293 = vrot.lane.b32.xlu2 %v10114_v22, %s9408_s2 }
 0x29f   : > { %v1282_v42 = vadd.f32 %v1281_v54, %v9932_v0  ;;  %1923 = vrot.lane.b32.xlu1 %v10114_v22, %s9409_s13  ;;  %v1185_v55 = vpop.f32.mrf.mxu0  ;;  %v1234_v19 = vpop.f32.mrf.mxu1 }
 0x2a0   : > { %v1186_v16 = vadd.f32 %v1185_v55, %v9916_v37  ;;  %v1235_v56 = vadd.f32 %v1234_v19, %v9921_v53 }
 0x2a1   : > { %v1316_v47 = vpack.c.bf16 %v1282_v42, %v1282_v42  ;;  %v10178_v27 = vpop.permute.xlu1 %1915 }
 0x2a2   : > { %v1317_v30 = vpack.c.bf16 %v1235_v56, %v1186_v16  ;;  %v8349_v44 = vld [vmem:[#allocation2 + $0x88] sm:$0xf0]  ;;  %v10199_v16 = vpop.permute.xlu2 %1897 }
 0x2a3   : > { %1348 = vst [vmem:[#allocation2 + $0x98] sm:$0xf] %v1316_v47  ;;  %v7876_v4 = vld [vmem:[#allocation2 + $0x94] sm:$0xf]  ;;  %v7844_v45 = vld [vmem:[#allocation2 + $0x90] sm:$0xf]  ;;  %v10146_v43 = vor.u32 %v8349_v44, %v7912_v5 }
 0x2a4   : > { %1349 = vst [vmem:[#allocation2 + $0x9c] sm:$0xff] %v1317_v30 }
 0x2a6   : > { %v1283_v1 = vpop.f32.mrf.mxu2 }
 0x2a7   : > { %v1284_v2 = vadd.f32 %v1283_v1, %v9932_v0  ;;  %1907 = vrot.lane.b32.xlu1 %v10125_v58, %s9409_s13 }
 0x2a9   : > { %v1318_v46 = vpack.c.bf16 %v1284_v2, %v1284_v2  ;;  %v10184_v3 = vpop.permute.xlu1 %1899 }
 0x2aa   : > { %v7916_v33 = vld [vmem:[#allocation2 + $0x98] sm:$0xf] }
 0x2ab   : > { %1350 = vst [vmem:[#allocation2 + $0xa4] sm:$0xf] %v1318_v46  ;;  %v8342_v7 = vld [vmem:[#allocation2 + $0x9c] sm:$0xf0]  ;;  %v8334_v10 = vld [vmem:[#allocation2 + $0x98] sm:$0xf0] }
 0x2ac   : > { %v10130_v11 = vor.u32 %v8342_v7, %v7876_v4  ;;  %v10132_v48 = vor.u32 %v8334_v10, %v7844_v45  ;;  %v10206_v7 = vpop.permute.xlu2 %2267 }
 0x2ae   : > { %1925 = vrot.lane.b32.xlu0 %v10130_v11, %s9409_s13  ;;  %1909 = vrot.lane.b32.xlu2 %v10132_v48, %s9409_s13  ;;  %v1578_v18 = vsel %vm1534_vm1, %v10130_v11, 0 }
 0x2af   : > { %2295 = vrot.lane.b32.xlu1 %v10130_v11, %s9408_s2 }
 0x2b1   : > { %v10194_v25 = vpop.permute.xlu1 %2285 }
 0x2b2   : > { %v8350_v8 = vld [vmem:[#allocation2 + $0xa0] sm:$0xf0] }
 0x2b3   : > { %v10140_v14 = vor.u32 %v8350_v8, %v7916_v33 }
 0x2b4   : > { %v10228_v32 = vpop.permute.xlu2 %2655 }
 0x2b6   : > { %2665 = vrot.lane.b32.xlu0 %v10130_v11, %s9410_s9  ;;  %v8345_v11 = vld [vmem:[#allocation2 + $0x28] sm:$0xf0] }
 0x2b7   : > { %2158 = vrot.lane.b32.xlu1 %v10140_v14, %s9409_s13 }
 0x2be   : > { %2156 = vrot.lane.b32.xlu0 %v10146_v43, %s9409_s13 }
 0x2bf   : > { %2152 = vrot.lane.b32.xlu1 %v10148_v49, %s9409_s13 }
 0x2c6   : > { %2146 = vrot.lane.b32.xlu0 %v10154_v41, %s9409_s13 }
 0x2c7   : > { %2273 = vrot.lane.b32.xlu1 %v10080_v6, %s9408_s2 }
 0x2ce   : > { %2277 = vrot.lane.b32.xlu0 %v10125_v58, %s9408_s2 }
 0x2cf   : > { %2643 = vrot.lane.b32.xlu1 %v10080_v6, %s9410_s9 }
 0x2d6   : > { %2649 = vrot.lane.b32.xlu0 %v10132_v48, %s9410_s9 }
 0x2d7   : > { %2150 = vrot.lane.b32.xlu1 %v10166_v21, %s9409_s13 }
 0x2de   : > { %2898 = vrot.lane.b32.xlu0 %v10140_v14, %s9410_s9 }
 0x2df   : > { %2275 = vrot.lane.b32.xlu1 %v10098_v17, %s9408_s2 }
 0x2e6   : > { %2890 = vrot.lane.b32.xlu0 %v10166_v21, %s9410_s9 }
 0x2e7   : > { %2645 = vrot.lane.b32.xlu1 %v10098_v17, %s9410_s9 }
 0x2ee   : > { %2886 = vrot.lane.b32.xlu0 %v10154_v41, %s9410_s9 }
 0x2ef   : > { %2279 = vrot.lane.b32.xlu1 %v10132_v48, %s9408_s2  ;;  %v10203_v56 = vpop.permute.xlu1 %2659 }
 0x2f0   : > { %v1188_v29 = vpop.f32.mrf.mxu0  ;;  %v1237_v31 = vpop.f32.mrf.mxu1 }
 0x2f1   : > { %v1189_v38 = vadd.f32 %v1188_v29, %v9916_v37  ;;  %v1238_v35 = vadd.f32 %v1237_v31, %v9921_v53  ;;  %v1575_v29 = vsel %vm1534_vm1, %v10114_v22, 0  ;;  %v10246_v31 = vpop.permute.xlu2 %2639 }
 0x2f3   : > { %v1319_v39 = vpack.c.bf16 %v1238_v35, %v1189_v38  ;;  %v7896_v38 = vld [vmem:[#allocation2 + $0x20] sm:$0xf]  ;;  %v1572_v35 = vsel %vm1534_vm1, %v10096_v24, 0 }
 0x2f5   : > { %1351 = vst [vmem:[#allocation2 + $0xa8] sm:$0xff] %v1319_v39 }
 0x2f7   : > { %2896 = vrot.lane.b32.xlu1 %v10146_v43, %s9410_s9  ;;  %v1286_v12 = vpop.f32.mrf.mxu2 }
 0x2f8   : > { %v1287_v28 = vadd.f32 %v1286_v12, %v9932_v0  ;;  %v1190_v51 = vpop.f32.mrf.mxu0  ;;  %v1239_v54 = vpop.f32.mrf.mxu1 }
 0x2f9   : > { %v1191_v9 = vadd.f32 %v1190_v51, %v9916_v37  ;;  %v1240_v55 = vadd.f32 %v1239_v54, %v9921_v53  ;;  %v7908_v37 = vld [vmem:[#allocation2 + $0x68] sm:$0xf]  ;;  %v10258_v22 = vpop.permute.xlu2 %1917 }
 0x2fa   : > { %v1320_v42 = vpack.c.bf16 %v1287_v28, %v1287_v28  ;;  %v7909_v2 = vor.u32 %v8348_v50, %v7908_v37  ;;  %v1569_v28 = vsel %vm1534_vm1, %v10078_v59, 0 }
 0x2fb   : > { %v1321_v19 = vpack.c.bf16 %v1240_v55, %v1191_v9  ;;  %v1566_v9 = vsel %vm1534_vm1, %v10046_v60, 0 }
 0x2fc   : > { %1352 = vst [vmem:[#allocation2 + $0xb0] sm:$0xf] %v1320_v42  ;;  %v7880_v1 = vld [vmem:[#allocation2 + $0xac] sm:$0xf]  ;;  %v7848_v46 = vld [vmem:[#allocation2 + $0xa8] sm:$0xf] }
 0x2fd   : > { %1353 = vst [vmem:[#allocation2 + $0xb4] sm:$0xff] %v1321_v19 }
 0x2ff   : > { %2528 = vrot.lane.b32.xlu1 %v10140_v14, %s9408_s2  ;;  %v1288_v47 = vpop.f32.mrf.mxu2 }
 0x300   : > { %v1289_v57 = vadd.f32 %v1288_v47, %v9932_v0  ;;  %v10213_v8 = vpop.permute.xlu1 %2661  ;;  %v1560_v47 = vsel %vm1534_vm1, %v9976_v52, 0 }
 0x301   : > { %v10270_v24 = vpop.permute.xlu2 %2657 }
 0x302   : > { %v1322_v30 = vpack.c.bf16 %v1289_v57, %v1289_v57 }
 0x303   : > { %v7920_v33 = vld [vmem:[#allocation2 + $0xb0] sm:$0xf] }
 0x304   : > { %1354 = vst [vmem:[#allocation2 + $0xbc] sm:$0xf] %v1322_v30  ;;  %v8343_v53 = vld [vmem:[#allocation2 + $0xb4] sm:$0xf0]  ;;  %v8335_v4 = vld [vmem:[#allocation2 + $0xb0] sm:$0xf0] }
 0x305   : > { %v10208_v45 = vor.u32 %v8343_v53, %v7880_v1  ;;  %v10210_v10 = vor.u32 %v8335_v4, %v7848_v46 }
 0x307   : > { %2894 = vrot.lane.b32.xlu1 %v7909_v2, %s9410_s9  ;;  %1927 = vrot.lane.b32.xlu2 %v10208_v45, %s9409_s13  ;;  %v1581_v0 = vsel %vm1534_vm1, %v10208_v45, 0 }
 0x308   : > { %1911 = vrot.lane.b32.xlu0 %v10210_v10, %s9409_s13  ;;  %1583 = vmatpush.bf16.xpose.msra.mxu3 %v1581_v0 }
 0x309   : > { %v10282_v42 = vpop.permute.xlu2 %1903 }
 0x30b   : > { %v8351_v44 = vld [vmem:[#allocation2 + $0xb8] sm:$0xf0] }
 0x30c   : > { %v10223_v5 = vor.u32 %v8351_v44, %v7920_v33 }
 0x30e   : > { %1800 = vmatpush.bf16.msrb.mxu0 %v10223_v5 }
 0x30f   : > { %2526 = vrot.lane.b32.xlu1 %v10146_v43, %s9408_s2  ;;  %2641 = vrot.lane.b32.xlu2 %v10048_v61, %s9410_s9 }
 0x310   : > { %1584 = vmatpush.bf16.xpose.msra.mxu3 %v1578_v18 }
 0x311   : > { %v10230_v36 = vpop.permute.xlu1 %1923  ;;  %v1922_v19 = vpop.permute.xlu2 %1921 }
 0x312   : > { %1801 = vmatpush.bf16.msrb.mxu0 %v10140_v14  ;;  %v7897_v14 = vor.u32 %v8345_v11, %v7896_v38  ;;  %v1969_v18 = vsel %vm1534_vm1, %v10230_v36, 0  ;;  %v1966_v11 = vsel %vm1534_vm1, %v1922_v19, 0  ;;  %v1957_v19 = vsel %vm1534_vm1, %v10178_v27, 0 }
 0x316   : > { %1802 = vmatpush.bf16.msrb.mxu0 %v10146_v43  ;;  %v10250_v43 = vpop.permute.xlu0 %2269 }
 0x317   : > { %2524 = vrot.lane.b32.xlu1 %v7909_v2, %s9408_s2  ;;  %2154 = vrot.lane.b32.xlu2 %v7909_v2, %s9409_s13 }
 0x318   : > { %1585 = vmatpush.bf16.xpose.msra.mxu3 %v1575_v29 }
 0x319   : > { %v10241_v23 = vpop.permute.xlu1 %1907 }
 0x31a   : > { %1803 = vmatpush.bf16.msrb.mxu0 %v7909_v2 }
 0x31e   : > { %1804 = vmatpush.bf16.msrb.mxu0 %v10148_v49  ;;  %v10261_v12 = vpop.permute.xlu0 %1901 }
 0x31f   : > { %2888 = vrot.lane.b32.xlu1 %v7897_v14, %s9410_s9  ;;  %2148 = vrot.lane.b32.xlu2 %v7897_v14, %s9409_s13 }
 0x320   : > { %1586 = vmatpush.bf16.xpose.msra.mxu3 %v1572_v35 }
 0x321   : > { %v10255_v39 = vpop.permute.xlu1 %2295 }
 0x322   : > { %1805 = vmatpush.bf16.msrb.mxu0 %v10166_v21 }
 0x326   : > { %1806 = vmatpush.bf16.msrb.mxu0 %v7897_v14  ;;  %v10280_v59 = vpop.permute.xlu0 %2287 }
 0x327   : > { %2518 = vrot.lane.b32.xlu1 %v7897_v14, %s9408_s2  ;;  %2647 = vrot.lane.b32.xlu2 %v10125_v58, %s9410_s9 }
 0x328   : > { %1587 = vmatpush.bf16.xpose.msra.mxu3 %v1569_v28  ;;  %v1960_v28 = vsel %vm1534_vm1, %v10258_v22, 0 }
 0x329   : > { %v10267_v51 = vpop.permute.xlu1 %2158 }
 0x32a   : > { %1807 = vmatpush.bf16.msrb.mxu0 %v10154_v41 }
 0x32e   : > { %v10292_v60 = vpop.permute.xlu0 %2271 }
 0x32f   : > { %2516 = vrot.lane.b32.xlu1 %v10154_v41, %s9408_s2  ;;  %2892 = vrot.lane.b32.xlu2 %v10148_v49, %s9410_s9  ;;  %v1563_v41 = vsel %vm1534_vm1, %v10026_v34, 0  ;;  %v10304_v34 = vpop.permute.xlu2 %2291 }
 0x330   : > { %1588 = vmatpush.bf16.xpose.msra.mxu3 %v1566_v9 }
 0x331   : > { %v10278_v54 = vpop.permute.xlu1 %2152 }
 0x337   : > { %2297 = vrot.lane.b32.xlu1 %v10208_v45, %s9408_s2  ;;  %2522 = vrot.lane.b32.xlu2 %v10148_v49, %s9408_s2  ;;  %v1920_v49 = vpop.permute.xlu0 %1919  ;;  %v10320_v50 = vpop.permute.xlu2 %2293 }
 0x338   : > { %1589 = vmatpush.bf16.xpose.msra.mxu3 %v1563_v41  ;;  %v1963_v35 = vsel %vm1534_vm1, %v1920_v49, 0  ;;  %v1954_v49 = vsel %vm1534_vm1, %v10221_v15, 0 }
 0x339   : > { %v10290_v55 = vpop.permute.xlu1 %2273 }
 0x33f   : > { %2651 = vrot.lane.b32.xlu1 %v10210_v10, %s9410_s9  ;;  %2520 = vrot.lane.b32.xlu2 %v10166_v21, %s9408_s2  ;;  %v10312_v21 = vpop.permute.xlu0 %2289  ;;  %v10330_v1 = vpop.permute.xlu2 %1909 }
 0x340   : > { %1590 = vmatpush.bf16.xpose.msra.mxu3 %v1560_v47 }
 0x341   : > { %v10300_v57 = vpop.permute.xlu1 %2643 }
 0x347   : > { %2160 = vrot.lane.b32.xlu1 %v10223_v5, %s9409_s13  ;;  %2667 = vrot.lane.b32.xlu2 %v10208_v45, %s9410_s9  ;;  %v10322_v37 = vpop.permute.xlu0 %1905 }
 0x348   : > { %7882 = vmatmul.msk.bf16.vlgmr.msra.gmra.mxu3 %vm1534_vm1, %v9978_v62 }
 0x349   : > { %v10310_v30 = vpop.permute.xlu1 %2150 }
 0x34f   : > { %2530 = vrot.lane.b32.xlu1 %v10223_v5, %s9408_s2  ;;  %2281 = vrot.lane.b32.xlu2 %v10210_v10, %s9408_s2  ;;  %v2664_v2 = vpop.permute.xlu0 %2663 }
 0x351   : > { %v10318_v52 = vpop.permute.xlu1 %2275 }
 0x357   : > { %2900 = vrot.lane.b32.xlu2 %v10223_v5, %s9410_s9  ;;  %v1926_v45 = vpop.permute.xlu0 %1925 }
 0x358   : > { %7883 = vmatmul.msk.bf16.gmra.mxu3 %vm1534_vm1, %v10028_v40  ;;  %v1972_v33 = vsel %vm1534_vm1, %v1926_v45, 0 }
 0x359   : > { %v10328_v62 = vpop.permute.xlu1 %2645 }
 0x35f   : > { %v2666_v27 = vpop.permute.xlu0 %2665 }
 0x360   : > { %v2712_v15 = vsel %vm1534_vm1, %v2666_v27, 0 }
 0x361   : > { %v10332_v53 = vpop.permute.xlu1 %2279  ;;  %v1928_v46 = vpop.permute.xlu2 %1927 }
 0x362   : > { %v1975_v4 = vsel %vm1534_vm1, %v1928_v46, 0 }
 0x363   : > { %1977 = vmatpush.bf16.xpose.msrb.mxu1 %v1975_v4 }
 0x368   : > { %7884 = vmatmul.msk.bf16.gmra.mxu3 %vm1534_vm1, %v10048_v61 }
 0x369   : > { %v10337_v0 = vpop.permute.xlu1 %2896  ;;  %v10339_v40 = vpop.permute.xlu2 %2641 }
 0x36b   : > { %1978 = vmatpush.bf16.xpose.msrb.mxu1 %v1972_v33 }
 0x371   : > { %v10342_v44 = vpop.permute.xlu1 %2528  ;;  %v10344_v5 = vpop.permute.xlu2 %2154 }
 0x373   : > { %1979 = vmatpush.bf16.xpose.msrb.mxu1 %v1969_v18  ;;  %v2157_v18 = vpop.permute.xlu0 %2156 }
 0x378   : > { %7885 = vmatmul.msk.bf16.gmra.mxu3 %vm1534_vm1, %v10080_v6 }
 0x379   : > { %v10350_v29 = vpop.permute.xlu1 %2894  ;;  %v10352_v61 = vpop.permute.xlu2 %2148 }
 0x37b   : > { %1980 = vmatpush.bf16.xpose.msrb.mxu1 %v1966_v11  ;;  %v2342_v11 = vsel %vm1534_vm1, %v10255_v39, 0  ;;  %v2147_v39 = vpop.permute.xlu0 %2146 }
 0x381   : > { %v10355_v38 = vpop.permute.xlu1 %2526  ;;  %v10357_v14 = vpop.permute.xlu2 %2647 }
 0x383   : > { %1981 = vmatpush.bf16.xpose.msrb.mxu1 %v1963_v35  ;;  %v2339_v35 = vsel %vm1534_vm1, %v10320_v50, 0 }
 0x388   : > { %7886 = vmatmul.msk.bf16.gmra.mxu3 %vm1534_vm1, %v10098_v17 }
 0x389   : > { %v10362_v36 = vpop.permute.xlu1 %2524  ;;  %v10364_v6 = vpop.permute.xlu2 %2892 }
 0x38b   : > { %1982 = vmatpush.bf16.xpose.msrb.mxu1 %v1960_v28  ;;  %v2706_v28 = vsel %vm1534_vm1, %v10213_v8, 0  ;;  %v2703_v8 = vsel %vm1534_vm1, %v10203_v56, 0  ;;  %v2333_v56 = vsel %vm1534_vm1, %v10312_v21, 0 }
 0x391   : > { %v10368_v9 = vpop.permute.xlu1 %2888  ;;  %v10370_v41 = vpop.permute.xlu2 %2522 }
 0x393   : > { %1983 = vmatpush.bf16.xpose.msrb.mxu1 %v1957_v19 }
 0x398   : > { %7887 = vmatmul.msk.bf16.gmra.mxu3 %vm1534_vm1, %v10125_v58 }
 0x399   : > { %v10376_v17 = vpop.permute.xlu1 %2518  ;;  %v10378_v47 = vpop.permute.xlu2 %2520 }
 0x39b   : > { %1984 = vmatpush.bf16.xpose.msrb.mxu1 %v1954_v49 }
 0x3a1   : > { %v10382_v22 = vpop.permute.xlu1 %2516  ;;  %v2668_v46 = vpop.permute.xlu2 %2667 }
 0x3a2   : > { %v2715_v4 = vsel %vm1534_vm1, %v2668_v46, 0  ;;  %7922 = vmatmul.msk.bf16.vlgmr.msrb.gmra.mxu1 %vm1534_vm1, %v10199_v16  ;;  %v2709_v16 = vsel %vm1534_vm1, %v2664_v2, 0 }
 0x3a3   : > { %2717 = vmatpush.bf16.xpose.msra.mxu1 %v2715_v4 }
 0x3a8   : > { %7888 = vmatmul.msk.bf16.gmra.mxu3 %vm1534_vm1, %v10132_v48 }
 0x3a9   : > { %v2298_v58 = vpop.permute.xlu1 %2297  ;;  %v10431_v46 = vpop.permute.xlu2 %2281 }
 0x3aa   : > { %v2345_v45 = vsel %vm1534_vm1, %v2298_v58, 0 }
 0x3ab   : > { %2347 = vmatpush.bf16.xpose.msrb.mxu3 %v2345_v45  ;;  %2718 = vmatpush.bf16.xpose.msra.mxu1 %v2712_v15 }
 0x3b1   : > { %v10391_v33 = vpop.permute.xlu1 %2651 }
 0x3b2   : > { %7923 = vmatmul.msk.bf16.gmra.mxu1 %vm1534_vm1, %v10184_v3  ;;  %v1355_v3 = vlaneseq }
 0x3b3   : > { %2348 = vmatpush.bf16.xpose.msrb.mxu3 %v2342_v11  ;;  %2719 = vmatpush.bf16.xpose.msra.mxu1 %v2709_v16 }
 0x3b4   : > { %v10407_v2 = vshrl.u32 %v1355_v3, 7  ;;  %v10409_v49 = vand.u32 127, %v1355_v3 }
 0x3b6   : > { %vm1374_vm2 = vcmp.ge.s32.totalorder %v10407_v2, %v10409_v49  ;;  %v1362_v16 = vadd.s32 48, %v10407_v2  ;;  %v1364_v3 = vadd.s32 64, %v10407_v2 }
 0x3b8   : > { %7889 = vmatmul.msk.bf16.gmra.mxu3 %vm1534_vm1, %v10210_v10  ;;  %v2336_v10 = vsel %vm1534_vm1, %v10304_v34, 0  ;;  %v9411_v34 = vmov -1e+30   ;;  %vm1380_vm8 = vcmp.ge.s32.totalorder %v1362_v16, %v10409_v49  ;;  %vm1382_vm10 = vcmp.ge.s32.totalorder %v1364_v3, %v10409_v49 }
 0x3b9   : > { %v2161_v48 = vpop.permute.xlu1 %2160  ;;  %v10422_v50 = vsel %vm1374_vm2, 0.0, %v9411_v34 }
 0x3ba   : > { %2170 = vmatpush.bf16.msrb.mxu2 %v2161_v48 }
 0x3bb   : > { %2349 = vmatpush.bf16.xpose.msrb.mxu3 %v2339_v35  ;;  %2720 = vmatpush.bf16.xpose.msra.mxu1 %v2706_v28  ;;  %v1363_v35 = vadd.s32 56, %v10407_v2 }
 0x3bd   : > { %vm1381_vm9 = vcmp.ge.s32.totalorder %v1363_v35, %v10409_v49  ;;  %v1371_v35 = vadd.s32 120, %v10407_v2 }
 0x3be   : > { %2171 = vmatpush.bf16.msrb.mxu2 %v10267_v51  ;;  %v10415_v51 = vpop.permute.xlu0 %2277 }
 0x3bf   : > { %vm1389_vm2 = vcmp.ge.s32.totalorder %v1371_v35, %v10409_v49 }
 0x3c1   : > { %v2531_v19 = vpop.permute.xlu1 %2530 }
 0x3c2   : > { %2172 = vmatpush.bf16.msrb.mxu2 %v2157_v18  ;;  %2540 = vmatpush.bf16.msra.mxu0 %v2531_v19 }
 0x3c3   : > { %2350 = vmatpush.bf16.xpose.msrb.mxu3 %v2336_v10  ;;  %7924 = vmatmul.msk.bf16.gmra.mxu1 %vm1534_vm1, %v10261_v12  ;;  %v1357_v12 = vadd.s32 8, %v10407_v2  ;;  %v10537_v10 = vsel %vm1382_vm10, 0.0, %v9411_v34 }
 0x3c4   : > { %2721 = vmatpush.bf16.xpose.msra.mxu1 %v2703_v8  ;;  %v1365_v8 = vadd.s32 72, %v10407_v2 }
 0x3c5   : > { %vm1375_vm3 = vcmp.ge.s32.totalorder %v1357_v12, %v10409_v49 }
 0x3c6   : > { %2173 = vmatpush.bf16.msrb.mxu2 %v10344_v5  ;;  %2541 = vmatpush.bf16.msra.mxu0 %v10342_v44  ;;  %v2700_v44 = vsel %vm1534_vm1, %v10270_v24, 0  ;;  %v10443_v21 = vsel %vm1375_vm3, 0.0, %v9411_v34  ;;  %v2330_v24 = vsel %vm1534_vm1, %v10280_v59, 0  ;;  %vm1383_vm11 = vcmp.ge.s32.totalorder %v1365_v8, %v10409_v49 }
 0x3c7   : > { %vm3239_vm3 = vcmask 523264  }
 0x3ca   : > { %2174 = vmatpush.bf16.msrb.mxu2 %v10278_v54  ;;  %2542 = vmatpush.bf16.msra.mxu0 %v10355_v38  ;;  %v10440_v54 = vpop.permute.xlu0 %2649 }
 0x3cb   : > { %2351 = vmatpush.bf16.xpose.msrb.mxu3 %v2333_v56  ;;  %v1592_v5 = vpop.f32.mrf.mxu3 }
 0x3cc   : > { %v10434_v4 = vadd.f32 %v1592_v5, %v10422_v50  ;;  %2722 = vmatpush.bf16.xpose.msra.mxu1 %v2700_v44  ;;  %v1366_v5 = vadd.s32 80, %v10407_v2 }
 0x3ce   : > { %2175 = vmatpush.bf16.msrb.mxu2 %v10310_v30  ;;  %2543 = vmatpush.bf16.msra.mxu0 %v10362_v36  ;;  %v1358_v30 = vadd.s32 16, %v10407_v2  ;;  %v2697_v36 = vsel %vm1534_vm1, %v10228_v32, 0  ;;  %v2327_v32 = vsel %vm1534_vm1, %v10194_v25, 0  ;;  %vm1384_vm12 = vcmp.ge.s32.totalorder %v1366_v5, %v10409_v49 }
 0x3cf   : > { %1632 = vmax.xlane.f32.xlu1 %v10434_v4 }
 0x3d0   : > { %vm1376_vm4 = vcmp.ge.s32.totalorder %v1358_v30, %v10409_v49  ;;  %v10558_v30 = vsel %vm1384_vm12, 0.0, %v9411_v34 }
 0x3d1   : > { %v10461_v59 = vsel %vm1376_vm4, 0.0, %v9411_v34  ;;  %vm3256_vm4 = vcmask 785408  }
 0x3d2   : > { %2176 = vmatpush.bf16.msrb.mxu2 %v10352_v61  ;;  %2544 = vmatpush.bf16.msra.mxu0 %v10370_v41  ;;  %v2901_v61 = vpop.permute.xlu2 %2900  ;;  %v1359_v41 = vadd.s32 24, %v10407_v2 }
 0x3d3   : > { %2352 = vmatpush.bf16.xpose.msrb.mxu3 %v2330_v24  ;;  %v1594_v38 = vpop.f32.mrf.mxu3  ;;  %7925 = vmatmul.msk.bf16.gmra.mxu1 %vm1534_vm1, %v10282_v42  ;;  %v2899_v42 = vpop.permute.xlu0 %2898 }
 0x3d4   : > { %2723 = vmatpush.bf16.xpose.msra.mxu1 %v2697_v36  ;;  %v10455_v27 = vadd.f32 %v1594_v38, %v10443_v21  ;;  %vm1377_vm5 = vcmp.ge.s32.totalorder %v1359_v41, %v10409_v49  ;;  %v1367_v38 = vadd.s32 88, %v10407_v2  ;;  %v1368_v41 = vadd.s32 96, %v10407_v2 }
 0x3d5   : > { %v10477_v25 = vsel %vm1377_vm5, 0.0, %v9411_v34 }
 0x3d6   : > { %2177 = vmatpush.bf16.msrb.mxu2 %v2147_v39  ;;  %2545 = vmatpush.bf16.msra.mxu0 %v10378_v47  ;;  %v2694_v47 = vsel %vm1534_vm1, %v10237_v63, 0  ;;  %v1360_v63 = vadd.s32 32, %v10407_v2  ;;  %vm1385_vm13 = vcmp.ge.s32.totalorder %v1367_v38, %v10409_v49  ;;  %vm1386_vm14 = vcmp.ge.s32.totalorder %v1368_v41, %v10409_v49 }
 0x3d7   : > { %1634 = vmax.xlane.f32.xlu0 %v10455_v27 }
 0x3d8   : > { %vm1378_vm6 = vcmp.ge.s32.totalorder %v1360_v63, %v10409_v49  ;;  %v1369_v63 = vadd.s32 104, %v10407_v2 }
 0x3da   : > { %2910 = vmatpush.bf16.msra.mxu2 %v2901_v61  ;;  %2546 = vmatpush.bf16.msra.mxu0 %v10376_v17  ;;  %v2324_v17 = vsel %vm1534_vm1, %v10164_v20, 0  ;;  %v10492_v20 = vsel %vm1378_vm6, 0.0, %v9411_v34  ;;  %vm1387_vm15 = vcmp.ge.s32.totalorder %v1369_v63, %v10409_v49 }
 0x3db   : > { %2353 = vmatpush.bf16.xpose.msrb.mxu3 %v2327_v32  ;;  %v1597_v58 = vpop.f32.mrf.mxu3  ;;  %v10569_v32 = vsel %vm1385_vm13, 0.0, %v9411_v34 }
 0x3dc   : > { %v10470_v45 = vadd.f32 %v1597_v58, %v10461_v59  ;;  %2724 = vmatpush.bf16.xpose.msra.mxu1 %v2694_v47 }
 0x3de   : > { %2911 = vmatpush.bf16.msra.mxu2 %v2899_v42  ;;  %2547 = vmatpush.bf16.msra.mxu0 %v10382_v22 }
 0x3df   : > { %1636 = vmax.xlane.f32.xlu1 %v10470_v45 }
 0x3e2   : > { %2912 = vmatpush.bf16.msra.mxu2 %v10337_v0  ;;  %v2891_v0 = vpop.permute.xlu0 %2890 }
 0x3e3   : > { %2354 = vmatpush.bf16.xpose.msrb.mxu3 %v2324_v17  ;;  %v1599_v15 = vpop.f32.mrf.mxu3  ;;  %7926 = vmatmul.msk.bf16.gmra.mxu1 %vm1534_vm1, %v10322_v37  ;;  %v10580_v17 = vsel %vm1386_vm14, 0.0, %v9411_v34 }
 0x3e4   : > { %v10486_v22 = vadd.f32 %v1599_v15, %v10477_v25 }
 0x3e6   : > { %2913 = vmatpush.bf16.msra.mxu2 %v10350_v29  ;;  %1638 = vmax.xlane.f32.xlu2 %v10486_v22  ;;  %v1361_v29 = vadd.s32 40, %v10407_v2 }
 0x3e8   : > { %vm1379_vm7 = vcmp.ge.s32.totalorder %v1361_v29, %v10409_v49  ;;  %v10591_v29 = vsel %vm1387_vm15, 0.0, %v9411_v34 }
 0x3ea   : > { %2914 = vmatpush.bf16.msra.mxu2 %v10364_v6  ;;  %7930 = vmatmul.msk.bf16.vlgmr.msrb.gmra.mxu3 %vm1534_vm1, %v10206_v7  ;;  %v10504_v6 = vsel %vm1379_vm7, 0.0, %v9411_v34  ;;  %v2887_v11 = vpop.permute.xlu0 %2886 }
 0x3eb   : > { %v1602_v37 = vpop.f32.mrf.mxu3 }
 0x3ec   : > { %v10498_v18 = vadd.f32 %v1602_v37, %v10492_v20  ;;  %v1370_v37 = vadd.s32 112, %v10407_v2 }
 0x3ee   : > { %2915 = vmatpush.bf16.msra.mxu2 %v2891_v0  ;;  %1640 = vmax.xlane.f32.xlu0 %v10498_v18  ;;  %vm1388_vm0 = vcmp.ge.s32.totalorder %v1370_v37, %v10409_v49 }
 0x3ef   : > { %v10602_v16 = vsel %vm1388_vm0, 0.0, %v9411_v34 }
 0x3f2   : > { %2916 = vmatpush.bf16.msra.mxu2 %v10368_v9  ;;  %v10515_v9 = vsel %vm1380_vm8, 0.0, %v9411_v34  ;;  %v1912_v44 = vpop.permute.xlu0 %1911 }
 0x3f3   : > { %v1604_v7 = vpop.f32.mrf.mxu3  ;;  %7927 = vmatmul.msk.bf16.gmra.mxu1 %vm1534_vm1, %v10241_v23  ;;  %v10526_v23 = vsel %vm1381_vm9, 0.0, %v9411_v34 }
 0x3f4   : > { %v10510_v48 = vadd.f32 %v1604_v7, %v10504_v6 }
 0x3f6   : > { %2917 = vmatpush.bf16.msra.mxu2 %v2887_v11  ;;  %1642 = vmax.xlane.f32.xlu1 %v10510_v48 }
 0x3fa   : > { %7931 = vmatmul.msk.bf16.gmra.mxu3 %vm1534_vm1, %v10250_v43 }
 0x3fb   : > { %v1607_v28 = vpop.f32.mrf.mxu3 }
 0x3fc   : > { %v10521_v39 = vadd.f32 %v1607_v28, %v10515_v9 }
 0x3fe   : > { %1644 = vmax.xlane.f32.xlu1 %v10521_v39 }
 0x403   : > { %v1609_v19 = vpop.f32.mrf.mxu3  ;;  %7928 = vmatmul.msk.bf16.gmra.mxu1 %vm1534_vm1, %v10330_v1  ;;  %v10548_v1 = vsel %vm1383_vm11, 0.0, %v9411_v34 }
 0x404   : > { %v10532_v43 = vadd.f32 %v1609_v19, %v10526_v23  ;;  %v10617_v19 = vsel %vm1389_vm2, 0.0, %v9411_v34 }
 0x406   : > { %1646 = vmax.xlane.f32.xlu2 %v10532_v43 }
 0x40a   : > { %7932 = vmatmul.msk.bf16.gmra.mxu3 %vm1534_vm1, %v10292_v60 }
 0x40b   : > { %v1612_v56 = vpop.f32.mrf.mxu3 }
 0x40c   : > { %v10543_v12 = vadd.f32 %v1612_v56, %v10537_v10 }
 0x40e   : > { %1648 = vmax.xlane.f32.xlu2 %v10543_v12 }
 0x413   : > { %v1614_v24 = vpop.f32.mrf.mxu3  ;;  %7929 = vmatmul.msk.bf16.gmra.mxu1 %vm1534_vm1, %v1912_v44 }
 0x414   : > { %v10553_v60 = vadd.f32 %v1614_v24, %v10548_v1 }
 0x416   : > { %1650 = vmax.xlane.f32.xlu0 %v10553_v60 }
 0x41a   : > { %7933 = vmatmul.msk.bf16.gmra.mxu3 %vm1534_vm1, %v10290_v55 }
 0x41b   : > { %v1617_v36 = vpop.f32.mrf.mxu3 }
 0x41c   : > { %v10564_v61 = vadd.f32 %v1617_v36, %v10558_v30 }
 0x41e   : > { %1652 = vmax.xlane.f32.xlu0 %v10564_v61 }
 0x41f   : > { %v1986_v42 = vpop.f32.mrf.mxu1 }
 0x420   : > { %v10608_v3 = vadd.f32 %v1986_v42, %v10422_v50 }
 0x423   : > { %v1619_v58 = vpop.f32.mrf.mxu3  ;;  %7938 = vmatmul.msk.bf16.vlgmr.msra.gmra.mxu1 %vm1534_vm1, %v10172_v26 }
 0x424   : > { %v10575_v55 = vadd.f32 %v1619_v58, %v10569_v32 }
 0x426   : > { %1654 = vmax.xlane.f32.xlu0 %v10575_v55 }
 0x427   : > { %v1988_v47 = vpop.f32.mrf.mxu1 }
 0x428   : > { %v10625_v5 = vadd.f32 %v1988_v47, %v10443_v21 }
 0x42a   : > { %7934 = vmatmul.msk.bf16.gmra.mxu3 %vm1534_vm1, %v10318_v52 }
 0x42b   : > { %v1622_v15 = vpop.f32.mrf.mxu3 }
 0x42c   : > { %v10586_v0 = vadd.f32 %v1622_v15, %v10580_v17 }
 0x42e   : > { %1656 = vmax.xlane.f32.xlu2 %v10586_v0 }
 0x42f   : > { %v1991_v26 = vpop.f32.mrf.mxu1 }
 0x433   : > { %v1624_v11 = vpop.f32.mrf.mxu3  ;;  %7939 = vmatmul.msk.bf16.gmra.mxu1 %vm1534_vm1, %v10246_v31 }
 0x434   : > { %v10597_v52 = vadd.f32 %v1624_v11, %v10591_v29 }
 0x436   : > { %1658 = vmax.xlane.f32.xlu0 %v10597_v52 }
 0x437   : > { %v1993_v7 = vpop.f32.mrf.mxu1 }
 0x438   : > { %v10642_v41 = vadd.f32 %v1993_v7, %v10477_v25 }
 0x43a   : > { %7935 = vmatmul.msk.bf16.gmra.mxu3 %vm1534_vm1, %v10415_v51 }
 0x43b   : > { %v1627_v28 = vpop.f32.mrf.mxu3 }
 0x43c   : > { %v10611_v31 = vadd.f32 %v1627_v28, %v10602_v16 }
 0x43e   : > { %1660 = vmax.xlane.f32.xlu2 %v10611_v31  ;;  %2026 = vmax.xlane.f32.xlu0 %v10608_v3 }
 0x440   : > { %v10620_v56 = vpop.f32.mrf.mxu1 }
 0x442   : > { %v1633_v8 = vpop.xlane.xlu1 %1632 }
 0x443   : > { %v1664_v51 = vsub.f32 %v10434_v4, %v1633_v8  ;;  %v1629_v2 = vpop.f32.mrf.mxu3  ;;  %7940 = vmatmul.msk.bf16.gmra.mxu1 %vm1534_vm1, %v10339_v40  ;;  %v10636_v40 = vadd.f32 %v1991_v26, %v10461_v59 }
 0x444   : > { %v10628_v44 = vadd.f32 %v1629_v2, %v10617_v19 }
 0x445   : > { %v1680_v24 = vmul.f32 1.442695, %v1664_v51 }
 0x446   : > { %2028 = vmax.xlane.f32.xlu2 %v10625_v5  ;;  %1662 = vmax.xlane.f32.xlu0 %v10628_v44 }
 0x447   : > { %8615 = vpow2.f32 %v1680_v24 }
 0x448   : > { %v1998_v36 = vpop.f32.mrf.mxu1 }
 0x44a   : > { %7936 = vmatmul.msk.bf16.gmra.mxu3 %vm1534_vm1, %v10332_v53  ;;  %v1635_v49 = vpop.xlane.xlu0 %1634 }
 0x44b   : > { %v1665_v34 = vsub.f32 %v10455_v27, %v1635_v49 }
 0x44d   : > { %v8616_v4 = vpop.eup %8615  ;;  %v1682_v38 = vmul.f32 1.442695, %v1665_v34 }
 0x44e   : > { %2030 = vmax.xlane.f32.xlu2 %v10636_v40  ;;  %1712 = vadd.xlane.f32.xlu0 %v8616_v4 }
 0x44f   : > { %8617 = vpow2.f32 %v1682_v38 }
 0x450   : > { %v10646_v47 = vpop.f32.mrf.mxu1 }
 0x452   : > { %v1637_v42 = vpop.xlane.xlu1 %1636 }
 0x453   : > { %7941 = vmatmul.msk.bf16.gmra.mxu1 %vm1534_vm1, %v10300_v57  ;;  %v1666_v27 = vsub.f32 %v10470_v45, %v1637_v42 }
 0x455   : > { %v8618_v53 = vpop.eup %8617  ;;  %v1684_v63 = vmul.f32 1.442695, %v1666_v27 }
 0x456   : > { %1714 = vadd.xlane.f32.xlu1 %v8618_v53  ;;  %2032 = vmax.xlane.f32.xlu0 %v10642_v41  ;;  %v1744_v58 = vpack.c.bf16 %v8618_v53, %v8616_v4 }
 0x457   : > { %8619 = vpow2.f32 %v1684_v63 }
 0x458   : > { %1808 = vmatmul.bf16.vlgmr.msrb.gmra.mxu0 %v1744_v58  ;;  %v10651_v37 = vpop.f32.mrf.mxu1 }
 0x459   : > { %v1639_v15 = vpop.xlane.xlu2 %1638 }
 0x45a   : > { %v1667_v26 = vsub.f32 %v10486_v22, %v1639_v15  ;;  %7937 = vmatmul.msk.bf16.gmra.mxu3 %vm1534_vm1, %v10431_v46 }
 0x45c   : > { %v1686_v57 = vmul.f32 1.442695, %v1667_v26 }
 0x45d   : > { %v8620_v11 = vpop.eup %8619 }
 0x45e   : > { %8621 = vpow2.f32 %v1686_v57  ;;  %v10681_v57 = vadd.f32 %v1998_v36, %v10504_v6 }
 0x460   : > { %v10657_v46 = vpop.f32.mrf.mxu1 }
 0x461   : > { %v1641_v45 = vpop.xlane.xlu0 %1640 }
 0x462   : > { %v1668_v35 = vsub.f32 %v10498_v18, %v1641_v45 }
 0x463   : > { %7942 = vmatmul.msk.bf16.gmra.mxu1 %vm1534_vm1, %v10328_v62 }
 0x464   : > { %v8622_v7 = vpop.eup %8621  ;;  %v1688_v8 = vmul.f32 1.442695, %v1668_v35 }
 0x465   : > { %v1745_v28 = vpack.c.bf16 %v8622_v7, %v8620_v11 }
 0x466   : > { %8623 = vpow2.f32 %v1688_v8 }
 0x468   : > { %1813 = vmatmul.bf16.gmra.mxu0 %v1745_v28  ;;  %v10666_v42 = vpop.f32.mrf.mxu1 }
 0x469   : > { %v1643_v22 = vpop.xlane.xlu1 %1642 }
 0x46a   : > { %v1669_v51 = vsub.f32 %v10510_v48, %v1643_v22 }
 0x46c   : > { %v1690_v2 = vmul.f32 1.442695, %v1669_v51  ;;  %v8624_v34 = vpop.eup %8623 }
 0x46d   : > { %v2356_v24 = vpop.f32.mrf.mxu3 }
 0x46e   : > { %8625 = vpow2.f32 %v1690_v2  ;;  %v10660_v49 = vadd.f32 %v2356_v24, %v10422_v50 }
 0x470   : > { %2396 = vmax.xlane.f32.xlu2 %v10660_v49  ;;  %v10683_v45 = vpop.f32.mrf.mxu1 }
 0x471   : > { %v1645_v62 = vpop.xlane.xlu1 %1644 }
 0x472   : > { %v1670_v4 = vsub.f32 %v10521_v39, %v1645_v62  ;;  %v10675_v39 = vadd.f32 %v10620_v56, %v10492_v20  ;;  %v10703_v62 = vadd.f32 %v10646_v47, %v10515_v9 }
 0x473   : > { %7943 = vmatmul.msk.bf16.gmra.mxu1 %vm1534_vm1, %v10357_v14 }
 0x474   : > { %v8626_v18 = vpop.eup %8625  ;;  %v1692_v27 = vmul.f32 1.442695, %v1670_v4  ;;  %v10707_v4 = vadd.f32 %v10651_v37, %v10526_v23 }
 0x475   : > { %v2358_v48 = vpop.f32.mrf.mxu3  ;;  %v1746_v38 = vpack.c.bf16 %v8626_v18, %v8624_v34 }
 0x476   : > { %v10669_v53 = vadd.f32 %v2358_v48, %v10443_v21  ;;  %8627 = vpow2.f32 %v1692_v27 }
 0x478   : > { %1716 = vadd.xlane.f32.xlu2 %v8620_v11  ;;  %2398 = vmax.xlane.f32.xlu0 %v10669_v53  ;;  %v10698_v2 = vpop.f32.mrf.mxu1 }
 0x479   : > { %1818 = vmatmul.bf16.gmra.mxu0 %v1746_v38  ;;  %v1647_v58 = vpop.xlane.xlu2 %1646 }
 0x47a   : > { %v1671_v63 = vsub.f32 %v10532_v43, %v1647_v58 }
 0x47c   : > { %v1694_v15 = vmul.f32 1.442695, %v1671_v63  ;;  %v8628_v11 = vpop.eup %8627 }
 0x47d   : > { %v2361_v14 = vpop.f32.mrf.mxu3 }
 0x47e   : > { %8629 = vpow2.f32 %v1694_v15  ;;  %v10678_v26 = vadd.f32 %v2361_v14, %v10461_v59  ;;  %v10730_v14 = vadd.f32 %v10657_v46, %v10537_v10 }
 0x480   : > { %2036 = vmax.xlane.f32.xlu2 %v10681_v57  ;;  %2034 = vmax.xlane.f32.xlu0 %v10675_v39  ;;  %v10713_v48 = vpop.f32.mrf.mxu1 }
 0x481   : > { %2400 = vmax.xlane.f32.xlu1 %v10678_v26  ;;  %v1649_v43 = vpop.xlane.xlu2 %1648 }
 0x482   : > { %v1672_v56 = vsub.f32 %v10543_v12, %v1649_v43 }
 0x483   : > { %7944 = vmatmul.msk.bf16.gmra.mxu1 %vm1534_vm1, %v10440_v54 }
 0x484   : > { %v10688_v35 = vpop.eup %8629  ;;  %v1696_v22 = vmul.f32 1.442695, %v1672_v56 }
 0x485   : > { %v2363_v28 = vpop.f32.mrf.mxu3  ;;  %v1747_v36 = vpack.c.bf16 %v10688_v35, %v8628_v11 }
 0x486   : > { %v10695_v8 = vadd.f32 %v2363_v28, %v10477_v25  ;;  %8631 = vpow2.f32 %v1696_v22 }
 0x488   : > { %2402 = vmax.xlane.f32.xlu2 %v10695_v8  ;;  %1718 = vadd.xlane.f32.xlu0 %v8622_v7  ;;  %v2018_v43 = vpop.f32.mrf.mxu1 }
 0x489   : > { %1720 = vadd.xlane.f32.xlu1 %v8624_v34  ;;  %1823 = vmatmul.bf16.gmra.mxu0 %v1747_v36  ;;  %v1651_v51 = vpop.xlane.xlu0 %1650 }
 0x48a   : > { %v1673_v24 = vsub.f32 %v10553_v60, %v1651_v51 }
 0x48c   : > { %v1698_v54 = vmul.f32 1.442695, %v1673_v24  ;;  %v8632_v34 = vpop.eup %8631 }
 0x48d   : > { %v2366_v12 = vpop.f32.mrf.mxu3 }
 0x48e   : > { %8633 = vpow2.f32 %v1698_v54  ;;  %v10720_v27 = vadd.f32 %v2366_v12, %v10492_v20  ;;  %v10749_v54 = vadd.f32 %v10666_v42, %v10548_v1 }
 0x490   : > { %2038 = vmax.xlane.f32.xlu2 %v10703_v62  ;;  %1722 = vadd.xlane.f32.xlu0 %v8626_v18  ;;  %v10751_v12 = vpop.f32.mrf.mxu1 }
 0x491   : > { %2040 = vmax.xlane.f32.xlu1 %v10707_v4  ;;  %v1653_v7 = vpop.xlane.xlu0 %1652 }
 0x492   : > { %v1674_v47 = vsub.f32 %v10564_v61, %v1653_v7 }
 0x493   : > { %7945 = vmatmul.msk.bf16.gmra.mxu1 %vm1534_vm1, %v10391_v33 }
 0x494   : > { %v10711_v60 = vpop.eup %8633  ;;  %v1700_v58 = vmul.f32 1.442695, %v1674_v47 }
 0x495   : > { %v2368_v38 = vpop.f32.mrf.mxu3  ;;  %v1748_v37 = vpack.c.bf16 %v10711_v60, %v8632_v34 }
 0x496   : > { %v10723_v18 = vadd.f32 %v2368_v38, %v10504_v6  ;;  %8635 = vpow2.f32 %v1700_v58 }
 0x498   : > { %2404 = vmax.xlane.f32.xlu2 %v10720_v27  ;;  %2406 = vmax.xlane.f32.xlu0 %v10723_v18 }
 0x499   : > { %1828 = vmatmul.bf16.gmra.mxu0 %v1748_v37  ;;  %v1655_v63 = vpop.xlane.xlu0 %1654 }
 0x49a   : > { %v1675_v33 = vsub.f32 %v10575_v55, %v1655_v63 }
 0x49c   : > { %v1702_v15 = vmul.f32 1.442695, %v1675_v33  ;;  %v10737_v36 = vpop.eup %8635 }
 0x49d   : > { %v2371_v61 = vpop.f32.mrf.mxu3 }
 0x49e   : > { %8637 = vpow2.f32 %v1702_v15  ;;  %v10733_v56 = vadd.f32 %v2371_v61, %v10515_v9 }
 0x4a0   : > { %2042 = vmax.xlane.f32.xlu2 %v10730_v14  ;;  %2408 = vmax.xlane.f32.xlu0 %v10733_v56 }
 0x4a1   : > { %v1657_v28 = vpop.xlane.xlu2 %1656 }
 0x4a2   : > { %v1676_v22 = vsub.f32 %v10586_v0, %v1657_v28 }
 0x4a4   : > { %v10739_v55 = vpop.eup %8637  ;;  %v1704_v7 = vmul.f32 1.442695, %v1676_v22 }
 0x4a5   : > { %15448 = vst [vmem:[#allocation26_spill] sm:$0xff] %v10739_v55  ;;  %v2373_v51 = vpop.f32.mrf.mxu3  ;;  %v1749_v46 = vpack.c.bf16 %v10739_v55, %v10737_v36 }
 0x4a6   : > { %v10745_v24 = vadd.f32 %v2373_v51, %v10526_v23  ;;  %8639 = vpow2.f32 %v1704_v7  ;;  %v10778_v51 = vadd.f32 %v10698_v2, %v10569_v32 }
 0x4a8   : > { %1724 = vadd.xlane.f32.xlu2 %v8628_v11  ;;  %2044 = vmax.xlane.f32.xlu0 %v10749_v54  ;;  %v2023_v11 = vpop.f32.mrf.mxu1 }
 0x4a9   : > { %2410 = vmax.xlane.f32.xlu1 %v10745_v24  ;;  %1833 = vmatmul.bf16.gmra.mxu0 %v1749_v46  ;;  %v1659_v0 = vpop.xlane.xlu0 %1658 }
 0x4aa   : > { %v1677_v47 = vsub.f32 %v10597_v52, %v1659_v0 }
 0x4ac   : > { %v1706_v38 = vmul.f32 1.442695, %v1677_v47  ;;  %v10761_v33 = vpop.eup %8639 }
 0x4ad   : > { %v2376_v37 = vpop.f32.mrf.mxu3  ;;  %15449 = vst [vmem:[#allocation27_spill] sm:$0xff] %v10761_v33 }
 0x4ae   : > { %8641 = vpow2.f32 %v1706_v38  ;;  %v10757_v58 = vadd.f32 %v2376_v37, %v10537_v10 }
 0x4b0   : > { %1728 = vadd.xlane.f32.xlu2 %v8632_v34  ;;  %1726 = vadd.xlane.f32.xlu0 %v10688_v35  ;;  %v10771_v35 = vadd.f32 %v10683_v45, %v10558_v30  ;;  %v2726_v47 = vpop.f32.mrf.mxu1 }
 0x4b1   : > { %2412 = vmax.xlane.f32.xlu1 %v10757_v58  ;;  %v1661_v42 = vpop.xlane.xlu2 %1660  ;;  %v2027_v63 = vpop.xlane.xlu0 %2026 }
 0x4b2   : > { %v1678_v52 = vsub.f32 %v10611_v31, %v1661_v42  ;;  %v2058_v61 = vsub.f32 %v10608_v3, %v2027_v63  ;;  %v10787_v42 = vadd.f32 %v10713_v48, %v10580_v17  ;;  %v10790_v63 = vadd.f32 %v2018_v43, %v10591_v29 }
 0x4b4   : > { %v10763_v15 = vpop.eup %8641  ;;  %v1708_v46 = vmul.f32 1.442695, %v1678_v52  ;;  %v2074_v3 = vmul.f32 1.442695, %v2058_v61 }
 0x4b5   : > { %15450 = vst [vmem:[#allocation28_spill] sm:$0xff] %v10763_v15  ;;  %v2378_v28 = vpop.f32.mrf.mxu3  ;;  %v1750_v22 = vpack.c.bf16 %v10763_v15, %v10761_v33 }
 0x4b6   : > { %v10774_v34 = vadd.f32 %v2378_v28, %v10548_v1  ;;  %8643 = vpow2.f32 %v1708_v46 }
 0x4b7   : > { %8645 = vpow2.f32 %v2074_v3 }
 0x4b8   : > { %2414 = vmax.xlane.f32.xlu2 %v10774_v34  ;;  %2046 = vmax.xlane.f32.xlu0 %v10771_v35  ;;  %v2728_v46 = vpop.f32.mrf.mxu1 }
 0x4b9   : > { %2048 = vmax.xlane.f32.xlu1 %v10778_v51  ;;  %1838 = vmatmul.bf16.gmra.mxu0 %v1750_v22  ;;  %v2029_v31 = vpop.xlane.xlu2 %2028  ;;  %v1663_v7 = vpop.xlane.xlu0 %1662 }
 0x4ba   : > { %v2059_v45 = vsub.f32 %v10625_v5, %v2029_v31  ;;  %v1679_v0 = vsub.f32 %v10628_v44, %v1663_v7 }
 0x4bc   : > { %v2076_v38 = vmul.f32 1.442695, %v2059_v45  ;;  %v1710_v2 = vmul.f32 1.442695, %v1679_v0  ;;  %v10795_v5 = vpop.eup %8643 }
 0x4bd   : > { %v2381_v37 = vpop.f32.mrf.mxu3  ;;  %15451 = vst [vmem:[#allocation29_spill] sm:$0xff] %v10795_v5  ;;  %v8646_v52 = vpop.eup %8645 }
 0x4be   : > { %8647 = vpow2.f32 %v2076_v38  ;;  %v10802_v3 = vadd.f32 %v2381_v37, %v10558_v30  ;;  %v10816_v37 = vadd.f32 %v10751_v12, %v10602_v16 }
 0x4bf   : > { %8649 = vpow2.f32 %v1710_v2 }
 0x4c0   : > { %2050 = vmax.xlane.f32.xlu2 %v10787_v42  ;;  %2052 = vmax.xlane.f32.xlu0 %v10790_v63 }
 0x4c1   : > { %1730 = vadd.xlane.f32.xlu1 %v10711_v60  ;;  %v10797_v44 = vpop.xlane.xlu0 %1712  ;;  %v2031_v61 = vpop.xlane.xlu2 %2030 }
 0x4c2   : > { %v2060_v31 = vsub.f32 %v10636_v40, %v2031_v61  ;;  %v10819_v61 = vadd.f32 %v2023_v11, %v10617_v19 }
 0x4c4   : > { %v8648_v28 = vpop.eup %8647  ;;  %v2078_v7 = vmul.f32 1.442695, %v2060_v31 }
 0x4c5   : > { %v10799_v48 = vpop.eup %8649  ;;  %v2383_v22 = vpop.f32.mrf.mxu3  ;;  %v2138_v43 = vpack.c.bf16 %v8648_v28, %v8646_v52 }
 0x4c6   : > { %15452 = vst [vmem:[#allocation30_spill] sm:$0xff] %v10799_v48  ;;  %v10806_v45 = vadd.f32 %v2383_v22, %v10569_v32  ;;  %v1751_v60 = vpack.c.bf16 %v10799_v48, %v10795_v5  ;;  %8651 = vpow2.f32 %v2078_v7  ;;  %v2731_v22 = vpop.f32.mrf.mxu1  ;;  %v10842_v5 = vadd.f32 %v2726_v47, %v10422_v50 }
 0x4c7   : > { %2178 = vmatmul.bf16.vlgmr.msrb.gmra.mxu2 %v2138_v43  ;;  %v10858_v47 = vadd.f32 %v2731_v22, %v10461_v59 }
 0x4c8   : > { %2418 = vmax.xlane.f32.xlu0 %v10806_v45  ;;  %2416 = vmax.xlane.f32.xlu2 %v10802_v3 }
 0x4c9   : > { %1732 = vadd.xlane.f32.xlu1 %v10737_v36  ;;  %1843 = vmatmul.bf16.gmra.mxu0 %v1751_v60  ;;  %v2033_v0 = vpop.xlane.xlu0 %2032  ;;  %v10854_v55 = vpop.xlane.xlu1 %1714 }
 0x4ca   : > { %v2061_v38 = vsub.f32 %v10642_v41, %v2033_v0 }
 0x4cc   : > { %v2080_v2 = vmul.f32 1.442695, %v2061_v38  ;;  %v8652_v36 = vpop.eup %8651 }
 0x4cd   : > { %v2386_v40 = vpop.f32.mrf.mxu3 }
 0x4ce   : > { %8653 = vpow2.f32 %v2080_v2  ;;  %v10824_v41 = vadd.f32 %v2386_v40, %v10580_v17  ;;  %v2733_v11 = vpop.f32.mrf.mxu1 }
 0x4d0   : > { %2054 = vmax.xlane.f32.xlu0 %v10816_v37 }
 0x4d1   : > { %2056 = vmax.xlane.f32.xlu1 %v10819_v61 }
 0x4d4   : > { %v8654_v43 = vpop.eup %8653 }
 0x4d5   : > { %v2388_v31 = vpop.f32.mrf.mxu3  ;;  %v10826_v60 = vpop.f32.mrf.mxu0  ;;  %v2139_v7 = vpack.c.bf16 %v8654_v43, %v8652_v36 }
 0x4d6   : > { %15453 = vst [vmem:[#allocation31_spill] sm:$0xff] %v10826_v60  ;;  %v10829_v12 = vadd.f32 %v2388_v31, %v10591_v29  ;;  %v10839_v13 = vpop.f32.mrf.mxu1 }
 0x4d7   : > { %2183 = vmatmul.bf16.gmra.mxu2 %v2139_v7 }
 0x4d8   : > { %2420 = vmax.xlane.f32.xlu0 %v10824_v41 }
 0x4d9   : > { %2422 = vmax.xlane.f32.xlu1 %v10829_v12 }
 0x4dd   : > { %v2391_v0 = vpop.f32.mrf.mxu3  ;;  %v10836_v2 = vpop.f32.mrf.mxu0 }
 0x4de   : > { %v10834_v38 = vadd.f32 %v2391_v0, %v10602_v16 }
 0x4e0   : > { %2106 = vadd.xlane.f32.xlu0 %v8646_v52 }
 0x4e1   : > { %2424 = vmax.xlane.f32.xlu1 %v10834_v38 }
 0x4e3   : > { %v2397_v40 = vpop.xlane.xlu2 %2396 }
 0x4e4   : > { %v2428_v15 = vsub.f32 %v10660_v49, %v2397_v40  ;;  %v10861_v40 = vadd.f32 %v2728_v46, %v10443_v21 }
 0x4e5   : > { %v2393_v31 = vpop.f32.mrf.mxu3  ;;  %v10850_v52 = vpop.f32.mrf.mxu0 }
 0x4e6   : > { %v10845_v7 = vadd.f32 %v2393_v31, %v10617_v19  ;;  %15454 = vst [vmem:[#allocation32_spill] sm:$0xff] %v10850_v52  ;;  %v2444_v0 = vmul.f32 1.442695, %v2428_v15  ;;  %v2738_v31 = vpop.f32.mrf.mxu1 }
 0x4e8   : > { %2426 = vmax.xlane.f32.xlu2 %v10845_v7  ;;  %2766 = vmax.xlane.f32.xlu0 %v10842_v5  ;;  %8655 = vpow2.f32 %v2444_v0  ;;  %v10871_v0 = vadd.f32 %v2733_v11, %v10477_v25 }
 0x4e9   : > { %2108 = vadd.xlane.f32.xlu1 %v8648_v28 }
 0x4eb   : > { %v10852_v48 = vpop.xlane.xlu2 %1716  ;;  %v2399_v33 = vpop.xlane.xlu0 %2398 }
 0x4ec   : > { %15455 = vst [vmem:[#allocation33_spill] sm:$0xff] %v10852_v48  ;;  %v2429_v50 = vsub.f32 %v10669_v53, %v2399_v33 }
 0x4ed   : > { %v10865_v52 = vpop.f32.mrf.mxu0 }
 0x4ee   : > { %v2446_v49 = vmul.f32 1.442695, %v2429_v50  ;;  %v8656_v22 = vpop.eup %8655  ;;  %v2741_v60 = vpop.f32.mrf.mxu1 }
 0x4f0   : > { %8657 = vpow2.f32 %v2446_v49  ;;  %2770 = vmax.xlane.f32.xlu2 %v10858_v47  ;;  %2110 = vadd.xlane.f32.xlu0 %v8652_v36 }
 0x4f1   : > { %2768 = vmax.xlane.f32.xlu1 %v10861_v40 }
 0x4f3   : > { %v2037_v15 = vpop.xlane.xlu2 %2036  ;;  %v2035_v28 = vpop.xlane.xlu0 %2034 }
 0x4f4   : > { %v2063_v53 = vsub.f32 %v10681_v57, %v2037_v15  ;;  %v2401_v59 = vpop.xlane.xlu1 %2400  ;;  %v2062_v33 = vsub.f32 %v10675_v39, %v2035_v28 }
 0x4f5   : > { %v2430_v21 = vsub.f32 %v10678_v26, %v2401_v59 }
 0x4f6   : > { %v8658_v46 = vpop.eup %8657  ;;  %v2084_v50 = vmul.f32 1.442695, %v2063_v53  ;;  %v2082_v36 = vmul.f32 1.442695, %v2062_v33  ;;  %v10879_v15 = vpop.f32.mrf.mxu0 }
 0x4f7   : > { %v2508_v49 = vpack.c.bf16 %v8658_v46, %v8656_v22  ;;  %v2448_v48 = vmul.f32 1.442695, %v2430_v21 }
 0x4f8   : > { %8659 = vpow2.f32 %v2084_v50  ;;  %2476 = vadd.xlane.f32.xlu2 %v8656_v22  ;;  %2772 = vmax.xlane.f32.xlu0 %v10871_v0 }
 0x4f9   : > { %8661 = vpow2.f32 %v2448_v48  ;;  %2112 = vadd.xlane.f32.xlu1 %v8654_v43  ;;  %2548 = vmatmul.bf16.vlgmr.msra.gmra.mxu0 %v2508_v49  ;;  %v2743_v43 = vpop.f32.mrf.mxu1 }
 0x4fa   : > { %8663 = vpow2.f32 %v2082_v36 }
 0x4fb   : > { %v2403_v39 = vpop.xlane.xlu2 %2402  ;;  %v10874_v57 = vpop.xlane.xlu0 %1718 }
 0x4fc   : > { %v2431_v26 = vsub.f32 %v10695_v8, %v2403_v39  ;;  %v10877_v25 = vpop.xlane.xlu1 %1720  ;;  %v10886_v39 = vadd.f32 %v2738_v31, %v10504_v6  ;;  %v10895_v6 = vadd.f32 %v10839_v13, %v10492_v20 }
 0x4fe   : > { %v8660_v11 = vpop.eup %8659  ;;  %v2450_v28 = vmul.f32 1.442695, %v2431_v26 }
 0x4ff   : > { %v8662_v53 = vpop.eup %8661 }
 0x500   : > { %v8664_v59 = vpop.eup %8663  ;;  %8665 = vpow2.f32 %v2450_v28  ;;  %2480 = vadd.xlane.f32.xlu2 %v8662_v53  ;;  %2478 = vadd.xlane.f32.xlu0 %v8658_v46  ;;  %v10888_v46 = vpop.f32.mrf.mxu0 }
 0x501   : > { %2116 = vadd.xlane.f32.xlu1 %v8660_v11  ;;  %v2140_v48 = vpack.c.bf16 %v8660_v11, %v8664_v59 }
 0x503   : > { %2188 = vmatmul.bf16.gmra.mxu2 %v2140_v48  ;;  %v2039_v33 = vpop.xlane.xlu2 %2038  ;;  %v10881_v22 = vpop.xlane.xlu0 %1722 }
 0x504   : > { %v2064_v8 = vsub.f32 %v10703_v62, %v2039_v33  ;;  %v2041_v21 = vpop.xlane.xlu1 %2040  ;;  %v2746_v48 = vpop.f32.mrf.mxu1 }
 0x505   : > { %v2065_v50 = vsub.f32 %v10707_v4, %v2041_v21 }
 0x506   : > { %v8666_v36 = vpop.eup %8665  ;;  %v2086_v49 = vmul.f32 1.442695, %v2064_v8 }
 0x507   : > { %v2088_v26 = vmul.f32 1.442695, %v2065_v50  ;;  %v2509_v28 = vpack.c.bf16 %v8666_v36, %v8662_v53 }
 0x508   : > { %8667 = vpow2.f32 %v2086_v49  ;;  %2114 = vadd.xlane.f32.xlu0 %v8664_v59  ;;  %v10898_v59 = vadd.f32 %v2741_v60, %v10515_v9 }
 0x509   : > { %8669 = vpow2.f32 %v2088_v26  ;;  %2776 = vmax.xlane.f32.xlu1 %v10886_v39  ;;  %2553 = vmatmul.bf16.gmra.mxu0 %v2509_v28 }
 0x50b   : > { %v2405_v11 = vpop.xlane.xlu2 %2404  ;;  %v2407_v62 = vpop.xlane.xlu0 %2406 }
 0x50c   : > { %v2432_v4 = vsub.f32 %v10720_v27, %v2405_v11  ;;  %v2433_v33 = vsub.f32 %v10723_v18, %v2407_v62  ;;  %v1824_v27 = vpop.f32.mrf.mxu0  ;;  %v10903_v26 = vpop.f32.mrf.mxu1 }
 0x50e   : > { %v8668_v8 = vpop.eup %8667  ;;  %v2452_v31 = vmul.f32 1.442695, %v2432_v4  ;;  %v2454_v53 = vmul.f32 1.442695, %v2433_v33 }
 0x50f   : > { %v8670_v21 = vpop.eup %8669  ;;  %2118 = vadd.xlane.f32.xlu2 %v8668_v8 }
 0x510   : > { %8671 = vpow2.f32 %v2452_v31  ;;  %2774 = vmax.xlane.f32.xlu0 %v10895_v6  ;;  %v2141_v50 = vpack.c.bf16 %v8670_v21, %v8668_v8 }
 0x511   : > { %8673 = vpow2.f32 %v2454_v53  ;;  %2778 = vmax.xlane.f32.xlu1 %v10898_v59  ;;  %v10910_v53 = vadd.f32 %v2743_v43, %v10526_v23 }
 0x513   : > { %2193 = vmatmul.bf16.gmra.mxu2 %v2141_v50  ;;  %v2043_v18 = vpop.xlane.xlu2 %2042  ;;  %v2409_v49 = vpop.xlane.xlu0 %2408 }
 0x514   : > { %v2066_v13 = vsub.f32 %v10730_v14, %v2043_v18  ;;  %v2434_v60 = vsub.f32 %v10733_v56, %v2409_v49  ;;  %v10906_v8 = vpop.f32.mrf.mxu0  ;;  %v10914_v49 = vpop.f32.mrf.mxu1 }
 0x516   : > { %v8672_v20 = vpop.eup %8671  ;;  %v2090_v28 = vmul.f32 1.442695, %v2066_v13  ;;  %v2456_v62 = vmul.f32 1.442695, %v2434_v60 }
 0x517   : > { %v8674_v9 = vpop.eup %8673  ;;  %2484 = vadd.xlane.f32.xlu2 %v8672_v20 }
 0x518   : > { %8675 = vpow2.f32 %v2090_v28  ;;  %2482 = vadd.xlane.f32.xlu0 %v8666_v36  ;;  %v2510_v11 = vpack.c.bf16 %v8674_v9, %v8672_v20  ;;  %v10921_v28 = vadd.f32 %v2746_v48, %v10537_v10 }
 0x51a   : > { %2558 = vmatmul.bf16.gmra.mxu0 %v2510_v11 }
 0x51b   : > { %v1725_v4 = vpop.xlane.xlu2 %1724  ;;  %v2045_v33 = vpop.xlane.xlu0 %2044 }
 0x51c   : > { %8677 = vrcp.f32 %v1725_v4  ;;  %v2411_v31 = vpop.xlane.xlu1 %2410  ;;  %v2067_v14 = vsub.f32 %v10749_v54, %v2045_v33  ;;  %v1829_v11 = vpop.f32.mrf.mxu0 }
 0x51d   : > { %v2435_v50 = vsub.f32 %v10745_v24, %v2411_v31  ;;  %8679 = vpow2.f32 %v2456_v62  ;;  %v2753_v31 = vpop.f32.mrf.mxu1 }
 0x51e   : > { %v8676_v56 = vpop.eup %8675  ;;  %v2092_v18 = vmul.f32 1.442695, %v2067_v14 }
 0x51f   : > { %v2458_v36 = vmul.f32 1.442695, %v2435_v50  ;;  %2780 = vmax.xlane.f32.xlu2 %v10910_v53  ;;  %2122 = vadd.xlane.f32.xlu1 %v8676_v56 }
 0x520   : > { %8681 = vpow2.f32 %v2092_v18  ;;  %2120 = vadd.xlane.f32.xlu0 %v8670_v21 }
 0x521   : > { %8683 = vpow2.f32 %v2458_v36 }
 0x522   : > { %v8678_v13 = vpop.eup %8677 }
 0x523   : > { %v10916_v20 = vmul.f32 %v8678_v13, %v1824_v27  ;;  %v1729_v54 = vpop.xlane.xlu2 %1728  ;;  %v10918_v23 = vpop.xlane.xlu0 %1726 }
 0x524   : > { %8685 = vrcp.f32 %v1729_v54  ;;  %v2413_v24 = vpop.xlane.xlu1 %2412  ;;  %v8680_v43 = vpop.eup %8679 }
 0x525   : > { %v2436_v4 = vsub.f32 %v10757_v58, %v2413_v24  ;;  %v10928_v58 = vadd.f32 %v2753_v31, %v10569_v32 }
 0x526   : > { %v8682_v60 = vpop.eup %8681 }
 0x527   : > { %v8684_v62 = vpop.eup %8683  ;;  %2782 = vmax.xlane.f32.xlu2 %v10921_v28  ;;  %2488 = vadd.xlane.f32.xlu1 %v8680_v43  ;;  %v2142_v21 = vpack.c.bf16 %v8682_v60, %v8676_v56  ;;  %v2460_v50 = vmul.f32 1.442695, %v2436_v4 }
 0x528   : > { %2486 = vadd.xlane.f32.xlu0 %v8674_v9  ;;  %v2511_v27 = vpack.c.bf16 %v8684_v62, %v8680_v43  ;;  %v1831_v43 = vpop.f32.mrf.mxu0 }
 0x529   : > { %2198 = vmatmul.bf16.gmra.mxu2 %v2142_v21  ;;  %8687 = vpow2.f32 %v2460_v50  ;;  %v10935_v21 = vadd.f32 %v10903_v26, %v10548_v1 }
 0x52a   : > { %v8686_v33 = vpop.eup %8685  ;;  %2563 = vmatmul.bf16.gmra.mxu0 %v2511_v27 }
 0x52b   : > { %v1873_v14 = vmul.f32 %v8686_v33, %v1829_v11  ;;  %v2415_v18 = vpop.xlane.xlu2 %2414  ;;  %v2047_v10 = vpop.xlane.xlu0 %2046 }
 0x52c   : > { %v2437_v48 = vsub.f32 %v10774_v34, %v2415_v18  ;;  %v2049_v36 = vpop.xlane.xlu1 %2048  ;;  %v2068_v13 = vsub.f32 %v10771_v35, %v2047_v10 }
 0x52d   : > { %v2069_v56 = vsub.f32 %v10778_v51, %v2049_v36  ;;  %v1889_v26 = vpack.c.bf16 %v1873_v14, %v1873_v14 }
 0x52e   : > { %v2462_v9 = vmul.f32 1.442695, %v2437_v48  ;;  %v2094_v54 = vmul.f32 1.442695, %v2068_v13 }
 0x52f   : > { %v2096_v24 = vmul.f32 1.442695, %v2069_v56  ;;  %2490 = vadd.xlane.f32.xlu2 %v8684_v62  ;;  %2788 = vmax.xlane.f32.xlu1 %v10928_v58  ;;  %v8688_v4 = vpop.eup %8687  ;;  %v10946_v14 = vunpack.c.l.b16 %v1889_v26 }
 0x530   : > { %8689 = vpow2.f32 %v2462_v9  ;;  %2124 = vadd.xlane.f32.xlu0 %v8682_v60  ;;  %v1834_v50 = vpop.f32.mrf.mxu0  ;;  %v2756_v9 = vpop.f32.mrf.mxu1 }
 0x531   : > { %8691 = vpow2.f32 %v2096_v24  ;;  %v10943_v24 = vadd.f32 %v10914_v49, %v10558_v30 }
 0x532   : > { %8693 = vpow2.f32 %v2094_v54 }
 0x533   : > { %v2051_v34 = vpop.xlane.xlu2 %2050  ;;  %v2053_v11 = vpop.xlane.xlu0 %2052 }
 0x534   : > { %v2070_v35 = vsub.f32 %v10787_v42, %v2051_v34  ;;  %v1731_v32 = vpop.xlane.xlu1 %1730  ;;  %v2071_v33 = vsub.f32 %v10790_v63, %v2053_v11 }
 0x535   : > { %8695 = vrcp.f32 %v1731_v32 }
 0x536   : > { %v8690_v51 = vpop.eup %8689  ;;  %v2098_v62 = vmul.f32 1.442695, %v2070_v35  ;;  %v2100_v10 = vmul.f32 1.442695, %v2071_v33  ;;  %v10956_v33 = vadd.f32 %v2756_v9, %v10580_v17 }
 0x537   : > { %v8692_v27 = vpop.eup %8691  ;;  %2494 = vadd.xlane.f32.xlu1 %v8690_v51  ;;  %v2512_v60 = vpack.c.bf16 %v8690_v51, %v8688_v4 }
 0x538   : > { %v8694_v31 = vpop.eup %8693  ;;  %8697 = vpow2.f32 %v2098_v62  ;;  %2784 = vmax.xlane.f32.xlu0 %v10935_v21 }
 0x539   : > { %2126 = vadd.xlane.f32.xlu2 %v8694_v31  ;;  %v2143_v42 = vpack.c.bf16 %v8692_v27, %v8694_v31 }
 0x53a   : > { %2568 = vmatmul.bf16.gmra.mxu0 %v2512_v60  ;;  %v10958_v60 = vpop.f32.mrf.mxu0 }
 0x53b   : > { %v8696_v18 = vpop.eup %8695  ;;  %2203 = vmatmul.bf16.gmra.mxu2 %v2143_v42  ;;  %v2417_v48 = vpop.xlane.xlu2 %2416 }
 0x53c   : > { %v2419_v1 = vpop.xlane.xlu0 %2418  ;;  %v1874_v36 = vmul.f32 %v8696_v18, %v1831_v43  ;;  %v2438_v13 = vsub.f32 %v10802_v3, %v2417_v48  ;;  %v1733_v63 = vpop.xlane.xlu1 %1732 }
 0x53d   : > { %v2439_v56 = vsub.f32 %v10806_v45, %v2419_v1  ;;  %8699 = vrcp.f32 %v1733_v63 }
 0x53e   : > { %v8698_v54 = vpop.eup %8697  ;;  %v1890_v34 = vpack.c.bf16 %v1874_v36, %v1874_v36  ;;  %v2464_v11 = vmul.f32 1.442695, %v2438_v13  ;;  %8701 = vpow2.f32 %v2100_v10 }
 0x53f   : > { %v2466_v35 = vmul.f32 1.442695, %v2439_v56  ;;  %2130 = vadd.xlane.f32.xlu1 %v8698_v54 }
 0x540   : > { %8703 = vpow2.f32 %v2464_v11  ;;  %2786 = vmax.xlane.f32.xlu0 %v10943_v24  ;;  %v10948_v3 = vunpack.c.l.b16 %v1890_v34 }
 0x541   : > { %8705 = vpow2.f32 %v2466_v35  ;;  %2492 = vadd.xlane.f32.xlu2 %v8688_v4  ;;  %v2758_v4 = vpop.f32.mrf.mxu1 }
 0x542   : > { %v10967_v56 = vpop.f32.mrf.mxu0 }
 0x543   : > { %v8700_v43 = vpop.eup %8699 }
 0x544   : > { %v2055_v30 = vpop.xlane.xlu0 %2054  ;;  %v10952_v49 = vmul.f32 %v8700_v43, %v1834_v50  ;;  %v2057_v32 = vpop.xlane.xlu1 %2056 }
 0x545   : > { %v2072_v51 = vsub.f32 %v10816_v37, %v2055_v30  ;;  %v8702_v62 = vpop.eup %8701  ;;  %v2073_v10 = vsub.f32 %v10819_v61, %v2057_v32  ;;  %v10965_v61 = vadd.f32 %v2758_v4, %v10591_v29 }
 0x546   : > { %v8704_v31 = vpop.eup %8703  ;;  %v2144_v48 = vpack.c.bf16 %v8702_v62, %v8698_v54 }
 0x547   : > { %v2102_v42 = vmul.f32 1.442695, %v2072_v51  ;;  %v8706_v18 = vpop.eup %8705  ;;  %2790 = vmax.xlane.f32.xlu1 %v10956_v33  ;;  %v2104_v37 = vmul.f32 1.442695, %v2073_v10 }
 0x548   : > { %2128 = vadd.xlane.f32.xlu0 %v8692_v27  ;;  %v2513_v50 = vpack.c.bf16 %v8706_v18, %v8704_v31 }
 0x549   : > { %8707 = vpow2.f32 %v2102_v42  ;;  %2132 = vadd.xlane.f32.xlu2 %v8702_v62  ;;  %v2761_v9 = vpop.f32.mrf.mxu1 }
 0x54a   : > { %2573 = vmatmul.bf16.gmra.mxu0 %v2513_v50  ;;  %8709 = vpow2.f32 %v2104_v37  ;;  %v10973_v43 = vpop.f32.mrf.mxu0 }
 0x54b   : > { %2208 = vmatmul.bf16.gmra.mxu2 %v2144_v48  ;;  %v10981_v48 = vadd.f32 %v2761_v9, %v10602_v16 }
 0x54c   : > { %v2421_v17 = vpop.xlane.xlu0 %2420  ;;  %v2423_v1 = vpop.xlane.xlu1 %2422 }
 0x54d   : > { %v2440_v26 = vsub.f32 %v10824_v41, %v2421_v17  ;;  %v2441_v36 = vsub.f32 %v10829_v12, %v2423_v1 }
 0x54f   : > { %v8708_v13 = vpop.eup %8707  ;;  %v2468_v63 = vmul.f32 1.442695, %v2440_v26  ;;  %v2470_v27 = vmul.f32 1.442695, %v2441_v36  ;;  %2496 = vadd.xlane.f32.xlu1 %v8704_v31 }
 0x550   : > { %2134 = vadd.xlane.f32.xlu0 %v8708_v13  ;;  %v8710_v12 = vpop.eup %8709 }
 0x551   : > { %8711 = vpow2.f32 %v2468_v63  ;;  %2792 = vmax.xlane.f32.xlu2 %v10965_v61  ;;  %v2145_v30 = vpack.c.bf16 %v8710_v12, %v8708_v13  ;;  %v2763_v32 = vpop.f32.mrf.mxu1 }
 0x552   : > { %8713 = vpow2.f32 %v2470_v27  ;;  %v10978_v50 = vadd.f32 %v2763_v32, %v10617_v19 }
 0x554   : > { %v10970_v54 = vpop.xlane.xlu0 %2106  ;;  %v2425_v41 = vpop.xlane.xlu1 %2424 }
 0x555   : > { %v2442_v29 = vsub.f32 %v10834_v38, %v2425_v41 }
 0x557   : > { %v8712_v34 = vpop.eup %8711  ;;  %v2472_v51 = vmul.f32 1.442695, %v2442_v29 }
 0x558   : > { %v8714_v11 = vpop.eup %8713  ;;  %2500 = vadd.xlane.f32.xlu0 %v8712_v34 }
 0x559   : > { %v2514_v35 = vpack.c.bf16 %v8714_v11, %v8712_v34  ;;  %2498 = vadd.xlane.f32.xlu2 %v8706_v18  ;;  %v10983_v18 = vpop.f32.mrf.mxu2  ;;  %8715 = vpow2.f32 %v2472_v51 }
 0x55b   : > { %2578 = vmatmul.bf16.gmra.mxu0 %v2514_v35  ;;  %2213 = vmatmul.bf16.gmra.mxu2 %v2145_v30  ;;  %v2427_v62 = vpop.xlane.xlu2 %2426 }
 0x55c   : > { %v2443_v31 = vsub.f32 %v10845_v7, %v2427_v62  ;;  %v2109_v42 = vpop.xlane.xlu1 %2108  ;;  %v2767_v4 = vpop.xlane.xlu0 %2766 }
 0x55d   : > { %v2798_v10 = vsub.f32 %v10842_v5, %v2767_v4  ;;  %v10987_v7 = vpop.f32.mrf.mxu0 }
 0x55e   : > { %v2474_v38 = vmul.f32 1.442695, %v2443_v31  ;;  %15456 = vst [vmem:[#allocation34_spill] sm:$0xff] %v10987_v7 }
 0x55f   : > { %v2814_v37 = vmul.f32 1.442695, %v2798_v10  ;;  %v8716_v19 = vpop.eup %8715 }
 0x560   : > { %8717 = vpow2.f32 %v2474_v38  ;;  %2796 = vmax.xlane.f32.xlu0 %v10978_v50 }
 0x561   : > { %8719 = vpow2.f32 %v2814_v37  ;;  %2794 = vmax.xlane.f32.xlu2 %v10981_v48  ;;  %v2181_v27 = vpop.f32.mrf.mxu2 }
 0x563   : > { %v2771_v26 = vpop.xlane.xlu2 %2770 }
 0x564   : > { %v2769_v5 = vpop.xlane.xlu1 %2768  ;;  %v10989_v17 = vpop.xlane.xlu0 %2110  ;;  %v2800_v9 = vsub.f32 %v10858_v47, %v2771_v26 }
 0x565   : > { %v2799_v1 = vsub.f32 %v10861_v40, %v2769_v5  ;;  %v10995_v35 = vpop.f32.mrf.mxu0 }
 0x566   : > { %v8718_v16 = vpop.eup %8717  ;;  %v2818_v29 = vmul.f32 1.442695, %v2800_v9  ;;  %15457 = vst [vmem:[#allocation35_spill] sm:$0xff] %v10995_v35 }
 0x567   : > { %v8720_v36 = vpop.eup %8719  ;;  %v2816_v13 = vmul.f32 1.442695, %v2799_v1  ;;  %v2515_v63 = vpack.c.bf16 %v8718_v16, %v8716_v19 }
 0x568   : > { %2846 = vadd.xlane.f32.xlu1 %v8720_v36  ;;  %2506 = vadd.xlane.f32.xlu0 %v8718_v16 }
 0x569   : > { %8721 = vpow2.f32 %v2816_v13  ;;  %2136 = vadd.xlane.f32.xlu2 %v8710_v12  ;;  %v10998_v62 = vpop.f32.mrf.mxu2 }
 0x56a   : > { %8723 = vpow2.f32 %v2818_v29 }
 0x56b   : > { %2583 = vmatmul.bf16.gmra.mxu0 %v2515_v63  ;;  %v2477_v51 = vpop.xlane.xlu2 %2476 }
 0x56c   : > { %v10993_v41 = vpop.xlane.xlu1 %2112  ;;  %v2773_v34 = vpop.xlane.xlu0 %2772 }
 0x56d   : > { %v2801_v30 = vsub.f32 %v10871_v0, %v2773_v34 }
 0x56f   : > { %v8722_v40 = vpop.eup %8721  ;;  %v2820_v47 = vmul.f32 1.442695, %v2801_v30 }
 0x570   : > { %v2878_v32 = vpack.c.bf16 %v8722_v40, %v8720_v36  ;;  %2504 = vadd.xlane.f32.xlu1 %v8716_v19  ;;  %v8724_v10 = vpop.eup %8723 }
 0x571   : > { %2502 = vadd.xlane.f32.xlu2 %v8714_v11  ;;  %8725 = vpow2.f32 %v2820_v47  ;;  %v11004_v19 = vpop.f32.mrf.mxu2 }
 0x572   : > { %2918 = vmatmul.bf16.vlgmr.msra.gmra.mxu2 %v2878_v32  ;;  %8727 = vrcp.f32 %v2109_v42 }
 0x573   : > { %v2481_v38 = vpop.xlane.xlu2 %2480  ;;  %8729 = vrcp.f32 %v10970_v54 }
 0x574   : > { %v2117_v12 = vpop.xlane.xlu1 %2116  ;;  %v2479_v31 = vpop.xlane.xlu0 %2478 }
 0x576   : > { %v11000_v4 = vpop.f32.mrf.mxu0 }
 0x577   : > { %v8726_v5 = vpop.eup %8725 }
 0x578   : > { %2850 = vadd.xlane.f32.xlu1 %v8724_v10  ;;  %v8728_v16 = vpop.eup %8727  ;;  %v2879_v36 = vpack.c.bf16 %v8726_v5, %v8724_v10 }
 0x579   : > { %2848 = vadd.xlane.f32.xlu2 %v8722_v40  ;;  %v8730_v13 = vpop.eup %8729  ;;  %v2236_v42 = vmul.f32 %v8728_v16, %v2181_v27 }
 0x57a   : > { %v2235_v34 = vmul.f32 %v8730_v13, %v10983_v18 }
 0x57b   : > { %v2252_v30 = vpack.c.bf16 %v2236_v42, %v2236_v42 }
 0x57c   : > { %v2777_v0 = vpop.xlane.xlu1 %2776  ;;  %v2115_v37 = vpop.xlane.xlu0 %2114 }
 0x57d   : > { %v2803_v11 = vsub.f32 %v10886_v39, %v2777_v0  ;;  %8731 = vrcp.f32 %v2115_v37  ;;  %v3064_v18 = vunpack.c.l.b16 %v2252_v30 }
 0x57e   : > { %v2551_v1 = vpop.f32.mrf.mxu0 }
 0x57f   : > { %v2824_v26 = vmul.f32 1.442695, %v2803_v11 }
 0x581   : > { %8733 = vpow2.f32 %v2824_v26  ;;  %2852 = vadd.xlane.f32.xlu2 %v8726_v5  ;;  %v2251_v5 = vpack.c.bf16 %v2235_v34, %v2235_v34 }
 0x582   : > { %2923 = vmatmul.bf16.gmra.mxu2 %v2879_v36  ;;  %v11006_v63 = vpop.xlane.xlu2 %2118  ;;  %8735 = vrcp.f32 %v2481_v38 }
 0x583   : > { %v8732_v40 = vpop.eup %8731  ;;  %8737 = vrcp.f32 %v2117_v12  ;;  %v3063_v16 = vunpack.c.l.b16 %v2251_v5 }
 0x584   : > { %v2779_v54 = vpop.xlane.xlu1 %2778  ;;  %v2775_v9 = vpop.xlane.xlu0 %2774 }
 0x585   : > { %v2804_v39 = vsub.f32 %v10898_v59, %v2779_v54  ;;  %v2802_v29 = vsub.f32 %v10895_v6, %v2775_v9  ;;  %v3079_v12 = vpack.c.b16 %v3064_v18, %v3063_v16 }
 0x586   : > { %v2189_v32 = vpop.f32.mrf.mxu2  ;;  %v2554_v47 = vpop.f32.mrf.mxu0 }
 0x587   : > { %v8734_v10 = vpop.eup %8733  ;;  %v2826_v0 = vmul.f32 1.442695, %v2804_v39  ;;  %v2822_v37 = vmul.f32 1.442695, %v2802_v29  ;;  %v2239_v27 = vmul.f32 %v8732_v40, %v2189_v32 }
 0x588   : > { %v8736_v6 = vpop.eup %8735 }
 0x589   : > { %8739 = vpow2.f32 %v2826_v0  ;;  %2856 = vadd.xlane.f32.xlu2 %v8734_v10  ;;  %v8738_v26 = vpop.eup %8737  ;;  %v2255_v42 = vpack.c.bf16 %v2239_v27, %v2239_v27  ;;  %v2607_v34 = vmul.f32 %v8736_v6, %v2554_v47 }
 0x58a   : > { %8741 = vpow2.f32 %v2822_v37  ;;  %v11011_v11 = vpop.xlane.xlu2 %2484 }
 0x58b   : > { %8743 = vrcp.f32 %v2479_v31  ;;  %v11018_v0 = vunpack.c.l.b16 %v2255_v42  ;;  %v2623_v5 = vpack.c.bf16 %v2607_v34, %v2607_v34 }
 0x58c   : > { %v2483_v59 = vpop.xlane.xlu0 %2482 }
 0x58d   : > { %8745 = vrcp.f32 %v2483_v59  ;;  %v11029_v42 = vunpack.c.l.b16 %v2623_v5 }
 0x58e   : > { %8747 = vrcp.f32 %v2477_v51  ;;  %v2191_v36 = vpop.f32.mrf.mxu2  ;;  %v2556_v38 = vpop.f32.mrf.mxu0 }
 0x58f   : > { %v8740_v13 = vpop.eup %8739  ;;  %v2240_v54 = vmul.f32 %v8738_v26, %v2191_v36  ;;  %8749 = vrcp.f32 %v10993_v41 }
 0x590   : > { %v11013_v9 = vpop.eup %8741  ;;  %2858 = vadd.xlane.f32.xlu0 %v8740_v13  ;;  %8751 = vrcp.f32 %v10989_v17 }
 0x591   : > { %v2256_v39 = vpack.c.bf16 %v2240_v54, %v2240_v54  ;;  %3087 = vrot.lane.b32.xlu1 %v3079_v12, %s9410_s9  ;;  %v2880_v31 = vpack.c.bf16 %v8734_v10, %v11013_v9  ;;  %v8744_v29 = vpop.eup %8743 }
 0x592   : > { %v2781_v40 = vpop.xlane.xlu2 %2780  ;;  %v2123_v51 = vpop.xlane.xlu1 %2122  ;;  %v2606_v32 = vmul.f32 %v8744_v29, %v2551_v1 }
 0x593   : > { %v8746_v30 = vpop.eup %8745  ;;  %v11020_v37 = vunpack.c.l.b16 %v2256_v39  ;;  %2928 = vmatmul.bf16.gmra.mxu2 %v2880_v31  ;;  %v2805_v47 = vsub.f32 %v10910_v53, %v2781_v40 }
 0x594   : > { %v8748_v27 = vpop.eup %8747  ;;  %v2608_v18 = vmul.f32 %v8746_v30, %v2556_v38  ;;  %v2121_v10 = vpop.xlane.xlu0 %2120  ;;  %v2622_v16 = vpack.c.bf16 %v2606_v32, %v2606_v32 }
 0x595   : > { %v2605_v59 = vmul.f32 %v8748_v27, %v11000_v4  ;;  %v2828_v6 = vmul.f32 1.442695, %v2805_v47  ;;  %v8750_v36 = vpop.eup %8749 }
 0x596   : > { %v2624_v1 = vpack.c.bf16 %v2608_v18, %v2608_v18  ;;  %v8752_v54 = vpop.eup %8751  ;;  %v2238_v34 = vmul.f32 %v8750_v36, %v11004_v19  ;;  %v3120_v39 = vunpack.c.l.b16 %v2622_v16  ;;  %v2194_v31 = vpop.f32.mrf.mxu2 }
 0x597   : > { %8753 = vpow2.f32 %v2828_v6  ;;  %v11027_v26 = vpop.f32.mrf.mxu0  ;;  %v2621_v17 = vpack.c.bf16 %v2605_v59, %v2605_v59  ;;  %v2237_v32 = vmul.f32 %v8752_v54, %v10998_v62 }
 0x598   : > { %v11031_v53 = vunpack.c.l.b16 %v2624_v1  ;;  %v2254_v5 = vpack.c.bf16 %v2238_v34, %v2238_v34 }
 0x599   : > { %v3119_v47 = vunpack.c.l.b16 %v2621_v17  ;;  %v2253_v19 = vpack.c.bf16 %v2237_v32, %v2237_v32 }
 0x59a   : > { %v2783_v4 = vpop.xlane.xlu2 %2782  ;;  %v11035_v12 = vpop.xlane.xlu1 %2488  ;;  %v3066_v16 = vunpack.c.l.b16 %v2254_v5 }
 0x59b   : > { %v2806_v29 = vsub.f32 %v10921_v28, %v2783_v4  ;;  %v3135_v18 = vpack.c.b16 %v3120_v39, %v3119_v47  ;;  %v3065_v62 = vunpack.c.l.b16 %v2253_v19 }
 0x59c   : > { %v11039_v40 = vpop.xlane.xlu0 %2486 }
 0x59d   : > { %v11041_v30 = vpop.eup %8753  ;;  %v2830_v27 = vmul.f32 1.442695, %v2806_v29 }
 0x59e   : > { %v2881_v6 = vpack.c.bf16 %v11041_v30, %v8740_v13  ;;  %v2196_v17 = vpop.f32.mrf.mxu2  ;;  %v3080_v13 = vpack.c.b16 %v3066_v16, %v3065_v62 }
 0x59f   : > { %8755 = vpow2.f32 %v2830_v27  ;;  %v11044_v59 = vpop.f32.mrf.mxu0 }
 0x5a0   : > { %8757 = vrcp.f32 %v2121_v10 }
 0x5a1   : > { %3143 = vrot.lane.b32.xlu2 %v3135_v18, %s9408_s2  ;;  %8759 = vrcp.f32 %v11006_v63 }
 0x5a2   : > { %v11048_v1 = vpop.xlane.xlu2 %2490  ;;  %v2789_v28 = vpop.xlane.xlu1 %2788  ;;  %8761 = vrcp.f32 %v2123_v51 }
 0x5a3   : > { %2933 = vmatmul.bf16.gmra.mxu2 %v2881_v6 }
 0x5a4   : > { %v2125_v36 = vpop.xlane.xlu0 %2124 }
 0x5a5   : > { %v8756_v4 = vpop.eup %8755  ;;  %8763 = vrcp.f32 %v2125_v36 }
 0x5a6   : > { %2862 = vadd.xlane.f32.xlu0 %v8756_v4  ;;  %v8758_v39 = vpop.eup %8757 }
 0x5a7   : > { %v11051_v54 = vpop.f32.mrf.mxu0  ;;  %v8760_v29 = vpop.eup %8759  ;;  %v2242_v32 = vmul.f32 %v8758_v39, %v2196_v17 }
 0x5a8   : > { %v8762_v5 = vpop.eup %8761  ;;  %v2241_v6 = vmul.f32 %v8760_v29, %v2194_v31 }
 0x5a9   : > { %3089 = vrot.lane.b32.xlu2 %v3080_v13, %s9410_s9  ;;  %v2258_v45 = vpack.c.bf16 %v2242_v32, %v2242_v32 }
 0x5aa   : > { %v2495_v34 = vpop.xlane.xlu1 %2494  ;;  %v2257_v16 = vpack.c.bf16 %v2241_v6, %v2241_v6 }
 0x5ab   : > { %v3070_v13 = vunpack.c.l.b16 %v2258_v45  ;;  %v8764_v17 = vpop.eup %8763  ;;  %v2809_v45 = vsub.f32 %v10928_v58, %v2789_v28 }
 0x5ac   : > { %v2127_v47 = vpop.xlane.xlu2 %2126  ;;  %v2785_v27 = vpop.xlane.xlu0 %2784  ;;  %v3069_v35 = vunpack.c.l.b16 %v2257_v16 }
 0x5ad   : > { %v2807_v18 = vsub.f32 %v10935_v21, %v2785_v27  ;;  %v2199_v10 = vpop.f32.mrf.mxu2  ;;  %v2836_v58 = vmul.f32 1.442695, %v2809_v45 }
 0x5ae   : > { %v2243_v19 = vmul.f32 %v8762_v5, %v2199_v10  ;;  %v3082_v29 = vpack.c.b16 %v3070_v13, %v3069_v35 }
 0x5af   : > { %v2832_v63 = vmul.f32 1.442695, %v2807_v18  ;;  %v11055_v51 = vpop.f32.mrf.mxu0 }
 0x5b0   : > { %v2259_v7 = vpack.c.bf16 %v2243_v19, %v2243_v19 }
 0x5b1   : > { %8765 = vpow2.f32 %v2832_v63 }
 0x5b2   : > { %v2131_v62 = vpop.xlane.xlu1 %2130  ;;  %v11062_v18 = vunpack.c.l.b16 %v2259_v7 }
 0x5b4   : > { %v2493_v41 = vpop.xlane.xlu2 %2492  ;;  %v2787_v38 = vpop.xlane.xlu0 %2786 }
 0x5b5   : > { %8767 = vrcp.f32 %v2493_v41  ;;  %v2201_v39 = vpop.f32.mrf.mxu2  ;;  %v2808_v31 = vsub.f32 %v10943_v24, %v2787_v38 }
 0x5b6   : > { %v2244_v21 = vmul.f32 %v8764_v17, %v2201_v39  ;;  %8769 = vrcp.f32 %v2127_v47 }
 0x5b7   : > { %v11057_v27 = vpop.eup %8765  ;;  %v2569_v36 = vpop.f32.mrf.mxu0  ;;  %8771 = vrcp.f32 %v2495_v34  ;;  %v2834_v19 = vmul.f32 1.442695, %v2808_v31 }
 0x5b8   : > { %v2260_v32 = vpack.c.bf16 %v2244_v21, %v2244_v21  ;;  %v2882_v5 = vpack.c.bf16 %v11057_v27, %v8756_v4 }
 0x5b9   : > { %8773 = vpow2.f32 %v2834_v19 }
 0x5ba   : > { %v11064_v41 = vunpack.c.l.b16 %v2260_v32  ;;  %2938 = vmatmul.bf16.gmra.mxu2 %v2882_v5  ;;  %v2791_v10 = vpop.xlane.xlu1 %2790  ;;  %3093 = vrot.lane.b32.xlu0 %v3082_v29, %s9410_s9 }
 0x5bb   : > { %v8768_v6 = vpop.eup %8767  ;;  %2854 = vadd.xlane.f32.xlu1 %v11013_v9 }
 0x5bc   : > { %v3083_v24 = vpack.c.b16 %v11064_v41, %v11062_v18  ;;  %v2613_v35 = vmul.f32 %v8768_v6, %v2569_v36  ;;  %v2133_v38 = vpop.xlane.xlu2 %2132  ;;  %v2129_v4 = vpop.xlane.xlu0 %2128 }
 0x5bd   : > { %v8770_v28 = vpop.eup %8769  ;;  %8775 = vrcp.f32 %v2129_v4 }
 0x5be   : > { %v2204_v7 = vpop.f32.mrf.mxu2  ;;  %v8772_v34 = vpop.eup %8771  ;;  %v2629_v16 = vpack.c.bf16 %v2613_v35, %v2613_v35  ;;  %8777 = vpow2.f32 %v2836_v58 }
 0x5bf   : > { %v2245_v47 = vmul.f32 %v8770_v28, %v2204_v7  ;;  %v2571_v63 = vpop.f32.mrf.mxu0  ;;  %v11075_v29 = vpop.eup %8773  ;;  %v2810_v28 = vsub.f32 %v10956_v33, %v2791_v10 }
 0x5c0   : > { %v2614_v13 = vmul.f32 %v8772_v34, %v2571_v63  ;;  %v11071_v9 = vunpack.c.l.b16 %v2629_v16 }
 0x5c1   : > { %v2261_v19 = vpack.c.bf16 %v2245_v47, %v2245_v47 }
 0x5c2   : > { %v2630_v17 = vpack.c.bf16 %v2614_v13, %v2614_v13  ;;  %v2497_v39 = vpop.xlane.xlu1 %2496 }
 0x5c3   : > { %2860 = vadd.xlane.f32.xlu1 %v11041_v30  ;;  %v8776_v32 = vpop.eup %8775  ;;  %8779 = vrcp.f32 %v2497_v39  ;;  %v11085_v34 = vunpack.c.l.b16 %v2261_v19  ;;  %v2838_v39 = vmul.f32 1.442695, %v2810_v28 }
 0x5c4   : > { %v11073_v21 = vunpack.c.l.b16 %v2630_v17  ;;  %v2793_v31 = vpop.xlane.xlu2 %2792  ;;  %v2135_v36 = vpop.xlane.xlu0 %2134  ;;  %8781 = vrcp.f32 %v2131_v62 }
 0x5c5   : > { %v11079_v6 = vpop.eup %8777  ;;  %v2811_v35 = vsub.f32 %v10965_v61, %v2793_v31 }
 0x5c6   : > { %v3139_v5 = vpack.c.b16 %v11073_v21, %v11071_v9  ;;  %v2206_v45 = vpop.f32.mrf.mxu2  ;;  %v2883_v58 = vpack.c.bf16 %v11079_v6, %v11075_v29 }
 0x5c7   : > { %v2246_v30 = vmul.f32 %v8776_v32, %v2206_v45  ;;  %v2574_v4 = vpop.f32.mrf.mxu0  ;;  %v2840_v63 = vmul.f32 1.442695, %v2811_v35 }
 0x5c9   : > { %v2262_v7 = vpack.c.bf16 %v2246_v30, %v2246_v30  ;;  %v8780_v17 = vpop.eup %8779 }
 0x5ca   : > { %2943 = vmatmul.bf16.gmra.mxu2 %v2883_v58  ;;  %v8782_v62 = vpop.eup %8781  ;;  %v2615_v10 = vmul.f32 %v8780_v17, %v2574_v4 }
 0x5cb   : > { %v11087_v16 = vunpack.c.l.b16 %v2262_v7 }
 0x5cc   : > { %v2499_v13 = vpop.xlane.xlu2 %2498  ;;  %v2501_v47 = vpop.xlane.xlu0 %2500  ;;  %v2631_v19 = vpack.c.bf16 %v2615_v10, %v2615_v10 }
 0x5cd   : > { %v3084_v61 = vpack.c.b16 %v11087_v16, %v11085_v34  ;;  %8783 = vrcp.f32 %v2499_v13  ;;  %v8353_v34 = vld [vmem:[#allocation9 + $0x8] sm:$0xff] }
 0x5ce   : > { %v2209_v31 = vpop.f32.mrf.mxu2  ;;  %8785 = vpow2.f32 %v2840_v63  ;;  %v11100_v17 = vunpack.c.l.b16 %v2631_v19 }
 0x5cf   : > { %v2247_v32 = vmul.f32 %v8782_v62, %v2209_v31  ;;  %v2576_v33 = vpop.f32.mrf.mxu0  ;;  %8787 = vrcp.f32 %v2133_v38 }
 0x5d0   : > { %8789 = vpow2.f32 %v2838_v39 }
 0x5d1   : > { %8791 = vrcp.f32 %v11039_v40  ;;  %v2263_v38 = vpack.c.bf16 %v2247_v32, %v2247_v32 }
 0x5d2   : > { %2864 = vadd.xlane.f32.xlu2 %v11057_v27  ;;  %8793 = vrcp.f32 %v11011_v11 }
 0x5d3   : > { %v8784_v45 = vpop.eup %8783  ;;  %8795 = vrcp.f32 %v2135_v36  ;;  %v11108_v11 = vunpack.c.l.b16 %v2263_v38 }
 0x5d4   : > { %v2616_v35 = vmul.f32 %v8784_v45, %v2576_v33  ;;  %v2795_v30 = vpop.xlane.xlu2 %2794  ;;  %v2797_v58 = vpop.xlane.xlu0 %2796  ;;  %8797 = vrcp.f32 %v11048_v1 }
 0x5d5   : > { %v11093_v28 = vpop.eup %8785  ;;  %v2812_v63 = vsub.f32 %v10981_v48, %v2795_v30  ;;  %v2813_v27 = vsub.f32 %v10978_v50, %v2797_v58  ;;  %v15458_v58 = vpack.c.b16 %v11031_v53, %v11029_v42  ;;  %8799 = vrcp.f32 %v11035_v12 }
 0x5d6   : > { %v8788_v7 = vpop.eup %8787  ;;  %v2632_v13 = vpack.c.bf16 %v2616_v35, %v2616_v35  ;;  %v2211_v62 = vpop.f32.mrf.mxu2 }
 0x5d7   : > { %v11096_v31 = vpop.eup %8789  ;;  %v2248_v4 = vmul.f32 %v8788_v7, %v2211_v62  ;;  %v2842_v35 = vmul.f32 1.442695, %v2812_v63  ;;  %v2844_v50 = vmul.f32 1.442695, %v2813_v27 }
 0x5d8   : > { %v2579_v40 = vpop.f32.mrf.mxu0  ;;  %v11102_v39 = vunpack.c.l.b16 %v2632_v13  ;;  %v2884_v33 = vpack.c.bf16 %v11093_v28, %v11096_v31  ;;  %v8792_v10 = vpop.eup %8791 }
 0x5d9   : > { %v2264_v48 = vpack.c.bf16 %v2248_v4, %v2248_v4  ;;  %v2610_v19 = vmul.f32 %v8792_v10, %v11044_v59  ;;  %v8794_v7 = vpop.eup %8793  ;;  %8801 = vpow2.f32 %v2842_v35 }
 0x5da   : > { %v3140_v45 = vpack.c.b16 %v11102_v39, %v11100_v17  ;;  %2948 = vmatmul.bf16.gmra.mxu2 %v2884_v33  ;;  %v8796_v63 = vpop.eup %8795  ;;  %v2609_v62 = vmul.f32 %v8794_v7, %v11027_v26  ;;  %8803 = vpow2.f32 %v2844_v50  ;;  %v15459_v26 = vpack.c.b16 %v11020_v37, %v11018_v0 }
 0x5db   : > { %v11110_v32 = vunpack.c.l.b16 %v2264_v48  ;;  %v11112_v36 = vpop.xlane.xlu1 %2846  ;;  %v2626_v27 = vpack.c.bf16 %v2610_v19, %v2610_v19  ;;  %v8798_v4 = vpop.eup %8797 }
 0x5dc   : > { %v2137_v30 = vpop.xlane.xlu2 %2136  ;;  %3145 = vrot.lane.b32.xlu1 %v15458_v58, %s9408_s2  ;;  %v2625_v42 = vpack.c.bf16 %v2609_v62, %v2609_v62  ;;  %v8800_v53 = vpop.eup %8799  ;;  %v2612_v33 = vmul.f32 %v8798_v4, %v11055_v51 }
 0x5dd   : > { %8805 = vrcp.f32 %v2137_v30  ;;  %v3124_v48 = vunpack.c.l.b16 %v2626_v27  ;;  %v2507_v51 = vpop.xlane.xlu0 %2506 }
 0x5de   : > { %v2214_v38 = vpop.f32.mrf.mxu2  ;;  %8807 = vrcp.f32 %v2501_v47  ;;  %v2611_v47 = vmul.f32 %v8800_v53, %v11051_v54  ;;  %v3123_v19 = vunpack.c.l.b16 %v2625_v42 }
 0x5df   : > { %v2249_v59 = vmul.f32 %v8796_v63, %v2214_v38  ;;  %v8802_v10 = vpop.eup %8801  ;;  %v2628_v63 = vpack.c.bf16 %v2612_v33, %v2612_v33 }
 0x5e0   : > { %v2581_v1 = vpop.f32.mrf.mxu0  ;;  %v11130_v35 = vpop.eup %8803  ;;  %v3137_v4 = vpack.c.b16 %v3124_v48, %v3123_v19  ;;  %v2627_v37 = vpack.c.bf16 %v2611_v47, %v2611_v47 }
 0x5e1   : > { %v2265_v62 = vpack.c.bf16 %v2249_v59, %v2249_v59  ;;  %v2885_v0 = vpack.c.bf16 %v11130_v35, %v8802_v10  ;;  %v3126_v42 = vunpack.c.l.b16 %v2628_v63 }
 0x5e3   : > { %v2505_v12 = vpop.xlane.xlu1 %2504  ;;  %v8806_v50 = vpop.eup %8805  ;;  %v11135_v53 = vunpack.c.l.b16 %v2265_v62 }
 0x5e4   : > { %v2503_v58 = vpop.xlane.xlu2 %2502  ;;  %8809 = vrcp.f32 %v2505_v12  ;;  %3091 = vrot.lane.b32.xlu1 %v15459_v26, %s9410_s9  ;;  %2866 = vadd.xlane.f32.xlu0 %v11075_v29  ;;  %v8808_v7 = vpop.eup %8807 }
 0x5e5   : > { %8811 = vrcp.f32 %v2503_v58  ;;  %v2617_v12 = vmul.f32 %v8808_v7, %v2579_v40  ;;  %v3125_v40 = vunpack.c.l.b16 %v2627_v37 }
 0x5e6   : > { %v2216_v30 = vpop.f32.mrf.mxu2  ;;  %8813 = vrcp.f32 %v2507_v51 }
 0x5e7   : > { %v2250_v38 = vmul.f32 %v8806_v50, %v2216_v30  ;;  %v2633_v59 = vpack.c.bf16 %v2617_v12, %v2617_v12  ;;  %8815 = vrcp.f32 %v10854_v55  ;;  %v3138_v30 = vpack.c.b16 %v3126_v42, %v3125_v40 }
 0x5e8   : > { %v2584_v27 = vpop.f32.mrf.mxu0  ;;  %8817 = vrcp.f32 %v10797_v44 }
 0x5e9   : > { %v2266_v29 = vpack.c.bf16 %v2250_v38, %v2250_v38  ;;  %v11143_v63 = vunpack.c.l.b16 %v2633_v59  ;;  %8819 = vrcp.f32 %v11112_v36  ;;  %v15461_v59 = vld [vmem:[#allocation33_spill] sm:$0xff] }
 0x5ea   : > { %v8810_v26 = vpop.eup %8809  ;;  %3147 = vrot.lane.b32.xlu2 %v3137_v4, %s9408_s2  ;;  %2953 = vmatmul.bf16.gmra.mxu2 %v2885_v0  ;;  %8821 = vrcp.f32 %v10874_v57 }
 0x5eb   : > { %v8812_v54 = vpop.eup %8811  ;;  %v11137_v58 = vunpack.c.l.b16 %v2266_v29  ;;  %v2619_v50 = vmul.f32 %v8810_v26, %v2584_v27 }
 0x5ec   : > { %v2618_v33 = vmul.f32 %v8812_v54, %v2581_v1  ;;  %v2849_v48 = vpop.xlane.xlu2 %2848  ;;  %2872 = vadd.xlane.f32.xlu0 %v11093_v28  ;;  %v8814_v51 = vpop.eup %8813  ;;  %v15460_v54 = vld [vmem:[#allocation31_spill] sm:$0xff] }
 0x5ed   : > { %v2635_v38 = vpack.c.bf16 %v2619_v50, %v2619_v50  ;;  %v8816_v0 = vpop.eup %8815  ;;  %8823 = vrcp.f32 %v2849_v48 }
 0x5ee   : > { %v2634_v19 = vpack.c.bf16 %v2618_v33, %v2618_v33  ;;  %v1866_v29 = vmul.f32 %v8816_v0, %v10836_v2  ;;  %v8818_v26 = vpop.eup %8817  ;;  %8825 = vrcp.f32 %v15461_v59 }
 0x5ef   : > { %v11151_v4 = vunpack.c.l.b16 %v2635_v38  ;;  %v1865_v42 = vmul.f32 %v8818_v26, %v15460_v54  ;;  %v8820_v50 = vpop.eup %8819  ;;  %v15462_v26 = vld [vmem:[#allocation32_spill] sm:$0xff]  ;;  %8827 = vrcp.f32 %v10918_v23 }
 0x5f0   : > { %v2586_v7 = vpop.f32.mrf.mxu0  ;;  %v11145_v62 = vunpack.c.l.b16 %v2634_v19  ;;  %v1882_v33 = vpack.c.bf16 %v1866_v29, %v1866_v29  ;;  %v8822_v40 = vpop.eup %8821 }
 0x5f1   : > { %v2620_v1 = vmul.f32 %v8814_v51, %v2586_v7  ;;  %v1881_v19 = vpack.c.bf16 %v1865_v42, %v1865_v42 }
 0x5f2   : > { %3149 = vrot.lane.b32.xlu2 %v3138_v30, %s9408_s2  ;;  %v3141_v28 = vpack.c.b16 %v11145_v62, %v11143_v63  ;;  %v3024_v7 = vunpack.c.l.b16 %v1882_v33 }
 0x5f3   : > { %v2636_v27 = vpack.c.bf16 %v2620_v1, %v2620_v1  ;;  %v8824_v2 = vpop.eup %8823  ;;  %v1868_v1 = vmul.f32 %v8822_v40, %v10865_v52  ;;  %v3023_v48 = vunpack.c.l.b16 %v1881_v19 }
 0x5f4   : > { %v11155_v55 = vpop.xlane.xlu2 %2852  ;;  %2874 = vadd.xlane.f32.xlu0 %v8802_v10  ;;  %v2851_v10 = vpop.xlane.xlu1 %2850 }
 0x5f5   : > { %v11153_v12 = vunpack.c.l.b16 %v2636_v27  ;;  %v2919_v37 = vpop.f32.mrf.mxu2  ;;  %v8826_v57 = vpop.eup %8825  ;;  %v3039_v29 = vpack.c.b16 %v3024_v7, %v3023_v48  ;;  %v1884_v42 = vpack.c.bf16 %v1868_v1, %v1868_v1  ;;  %v8359_v48 = vld [vmem:[#allocation9 + $0x38] sm:$0xff]  ;;  %8829 = vrcp.f32 %v11155_v55 }
 0x5f6   : > { %v2975_v36 = vmul.f32 %v8820_v50, %v2919_v37  ;;  %v1867_v54 = vmul.f32 %v8826_v57, %v15462_v26  ;;  %3349 = vmatpush.bf16.msra.mxu3 %v8359_v48  ;;  %v1887_v26 = vpack.c.bf16 %v10916_v20, %v10916_v20  ;;  %8831 = vrcp.f32 %v2851_v10  ;;  %v8358_v20 = vld [vmem:[#allocation9 + $0x30] sm:$0xff] }
 0x5f7   : > { %v3026_v52 = vunpack.c.l.b16 %v1884_v42  ;;  %v15463_v42 = vld [vmem:[#allocation26_spill] sm:$0xff] }
 0x5f8   : > { %v2991_v27 = vpack.c.bf16 %v2975_v36, %v2975_v36  ;;  %v1883_v33 = vpack.c.bf16 %v1867_v54, %v1867_v54 }
 0x5fa   : > { %v3175_v37 = vunpack.c.l.b16 %v2991_v27  ;;  %v3025_v19 = vunpack.c.l.b16 %v1883_v33  ;;  %3350 = vmatpush.bf16.msra.mxu3 %v8358_v20 }
 0x5fc   : > { %v11164_v51 = vpop.xlane.xlu2 %2856  ;;  %v3040_v36 = vpack.c.b16 %v3026_v52, %v3025_v19 }
 0x5fd   : > { %v2921_v30 = vpop.f32.mrf.mxu2 }
 0x5fe   : > { %v2976_v38 = vmul.f32 %v8824_v2, %v2921_v30 }
 0x600   : > { %v2992_v0 = vpack.c.bf16 %v2976_v38, %v2976_v38 }
 0x602   : > { %v3176_v59 = vunpack.c.l.b16 %v2992_v0 }
 0x603   : > { %v3088_v47 = vpop.permute.xlu1 %3087 }
 0x604   : > { %v3217_v50 = vsel %vm1534_vm1, %v3039_v29, %v3088_v47  ;;  %v3144_v44 = vpop.permute.xlu2 %3143  ;;  %v3191_v2 = vpack.c.b16 %v3176_v59, %v3175_v37  ;;  %v8828_v47 = vpop.eup %8827  ;;  %v3029_v29 = vunpack.c.l.b16 %v1887_v26 }
 0x605   : > { %v11170_v13 = vsel %vm3239_vm3, %v3217_v50, %v3144_v44  ;;  %v2924_v40 = vpop.f32.mrf.mxu2  ;;  %v2859_v44 = vpop.xlane.xlu0 %2858  ;;  %v1872_v1 = vmul.f32 %v8828_v47, %v10906_v8 }
 0x606   : > { %8833 = vrcp.f32 %v2859_v44  ;;  %v8830_v50 = vpop.eup %8829 }
 0x607   : > { %v1888_v27 = vpack.c.bf16 %v1872_v1, %v1872_v1  ;;  %v8832_v9 = vpop.eup %8831 }
 0x608   : > { %3199 = vrot.lane.b32.xlu0 %v3191_v2, %s9409_s13  ;;  %v2977_v33 = vmul.f32 %v8832_v9, %v2924_v40 }
 0x609   : > { %v3030_v54 = vunpack.c.l.b16 %v1888_v27 }
 0x60b   : > { %v3042_v23 = vpack.c.b16 %v3030_v54, %v3029_v29 }
 0x60c   : > { %v3090_v30 = vpop.permute.xlu2 %3089 }
 0x60d   : > { %v11174_v57 = vsel %vm1534_vm1, %v3040_v36, %v3090_v30  ;;  %v2926_v7 = vpop.f32.mrf.mxu2  ;;  %v2993_v36 = vpack.c.bf16 %v2977_v33, %v2977_v33 }
 0x60e   : > { %2868 = vadd.xlane.f32.xlu1 %v11079_v6  ;;  %v2978_v21 = vmul.f32 %v8830_v50, %v2926_v7 }
 0x60f   : > { %v3177_v7 = vunpack.c.l.b16 %v2993_v36 }
 0x610   : > { %v2994_v52 = vpack.c.bf16 %v2978_v21, %v2978_v21 }
 0x616   : > { %2870 = vadd.xlane.f32.xlu1 %v11096_v31  ;;  %v2929_v38 = vpop.f32.mrf.mxu2 }
 0x619   : > { %v2863_v0 = vpop.xlane.xlu0 %2862 }
 0x61b   : > { %2876 = vadd.xlane.f32.xlu2 %v11130_v35 }
 0x61e   : > { %v2931_v6 = vpop.f32.mrf.mxu2 }
 0x626   : > { %v2934_v8 = vpop.f32.mrf.mxu2 }
 0x62c   : > { %v3094_v59 = vpop.permute.xlu0 %3093 }
 0x62d   : > { %v11184_v31 = vsel %vm1534_vm1, %v3042_v23, %v3094_v59 }
 0x62e   : > { %v2855_v35 = vpop.xlane.xlu1 %2854  ;;  %v2936_v10 = vpop.f32.mrf.mxu2 }
 0x62f   : > { %3151 = vrot.lane.b32.xlu1 %v3139_v5, %s9408_s2  ;;  %8835 = vrcp.f32 %v2855_v35  ;;  %v8834_v5 = vpop.eup %8833 }
 0x630   : > { %v2981_v55 = vmul.f32 %v8834_v5, %v2934_v8  ;;  %v8356_v8 = vld [vmem:[#allocation9 + $0x20] sm:$0xff] }
 0x632   : > { %1734 = vadd.xlane.f32.xlu0 %v15463_v42  ;;  %v2997_v18 = vpack.c.bf16 %v2981_v55, %v2981_v55  ;;  %v8355_v55 = vld [vmem:[#allocation9 + $0x18] sm:$0xff] }
 0x633   : > { %3095 = vrot.lane.b32.xlu2 %v3083_v24, %s9410_s9  ;;  %v3178_v24 = vunpack.c.l.b16 %v2994_v52 }
 0x634   : > { %v3181_v1 = vunpack.c.l.b16 %v2997_v18  ;;  %v8354_v18 = vld [vmem:[#allocation9 + $0x10] sm:$0xff] }
 0x635   : > { %v8836_v2 = vpop.eup %8835  ;;  %v3192_v26 = vpack.c.b16 %v3178_v24, %v3177_v7  ;;  %v8352_v7 = vld [vmem:[#allocation9] sm:$0xff] }
 0x636   : > { %v2861_v37 = vpop.xlane.xlu1 %2860  ;;  %v2979_v30 = vmul.f32 %v8836_v2, %v2929_v38 }
 0x637   : > { %8837 = vrcp.f32 %v2861_v37 }
 0x638   : > { %8839 = vrcp.f32 %v11164_v51  ;;  %v8357_v51 = vld [vmem:[#allocation9 + $0x28] sm:$0xff]  ;;  %v2995_v54 = vpack.c.bf16 %v2979_v30, %v2979_v30 }
 0x639   : > { %8841 = vrcp.f32 %v10881_v22  ;;  %3351 = vmatpush.bf16.msra.mxu3 %v8357_v51 }
 0x63a   : > { %8843 = vrcp.f32 %v10877_v25  ;;  %v3179_v38 = vunpack.c.l.b16 %v2995_v54 }
 0x63b   : > { %8845 = vrcp.f32 %v2863_v0 }
 0x63d   : > { %v8838_v19 = vpop.eup %8837  ;;  %v2939_v27 = vpop.f32.mrf.mxu2  ;;  %3352 = vmatpush.bf16.msra.mxu3 %v8356_v8 }
 0x63e   : > { %v2982_v41 = vmul.f32 %v8838_v19, %v2936_v10  ;;  %v8840_v44 = vpop.eup %8839 }
 0x63f   : > { %v2980_v40 = vmul.f32 %v8840_v44, %v2931_v6  ;;  %v8842_v59 = vpop.eup %8841 }
 0x640   : > { %v2998_v47 = vpack.c.bf16 %v2982_v41, %v2982_v41  ;;  %v8844_v25 = vpop.eup %8843  ;;  %v1870_v35 = vmul.f32 %v8842_v59, %v10888_v46 }
 0x641   : > { %v2996_v22 = vpack.c.bf16 %v2980_v40, %v2980_v40  ;;  %v8846_v6 = vpop.eup %8845  ;;  %v1869_v20 = vmul.f32 %v8844_v25, %v10879_v15  ;;  %3353 = vmatpush.bf16.msra.mxu3 %v8355_v55 }
 0x642   : > { %v3182_v48 = vunpack.c.l.b16 %v2998_v47  ;;  %v2983_v42 = vmul.f32 %v8846_v6, %v2939_v27  ;;  %v1886_v33 = vpack.c.bf16 %v1870_v35, %v1870_v35  ;;  %v15465_v27 = vld [vmem:[#allocation30_spill] sm:$0xff] }
 0x643   : > { %v3180_v0 = vunpack.c.l.b16 %v2996_v22  ;;  %v1885_v52 = vpack.c.bf16 %v1869_v20, %v1869_v20 }
 0x644   : > { %v3194_v29 = vpack.c.b16 %v3182_v48, %v3181_v1  ;;  %v2999_v10 = vpack.c.bf16 %v2983_v42, %v2983_v42  ;;  %v3028_v36 = vunpack.c.l.b16 %v1886_v33  ;;  %v15464_v1 = vld [vmem:[#allocation27_spill] sm:$0xff] }
 0x645   : > { %v2865_v23 = vpop.xlane.xlu2 %2864  ;;  %v2941_v50 = vpop.f32.mrf.mxu2  ;;  %v3193_v9 = vpack.c.b16 %v3180_v0, %v3179_v38  ;;  %v3027_v24 = vunpack.c.l.b16 %v1885_v52  ;;  %3354 = vmatpush.bf16.msra.mxu3 %v8354_v18 }
 0x646   : > { %8847 = vrcp.f32 %v2865_v23  ;;  %3205 = vrot.lane.b32.xlu1 %v3194_v29, %s9409_s13  ;;  %3201 = vrot.lane.b32.xlu0 %v3192_v26, %s9409_s13  ;;  %v3183_v41 = vunpack.c.l.b16 %v2999_v10  ;;  %v15466_v29 = vld [vmem:[#allocation28_spill] sm:$0xff]  ;;  %v15467_v10 = vpack.c.b16 %v11110_v32, %v11108_v11  ;;  %v15468_v11 = vpack.c.b16 %v11153_v12, %v11151_v4 }
 0x647   : > { %v3041_v44 = vpack.c.b16 %v3028_v36, %v3027_v24 }
 0x649   : > { %3355 = vmatpush.bf16.msra.mxu3 %v8353_v34 }
 0x64c   : > { %v8848_v37 = vpop.eup %8847 }
 0x64d   : > { %v2984_v21 = vmul.f32 %v8848_v37, %v2941_v50  ;;  %v3148_v5 = vpop.permute.xlu2 %3147  ;;  %3356 = vmatpush.bf16.msra.mxu3 %v8352_v7  ;;  %v2944_v48 = vpop.f32.mrf.mxu2 }
 0x64e   : > { %v3146_v2 = vpop.permute.xlu1 %3145  ;;  %3097 = vrot.lane.b32.xlu1 %v3084_v61, %s9410_s9  ;;  %3203 = vrot.lane.b32.xlu0 %v3193_v9, %s9409_s13 }
 0x64f   : > { %v3000_v46 = vpack.c.bf16 %v2984_v21, %v2984_v21  ;;  %v11210_v15 = vsel %vm3239_vm3, %v11174_v57, %v3146_v2 }
 0x651   : > { %v3184_v19 = vunpack.c.l.b16 %v3000_v46 }
 0x653   : > { %v3195_v30 = vpack.c.b16 %v3184_v19, %v3183_v41 }
 0x655   : > { %v3150_v47 = vpop.permute.xlu2 %3149  ;;  %v2946_v26 = vpop.f32.mrf.mxu2 }
 0x656   : > { %v11214_v16 = vsel %vm3239_vm3, %v11184_v31, %v3150_v47  ;;  %v3092_v61 = vpop.permute.xlu1 %3091  ;;  %3153 = vrot.lane.b32.xlu1 %v3140_v45, %s9408_s2  ;;  %3207 = vrot.lane.b32.xlu0 %v3195_v30, %s9409_s13 }
 0x657   : > { %v3223_v57 = vsel %vm1534_vm1, %v3041_v44, %v3092_v61  ;;  %v2867_v31 = vpop.xlane.xlu0 %2866  ;;  %v1891_v61 = vpack.c.bf16 %v10952_v49, %v10952_v49  ;;  %v15470_v49 = vpack.c.b16 %v11137_v58, %v11135_v53 }
 0x658   : > { %v11223_v40 = vsel %vm3239_vm3, %v3223_v57, %v3148_v5  ;;  %8849 = vrcp.f32 %v2867_v31 }
 0x65c   : > { %1736 = vadd.xlane.f32.xlu2 %v15464_v1  ;;  %v3033_v1 = vunpack.c.l.b16 %v1891_v61 }
 0x65d   : > { %v2949_v39 = vpop.f32.mrf.mxu2 }
 0x65e   : > { %v8850_v22 = vpop.eup %8849 }
 0x65f   : > { %v2873_v51 = vpop.xlane.xlu0 %2872  ;;  %v2985_v25 = vmul.f32 %v8850_v22, %v2944_v48 }
 0x661   : > { %v3001_v6 = vpack.c.bf16 %v2985_v25, %v2985_v25 }
 0x663   : > { %v3185_v63 = vunpack.c.l.b16 %v3001_v6  ;;  %v3398_v6 = vld [vmem:[%s9628_s29] sm:$0xff] }
 0x664   : > { %1742 = vadd.xlane.f32.xlu2 %v15465_v27 }
 0x665   : > { %v2951_v23 = vpop.f32.mrf.mxu2 }
 0x667   : > { %v2875_v17 = vpop.xlane.xlu0 %2874 }
 0x66d   : > { %v2954_v8 = vpop.f32.mrf.mxu2 }
 0x675   : > { %v2956_v46 = vpop.f32.mrf.mxu2 }
 0x67a   : > { %v3200_v45 = vpop.permute.xlu0 %3199 }
 0x67b   : > { %v3258_v54 = vsel %vm3256_vm4, %v11170_v13, %v3200_v45 }
 0x67c   : > { %3155 = vrot.lane.b32.xlu2 %v3141_v28, %s9408_s2  ;;  %3357 = vmatmul.bf16.vlgmr.msra.gmra.mxu3 %v3258_v54  ;;  %v15471_v54 = vpack.c.b16 %v10948_v3, %v10946_v14 }
 0x680   : > { %1738 = vadd.xlane.f32.xlu0 %v15466_v29 }
 0x681   : > { %v2869_v59 = vpop.xlane.xlu1 %2868 }
 0x682   : > { %8851 = vrcp.f32 %v2869_v59 }
 0x683   : > { %8853 = vrcp.f32 %v2873_v51 }
 0x684   : > { %8855 = vrcp.f32 %v2875_v17 }
 0x688   : > { %v8852_v38 = vpop.eup %8851 }
 0x689   : > { %v2986_v35 = vmul.f32 %v8852_v38, %v2946_v26  ;;  %v2871_v13 = vpop.xlane.xlu1 %2870  ;;  %v8854_v42 = vpop.eup %8853  ;;  %v15469_v26 = vld [vmem:[#allocation29_spill] sm:$0xff] }
 0x68a   : > { %8857 = vrcp.f32 %v2871_v13  ;;  %v8856_v20 = vpop.eup %8855  ;;  %v2988_v9 = vmul.f32 %v8854_v42, %v2951_v23 }
 0x68b   : > { %v3002_v0 = vpack.c.bf16 %v2986_v35, %v2986_v35  ;;  %v2989_v5 = vmul.f32 %v8856_v20, %v2954_v8 }
 0x68c   : > { %v3004_v55 = vpack.c.bf16 %v2988_v9, %v2988_v9 }
 0x68d   : > { %v3186_v62 = vunpack.c.l.b16 %v3002_v0  ;;  %v3005_v52 = vpack.c.bf16 %v2989_v5, %v2989_v5 }
 0x68e   : > { %v2877_v28 = vpop.xlane.xlu2 %2876  ;;  %v3188_v18 = vunpack.c.l.b16 %v3004_v55 }
 0x68f   : > { %8859 = vrcp.f32 %v2877_v28  ;;  %v3196_v37 = vpack.c.b16 %v3186_v62, %v3185_v63  ;;  %v3189_v24 = vunpack.c.l.b16 %v3005_v52 }
 0x690   : > { %v8858_v50 = vpop.eup %8857 }
 0x691   : > { %v2987_v21 = vmul.f32 %v8858_v50, %v2949_v39  ;;  %3209 = vrot.lane.b32.xlu1 %v3196_v37, %s9409_s13  ;;  %v3399_v50 = vld [vmem:[%s9628_s29 + $0x8] sm:$0xff] }
 0x693   : > { %v3003_v33 = vpack.c.bf16 %v2987_v21, %v2987_v21 }
 0x694   : > { %3099 = vrot.lane.b32.xlu0 %v15467_v10, %s9410_s9 }
 0x695   : > { %v8860_v2 = vpop.eup %8859  ;;  %v3187_v19 = vunpack.c.l.b16 %v3003_v33 }
 0x696   : > { %v2990_v36 = vmul.f32 %v8860_v2, %v2956_v46 }
 0x697   : > { %v3197_v47 = vpack.c.b16 %v3188_v18, %v3187_v19 }
 0x698   : > { %v3006_v41 = vpack.c.bf16 %v2990_v36, %v2990_v36 }
 0x69a   : > { %v3190_v30 = vunpack.c.l.b16 %v3006_v41 }
 0x69c   : > { %3211 = vrot.lane.b32.xlu0 %v3197_v47, %s9409_s13  ;;  %v3198_v44 = vpack.c.b16 %v3190_v30, %v3189_v24  ;;  %v15474_v24 = vld [vmem:[#allocation34_spill] sm:$0xff]  ;;  %v15475_v47 = vld [vmem:[#allocation35_spill] sm:$0xff] }
 0x69e   : > { %3213 = vrot.lane.b32.xlu2 %v3198_v44, %s9409_s13 }
 0x6a1   : > { %v3152_v17 = vpop.permute.xlu1 %3151 }
 0x6a4   : > { %3157 = vrot.lane.b32.xlu0 %v15468_v11, %s9408_s2 }
 0x6a5   : > { %v1735_v32 = vpop.xlane.xlu0 %1734 }
 0x6a6   : > { %8861 = vrcp.f32 %v1735_v32 }
 0x6ac   : > { %v8862_v34 = vpop.eup %8861 }
 0x6ad   : > { %v1876_v57 = vmul.f32 %v8862_v34, %v10958_v60  ;;  %v3400_v34 = vld [vmem:[%s9628_s29 + $0x10] sm:$0xff] }
 0x6af   : > { %v1892_v7 = vpack.c.bf16 %v1876_v57, %v1876_v57 }
 0x6b1   : > { %v3034_v31 = vunpack.c.l.b16 %v1892_v7 }
 0x6b3   : > { %v3044_v48 = vpack.c.b16 %v3034_v31, %v3033_v1 }
 0x6b8   : > { %v3202_v27 = vpop.permute.xlu0 %3201  ;;  %v3206_v60 = vpop.permute.xlu1 %3205 }
 0x6b9   : > { %v3261_v51 = vsel %vm3256_vm4, %v11210_v15, %v3202_v27  ;;  %v3267_v39 = vsel %vm3256_vm4, %v11214_v16, %v3206_v60  ;;  %v3096_v15 = vpop.permute.xlu2 %3095  ;;  %v11265_v16 = vld [vmem:[#allocation11] ss:$0 sm:$0xff] }
 0x6ba   : > { %3362 = vmatmul.bf16.gmra.mxu3 %v3261_v51  ;;  %v3401_v51 = vld [vmem:[%s9628_s29 + $0x18] sm:$0xff] }
 0x6bb   : > { %1740 = vadd.xlane.f32.xlu1 %v15469_v26 }
 0x6c0   : > { %v3204_v4 = vpop.permute.xlu0 %3203  ;;  %v3098_v53 = vpop.permute.xlu1 %3097 }
 0x6c1   : > { %v3264_v12 = vsel %vm3256_vm4, %v11223_v40, %v3204_v4  ;;  %v3229_v40 = vsel %vm1534_vm1, %v15471_v54, %v3096_v15  ;;  %v3232_v35 = vsel %vm1534_vm1, %v3044_v48, %v3098_v53  ;;  %v3402_v54 = vld [vmem:[%s9628_s29 + $0x20] sm:$0xff]  ;;  %v3403_v53 = vld [vmem:[%s9628_s29 + $0x28] sm:$0xff] }
 0x6c2   : > { %v3249_v29 = vsel %vm3239_vm3, %v3229_v40, %v3152_v17 }
 0x6c8   : > { %v3208_v45 = vpop.permute.xlu0 %3207  ;;  %v3154_v22 = vpop.permute.xlu1 %3153 }
 0x6c9   : > { %v3270_v23 = vsel %vm3256_vm4, %v3249_v29, %v3208_v45  ;;  %v3251_v0 = vsel %vm3239_vm3, %v3232_v35, %v3154_v22 }
 0x6ca   : > { %3367 = vmatmul.bf16.gmra.mxu3 %v3264_v12 }
 0x6cf   : > { %v1737_v59 = vpop.xlane.xlu2 %1736 }
 0x6d4   : > { %3101 = vrot.lane.b32.xlu1 %v15470_v49, %s9410_s9  ;;  %s9327_s9 = scalar_lea.hbm %s15788_s21, 256 }
 0x6d7   : > { %v1743_v21 = vpop.xlane.xlu2 %1742 }
 0x6da   : > { %3372 = vmatmul.bf16.gmra.mxu3 %v3267_v39 }
 0x6df   : > { %v3156_v46 = vpop.permute.xlu2 %3155 }
 0x6ea   : > { %3377 = vmatmul.bf16.gmra.mxu3 %v3270_v23 }
 0x6f3   : > { %v1739_v58 = vpop.xlane.xlu0 %1738 }
 0x6f4   : > { %8863 = vrcp.f32 %v1739_v58 }
 0x6f5   : > { %8865 = vrcp.f32 %v1737_v59 }
 0x6f8   : > { %v3214_v49 = vpop.permute.xlu2 %3213 }
 0x6fa   : > { %v8864_v25 = vpop.eup %8863 }
 0x6fb   : > { %v8866_v3 = vpop.eup %8865  ;;  %v1878_v13 = vmul.f32 %v8864_v25, %v10973_v43  ;;  %v3404_v25 = vld [vmem:[%s9628_s29 + $0x30] sm:$0xff] }
 0x6fc   : > { %v1877_v63 = vmul.f32 %v8866_v3, %v10967_v56  ;;  %v15481_v3 = vld [vmem:[#allocation25_spill] sm:$0xff] }
 0x6fd   : > { %v1894_v28 = vpack.c.bf16 %v1878_v13, %v1878_v13 }
 0x6fe   : > { %v1893_v9 = vpack.c.bf16 %v1877_v63, %v1877_v63 }
 0x6ff   : > { %v3358_v38 = vpop.f32.mrf.mxu3  ;;  %v3036_v5 = vunpack.c.l.b16 %v1894_v28 }
 0x700   : > { %v3359_v14 = vadd.f32 %v11265_v16, %v3358_v38  ;;  %v3035_v55 = vunpack.c.l.b16 %v1893_v9 }
 0x702   : > { %v11271_v8 = vadd.f32 %v3398_v6, %v3359_v14  ;;  %v3045_v56 = vpack.c.b16 %v3036_v5, %v3035_v55  ;;  %v3406_v5 = vld [vmem:[%s9628_s29 + $0x40] sm:$0xff] }
 0x703   : > { %v3210_v42 = vpop.permute.xlu1 %3209 }
 0x704   : > { %15472 = vst [vmem:[#allocation31_spill] sm:$0xff] %v11271_v8  ;;  %3432 = vadd.xlane.f32.xlu0 %v11271_v8  ;;  %v3273_v62 = vsel %vm3256_vm4, %v3251_v0, %v3210_v42 }
 0x705   : > { %3382 = vmatmul.bf16.gmra.mxu3 %v3273_v62 }
 0x706   : > { %v3100_v20 = vpop.permute.xlu0 %3099 }
 0x707   : > { %v3360_v37 = vpop.f32.mrf.mxu3  ;;  %v3235_v10 = vsel %vm1534_vm1, %v3045_v56, %v3100_v20  ;;  %v3405_v20 = vld [vmem:[%s9628_s29 + $0x38] sm:$0xff] }
 0x708   : > { %v3361_v43 = vadd.f32 %v11265_v16, %v3360_v37  ;;  %v3253_v52 = vsel %vm3239_vm3, %v3235_v10, %v3156_v46 }
 0x70a   : > { %v11279_v33 = vadd.f32 %v3399_v50, %v3361_v43 }
 0x70c   : > { %15473 = vst [vmem:[#allocation33_spill] sm:$0xff] %v11279_v33  ;;  %3434 = vadd.xlane.f32.xlu2 %v11279_v33 }
 0x70e   : > { %v3212_v2 = vpop.permute.xlu0 %3211 }
 0x70f   : > { %v3276_v19 = vsel %vm3256_vm4, %v3253_v52, %v3212_v2 }
 0x715   : > { %3387 = vmatmul.bf16.gmra.mxu3 %v3276_v19 }
 0x716   : > { %v3158_v12 = vpop.permute.xlu0 %3157 }
 0x72e   : > { %v1741_v36 = vpop.xlane.xlu1 %1740 }
 0x72f   : > { %8867 = vrcp.f32 %v1741_v36 }
 0x730   : > { %8869 = vrcp.f32 %v1743_v21 }
 0x735   : > { %v8868_v18 = vpop.eup %8867 }
 0x736   : > { %v8870_v41 = vpop.eup %8869  ;;  %v1879_v30 = vmul.f32 %v8868_v18, %v15474_v24  ;;  %v3407_v24 = vld [vmem:[%s9628_s29 + $0x48] sm:$0xff] }
 0x737   : > { %v1880_v44 = vmul.f32 %v8870_v41, %v15475_v47 }
 0x738   : > { %v1895_v11 = vpack.c.bf16 %v1879_v30, %v1879_v30 }
 0x739   : > { %v1896_v57 = vpack.c.bf16 %v1880_v44, %v1880_v44 }
 0x73a   : > { %v3037_v1 = vunpack.c.l.b16 %v1895_v11 }
 0x73b   : > { %v3038_v31 = vunpack.c.l.b16 %v1896_v57 }
 0x73d   : > { %v3363_v32 = vpop.f32.mrf.mxu3  ;;  %v3046_v48 = vpack.c.b16 %v3038_v31, %v3037_v1 }
 0x73e   : > { %v3364_v61 = vadd.f32 %v11265_v16, %v3363_v32 }
 0x740   : > { %v11289_v7 = vadd.f32 %v3400_v34, %v3364_v61  ;;  %v3408_v61 = vld [vmem:[%s9628_s29 + $0x50] sm:$0xff] }
 0x742   : > { %15476 = vst [vmem:[#allocation32_spill] sm:$0xff] %v11289_v7  ;;  %3436 = vadd.xlane.f32.xlu1 %v11289_v7 }
 0x745   : > { %v3365_v27 = vpop.f32.mrf.mxu3 }
 0x746   : > { %v3102_v26 = vpop.permute.xlu1 %3101  ;;  %v3366_v4 = vadd.f32 %v11265_v16, %v3365_v27 }
 0x747   : > { %v3238_v17 = vsel %vm1534_vm1, %v3046_v48, %v3102_v26 }
 0x748   : > { %v11295_v60 = vadd.f32 %v3401_v51, %v3366_v4  ;;  %v3255_v39 = vsel %vm3239_vm3, %v3238_v17, %v3158_v12  ;;  %v3409_v4 = vld [vmem:[%s9628_s29 + $0x58] sm:$0xff] }
 0x749   : > { %v3279_v15 = vsel %vm3256_vm4, %v3255_v39, %v3214_v49 }
 0x74a   : > { %15477 = vst [vmem:[#allocation26_spill] sm:$0xff] %v11295_v60  ;;  %3392 = vmatmul.bf16.gmra.mxu3 %v3279_v15  ;;  %3438 = vadd.xlane.f32.xlu2 %v11295_v60 }
 0x74d   : > { %v3368_v45 = vpop.f32.mrf.mxu3 }
 0x74e   : > { %v3369_v40 = vadd.f32 %v11265_v16, %v3368_v45 }
 0x750   : > { %v11302_v29 = vadd.f32 %v3402_v54, %v3369_v40  ;;  %v3410_v40 = vld [vmem:[%s9628_s29 + $0x60] sm:$0xff] }
 0x752   : > { %15478 = vst [vmem:[#allocation27_spill] sm:$0xff] %v11302_v29  ;;  %3440 = vadd.xlane.f32.xlu0 %v11302_v29 }
 0x755   : > { %v3370_v23 = vpop.f32.mrf.mxu3 }
 0x756   : > { %v3371_v58 = vadd.f32 %v11265_v16, %v3370_v23 }
 0x758   : > { %v11307_v59 = vadd.f32 %v3403_v53, %v3371_v58  ;;  %v8092_v53 = vld [vmem:[#allocation12 + $0xe0] sm:$0xf]  ;;  %v8390_v58 = vld [vmem:[#allocation12 + $0xec] sm:$0xf0] }
 0x75a   : > { %15479 = vst [vmem:[#allocation30_spill] sm:$0xff] %v11307_v59  ;;  %3442 = vadd.xlane.f32.xlu2 %v11307_v59 }
 0x75d   : > { %v3373_v22 = vpop.f32.mrf.mxu3 }
 0x75e   : > { %v3374_v38 = vadd.f32 %v11265_v16, %v3373_v22  ;;  %v8388_v22 = vld [vmem:[#allocation12 + $0xe4] sm:$0xf] }
 0x760   : > { %v11312_v6 = vadd.f32 %v3404_v25, %v3374_v38  ;;  %v8093_v25 = vor.u32 %v8390_v58, %v8092_v53  ;;  %v8094_v38 = vld [vmem:[#allocation12 + $0xf0] sm:$0xf0]  ;;  %v8044_v53 = vld [vmem:[#allocation12 + $0x80] sm:$0xf]  ;;  %v8378_v58 = vld [vmem:[#allocation12 + $0x8c] sm:$0xf0] }
 0x762   : > { %15480 = vst [vmem:[#allocation28_spill] sm:$0xff] %v11312_v6  ;;  %3444 = vadd.xlane.f32.xlu2 %v11312_v6  ;;  %4000 = vmatpush.bf16.msrb.mxu0 %v8093_v25  ;;  %v8045_v25 = vor.u32 %v8378_v58, %v8044_v53  ;;  %v8364_v53 = vld [vmem:[#allocation12 + $0x24] sm:$0xf] }
 0x765   : > { %v3375_v0 = vpop.f32.mrf.mxu3 }
 0x766   : > { %v3376_v62 = vadd.f32 %v11265_v16, %v3375_v0 }
 0x768   : > { %v11327_v50 = vadd.f32 %v3405_v20, %v3376_v62  ;;  %v8102_v20 = vld [vmem:[#allocation12 + $0xf8] sm:$0xf0] }
 0x76a   : > { %15482 = vst [vmem:[#allocation29_spill] sm:$0xff] %v11327_v50 }
 0x76d   : > { %v3378_v21 = vpop.f32.mrf.mxu3 }
 0x76e   : > { %v3379_v43 = vadd.f32 %v11265_v16, %v3378_v21 }
 0x770   : > { %v11334_v55 = vadd.f32 %v3406_v5, %v3379_v43  ;;  %v8076_v43 = vld [vmem:[#allocation12 + $0xc0] sm:$0xf]  ;;  %v8386_v5 = vld [vmem:[#allocation12 + $0xcc] sm:$0xf0] }
 0x772   : > { %15483 = vst [vmem:[#allocation34_spill] sm:$0xff] %v11334_v55 }
 0x775   : > { %v3380_v56 = vpop.f32.mrf.mxu3 }
 0x776   : > { %v3381_v18 = vadd.f32 %v11265_v16, %v3380_v56  ;;  %v8384_v56 = vld [vmem:[#allocation12 + $0xc4] sm:$0xf] }
 0x777   : > { %v3433_v14 = vpop.xlane.xlu0 %3432 }
 0x778   : > { %v3464_v35 = vmul.f32 %v3433_v14, %v15481_v3  ;;  %v11349_v47 = vadd.f32 %v3407_v24, %v3381_v18  ;;  %v8100_v14 = vld [vmem:[#allocation12 + $0xe8] sm:$0xf]  ;;  %v8385_v24 = vld [vmem:[#allocation12 + $0xcc] sm:$0xf] }
 0x77a   : > { %v11317_v13 = vsub.f32 %v11271_v8, %v3464_v35  ;;  %15484 = vst [vmem:[#allocation35_spill] sm:$0xff] %v11349_v47  ;;  %v8391_v35 = vld [vmem:[#allocation12 + $0xf4] sm:$0xf0] }
 0x77b   : > { %v8101_v62 = vor.u32 %v8391_v35, %v8100_v14  ;;  %v8052_v14 = vld [vmem:[#allocation12 + $0x88] sm:$0xf]  ;;  %v8379_v35 = vld [vmem:[#allocation12 + $0x94] sm:$0xf0] }
 0x77c   : > { %v3496_v42 = vmul.f32 %v11317_v13, %v11317_v13 }
 0x77d   : > { %4098 = vmatpush.bf16.msrb.mxu2 %v8101_v62  ;;  %v8053_v62 = vor.u32 %v8379_v35, %v8052_v14  ;;  %v8367_v14 = vld [vmem:[#allocation12 + $0x34] sm:$0xf0] }
 0x77e   : > { %3512 = vadd.xlane.f32.xlu0 %v3496_v42 }
 0x77f   : > { %v3435_v63 = vpop.xlane.xlu2 %3434 }
 0x780   : > { %v3465_v28 = vmul.f32 %v3435_v63, %v15481_v3  ;;  %v8097_v63 = vor.u32 %v8388_v22, %v8094_v38  ;;  %v8376_v22 = vld [vmem:[#allocation12 + $0x84] sm:$0xf]  ;;  %v8046_v38 = vld [vmem:[#allocation12 + $0x90] sm:$0xf0] }
 0x782   : > { %v11325_v37 = vsub.f32 %v11279_v33, %v3465_v28  ;;  %v8389_v28 = vld [vmem:[#allocation12 + $0xec] sm:$0xf]  ;;  %4049 = vmatpush.bf16.msrb.mxu1 %v8097_v63  ;;  %v8049_v63 = vor.u32 %v8376_v22, %v8046_v38  ;;  %v8004_v38 = vld [vmem:[#allocation12 + $0x28] sm:$0xf] }
 0x783   : > { %v8105_v21 = vor.u32 %v8389_v28, %v8102_v20  ;;  %v8377_v28 = vld [vmem:[#allocation12 + $0x8c] sm:$0xf]  ;;  %v8054_v20 = vld [vmem:[#allocation12 + $0x98] sm:$0xf0] }
 0x784   : > { %v3497_v9 = vmul.f32 %v11325_v37, %v11325_v37 }
 0x785   : > { %4147 = vmatpush.bf16.msrb.mxu3 %v8105_v21  ;;  %v8057_v21 = vor.u32 %v8377_v28, %v8054_v20  ;;  %v8006_v28 = vld [vmem:[#allocation12 + $0x38] sm:$0xf0] }
 0x786   : > { %3514 = vadd.xlane.f32.xlu1 %v3497_v9  ;;  %3446 = vadd.xlane.f32.xlu0 %v11327_v50 }
 0x788   : > { %v3383_v19 = vpop.f32.mrf.mxu3 }
 0x789   : > { %v3384_v32 = vadd.f32 %v11265_v16, %v3383_v19  ;;  %v8387_v19 = vld [vmem:[#allocation12 + $0xd4] sm:$0xf0] }
 0x78b   : > { %v11360_v31 = vadd.f32 %v3408_v61, %v3384_v32  ;;  %v8382_v61 = vld [vmem:[#allocation12 + $0xac] sm:$0xf0] }
 0x78d   : > { %15485 = vst [vmem:[#allocation36_spill] sm:$0xff] %v11360_v31 }
 0x78e   : > { %3448 = vadd.xlane.f32.xlu0 %v11334_v55 }
 0x790   : > { %v3385_v57 = vpop.f32.mrf.mxu3 }
 0x791   : > { %v3386_v51 = vadd.f32 %v11265_v16, %v3385_v57  ;;  %v8380_v57 = vld [vmem:[#allocation12 + $0xa4] sm:$0xf] }
 0x793   : > { %v11371_v49 = vadd.f32 %v3409_v4, %v3386_v51  ;;  %v8068_v51 = vld [vmem:[#allocation12 + $0xa8] sm:$0xf] }
 0x795   : > { %15486 = vst [vmem:[#allocation37_spill] sm:$0xff] %v11371_v49 }
 0x798   : > { %v3388_v17 = vpop.f32.mrf.mxu3 }
 0x799   : > { %v3389_v45 = vadd.f32 %v11265_v16, %v3388_v17 }
 0x79b   : > { %v11382_v0 = vadd.f32 %v3410_v40, %v3389_v45  ;;  %v8070_v45 = vld [vmem:[#allocation12 + $0xb8] sm:$0xf0] }
 0x79d   : > { %15487 = vst [vmem:[#allocation38_spill] sm:$0xff] %v11382_v0 }
 0x7a0   : > { %v3390_v9 = vpop.f32.mrf.mxu3 }
 0x7b5   : > { %v3437_v10 = vpop.xlane.xlu1 %3436 }
 0x7b6   : > { %v3466_v2 = vmul.f32 %v3437_v10, %v15481_v3  ;;  %v8077_v10 = vor.u32 %v8386_v5, %v8076_v43  ;;  %v8028_v43 = vld [vmem:[#allocation12 + $0x60] sm:$0xf]  ;;  %v8374_v5 = vld [vmem:[#allocation12 + $0x6c] sm:$0xf0] }
 0x7b8   : > { %v11339_v46 = vsub.f32 %v11289_v7, %v3466_v2  ;;  %v8078_v2 = vld [vmem:[#allocation12 + $0xd0] sm:$0xf0]  ;;  %4001 = vmatpush.bf16.msrb.mxu0 %v8077_v10  ;;  %v8029_v10 = vor.u32 %v8374_v5, %v8028_v43  ;;  %v8362_v43 = vld [vmem:[#allocation12 + $0xc] sm:$0xf0] }
 0x7b9   : > { %v8081_v18 = vor.u32 %v8384_v56, %v8078_v2  ;;  %v8372_v56 = vld [vmem:[#allocation12 + $0x64] sm:$0xf]  ;;  %v8030_v2 = vld [vmem:[#allocation12 + $0x70] sm:$0xf0] }
 0x7ba   : > { %v3498_v52 = vmul.f32 %v11339_v46, %v11339_v46 }
 0x7bb   : > { %4050 = vmatpush.bf16.msrb.mxu1 %v8081_v18  ;;  %v8033_v18 = vor.u32 %v8372_v56, %v8030_v2  ;;  %v8360_v56 = vld [vmem:[#allocation12 + $0x4] sm:$0xf]  ;;  %v7988_v2 = vld [vmem:[#allocation12 + $0x8] sm:$0xf] }
 0x7bc   : > { %3516 = vadd.xlane.f32.xlu1 %v3498_v52  ;;  %v8084_v52 = vld [vmem:[#allocation12 + $0xc8] sm:$0xf] }
 0x7bd   : > { %v3439_v36 = vpop.xlane.xlu2 %3438 }
 0x7be   : > { %v3467_v41 = vmul.f32 %v3439_v36, %v15481_v3  ;;  %v3391_v36 = vadd.f32 %v11265_v16, %v3390_v9  ;;  %v3412_v9 = vld [vmem:[%s9628_s29 + $0x70] sm:$0xff] }
 0x7c0   : > { %v11347_v30 = vsub.f32 %v11295_v60, %v3467_v41  ;;  %v8085_v41 = vor.u32 %v8387_v19, %v8084_v52  ;;  %v8036_v52 = vld [vmem:[#allocation12 + $0x68] sm:$0xf]  ;;  %v8375_v19 = vld [vmem:[#allocation12 + $0x74] sm:$0xf0] }
 0x7c2   : > { %v3499_v44 = vmul.f32 %v11347_v30, %v11347_v30  ;;  %4099 = vmatpush.bf16.msrb.mxu2 %v8085_v41  ;;  %v8037_v41 = vor.u32 %v8375_v19, %v8036_v52  ;;  %v8363_v19 = vld [vmem:[#allocation12 + $0x14] sm:$0xf0] }
 0x7c4   : > { %3518 = vadd.xlane.f32.xlu2 %v3499_v44  ;;  %3450 = vadd.xlane.f32.xlu1 %v11349_v47  ;;  %v8086_v44 = vld [vmem:[#allocation12 + $0xd8] sm:$0xf0] }
 0x7c5   : > { %v3441_v11 = vpop.xlane.xlu0 %3440  ;;  %v8089_v32 = vor.u32 %v8385_v24, %v8086_v44  ;;  %v8373_v24 = vld [vmem:[#allocation12 + $0x6c] sm:$0xf]  ;;  %v8038_v44 = vld [vmem:[#allocation12 + $0x78] sm:$0xf0] }
 0x7c6   : > { %v3468_v34 = vmul.f32 %v3441_v11, %v15481_v3  ;;  %v3411_v11 = vld [vmem:[%s9628_s29 + $0x68] sm:$0xff] }
 0x7c7   : > { %v11389_v4 = vadd.f32 %v3411_v11, %v3391_v36  ;;  %4148 = vmatpush.bf16.msrb.mxu3 %v8089_v32  ;;  %v8041_v11 = vor.u32 %v8373_v24, %v8038_v44  ;;  %v8012_v32 = vld [vmem:[#allocation12 + $0x40] sm:$0xf]  ;;  %v7989_v24 = vor.u32 %v8363_v19, %v7988_v2 }
 0x7c8   : > { %v11358_v1 = vsub.f32 %v11302_v29, %v3468_v34  ;;  %v8060_v34 = vld [vmem:[#allocation12 + $0xa0] sm:$0xf] }
 0x7c9   : > { %15488 = vst [vmem:[#allocation39_spill] sm:$0xff] %v11389_v4 }
 0x7ca   : > { %v3500_v48 = vmul.f32 %v11358_v1, %v11358_v1 }
 0x7cc   : > { %3452 = vadd.xlane.f32.xlu1 %v11360_v31  ;;  %3520 = vadd.xlane.f32.xlu2 %v3500_v48  ;;  %v8061_v48 = vor.u32 %v8382_v61, %v8060_v34  ;;  %v8370_v34 = vld [vmem:[#allocation12 + $0x4c] sm:$0xf0]  ;;  %v8368_v61 = vld [vmem:[#allocation12 + $0x44] sm:$0xf] }
 0x7cd   : > { %v3443_v27 = vpop.xlane.xlu2 %3442 }
 0x7ce   : > { %v3469_v26 = vmul.f32 %v3443_v27, %v15481_v3  ;;  %v8062_v27 = vld [vmem:[#allocation12 + $0xb0] sm:$0xf0]  ;;  %4002 = vmatpush.bf16.msrb.mxu0 %v8061_v48 }
 0x7cf   : > { %v8065_v17 = vor.u32 %v8380_v57, %v8062_v27  ;;  %v8013_v57 = vor.u32 %v8370_v34, %v8012_v32  ;;  %v8014_v48 = vld [vmem:[#allocation12 + $0x50] sm:$0xf0]  ;;  %v8020_v27 = vld [vmem:[#allocation12 + $0x48] sm:$0xf] }
 0x7d0   : > { %v11369_v12 = vsub.f32 %v11307_v59, %v3469_v26  ;;  %v8383_v26 = vld [vmem:[#allocation12 + $0xb4] sm:$0xf0] }
 0x7d1   : > { %4051 = vmatpush.bf16.msrb.mxu1 %v8065_v17 }
 0x7d2   : > { %v3501_v39 = vmul.f32 %v11369_v12, %v11369_v12  ;;  %4003 = vmatpush.bf16.msrb.mxu0 %v8045_v25  ;;  %v7998_v25 = vld [vmem:[#allocation12 + $0x30] sm:$0xf0] }
 0x7d4   : > { %3522 = vadd.xlane.f32.xlu0 %v3501_v39  ;;  %3454 = vadd.xlane.f32.xlu2 %v11371_v49  ;;  %v8069_v39 = vor.u32 %v8383_v26, %v8068_v51  ;;  %v8371_v51 = vld [vmem:[#allocation12 + $0x54] sm:$0xf0]  ;;  %v8017_v26 = vor.u32 %v8368_v61, %v8014_v48 }
 0x7d5   : > { %v3445_v15 = vpop.xlane.xlu2 %3444  ;;  %4052 = vmatpush.bf16.msrb.mxu1 %v8049_v63  ;;  %v8021_v17 = vor.u32 %v8371_v51, %v8020_v27  ;;  %v8005_v63 = vor.u32 %v8367_v14, %v8004_v38 }
 0x7d6   : > { %v3470_v54 = vmul.f32 %v3445_v15, %v15481_v3  ;;  %v8381_v15 = vld [vmem:[#allocation12 + $0xac] sm:$0xf]  ;;  %4100 = vmatpush.bf16.msrb.mxu2 %v8069_v39  ;;  %4004 = vmatpush.bf16.msrb.mxu0 %v8029_v10  ;;  %v7982_v10 = vld [vmem:[#allocation12 + $0x10] sm:$0xf0] }
 0x7d7   : > { %v8073_v40 = vor.u32 %v8381_v15, %v8070_v45  ;;  %v8369_v39 = vld [vmem:[#allocation12 + $0x4c] sm:$0xf]  ;;  %v8022_v15 = vld [vmem:[#allocation12 + $0x58] sm:$0xf0]  ;;  %v7985_v52 = vor.u32 %v8360_v56, %v7982_v10 }
 0x7d8   : > { %v11380_v23 = vsub.f32 %v11312_v6, %v3470_v54  ;;  %v3393_v54 = vpop.f32.mrf.mxu3  ;;  %v8025_v45 = vor.u32 %v8369_v39, %v8022_v15 }
 0x7d9   : > { %4149 = vmatpush.bf16.msrb.mxu3 %v8073_v40  ;;  %4053 = vmatpush.bf16.msrb.mxu1 %v8033_v18  ;;  %v8366_v40 = vld [vmem:[#allocation12 + $0x2c] sm:$0xf0]  ;;  %v8361_v18 = vld [vmem:[#allocation12 + $0xc] sm:$0xf] }
 0x7da   : > { %v3502_v42 = vmul.f32 %v11380_v23, %v11380_v23  ;;  %4101 = vmatpush.bf16.msrb.mxu2 %v8053_v62  ;;  %4005 = vmatpush.bf16.msrb.mxu0 %v8013_v57  ;;  %v8365_v62 = vld [vmem:[#allocation12 + $0x2c] sm:$0xf] }
 0x7db   : > { %v8009_v20 = vor.u32 %v8365_v62, %v8006_v28  ;;  %v3413_v62 = vld [vmem:[%s9628_s29 + $0x78] sm:$0xff]  ;;  %s7544_s29 = scalar_lea.hbm %s15788_s21, %s8424_s5 }
 0x7dc   : > { %3524 = vadd.xlane.f32.xlu0 %v3502_v42  ;;  %3456 = vadd.xlane.f32.xlu2 %v11382_v0  ;;  %v3394_v42 = vadd.f32 %v11265_v16, %v3393_v54  ;;  %v7996_v54 = vld [vmem:[#allocation12 + $0x20] sm:$0xf]  ;;  %s7547_s22 = sshll.u32 %s7544_s29, 4  ;;  %s7548_s22 = int_to_ptr.hbm [resolvable:$true] %s7547_s22 }
 0x7dd   : > { %4150 = vmatpush.bf16.msrb.mxu3 %v8057_v21  ;;  %4054 = vmatpush.bf16.msrb.mxu1 %v8017_v26  ;;  %v7997_v22 = vor.u32 %v8366_v40, %v7996_v54  ;;  %v7980_v21 = vld [vmem:[#allocation12] sm:$0xf]  ;;  %s9321_s19 = sshra.s32 %s7548_s22, 4  ;;  %s9322_s19 = int_to_ptr.hbm [resolvable:$true] %s9321_s19 }
 0x7de   : > { %v11394_v36 = vadd.f32 %v3412_v9, %v3394_v42  ;;  %4102 = vmatpush.bf16.msrb.mxu2 %v8037_v41  ;;  %v8001_v42 = vor.u32 %v8364_v53, %v7998_v25  ;;  %v7981_v5 = vor.u32 %v8362_v43, %v7980_v21  ;;  %v7990_v41 = vld [vmem:[#allocation12 + $0x18] sm:$0xf0]  ;;  %s9323_s11 = scalar_lea.hbm %s9322_s19, 128  ;;  %p9328_p12 = scmp.lt.s32.totalorder %s9322_s19, %s15788_s21 }
 0x7df   : > { %4006 = vmatpush.bf16.msrb.mxu0 %v7997_v22  ;;  %v7993_v44 = vor.u32 %v8361_v18, %v7990_v41  ;;  %p9324_p1 = scmp.ne.s32.totalorder %s9322_s19, %s9323_s11  ;;  %p9329_p7 = scmp.lt.s32.totalorder %s9327_s9, %s9323_s11 }
 0x7e0   : > { %15489 = vst [vmem:[#allocation40_spill] sm:$0xff] %v11394_v36  ;;  %v3395_v38 = vpop.f32.mrf.mxu3 }
 0x7e1   : > { %4151 = vmatpush.bf16.msrb.mxu3 %v8041_v11  ;;  %4055 = vmatpush.bf16.msrb.mxu1 %v8001_v42  ;;  %p9325_p3 = pnand %p9324_p1, %p9591_p5  ;;  %p9330_p8 = por %p9329_p7, %p9328_p12 }
 0x7e2   : > { %4103 = vmatpush.bf16.msrb.mxu2 %v8021_v17 }
 0x7e3   : > { %4007 = vmatpush.bf16.msrb.mxu0 %v7981_v5  ;;  %p9326_p4 = pneg %p9325_p3 }
 0x7e4   : > { %3458 = vadd.xlane.f32.xlu0 %v11389_v4 }
 0x7e5   : > { %4152 = vmatpush.bf16.msrb.mxu3 %v8025_v45  ;;  %4056 = vmatpush.bf16.msrb.mxu1 %v7985_v52  ;;  %p9331_p9 = pnand %p9330_p8, %p9326_p4 }
 0x7e6   : > { %4104 = vmatpush.bf16.msrb.mxu2 %v8005_v63  ;;  %v3396_v63 = vadd.f32 %v11265_v16, %v3395_v38  ;;  %v11424_v16 = vld [vmem:[%s15492_s3] ss:$0 sm:$0xff] }
 0x7e9   : > { %4153 = vmatpush.bf16.msrb.mxu3 %v8009_v20  ;;  %v11416_v20 = vld [vmem:[%s15490_s20] ss:$0 sm:$0xff] }
 0x7ea   : > { %4105 = vmatpush.bf16.msrb.mxu2 %v7989_v24 }
 0x7ec   : > { %3460 = vadd.xlane.f32.xlu0 %v11394_v36 }
 0x7ed   : > { %4154 = vmatpush.bf16.msrb.mxu3 %v7993_v44 }
 0x7f1   : > { %v3513_v58 = vpop.xlane.xlu0 %3512 }
 0x7f2   : > { %v3544_v35 = vmul.f32 %v3513_v58, %v15481_v3 }
 0x7f4   : > { %v3560_v9 = vadd.f32 1e-05, %v3544_v35 }
 0x7f6   : > { %8871 = vrsqrt.f32 %v3560_v9  ;;  %vm3582_vm5 = vweird.f32 %v3560_v9 }
 0x7f9   : > { %v3515_v11 = vpop.xlane.xlu1 %3514  ;;  %v3447_v32 = vpop.xlane.xlu0 %3446 }
 0x7fa   : > { %v3545_v34 = vmul.f32 %v3515_v11, %v15481_v3  ;;  %v3471_v61 = vmul.f32 %v3447_v32, %v15481_v3 }
 0x7fc   : > { %v8872_v57 = vpop.eup %8871  ;;  %v3561_v48 = vadd.f32 1e-05, %v3545_v34  ;;  %v11401_v27 = vsub.f32 %v11327_v50, %v3471_v61 }
 0x7fd   : > { %v3577_v51 = vmul.f32 %v8872_v57, %v3560_v9  ;;  %vm3583_vm1 = vweird.f32 %v8872_v57  ;;  %v11419_v9 = vadd.f32 %v3413_v62, %v3396_v63 }
 0x7fe   : > { %8873 = vrsqrt.f32 %v3561_v48  ;;  %v3503_v26 = vmul.f32 %v11401_v27, %v11401_v27  ;;  %vm3584_vm6 = vmor %vm3582_vm5, %vm3583_vm1  ;;  %vm3592_vm8 = vweird.f32 %v3561_v48 }
 0x7ff   : > { %v3578_v17 = vmul.f32 %v8872_v57, %v3577_v51  ;;  %15491 = vst [vmem:[#allocation41_spill] sm:$0xff] %v11419_v9 }
 0x800   : > { %3526 = vadd.xlane.f32.xlu1 %v3503_v26 }
 0x801   : > { %v3579_v39 = vmul.f32 0.5, %v3578_v17  ;;  %v3449_v15 = vpop.xlane.xlu0 %3448 }
 0x802   : > { %v3472_v45 = vmul.f32 %v3449_v15, %v15481_v3 }
 0x803   : > { %v3580_v54 = vsub.f32 1.5, %v3579_v39 }
 0x804   : > { %v8874_v40 = vpop.eup %8873  ;;  %v11407_v53 = vsub.f32 %v11334_v55, %v3472_v45 }
 0x805   : > { %v3581_v58 = vmul.f32 %v8872_v57, %v3580_v54  ;;  %v3587_v22 = vmul.f32 %v8874_v40, %v3561_v48  ;;  %vm3593_vm7 = vweird.f32 %v8874_v40 }
 0x806   : > { %v3504_v25 = vmul.f32 %v11407_v53, %v11407_v53  ;;  %vm3594_vm9 = vmor %vm3592_vm8, %vm3593_vm7 }
 0x807   : > { %v3588_v14 = vmul.f32 %v8874_v40, %v3587_v22  ;;  %v3585_v35 = vsel %vm3584_vm6, %v8872_v57, %v3581_v58 }
 0x808   : > { %3528 = vadd.xlane.f32.xlu1 %v3504_v25  ;;  %v3736_v21 = vmul.f32 %v3585_v35, %v11317_v13 }
 0x809   : > { %v3589_v42 = vmul.f32 0.5, %v3588_v14 }
 0x80a   : > { %v3755_v56 = vmul.f32 %v11416_v20, %v3736_v21 }
 0x80b   : > { %v3590_v28 = vsub.f32 1.5, %v3589_v42 }
 0x80c   : > { %v3774_v13 = vadd.f32 %v11424_v16, %v3755_v56 }
 0x80d   : > { %v3591_v43 = vmul.f32 %v8874_v40, %v3590_v28 }
 0x80f   : > { %v3595_v5 = vsel %vm3594_vm9, %v8874_v40, %v3591_v43 }
 0x810   : > { %v3737_v10 = vmul.f32 %v3595_v5, %v11325_v37  ;;  %3462 = vadd.xlane.f32.xlu1 %v11419_v9 }
 0x812   : > { %v3756_v2 = vmul.f32 %v11416_v20, %v3737_v10 }
 0x814   : > { %v3775_v52 = vadd.f32 %v11424_v16, %v3756_v2 }
 0x816   : > { %v3790_v19 = vpack.c.bf16 %v3775_v52, %v3774_v13 }
 0x818   : > { %4008 = vmatmul.bf16.vlgmr.msrb.gmra.mxu0 %v3790_v19  ;;  %4057 = vmatmul.bf16.vlgmr.msrb.gmra.mxu1 %v3790_v19 }
 0x819   : > { %4106 = vmatmul.bf16.vlgmr.msrb.gmra.mxu2 %v3790_v19  ;;  %4155 = vmatmul.bf16.vlgmr.msrb.gmra.mxu3 %v3790_v19 }
 0x82f   : > { %v3517_v18 = vpop.xlane.xlu1 %3516 }
 0x830   : > { %v3546_v41 = vmul.f32 %v3517_v18, %v15481_v3 }
 0x832   : > { %v3562_v24 = vadd.f32 1e-05, %v3546_v41 }
 0x834   : > { %8875 = vrsqrt.f32 %v3562_v24  ;;  %vm3602_vm11 = vweird.f32 %v3562_v24 }
 0x837   : > { %v3519_v44 = vpop.xlane.xlu2 %3518  ;;  %v3451_v37 = vpop.xlane.xlu1 %3450 }
 0x838   : > { %v3547_v11 = vmul.f32 %v3519_v44, %v15481_v3  ;;  %v3473_v32 = vmul.f32 %v3451_v37, %v15481_v3 }
 0x83a   : > { %v8876_v34 = vpop.eup %8875  ;;  %v3563_v61 = vadd.f32 1e-05, %v3547_v11  ;;  %v11436_v57 = vsub.f32 %v11349_v47, %v3473_v32 }
 0x83b   : > { %v3597_v48 = vmul.f32 %v8876_v34, %v3562_v24  ;;  %vm3603_vm10 = vweird.f32 %v8876_v34 }
 0x83c   : > { %8877 = vrsqrt.f32 %v3563_v61  ;;  %v3505_v51 = vmul.f32 %v11436_v57, %v11436_v57  ;;  %vm3604_vm12 = vmor %vm3602_vm11, %vm3603_vm10  ;;  %vm3612_vm14 = vweird.f32 %v3563_v61 }
 0x83d   : > { %v3598_v26 = vmul.f32 %v8876_v34, %v3597_v48 }
 0x83e   : > { %3530 = vadd.xlane.f32.xlu2 %v3505_v51 }
 0x83f   : > { %v3599_v17 = vmul.f32 0.5, %v3598_v26  ;;  %v3453_v39 = vpop.xlane.xlu1 %3452  ;;  %v3521_v15 = vpop.xlane.xlu2 %3520 }
 0x840   : > { %v3474_v45 = vmul.f32 %v3453_v39, %v15481_v3  ;;  %v3548_v54 = vmul.f32 %v3521_v15, %v15481_v3 }
 0x841   : > { %v3600_v40 = vsub.f32 1.5, %v3599_v17 }
 0x842   : > { %v8878_v58 = vpop.eup %8877  ;;  %v11443_v22 = vsub.f32 %v11360_v31, %v3474_v45  ;;  %v3564_v25 = vadd.f32 1e-05, %v3548_v54 }
 0x843   : > { %v3601_v38 = vmul.f32 %v8876_v34, %v3600_v40  ;;  %v3607_v14 = vmul.f32 %v8878_v58, %v3563_v61  ;;  %vm3613_vm13 = vweird.f32 %v8878_v58 }
 0x844   : > { %15493 = vst [vmem:[#allocation42_spill] sm:$0xff] %v11443_v22  ;;  %8879 = vrsqrt.f32 %v3564_v25  ;;  %v3506_v35 = vmul.f32 %v11443_v22, %v11443_v22  ;;  %vm3614_vm15 = vmor %vm3612_vm14, %vm3613_vm13  ;;  %vm3622_vm2 = vweird.f32 %v3564_v25 }
 0x845   : > { %v3608_v42 = vmul.f32 %v8878_v58, %v3607_v14  ;;  %v3605_v63 = vsel %vm3604_vm12, %v8876_v34, %v3601_v38 }
 0x846   : > { %3532 = vadd.xlane.f32.xlu2 %v3506_v35  ;;  %v3738_v2 = vmul.f32 %v3605_v63, %v11339_v46 }
 0x847   : > { %v3609_v62 = vmul.f32 0.5, %v3608_v42  ;;  %v3455_v28 = vpop.xlane.xlu2 %3454  ;;  %v3523_v21 = vpop.xlane.xlu0 %3522 }
 0x848   : > { %v3475_v43 = vmul.f32 %v3455_v28, %v15481_v3  ;;  %v3549_v5 = vmul.f32 %v3523_v21, %v15481_v3  ;;  %v3757_v11 = vmul.f32 %v11416_v20, %v3738_v2 }
 0x849   : > { %v3610_v56 = vsub.f32 1.5, %v3609_v62 }
 0x84a   : > { %v8880_v10 = vpop.eup %8879  ;;  %v11451_v13 = vsub.f32 %v11371_v49, %v3475_v43  ;;  %v3565_v52 = vadd.f32 1e-05, %v3549_v5  ;;  %v3776_v39 = vadd.f32 %v11424_v16, %v3757_v11 }
 0x84b   : > { %v3611_v19 = vmul.f32 %v8878_v58, %v3610_v56  ;;  %v3617_v18 = vmul.f32 %v8880_v10, %v3564_v25  ;;  %vm3623_vm0 = vweird.f32 %v8880_v10 }
 0x84c   : > { %8881 = vrsqrt.f32 %v3565_v52  ;;  %v3507_v41 = vmul.f32 %v11451_v13, %v11451_v13  ;;  %vm3624_vm3 = vmor %vm3622_vm2, %vm3623_vm0  ;;  %vm3632_vm1 = vweird.f32 %v3565_v52 }
 0x84d   : > { %v3615_v24 = vsel %vm3614_vm15, %v8878_v58, %v3611_v19  ;;  %v3618_v44 = vmul.f32 %v8880_v10, %v3617_v18 }
 0x84e   : > { %v3739_v37 = vmul.f32 %v3615_v24, %v11347_v30  ;;  %3534 = vadd.xlane.f32.xlu0 %v3507_v41 }
 0x84f   : > { %v3619_v46 = vmul.f32 0.5, %v3618_v44  ;;  %v3457_v32 = vpop.xlane.xlu2 %3456  ;;  %v3525_v34 = vpop.xlane.xlu0 %3524 }
 0x850   : > { %v3476_v48 = vmul.f32 %v3457_v32, %v15481_v3  ;;  %v3758_v61 = vmul.f32 %v11416_v20, %v3739_v37  ;;  %v3550_v56 = vmul.f32 %v3525_v34, %v15481_v3 }
 0x851   : > { %v3620_v51 = vsub.f32 1.5, %v3619_v46 }
 0x852   : > { %v8882_v26 = vpop.eup %8881  ;;  %v11460_v17 = vsub.f32 %v11382_v0, %v3476_v48  ;;  %v3777_v15 = vadd.f32 %v11424_v16, %v3758_v61  ;;  %v3566_v18 = vadd.f32 1e-05, %v3550_v56 }
 0x853   : > { %v3621_v30 = vmul.f32 %v8880_v10, %v3620_v51  ;;  %v3627_v45 = vmul.f32 %v8882_v26, %v3565_v52  ;;  %vm3633_vm4 = vweird.f32 %v8882_v26 }
 0x854   : > { %15494 = vst [vmem:[#allocation43_spill] sm:$0xff] %v11460_v17  ;;  %v3791_v54 = vpack.c.bf16 %v3777_v15, %v3776_v39  ;;  %v3508_v40 = vmul.f32 %v11460_v17, %v11460_v17  ;;  %vm3634_vm5 = vmor %vm3632_vm1, %vm3633_vm4  ;;  %8883 = vrsqrt.f32 %v3566_v18  ;;  %vm3642_vm7 = vweird.f32 %v3566_v18 }
 0x855   : > { %v3628_v58 = vmul.f32 %v8882_v26, %v3627_v45  ;;  %v3625_v38 = vsel %vm3624_vm3, %v8880_v10, %v3621_v30 }
 0x856   : > { %4013 = vmatmul.bf16.gmra.mxu0 %v3791_v54  ;;  %4062 = vmatmul.bf16.gmra.mxu1 %v3791_v54  ;;  %v3740_v62 = vmul.f32 %v3625_v38, %v11358_v1 }
 0x857   : > { %v3629_v14 = vmul.f32 0.5, %v3628_v58  ;;  %4111 = vmatmul.bf16.gmra.mxu2 %v3791_v54  ;;  %4160 = vmatmul.bf16.gmra.mxu3 %v3791_v54  ;;  %v3459_v35 = vpop.xlane.xlu0 %3458 }
 0x858   : > { %3536 = vadd.xlane.f32.xlu1 %v3508_v40  ;;  %v3477_v42 = vmul.f32 %v3459_v35, %v15481_v3  ;;  %v3759_v10 = vmul.f32 %v11416_v20, %v3740_v62 }
 0x859   : > { %v3630_v63 = vsub.f32 1.5, %v3629_v14 }
 0x85a   : > { %v11469_v28 = vsub.f32 %v11389_v4, %v3477_v42  ;;  %v3778_v41 = vadd.f32 %v11424_v16, %v3759_v10  ;;  %v8884_v37 = vpop.eup %8883 }
 0x85b   : > { %v3631_v25 = vmul.f32 %v8882_v26, %v3630_v63  ;;  %v3637_v11 = vmul.f32 %v8884_v37, %v3566_v18  ;;  %vm3643_vm6 = vweird.f32 %v8884_v37 }
 0x85c   : > { %15495 = vst [vmem:[#allocation44_spill] sm:$0xff] %v11469_v28  ;;  %v3509_v21 = vmul.f32 %v11469_v28, %v11469_v28  ;;  %vm3644_vm8 = vmor %vm3642_vm7, %vm3643_vm6 }
 0x85d   : > { %v3635_v43 = vsel %vm3634_vm5, %v8882_v26, %v3631_v25  ;;  %v3638_v46 = vmul.f32 %v8884_v37, %v3637_v11 }
 0x85e   : > { %v3741_v5 = vmul.f32 %v3635_v43, %v11369_v12  ;;  %3538 = vadd.xlane.f32.xlu2 %v3509_v21 }
 0x85f   : > { %v3461_v2 = vpop.xlane.xlu0 %3460  ;;  %v3639_v61 = vmul.f32 0.5, %v3638_v46 }
 0x860   : > { %v3478_v1 = vmul.f32 %v3461_v2, %v15481_v3  ;;  %v3760_v19 = vmul.f32 %v11416_v20, %v3741_v5  ;;  %v3830_v2 = vld [vmem:[#allocation14] sm:$0xf] }
 0x861   : > { %v3640_v51 = vsub.f32 1.5, %v3639_v61  ;;  %v11500_v18 = vperm.slane %v3830_v2, 1 }
 0x862   : > { %v11479_v52 = vsub.f32 %v11394_v36, %v3478_v1  ;;  %v3779_v24 = vadd.f32 %v11424_v16, %v3760_v19  ;;  %v11498_v1 = vperm.slane %v3830_v2, 0 }
 0x863   : > { %v3641_v15 = vmul.f32 %v8884_v37, %v3640_v51 }
 0x864   : > { %15496 = vst [vmem:[#allocation45_spill] sm:$0xff] %v11479_v52  ;;  %v3792_v44 = vpack.c.bf16 %v3779_v24, %v3778_v41  ;;  %v3510_v12 = vmul.f32 %v11479_v52, %v11479_v52 }
 0x865   : > { %v3645_v54 = vsel %vm3644_vm8, %v8884_v37, %v3641_v15 }
 0x866   : > { %4018 = vmatmul.bf16.gmra.mxu0 %v3792_v44  ;;  %4067 = vmatmul.bf16.gmra.mxu1 %v3792_v44  ;;  %v3742_v35 = vmul.f32 %v3645_v54, %v11380_v23 }
 0x867   : > { %4116 = vmatmul.bf16.gmra.mxu2 %v3792_v44  ;;  %4165 = vmatmul.bf16.gmra.mxu3 %v3792_v44 }
 0x868   : > { %3540 = vadd.xlane.f32.xlu0 %v3510_v12  ;;  %v3761_v43 = vmul.f32 %v11416_v20, %v3742_v35 }
 0x86a   : > { %v3780_v56 = vadd.f32 %v11424_v16, %v3761_v43 }
 0x873   : > { %v3527_v32 = vpop.xlane.xlu1 %3526 }
 0x874   : > { %v3551_v34 = vmul.f32 %v3527_v32, %v15481_v3  ;;  %v11520_v32 = vperm.slane %v3830_v2, 2 }
 0x876   : > { %v3567_v48 = vadd.f32 1e-05, %v3551_v34  ;;  %15498 = vst [vmem:[#allocation47_spill] sm:$0xff] %v11520_v32 }
 0x878   : > { %8885 = vrsqrt.f32 %v3567_v48  ;;  %vm3652_vm10 = vweird.f32 %v3567_v48 }
 0x87b   : > { %v3529_v26 = vpop.xlane.xlu1 %3528 }
 0x87e   : > { %v8886_v39 = vpop.eup %8885 }
 0x87f   : > { %v3647_v30 = vmul.f32 %v8886_v39, %v3567_v48  ;;  %vm3653_vm9 = vweird.f32 %v8886_v39 }
 0x880   : > { %vm3654_vm11 = vmor %vm3652_vm10, %vm3653_vm9 }
 0x881   : > { %v3648_v45 = vmul.f32 %v8886_v39, %v3647_v30 }
 0x883   : > { %v3649_v40 = vmul.f32 0.5, %v3648_v45  ;;  %v3463_v58 = vpop.xlane.xlu1 %3462 }
 0x884   : > { %v3479_v38 = vmul.f32 %v3463_v58, %v15481_v3 }
 0x885   : > { %v3650_v14 = vsub.f32 1.5, %v3649_v40 }
 0x886   : > { %v11489_v42 = vsub.f32 %v11419_v9, %v3479_v38  ;;  %v3552_v38 = vmul.f32 %v3529_v26, %v15481_v3 }
 0x887   : > { %v3651_v63 = vmul.f32 %v8886_v39, %v3650_v14 }
 0x888   : > { %15497 = vst [vmem:[#allocation46_spill] sm:$0xff] %v11489_v42  ;;  %v3511_v62 = vmul.f32 %v11489_v42, %v11489_v42  ;;  %v11548_v43 = vadd.f32 1e-05, %v3552_v38 }
 0x889   : > { %v3655_v25 = vsel %vm3654_vm11, %v8886_v39, %v3651_v63  ;;  %v11528_v39 = vperm.slane %v3830_v2, 3 }
 0x88a   : > { %v3743_v21 = vmul.f32 %v3655_v25, %v11401_v27  ;;  %3542 = vadd.xlane.f32.xlu1 %v3511_v62  ;;  %8887 = vrsqrt.f32 %v11548_v43  ;;  %vm3662_vm13 = vweird.f32 %v11548_v43 }
 0x88b   : > { %15499 = vst [vmem:[#allocation48_spill] sm:$0xff] %v11528_v39 }
 0x88c   : > { %v3762_v5 = vmul.f32 %v11416_v20, %v3743_v21 }
 0x88e   : > { %v3781_v23 = vadd.f32 %v11424_v16, %v3762_v5 }
 0x890   : > { %v3793_v10 = vpack.c.bf16 %v3781_v23, %v3780_v56 }
 0x892   : > { %4023 = vmatmul.bf16.gmra.mxu0 %v3793_v10  ;;  %4072 = vmatmul.bf16.gmra.mxu1 %v3793_v10 }
 0x893   : > { %4121 = vmatmul.bf16.gmra.mxu2 %v3793_v10  ;;  %4170 = vmatmul.bf16.gmra.mxu3 %v3793_v10 }
 0x895   : > { %v4009_v19 = vpop.f32.mrf.mxu0  ;;  %v4058_v41 = vpop.f32.mrf.mxu1 }
 0x896   : > { %v11503_v27 = vadd.f32 %v4009_v19, %v11498_v1  ;;  %v11506_v24 = vadd.f32 %v4058_v41, %v11500_v18 }
 0x898   : > { %v11509_v44 = vmul.f32 0.70710677, %v11503_v27  ;;  %v11512_v12 = vmul.f32 0.70710677, %v11506_v24  ;;  %v11637_v59 = vmul.f32 0.5, %v11503_v27 }
 0x89a   : > { %v4324_v37 = vmul.f32 %v11509_v44, %v11509_v44  ;;  %v4364_v11 = vmul.f32 %v11512_v12, %v11512_v12 }
 0x89c   : > { %v11518_v46 = vmin.f32 %v4324_v37, 16.0  ;;  %v4107_v34 = vpop.f32.mrf.mxu2  ;;  %v11522_v48 = vmin.f32 %v4364_v11, 16.0  ;;  %v4156_v30 = vpop.f32.mrf.mxu3 }
 0x89d   : > { %v11526_v51 = vadd.f32 %v4107_v34, %v11520_v32  ;;  %v11535_v40 = vadd.f32 %v4156_v30, %v11528_v39  ;;  %v4011_v63 = vpop.f32.mrf.mxu0 }
 0x89e   : > { %v4337_v61 = vmul.f32 3.8918573e-05, %v11518_v46  ;;  %v4377_v15 = vmul.f32 3.8918573e-05, %v11522_v48  ;;  %v11546_v21 = vadd.f32 %v4011_v63, %v11498_v1  ;;  %v4326_v23 = vmul.f32 2.1237322e-06, %v11518_v46 }
 0x89f   : > { %v11532_v54 = vmul.f32 0.70710677, %v11526_v51  ;;  %v11542_v62 = vmul.f32 0.70710677, %v11535_v40  ;;  %v4366_v34 = vmul.f32 2.1237322e-06, %v11522_v48 }
 0x8a0   : > { %v4338_v45 = vadd.f32 0.001143296, %v4337_v61  ;;  %v4378_v58 = vadd.f32 0.001143296, %v4377_v15  ;;  %v11556_v2 = vmul.f32 0.70710677, %v11546_v21 }
 0x8a1   : > { %v4404_v35 = vmul.f32 %v11532_v54, %v11532_v54  ;;  %v4444_v26 = vmul.f32 %v11542_v62, %v11542_v62  ;;  %v4327_v11 = vadd.f32 0.00028619796, %v4326_v23 }
 0x8a2   : > { %v4339_v14 = vmul.f32 %v4338_v45, %v11518_v46  ;;  %v4379_v25 = vmul.f32 %v4378_v58, %v11522_v48  ;;  %v4484_v15 = vmul.f32 %v11556_v2, %v11556_v2  ;;  %v11567_v58 = vpop.eup %8887 }
 0x8a3   : > { %v11550_v56 = vmin.f32 %v4404_v35, 16.0  ;;  %v11561_v37 = vmin.f32 %v4444_v26, 16.0  ;;  %v4367_v35 = vadd.f32 0.00028619796, %v4366_v34  ;;  %v3657_v23 = vmul.f32 %v11567_v58, %v11548_v43 }
 0x8a4   : > { %v4340_v5 = vadd.f32 0.014752088, %v4339_v14  ;;  %v4380_v10 = vadd.f32 0.014752088, %v4379_v25  ;;  %v4328_v14 = vmul.f32 %v4327_v11, %v11518_v46  ;;  %v11571_v25 = vmin.f32 %v4484_v15, 16.0  ;;  %v4060_v11 = vpop.f32.mrf.mxu1 }
 0x8a5   : > { %v4417_v41 = vmul.f32 3.8918573e-05, %v11550_v56  ;;  %v4457_v38 = vmul.f32 3.8918573e-05, %v11561_v37  ;;  %v11584_v33 = vadd.f32 %v4060_v11, %v11500_v18  ;;  %vm3663_vm12 = vweird.f32 %v11567_v58 }
 0x8a6   : > { %v4341_v19 = vmul.f32 %v4340_v5, %v11518_v46  ;;  %v4381_v61 = vmul.f32 %v4380_v10, %v11522_v48  ;;  %v4497_v36 = vmul.f32 3.8918573e-05, %v11571_v25  ;;  %vm3664_vm14 = vmor %vm3662_vm13, %vm3663_vm12 }
 0x8a7   : > { %v4418_v45 = vadd.f32 0.001143296, %v4417_v41  ;;  %v4458_v10 = vadd.f32 0.001143296, %v4457_v38  ;;  %v4368_v41 = vmul.f32 %v4367_v35, %v11522_v48 }
 0x8a8   : > { %v4342_v30 = vadd.f32 0.112945676, %v4341_v19  ;;  %v4382_v63 = vadd.f32 0.112945676, %v4381_v61  ;;  %v4329_v19 = vadd.f32 0.0036580483, %v4328_v14 }
 0x8a9   : > { %v4419_v26 = vmul.f32 %v4418_v45, %v11550_v56  ;;  %v4406_v61 = vmul.f32 2.1237322e-06, %v11550_v56  ;;  %v4459_v45 = vmul.f32 %v4458_v10, %v11561_v37  ;;  %v4369_v14 = vadd.f32 0.0036580483, %v4368_v41 }
 0x8aa   : > { %v4343_v5 = vmul.f32 %v4342_v30, %v11518_v46  ;;  %v4383_v9 = vmul.f32 %v4382_v63, %v11522_v48  ;;  %v3658_v30 = vmul.f32 %v11567_v58, %v3657_v23  ;;  %v4330_v38 = vmul.f32 %v4329_v19, %v11518_v46  ;;  %v4109_v23 = vpop.f32.mrf.mxu2 }
 0x8ab   : > { %v4420_v15 = vadd.f32 0.014752088, %v4419_v26  ;;  %v4498_v8 = vadd.f32 0.001143296, %v4497_v36  ;;  %v4407_v4 = vadd.f32 0.00028619796, %v4406_v61  ;;  %v4370_v11 = vmul.f32 %v4369_v14, %v11522_v48 }
 0x8ac   : > { %v4344_v34 = vadd.f32 0.4994258, %v4343_v5  ;;  %v4384_v35 = vadd.f32 0.4994258, %v4383_v9  ;;  %v3659_v0 = vmul.f32 0.5, %v3658_v30 }
 0x8ad   : > { %v4421_v5 = vmul.f32 %v4420_v15, %v11550_v56  ;;  %v4460_v49 = vadd.f32 0.014752088, %v4459_v45  ;;  %v11590_v26 = vmul.f32 0.70710677, %v11584_v33  ;;  %v4331_v10 = vadd.f32 0.05243302, %v4330_v38 }
 0x8ae   : > { %v4345_v63 = vmul.f32 %v4344_v34, %v11518_v46  ;;  %v4385_v31 = vmul.f32 %v4384_v35, %v11522_v48  ;;  %v4499_v19 = vmul.f32 %v4498_v8, %v11571_v25  ;;  %v4408_v36 = vmul.f32 %v4407_v4, %v11550_v56 }
 0x8af   : > { %v4422_v41 = vadd.f32 0.112945676, %v4421_v5  ;;  %v4446_v34 = vmul.f32 2.1237322e-06, %v11561_v37  ;;  %v3660_v61 = vsub.f32 1.5, %v3659_v0  ;;  %v11600_v15 = vadd.f32 %v4109_v23, %v11520_v32 }
 0x8b0   : > { %v11595_v9 = vadd.f32 1.0, %v4345_v63  ;;  %v4461_v30 = vmul.f32 %v4460_v49, %v11561_v37  ;;  %v4524_v45 = vmul.f32 %v11590_v26, %v11590_v26  ;;  %v4332_v38 = vmul.f32 %v4331_v10, %v11518_v46 }
 0x8b1   : > { %v4371_v14 = vadd.f32 0.05243302, %v4370_v11  ;;  %v11606_v8 = vadd.f32 1.0, %v4385_v31  ;;  %v4500_v35 = vadd.f32 0.014752088, %v4499_v19  ;;  %v4423_v63 = vmul.f32 %v4422_v41, %v11550_v56 }
 0x8b2   : > { %8889 = vrcp.f32 %v11595_v9  ;;  %v4409_v4 = vadd.f32 0.0036580483, %v4408_v36  ;;  %v4447_v0 = vadd.f32 0.00028619796, %v4446_v34  ;;  %v3661_v5 = vmul.f32 %v11567_v58, %v3660_v61  ;;  %v3531_v61 = vpop.xlane.xlu2 %3530 }
 0x8b3   : > { %v11613_v49 = vmul.f32 0.70710677, %v11600_v15  ;;  %v4462_v23 = vadd.f32 0.112945676, %v4461_v30  ;;  %v11616_v10 = vmin.f32 %v4524_v45, 16.0  ;;  %v4372_v11 = vmul.f32 %v4371_v14, %v11522_v48  ;;  %v4158_v14 = vpop.f32.mrf.mxu3 }
 0x8b4   : > { %v4333_v31 = vadd.f32 0.18741608, %v4332_v38  ;;  %8891 = vrcp.f32 %v11606_v8  ;;  %v4501_v19 = vmul.f32 %v4500_v35, %v11571_v25  ;;  %v4410_v36 = vmul.f32 %v4409_v4, %v11550_v56 }
 0x8b5   : > { %v4424_v41 = vadd.f32 0.4994258, %v4423_v63  ;;  %v4448_v34 = vmul.f32 %v4447_v0, %v11561_v37  ;;  %v3665_v47 = vsel %vm3664_vm14, %v11567_v58, %v3661_v5  ;;  %v4564_v43 = vmul.f32 %v11613_v49, %v11613_v49 }
 0x8b6   : > { %v4463_v45 = vmul.f32 %v4462_v23, %v11561_v37  ;;  %v4537_v38 = vmul.f32 3.8918573e-05, %v11616_v10  ;;  %v4334_v35 = vmul.f32 %v4333_v31, %v11518_v46  ;;  %v4373_v55 = vadd.f32 0.18741608, %v4372_v11 }
 0x8b7   : > { %v4502_v4 = vadd.f32 0.112945676, %v4501_v19  ;;  %v3553_v63 = vmul.f32 %v3531_v61, %v15481_v3  ;;  %v3744_v0 = vmul.f32 %v3665_v47, %v11407_v53  ;;  %v4411_v50 = vadd.f32 0.05243302, %v4410_v36 }
 0x8b8   : > { %v11626_v30 = vpop.eup %8889  ;;  %v4425_v58 = vmul.f32 %v4424_v41, %v11550_v56  ;;  %v4449_v5 = vadd.f32 0.0036580483, %v4448_v34  ;;  %v11641_v29 = vmin.f32 %v4564_v43, 16.0  ;;  %v11644_v46 = vadd.f32 %v4158_v14, %v11528_v39 }
 0x8b9   : > { %v4348_v23 = vmul.f32 %v11626_v30, %v11595_v9  ;;  %v11647_v31 = vmul.f32 0.5, %v11506_v24  ;;  %v11650_v47 = vmul.f32 0.5, %v11526_v51  ;;  %v4464_v53 = vadd.f32 0.4994258, %v4463_v45 }
 0x8ba   : > { %v11634_v6 = vpop.eup %8891  ;;  %v4538_v11 = vadd.f32 0.001143296, %v4537_v38  ;;  %v4335_v19 = vadd.f32 1.1283791, %v4334_v35  ;;  %v4374_v27 = vmul.f32 %v4373_v55, %v11522_v48  ;;  %v4503_v36 = vmul.f32 %v4502_v4, %v11571_v25 }
 0x8bb   : > { %v11654_v41 = vadd.f32 1e-05, %v3553_v63  ;;  %v4388_v34 = vmul.f32 %v11634_v6, %v11606_v8  ;;  %v4412_v61 = vmul.f32 %v4411_v50, %v11550_v56  ;;  %v11659_v43 = vadd.f32 1.0, %v4425_v58 }
 0x8bc   : > { %v4450_v24 = vmul.f32 %v4449_v5, %v11561_v37  ;;  %v4349_v51 = vsub.f32 1.0, %v4348_v23  ;;  %v4577_v45 = vmul.f32 3.8918573e-05, %v11641_v29  ;;  %v11664_v38 = vmul.f32 0.70710677, %v11644_v46 }
 0x8bd   : > { %8893 = vrsqrt.f32 %v11654_v41  ;;  %v11668_v55 = vmul.f32 0.5, %v11535_v40  ;;  %v4465_v48 = vmul.f32 %v4464_v53, %v11561_v37  ;;  %v4486_v14 = vmul.f32 2.1237322e-06, %v11571_v25 }
 0x8be   : > { %v4539_v50 = vmul.f32 %v4538_v11, %v11616_v10  ;;  %v11674_v35 = vmul.f32 %v4335_v19, %v11509_v44  ;;  %v4375_v4 = vadd.f32 1.1283791, %v4374_v27  ;;  %v4504_v63 = vadd.f32 0.4994258, %v4503_v36 }
 0x8bf   : > { %v11677_v58 = vmul.f32 %v11416_v20, %v3744_v0  ;;  %v4356_v5 = vand.u32 2147483647, %v11595_v9  ;;  %v4413_v23 = vadd.f32 0.18741608, %v4412_v61  ;;  %8895 = vrcp.f32 %v11659_v43 }
 0x8c0   : > { %v4451_v40 = vadd.f32 0.05243302, %v4450_v24  ;;  %v4350_v53 = vmul.f32 %v11626_v30, %v4349_v51  ;;  %v4389_v60 = vsub.f32 1.0, %v4388_v34  ;;  %v4578_v7 = vadd.f32 0.001143296, %v4577_v45 }
 0x8c1   : > { %v4604_v11 = vmul.f32 %v11664_v38, %v11664_v38  ;;  %vm4352_vm15 = vweird.f32 %v11595_v9  ;;  %v11685_v44 = vadd.f32 1.0, %v4465_v48  ;;  %v4487_v19 = vadd.f32 0.00028619796, %v4486_v14 }
 0x8c2   : > { %v4540_v0 = vadd.f32 0.014752088, %v4539_v50  ;;  %v4358_v36 = vand.u32 2147483648, %v11595_v9  ;;  %v11691_v61 = vmul.f32 %v4375_v4, %v11512_v12  ;;  %v4396_v24 = vand.u32 2147483647, %v11606_v8 }
 0x8c3   : > { %v11687_v27 = vpop.eup %8893  ;;  %v4505_v34 = vmul.f32 %v4504_v63, %v11571_v25  ;;  %vm4353_vm0 = vweird.f32 %v11626_v30  ;;  %vm4392_vm2 = vweird.f32 %v11606_v8  ;;  %v4414_v51 = vmul.f32 %v4413_v23, %v11550_v56 }
 0x8c4   : > { %v4452_v45 = vmul.f32 %v4451_v40, %v11561_v37  ;;  %v3667_v48 = vmul.f32 %v11687_v27, %v11654_v41  ;;  %v4351_v14 = vadd.f32 %v11626_v30, %v4350_v53  ;;  %v4390_v12 = vmul.f32 %v11634_v6, %v4389_v60  ;;  %vm11725_vm1 = vmor %vm4352_vm15, %vm4353_vm0 }
 0x8c5   : > { %v4579_v50 = vmul.f32 %v4578_v7, %v11641_v29  ;;  %v11704_v4 = vmin.f32 %v4604_v11, 16.0  ;;  %v11706_v63 = vpop.eup %8895  ;;  %8897 = vrcp.f32 %v11685_v44  ;;  %v4488_v42 = vmul.f32 %v4487_v19, %v11571_v25 }
 0x8c6   : > { %v4541_v56 = vmul.f32 %v4540_v0, %v11616_v10  ;;  %v3668_v23 = vmul.f32 %v11687_v27, %v3667_v48  ;;  %vm11712_vm3 = vcmp.eq.f32.partialorder %v4356_v5, 8.507059e+37  ;;  %v4359_v53 = vor.u32 1.1754944e-38, %v4358_v36 }
 0x8c7   : > { %v4398_v60 = vand.u32 2147483648, %v11606_v8  ;;  %v11717_v7 = vadd.f32 1.0, %v4505_v34  ;;  %vm4393_vm4 = vweird.f32 %v11634_v6  ;;  %v4415_v11 = vadd.f32 1.1283791, %v4414_v51 }
 0x8c8   : > { %v4453_v52 = vadd.f32 0.18741608, %v4452_v45  ;;  %v4526_v28 = vmul.f32 2.1237322e-06, %v11616_v10  ;;  %v4391_v19 = vadd.f32 %v11634_v6, %v4390_v12  ;;  %vm11730_vm5 = vcmp.eq.f32.partialorder %v4396_v24, 8.507059e+37  ;;  %vm11753_vm7 = vmor %vm4392_vm2, %vm4393_vm4 }
 0x8c9   : > { %v4580_v36 = vadd.f32 0.014752088, %v4579_v50  ;;  %v4617_v34 = vmul.f32 3.8918573e-05, %v11704_v4  ;;  %v3669_v51 = vmul.f32 0.5, %v3668_v23  ;;  %v4355_v45 = vsel %vm11725_vm1, %v11626_v30, %v4351_v14 }
 0x8ca   : > { %v4428_v9 = vmul.f32 %v11706_v63, %v11659_v43  ;;  %v4489_v48 = vadd.f32 0.0036580483, %v4488_v42  ;;  %v4542_v17 = vadd.f32 0.112945676, %v4541_v56  ;;  %8899 = vrcp.f32 %v11717_v7 }
 0x8cb   : > { %v4566_v24 = vmul.f32 2.1237322e-06, %v11641_v29  ;;  %v3670_v12 = vsub.f32 1.5, %v3669_v51  ;;  %vm3673_vm6 = vweird.f32 %v11687_v27  ;;  %v11743_v50 = vpop.eup %8897  ;;  %v4399_v22 = vor.u32 1.1754944e-38, %v4398_v60 }
 0x8cc   : > { %v11746_v23 = vmul.f32 %v4415_v11, %v11532_v54  ;;  %v4454_v30 = vmul.f32 %v4453_v52, %v11561_v37  ;;  %v4527_v14 = vadd.f32 0.00028619796, %v4526_v28  ;;  %v4581_v56 = vmul.f32 %v4580_v36, %v11641_v29 }
 0x8cd   : > { %v4618_v5 = vadd.f32 0.001143296, %v4617_v34  ;;  %v3671_v51 = vmul.f32 %v11687_v27, %v3670_v12  ;;  %vm3672_vm8 = vweird.f32 %v11654_v41  ;;  %v4360_v54 = vsel %vm11712_vm3, %v4359_v53, %v4355_v45 }
 0x8ce   : > { %v4429_v52 = vsub.f32 1.0, %v4428_v9  ;;  %v4490_v28 = vmul.f32 %v4489_v48, %v11571_v25  ;;  %v4543_v37 = vmul.f32 %v4542_v17, %v11616_v10  ;;  %vm3674_vm9 = vmor %vm3672_vm8, %vm3673_vm6  ;;  %v4395_v8 = vsel %vm11753_vm7, %v11634_v6, %v4391_v19 }
 0x8cf   : > { %v4468_v60 = vmul.f32 %v11743_v50, %v11685_v44  ;;  %v4567_v11 = vadd.f32 0.00028619796, %v4566_v24  ;;  %v3675_v41 = vsel %vm3674_vm9, %v11687_v27, %v3671_v51  ;;  %v4438_v40 = vand.u32 2147483648, %v11659_v43 }
 0x8d0   : > { %v4455_v53 = vadd.f32 1.1283791, %v4454_v30  ;;  %v4528_v36 = vmul.f32 %v4527_v14, %v11616_v10  ;;  %v3745_v17 = vmul.f32 %v3675_v41, %v11436_v57  ;;  %v11775_v34 = vpop.eup %8899  ;;  %v11778_v45 = vmul.f32 %v4360_v54, %v11674_v35 }
 0x8d1   : > { %v4436_v6 = vand.u32 2147483647, %v11659_v43  ;;  %v4582_v19 = vadd.f32 0.112945676, %v4581_v56  ;;  %v4619_v9 = vmul.f32 %v4618_v5, %v11704_v4  ;;  %v4400_v27 = vsel %vm11730_vm5, %v4399_v22, %v4395_v8 }
 0x8d2   : > { %v4430_v48 = vmul.f32 %v11706_v63, %v4429_v52  ;;  %v4491_v24 = vadd.f32 0.05243302, %v4490_v28  ;;  %v4544_v12 = vadd.f32 0.4994258, %v4543_v37  ;;  %vm4432_vm10 = vweird.f32 %v11659_v43 }
 0x8d3   : > { %v4469_v57 = vsub.f32 1.0, %v4468_v60  ;;  %v4568_v30 = vmul.f32 %v4567_v11, %v11641_v29  ;;  %v3764_v35 = vmul.f32 %v11416_v20, %v3745_v17  ;;  %v4439_v14 = vor.u32 1.1754944e-38, %v4438_v40  ;;  %v4014_v37 = vpop.f32.mrf.mxu0 }
 0x8d4   : > { %v11789_v42 = vmul.f32 %v4455_v53, %v11542_v62  ;;  %v4508_v56 = vmul.f32 %v11775_v34, %v11717_v7  ;;  %v4529_v0 = vadd.f32 0.0036580483, %v4528_v36  ;;  %v11794_v22 = vmul.f32 %v4400_v27, %v11691_v61 }
 0x8d5   : > { %vm4433_vm11 = vweird.f32 %v11706_v63  ;;  %vm11797_vm12 = vcmp.eq.f32.partialorder %v4436_v6, 8.507059e+37  ;;  %v4583_v51 = vmul.f32 %v4582_v19, %v11641_v29  ;;  %v4620_v20 = vadd.f32 0.014752088, %v4619_v9 }
 0x8d6   : > { %v8106_v54 = vclamps-f32 %v11778_v45, 1.0  ;;  %v4431_v62 = vadd.f32 %v11706_v63, %v4430_v48  ;;  %v4492_v52 = vmul.f32 %v4491_v24, %v11571_v25  ;;  %v4545_v28 = vmul.f32 %v4544_v12, %v11616_v10  ;;  %vm11817_vm14 = vmor %vm4432_vm10, %vm4433_vm11 }
 0x8d7   : > { %v4470_v61 = vmul.f32 %v11743_v50, %v4469_v57  ;;  %v4569_v8 = vadd.f32 0.0036580483, %v4568_v30  ;;  %v3782_v60 = vadd.f32 %v11424_v16, %v11677_v58  ;;  %v3783_v11 = vadd.f32 %v11424_v16, %v3764_v35 }
 0x8d8   : > { %vm4472_vm13 = vweird.f32 %v11685_v44  ;;  %v4476_v41 = vand.u32 2147483647, %v11685_v44  ;;  %v4509_v40 = vsub.f32 1.0, %v4508_v56  ;;  %v4530_v53 = vmul.f32 %v4529_v0, %v11616_v10 }
 0x8d9   : > { %v4584_v17 = vadd.f32 0.4994258, %v4583_v51  ;;  %v4621_v58 = vmul.f32 %v4620_v20, %v11704_v4  ;;  %v3794_v6 = vpack.c.bf16 %v3783_v11, %v3782_v60  ;;  %v11823_v16 = vadd.f32 %v4014_v37, %v11498_v1 }
 0x8da   : > { %v4435_v19 = vsel %vm11817_vm14, %v11706_v63, %v4431_v62  ;;  %v4478_v9 = vand.u32 2147483648, %v11685_v44  ;;  %v4493_v27 = vadd.f32 0.18741608, %v4492_v52  ;;  %v11829_v48 = vadd.f32 1.0, %v4545_v28 }
 0x8db   : > { %v4471_v43 = vadd.f32 %v11743_v50, %v4470_v61  ;;  %vm4473_vm15 = vweird.f32 %v11743_v50  ;;  %v4570_v24 = vmul.f32 %v4569_v8, %v11641_v29  ;;  %4028 = vmatmul.bf16.gmra.mxu0 %v3794_v6  ;;  %4077 = vmatmul.bf16.gmra.mxu1 %v3794_v6  ;;  %v11835_v12 = vmul.f32 0.70710677, %v11823_v16 }
 0x8dc   : > { %v8107_v57 = vclamps-f32 %v11794_v22, 1.0  ;;  %v4510_v63 = vmul.f32 %v11775_v34, %v4509_v40  ;;  %v4531_v30 = vadd.f32 0.05243302, %v4530_v53  ;;  %v4606_v35 = vmul.f32 2.1237322e-06, %v11704_v4  ;;  %4126 = vmatmul.bf16.gmra.mxu2 %v3794_v6  ;;  %4175 = vmatmul.bf16.gmra.mxu3 %v3794_v6  ;;  %vm11853_vm2 = vmor %vm4472_vm13, %vm4473_vm15 }
 0x8dd   : > { %vm11840_vm0 = vcmp.eq.f32.partialorder %v4476_v41, 8.507059e+37  ;;  %v4585_v0 = vmul.f32 %v4584_v17, %v11641_v29  ;;  %v4622_v51 = vadd.f32 0.112945676, %v4621_v58  ;;  %v4644_v20 = vmul.f32 %v11835_v12, %v11835_v12  ;;  %v3533_v41 = vpop.xlane.xlu2 %3532 }
 0x8de   : > { %v4440_v62 = vsel %vm11797_vm12, %v4439_v14, %v4435_v19  ;;  %v4479_v28 = vor.u32 1.1754944e-38, %v4478_v9  ;;  %v4494_v37 = vmul.f32 %v4493_v27, %v11571_v25  ;;  %8901 = vrcp.f32 %v11829_v48 }
 0x8df   : > { %v4475_v61 = vsel %vm11853_vm2, %v11743_v50, %v4471_v43  ;;  %v4518_v5 = vand.u32 2147483648, %v11717_v7  ;;  %v4571_v14 = vadd.f32 0.05243302, %v4570_v24  ;;  %v11863_v8 = vmin.f32 %v4644_v20, 16.0  ;;  %v3535_v50 = vpop.xlane.xlu0 %3534 }
 0x8e0   : > { %v4511_v44 = vadd.f32 %v11775_v34, %v4510_v63  ;;  %vm4513_vm3 = vweird.f32 %v11775_v34  ;;  %v4532_v60 = vmul.f32 %v4531_v30, %v11616_v10  ;;  %v4607_v11 = vadd.f32 0.00028619796, %v4606_v35 }
 0x8e1   : > { %v4441_v25 = vmul.f32 %v4440_v62, %v11746_v23  ;;  %v11869_v40 = vadd.f32 1.0, %v4585_v0  ;;  %v4623_v53 = vmul.f32 %v4622_v51, %v11704_v4  ;;  %v4657_v36 = vmul.f32 3.8918573e-05, %v11863_v8 }
 0x8e2   : > { %v4480_v17 = vsel %vm11840_vm0, %v4479_v28, %v4475_v61  ;;  %v4495_v58 = vadd.f32 1.1283791, %v4494_v37  ;;  %vm4512_vm4 = vweird.f32 %v11717_v7  ;;  %v4516_v6 = vand.u32 2147483647, %v11717_v7 }
 0x8e3   : > { %vm11877_vm1 = vmor %vm4512_vm4, %vm4513_vm3  ;;  %v4519_v23 = vor.u32 1.1754944e-38, %v4518_v5  ;;  %v4572_v9 = vmul.f32 %v4571_v14, %v11641_v29  ;;  %v3554_v27 = vmul.f32 %v3533_v41, %v15481_v3  ;;  %v4658_v43 = vadd.f32 0.001143296, %v4657_v36 }
 0x8e4   : > { %v11883_v24 = vpop.eup %8901  ;;  %v4515_v63 = vsel %vm11877_vm1, %v11775_v34, %v4511_v44  ;;  %v4533_v30 = vadd.f32 0.18741608, %v4532_v60  ;;  %v4608_v35 = vmul.f32 %v4607_v11, %v11704_v4  ;;  %v3555_v7 = vmul.f32 %v3535_v50, %v15481_v3 }
 0x8e5   : > { %v4481_v56 = vmul.f32 %v4480_v17, %v11789_v42  ;;  %8903 = vrcp.f32 %v11869_v40  ;;  %v4624_v0 = vadd.f32 0.4994258, %v4623_v53  ;;  %v4659_v51 = vmul.f32 %v4658_v43, %v11863_v8 }
 0x8e6   : > { %v6884_v20 = vadd.f32 1.0, %v8106_v54  ;;  %v8108_v62 = vclamps-f32 %v4441_v25, 1.0  ;;  %v4496_v52 = vmul.f32 %v4495_v58, %v11556_v2  ;;  %vm4517_vm5 = vcmp.eq.f32.partialorder %v4516_v6, 8.507059e+37 }
 0x8e7   : > { %v4520_v34 = vsel %vm4517_vm5, %v4519_v23, %v4515_v63  ;;  %v4548_v28 = vmul.f32 %v11883_v24, %v11829_v48  ;;  %v4573_v37 = vadd.f32 0.18741608, %v4572_v9  ;;  %v11898_v61 = vadd.f32 1e-05, %v3554_v27 }
 0x8e8   : > { %v4534_v42 = vmul.f32 %v4533_v30, %v11616_v10  ;;  %v4609_v5 = vadd.f32 0.0036580483, %v4608_v35  ;;  %v11901_v14 = vadd.f32 1e-05, %v3555_v7  ;;  %v4660_v44 = vadd.f32 0.014752088, %v4659_v51  ;;  %v3537_v35 = vpop.xlane.xlu1 %3536 }
 0x8e9   : > { %v8109_v60 = vclamps-f32 %v4481_v56, 1.0  ;;  %v4200_v45 = vmul.f32 0.5, %v11546_v21  ;;  %v11905_v54 = vmul.f32 0.5, %v11584_v33  ;;  %v4625_v2 = vmul.f32 %v4624_v0, %v11704_v4 }
 0x8ea   : > { %v6885_v11 = vadd.f32 1.0, %v8107_v57  ;;  %v6886_v41 = vadd.f32 1.0, %v8108_v62  ;;  %v4521_v25 = vmul.f32 %v4520_v34, %v4496_v52  ;;  %v11911_v53 = vmul.f32 0.5, %v11600_v15  ;;  %v4063_v57 = vpop.f32.mrf.mxu1 }
 0x8eb   : > { %v11913_v10 = vpop.eup %8903  ;;  %v11916_v50 = vmul.f32 %v6884_v20, %v11637_v59  ;;  %v4549_v36 = vsub.f32 1.0, %v4548_v28  ;;  %v4574_v21 = vmul.f32 %v4573_v37, %v11641_v29  ;;  %8905 = vrsqrt.f32 %v11898_v61 }
 0x8ec   : > { %v4535_v33 = vadd.f32 1.1283791, %v4534_v42  ;;  %v4610_v17 = vmul.f32 %v4609_v5, %v11704_v4  ;;  %8907 = vrsqrt.f32 %v11901_v14  ;;  %v4661_v22 = vmul.f32 %v4660_v44, %v11863_v8 }
 0x8ed   : > { %15518 = vst [vmem:[#allocation49_spill] sm:$0xff] %v11916_v50  ;;  %v6887_v15 = vadd.f32 1.0, %v8109_v60  ;;  %v4556_v58 = vand.u32 2147483647, %v11829_v48  ;;  %v11924_v6 = vadd.f32 1.0, %v4625_v2  ;;  %v11927_v59 = vadd.f32 %v4063_v57, %v11500_v18 }
 0x8ee   : > { %v11930_v29 = vmul.f32 %v6885_v11, %v11647_v31  ;;  %v11933_v19 = vmul.f32 %v6886_v41, %v11650_v47  ;;  %v8110_v23 = vclamps-f32 %v4521_v25, 1.0  ;;  %v4588_v9 = vmul.f32 %v11913_v10, %v11869_v40  ;;  %v4161_v25 = vpop.f32.mrf.mxu3 }
 0x8ef   : > { %v4550_v27 = vmul.f32 %v11883_v24, %v4549_v36  ;;  %v4558_v43 = vand.u32 2147483648, %v11829_v48  ;;  %v4575_v63 = vadd.f32 1.1283791, %v4574_v21  ;;  %v11940_v30 = vmul.f32 0.5, %v11644_v46 }
 0x8f0   : > { %15519 = vst [vmem:[#allocation50_spill] sm:$0xff] %v11930_v29  ;;  %v11943_v7 = vmul.f32 %v4535_v33, %v11590_v26  ;;  %v4611_v31 = vadd.f32 0.05243302, %v4610_v17  ;;  %v4662_v56 = vadd.f32 0.112945676, %v4661_v22  ;;  %v11951_v51 = vmul.f32 %v6887_v15, %v11668_v55  ;;  %v3539_v22 = vpop.xlane.xlu2 %3538 }
 0x8f1   : > { %15520 = vst [vmem:[#allocation51_spill] sm:$0xff] %v11933_v19  ;;  %v11946_v47 = vmul.f32 0.70710677, %v11927_v59  ;;  %v11948_v0 = vpop.eup %8905  ;;  %vm4552_vm6 = vweird.f32 %v11829_v48  ;;  %vm11954_vm7 = vcmp.eq.f32.partialorder %v4556_v58, 8.507059e+37  ;;  %8909 = vrcp.f32 %v11924_v6 }
 0x8f2   : > { %15521 = vst [vmem:[#allocation52_spill] sm:$0xff] %v11951_v51  ;;  %v11959_v26 = vpop.eup %8907  ;;  %v6888_v46 = vadd.f32 1.0, %v8110_v23  ;;  %v4589_v62 = vsub.f32 1.0, %v4588_v9  ;;  %v3556_v52 = vmul.f32 %v3537_v35, %v15481_v3  ;;  %v4551_v55 = vadd.f32 %v11883_v24, %v4550_v27 }
 0x8f3   : > { %v4684_v34 = vmul.f32 %v11946_v47, %v11946_v47  ;;  %vm4553_vm8 = vweird.f32 %v11883_v24  ;;  %v4559_v28 = vor.u32 1.1754944e-38, %v4558_v43  ;;  %v11967_v37 = vmul.f32 %v4575_v63, %v11613_v49  ;;  %v4112_v49 = vpop.f32.mrf.mxu2 }
 0x8f4   : > { %v4612_v42 = vmul.f32 %v4611_v31, %v11704_v4  ;;  %v3677_v5 = vmul.f32 %v11948_v0, %v11898_v61  ;;  %v4663_v44 = vmul.f32 %v4662_v56, %v11863_v8  ;;  %vm4592_vm9 = vweird.f32 %v11869_v40  ;;  %vm11984_vm10 = vmor %vm4552_vm6, %vm4553_vm8 }
 0x8f5   : > { %v11973_v60 = vmin.f32 %v4684_v34, 16.0  ;;  %v4596_v2 = vand.u32 2147483647, %v11869_v40  ;;  %v4598_v11 = vand.u32 2147483648, %v11869_v40  ;;  %v3687_v41 = vmul.f32 %v11959_v26, %v11901_v14 }
 0x8f6   : > { %v11980_v36 = vmul.f32 %v6888_v46, %v4200_v45  ;;  %v4590_v33 = vmul.f32 %v11913_v10, %v4589_v62  ;;  %v11989_v17 = vadd.f32 1e-05, %v3556_v52  ;;  %v11992_v57 = vadd.f32 %v4112_v49, %v11520_v32 }
 0x8f7   : > { %v11994_v15 = vpop.eup %8909  ;;  %v4555_v45 = vsel %vm11984_vm10, %v11883_v24, %v4551_v55  ;;  %v4646_v48 = vmul.f32 2.1237322e-06, %v11863_v8  ;;  %v4697_v58 = vmul.f32 3.8918573e-05, %v11973_v60  ;;  %v12002_v23 = vadd.f32 %v4161_v25, %v11528_v39 }
 0x8f8   : > { %15524 = vst [vmem:[#allocation53_spill] sm:$0xff] %v11980_v36  ;;  %vm4593_vm11 = vweird.f32 %v11913_v10  ;;  %v4613_v9 = vadd.f32 0.18741608, %v4612_v42  ;;  %v3678_v27 = vmul.f32 %v11948_v0, %v3677_v5  ;;  %v4664_v43 = vadd.f32 0.4994258, %v4663_v44 }
 0x8f9   : > { %v3688_v63 = vmul.f32 %v11959_v26, %v3687_v41  ;;  %v3557_v35 = vmul.f32 %v3539_v22, %v15481_v3  ;;  %v12009_v31 = vmul.f32 0.70710677, %v11992_v57  ;;  %v12012_v24 = vmul.f32 0.70710677, %v12002_v23  ;;  %vm12035_vm13 = vmor %vm4592_vm9, %vm4593_vm11 }
 0x8fa   : > { %v4560_v56 = vsel %vm11954_vm7, %v4559_v28, %v4555_v45  ;;  %v4591_v46 = vadd.f32 %v11913_v10, %v4590_v33  ;;  %v4628_v62 = vmul.f32 %v11994_v15, %v11924_v6  ;;  %8911 = vrsqrt.f32 %v11989_v17 }
 0x8fb   : > { %v4647_v52 = vadd.f32 0.00028619796, %v4646_v48  ;;  %v4698_v34 = vadd.f32 0.001143296, %v4697_v58  ;;  %v4724_v55 = vmul.f32 %v12009_v31, %v12009_v31  ;;  %v4764_v42 = vmul.f32 %v12012_v24, %v12012_v24 }
 0x8fc   : > { %vm12026_vm12 = vcmp.eq.f32.partialorder %v4596_v2, 8.507059e+37  ;;  %v4599_v28 = vor.u32 1.1754944e-38, %v4598_v11  ;;  %v4665_v44 = vmul.f32 %v4664_v43, %v11863_v8  ;;  %v3689_v49 = vmul.f32 0.5, %v3688_v63  ;;  %v4016_v63 = vpop.f32.mrf.mxu0 }
 0x8fd   : > { %v12039_v25 = vadd.f32 1e-05, %v3557_v35  ;;  %v12041_v21 = vmin.f32 %v4724_v55, 16.0  ;;  %v12043_v2 = vmin.f32 %v4764_v42, 16.0  ;;  %v4561_v33 = vmul.f32 %v4560_v56, %v11943_v7 }
 0x8fe   : > { %v4595_v11 = vsel %vm12035_vm13, %v11913_v10, %v4591_v46  ;;  %v4614_v22 = vmul.f32 %v4613_v9, %v11704_v4  ;;  %v3679_v40 = vmul.f32 0.5, %v3678_v27  ;;  %v4629_v45 = vsub.f32 1.0, %v4628_v62 }
 0x8ff   : > { %v4648_v48 = vmul.f32 %v4647_v52, %v11863_v8  ;;  %v4699_v58 = vmul.f32 %v4698_v34, %v11973_v60  ;;  %v4737_v43 = vmul.f32 3.8918573e-05, %v12041_v21  ;;  %vm3682_vm14 = vweird.f32 %v11898_v61 }
 0x900   : > { %v12053_v35 = vpop.eup %8911  ;;  %vm3683_vm15 = vweird.f32 %v11948_v0  ;;  %vm3692_vm0 = vweird.f32 %v11901_v14  ;;  %v12058_v10 = vadd.f32 1.0, %v4665_v44  ;;  %v4777_v4 = vmul.f32 3.8918573e-05, %v12043_v2 }
 0x901   : > { %v4600_v7 = vsel %vm12026_vm12, %v4599_v28, %v4595_v11  ;;  %v3690_v9 = vsub.f32 1.5, %v3689_v49  ;;  %8913 = vrsqrt.f32 %v12039_v25  ;;  %v4738_v27 = vadd.f32 0.001143296, %v4737_v43  ;;  %vm12101_vm5 = vmor %vm3682_vm14, %vm3683_vm15 }
 0x902   : > { %v8111_v56 = vclamps-f32 %v4561_v33, 1.0  ;;  %v4615_v46 = vadd.f32 1.1283791, %v4614_v22  ;;  %v3680_v62 = vsub.f32 1.5, %v3679_v40  ;;  %v12065_v52 = vadd.f32 %v4016_v63, %v11498_v1 }
 0x903   : > { %v4630_v34 = vmul.f32 %v11994_v15, %v4629_v45  ;;  %v4649_v55 = vadd.f32 0.0036580483, %v4648_v48  ;;  %v4700_v42 = vadd.f32 0.014752088, %v4699_v58  ;;  %v4739_v44 = vmul.f32 %v4738_v27, %v12041_v21 }
 0x904   : > { %v4601_v41 = vmul.f32 %v4600_v7, %v11967_v37  ;;  %v3697_v20 = vmul.f32 %v12053_v35, %v11989_v17  ;;  %8915 = vrcp.f32 %v12058_v10  ;;  %v4778_v28 = vadd.f32 0.001143296, %v4777_v4 }
 0x905   : > { %v4638_v49 = vand.u32 2147483648, %v11924_v6  ;;  %v3691_v33 = vmul.f32 %v11959_v26, %v3690_v9  ;;  %vm3693_vm2 = vweird.f32 %v11959_v26  ;;  %v4686_v11 = vmul.f32 2.1237322e-06, %v11973_v60 }
 0x906   : > { %v6889_v22 = vadd.f32 1.0, %v8111_v56  ;;  %vm4633_vm3 = vweird.f32 %v11994_v15  ;;  %v3681_v40 = vmul.f32 %v11948_v0, %v3680_v62  ;;  %v12080_v37 = vmul.f32 0.70710677, %v12065_v52  ;;  %vm12090_vm1 = vmor %vm3692_vm0, %vm3693_vm2 }
 0x907   : > { %v12082_v45 = vpop.eup %8913  ;;  %v4631_v48 = vadd.f32 %v11994_v15, %v4630_v34  ;;  %v4650_v58 = vmul.f32 %v4649_v55, %v11863_v8  ;;  %v4701_v43 = vmul.f32 %v4700_v42, %v11973_v60  ;;  %v4740_v63 = vadd.f32 0.014752088, %v4739_v44 }
 0x908   : > { %v8112_v4 = vclamps-f32 %v4601_v41, 1.0  ;;  %vm4632_vm4 = vweird.f32 %v11924_v6  ;;  %v3698_v9 = vmul.f32 %v12053_v35, %v3697_v20  ;;  %v4779_v27 = vmul.f32 %v4778_v28, %v12043_v2 }
 0x909   : > { %v4636_v56 = vand.u32 2147483647, %v11924_v6  ;;  %v4639_v62 = vor.u32 1.1754944e-38, %v4638_v49  ;;  %v3695_v14 = vsel %vm12090_vm1, %v11959_v26, %v3691_v33  ;;  %v4687_v55 = vadd.f32 0.00028619796, %v4686_v11  ;;  %vm12115_vm6 = vmor %vm4632_vm4, %vm4633_vm3  ;;  %v15538_v6 = vld [vmem:[#allocation42_spill] sm:$0xff] }
 0x90a   : > { %v12108_v42 = vpop.eup %8915  ;;  %v12111_v44 = vmul.f32 %v6889_v22, %v11905_v54  ;;  %v3685_v61 = vsel %vm12101_vm5, %v11948_v0, %v3681_v40  ;;  %v3707_v41 = vmul.f32 %v12082_v45, %v12039_v25  ;;  %v4804_v26 = vmul.f32 %v12080_v37, %v12080_v37 }
 0x90b   : > { %v4635_v54 = vsel %vm12115_vm6, %v11994_v15, %v4631_v48  ;;  %v4651_v20 = vadd.f32 0.05243302, %v4650_v58  ;;  %v4702_v28 = vadd.f32 0.112945676, %v4701_v43  ;;  %v4741_v49 = vmul.f32 %v4740_v63, %v12041_v21  ;;  %v3541_v63 = vpop.xlane.xlu0 %3540 }
 0x90c   : > { %15535 = vst [vmem:[#allocation54_spill] sm:$0xff] %v12111_v44  ;;  %v6890_v33 = vadd.f32 1.0, %v8112_v4  ;;  %v3747_v11 = vmul.f32 %v3695_v14, %v11451_v13  ;;  %v3699_v22 = vmul.f32 0.5, %v3698_v9  ;;  %v4780_v7 = vadd.f32 0.014752088, %v4779_v27 }
 0x90d   : > { %v4616_v0 = vmul.f32 %v4615_v46, %v11664_v38  ;;  %vm4637_vm7 = vcmp.eq.f32.partialorder %v4636_v56, 8.507059e+37  ;;  %v4668_v40 = vmul.f32 %v12108_v42, %v12058_v10  ;;  %v4688_v34 = vmul.f32 %v4687_v55, %v11973_v60  ;;  %v12150_v56 = vld [vmem:[%s15490_s20] ss:$0 sm:$0xff] }
 0x90e   : > { %v4640_v5 = vsel %vm4637_vm7, %v4639_v62, %v4635_v54  ;;  %v3746_v15 = vmul.f32 %v3685_v61, %v15538_v6  ;;  %v3708_v48 = vmul.f32 %v12082_v45, %v3707_v41  ;;  %v12137_v58 = vmin.f32 %v4804_v26, 16.0  ;;  %v4065_v26 = vpop.f32.mrf.mxu1 }
 0x90f   : > { %v4652_v43 = vmul.f32 %v4651_v20, %v11863_v8  ;;  %v4703_v38 = vmul.f32 %v4702_v28, %v11973_v60  ;;  %v4742_v46 = vadd.f32 0.112945676, %v4741_v49  ;;  %v12144_v4 = vmul.f32 %v6890_v33, %v11911_v53 }
 0x910   : > { %v3700_v9 = vsub.f32 1.5, %v3699_v22  ;;  %v4781_v27 = vmul.f32 %v4780_v7, %v12043_v2  ;;  %v3766_v62 = vmul.f32 %v12150_v56, %v3747_v11  ;;  %v12153_v14 = vmul.f32 %v4640_v5, %v4616_v0 }
 0x911   : > { %15539 = vst [vmem:[#allocation42_spill] sm:$0xff] %v12144_v4  ;;  %v4669_v55 = vsub.f32 1.0, %v4668_v40  ;;  %v4689_v61 = vadd.f32 0.0036580483, %v4688_v34  ;;  %v4726_v41 = vmul.f32 2.1237322e-06, %v12041_v21  ;;  %v3558_v53 = vmul.f32 %v3541_v63, %v15481_v3 }
 0x912   : > { %v3709_v54 = vmul.f32 0.5, %v3708_v48  ;;  %v4817_v20 = vmul.f32 3.8918573e-05, %v12137_v58  ;;  %v3765_v28 = vmul.f32 %v12150_v56, %v3746_v15  ;;  %vm3703_vm8 = vweird.f32 %v12053_v35  ;;  %v12171_v40 = vld [vmem:[%s15492_s3] ss:$0 sm:$0xff] }
 0x913   : > { %v4653_v49 = vadd.f32 0.18741608, %v4652_v43  ;;  %v4704_v33 = vadd.f32 0.4994258, %v4703_v38  ;;  %v4743_v11 = vmul.f32 %v4742_v46, %v12041_v21  ;;  %v4766_v5 = vmul.f32 2.1237322e-06, %v12043_v2  ;;  %v4114_v38 = vpop.f32.mrf.mxu2 }
 0x914   : > { %v12163_v22 = vmul.f32 %v12053_v35, %v3700_v9  ;;  %v4782_v7 = vadd.f32 0.112945676, %v4781_v27  ;;  %v12166_v0 = vadd.f32 %v4065_v26, %v11500_v18  ;;  %v3785_v34 = vadd.f32 %v12171_v40, %v3766_v62 }
 0x915   : > { %v8113_v6 = vclamps-f32 %v12153_v14, 1.0  ;;  %vm3702_vm9 = vweird.f32 %v11989_v17  ;;  %v4670_v15 = vmul.f32 %v12108_v42, %v4669_v55  ;;  %v4690_v48 = vmul.f32 %v4689_v61, %v11973_v60 }
 0x916   : > { %v4727_v43 = vadd.f32 0.00028619796, %v4726_v41  ;;  %v3710_v46 = vsub.f32 1.5, %v3709_v54  ;;  %vm3713_vm10 = vweird.f32 %v12082_v45  ;;  %v12179_v63 = vadd.f32 1e-05, %v3558_v53  ;;  %vm12224_vm15 = vmor %vm3702_vm9, %vm3703_vm8 }
 0x917   : > { %v4818_v9 = vadd.f32 0.001143296, %v4817_v20  ;;  %v3784_v27 = vadd.f32 %v12171_v40, %v3765_v28  ;;  %v4654_v62 = vmul.f32 %v4653_v49, %v11863_v8  ;;  %v4705_v14 = vmul.f32 %v4704_v33, %v11973_v60 }
 0x918   : > { %v4744_v26 = vadd.f32 0.4994258, %v4743_v11  ;;  %v4767_v13 = vadd.f32 0.00028619796, %v4766_v5  ;;  %vm3712_vm11 = vweird.f32 %v12039_v25  ;;  %v4783_v55 = vmul.f32 %v4782_v7, %v12043_v2 }
 0x919   : > { %v12187_v61 = vmul.f32 0.70710677, %v12166_v0  ;;  %v3795_v41 = vpack.c.bf16 %v3785_v34, %v3784_v27  ;;  %v12190_v54 = vadd.f32 %v4114_v38, %v11520_v32  ;;  %v4671_v53 = vadd.f32 %v12108_v42, %v4670_v15  ;;  %vm12247_vm2 = vmor %vm3712_vm11, %vm3713_vm10  ;;  %v15547_v27 = vld [vmem:[#allocation43_spill] sm:$0xff] }
 0x91a   : > { %vm4673_vm12 = vweird.f32 %v12108_v42  ;;  %v4691_v8 = vadd.f32 0.05243302, %v4690_v48  ;;  %v4728_v20 = vmul.f32 %v4727_v43, %v12041_v21  ;;  %vm4672_vm13 = vweird.f32 %v12058_v10 }
 0x91b   : > { %v4678_v28 = vand.u32 2147483648, %v12058_v10  ;;  %8917 = vrsqrt.f32 %v12179_v63  ;;  %v4819_v49 = vmul.f32 %v4818_v9, %v12137_v58  ;;  %4033 = vmatmul.bf16.gmra.mxu0 %v3795_v41  ;;  %4082 = vmatmul.bf16.gmra.mxu1 %v3795_v41  ;;  %v4676_v33 = vand.u32 2147483647, %v12058_v10  ;;  %vm12208_vm14 = vmor %vm4672_vm13, %vm4673_vm12 }
 0x91c   : > { %v12200_v11 = vadd.f32 1.0, %v4705_v14  ;;  %v4768_v5 = vmul.f32 %v4767_v13, %v12043_v2  ;;  %v4844_v7 = vmul.f32 %v12187_v61, %v12187_v61  ;;  %4131 = vmatmul.bf16.gmra.mxu2 %v3795_v41  ;;  %4180 = vmatmul.bf16.gmra.mxu3 %v3795_v41  ;;  %v3711_v34 = vmul.f32 %v12082_v45, %v3710_v46 }
 0x91d   : > { %v4745_v48 = vmul.f32 %v4744_v26, %v12041_v21  ;;  %v4784_v10 = vadd.f32 0.4994258, %v4783_v55  ;;  %v12214_v43 = vmul.f32 0.70710677, %v12190_v54  ;;  %v4655_v13 = vadd.f32 1.1283791, %v4654_v62 }
 0x91e   : > { %v4675_v38 = vsel %vm12208_vm14, %v12108_v42, %v4671_v53  ;;  %v4692_v9 = vmul.f32 %v4691_v8, %v11973_v60  ;;  %v4729_v46 = vadd.f32 0.0036580483, %v4728_v20  ;;  %v4679_v14 = vor.u32 1.1754944e-38, %v4678_v28 }
 0x91f   : > { %v4820_v26 = vadd.f32 0.014752088, %v4819_v49  ;;  %v12228_v55 = vmin.f32 %v4844_v7, 16.0  ;;  %v4884_v62 = vmul.f32 %v12214_v43, %v12214_v43  ;;  %v3705_v42 = vsel %vm12224_vm15, %v12053_v35, %v12163_v22 }
 0x920   : > { %vm4677_vm0 = vcmp.eq.f32.partialorder %v4676_v33, 8.507059e+37  ;;  %8919 = vrcp.f32 %v12200_v11  ;;  %v4769_v17 = vadd.f32 0.0036580483, %v4768_v5  ;;  %v12239_v8 = vadd.f32 1.0, %v4745_v48 }
 0x921   : > { %v12237_v41 = vpop.eup %8917  ;;  %v4680_v53 = vsel %vm4677_vm0, %v4679_v14, %v4675_v38  ;;  %v4785_v20 = vmul.f32 %v4784_v10, %v12043_v2  ;;  %v4857_v28 = vmul.f32 3.8918573e-05, %v12228_v55  ;;  %v6891_v49 = vadd.f32 1.0, %v8113_v6 }
 0x922   : > { %v4656_v22 = vmul.f32 %v4655_v13, %v11835_v12  ;;  %v4693_v33 = vadd.f32 0.18741608, %v4692_v9  ;;  %v4730_v5 = vmul.f32 %v4729_v46, %v12041_v21  ;;  %v3715_v7 = vsel %vm12247_vm2, %v12082_v45, %v3711_v34 }
 0x923   : > { %v4821_v15 = vmul.f32 %v4820_v26, %v12137_v58  ;;  %v4858_v6 = vadd.f32 0.001143296, %v4857_v28  ;;  %v12257_v48 = vmin.f32 %v4884_v62, 16.0  ;;  %v4770_v25 = vmul.f32 %v4769_v17, %v12043_v2  ;;  %v4163_v17 = vpop.f32.mrf.mxu3 }
 0x924   : > { %v4681_v10 = vmul.f32 %v4680_v53, %v4656_v22  ;;  %v3717_v38 = vmul.f32 %v12237_v41, %v12179_v63  ;;  %v4806_v12 = vmul.f32 2.1237322e-06, %v12137_v58  ;;  %v4204_v9 = vmul.f32 0.5, %v11823_v16  ;;  %v15548_v53 = vld [vmem:[#allocation44_spill] sm:$0xff] }
 0x925   : > { %8921 = vrcp.f32 %v12239_v8  ;;  %v12267_v45 = vadd.f32 1.0, %v4785_v20  ;;  %v12272_v46 = vmul.f32 %v6891_v49, %v11940_v30  ;;  %v12275_v14 = vmul.f32 %v3705_v42, %v15547_v27 }
 0x926   : > { %v12269_v34 = vpop.eup %8919  ;;  %v4694_v26 = vmul.f32 %v4693_v33, %v11973_v60  ;;  %v4731_v62 = vadd.f32 0.05243302, %v4730_v5  ;;  %v12279_v28 = vmul.f32 %v3715_v7, %v15548_v53  ;;  %v4822_v16 = vadd.f32 0.112945676, %v4821_v15 }
 0x927   : > { %15546 = vst [vmem:[#allocation55_spill] sm:$0xff] %v12272_v46  ;;  %v4859_v35 = vmul.f32 %v4858_v6, %v12228_v55  ;;  %v4897_v20 = vmul.f32 3.8918573e-05, %v12257_v48  ;;  %v8114_v22 = vclamps-f32 %v4681_v10, 1.0  ;;  %v4771_v13 = vadd.f32 0.05243302, %v4770_v25  ;;  %v4019_v10 = vpop.f32.mrf.mxu0 }
 0x928   : > { %v3718_v30 = vmul.f32 %v12237_v41, %v3717_v38  ;;  %v4807_v49 = vadd.f32 0.00028619796, %v4806_v12  ;;  %v12285_v42 = vmul.f32 0.5, %v11927_v59  ;;  %v4708_v60 = vmul.f32 %v12269_v34, %v12200_v11 }
 0x929   : > { %8923 = vrcp.f32 %v12267_v45  ;;  %v12291_v33 = vadd.f32 %v4163_v17, %v11528_v39  ;;  %v4695_v5 = vadd.f32 1.1283791, %v4694_v26  ;;  %v12294_v7 = vmul.f32 0.5, %v11992_v57 }
 0x92a   : > { %v4732_v15 = vmul.f32 %v4731_v62, %v12041_v21  ;;  %v12298_v6 = vmul.f32 0.5, %v12002_v23  ;;  %v12303_v25 = vmul.f32 0.5, %v12065_v52  ;;  %v4823_v38 = vmul.f32 %v4822_v16, %v12137_v58 }
 0x92b   : > { %v12300_v59 = vpop.eup %8921  ;;  %v4860_v12 = vadd.f32 0.014752088, %v4859_v35  ;;  %v4898_v27 = vadd.f32 0.001143296, %v4897_v20  ;;  %v6892_v17 = vadd.f32 1.0, %v8114_v22  ;;  %v4772_v26 = vmul.f32 %v4771_v13, %v12043_v2 }
 0x92c   : > { %v3719_v57 = vmul.f32 0.5, %v3718_v30  ;;  %v4808_v53 = vmul.f32 %v4807_v49, %v12137_v58  ;;  %v4709_v62 = vsub.f32 1.0, %v4708_v60  ;;  %v4718_v23 = vand.u32 2147483648, %v12200_v11 }
 0x92d   : > { %v12310_v46 = vmul.f32 0.70710677, %v12291_v33  ;;  %v12313_v51 = vadd.f32 %v4019_v10, %v11498_v1  ;;  %v12316_v52 = vmul.f32 %v4695_v5, %v11946_v47  ;;  %v4716_v16 = vand.u32 2147483647, %v12200_v11 }
 0x92e   : > { %v4733_v35 = vadd.f32 0.18741608, %v4732_v15  ;;  %v4748_v13 = vmul.f32 %v12300_v59, %v12239_v8  ;;  %vm4712_vm3 = vweird.f32 %v12200_v11  ;;  %v4824_v22 = vadd.f32 0.4994258, %v4823_v38 }
 0x92f   : > { %v12321_v20 = vpop.eup %8923  ;;  %v4861_v30 = vmul.f32 %v4860_v12, %v12228_v55  ;;  %v4899_v49 = vmul.f32 %v4898_v27, %v12257_v48  ;;  %v4924_v60 = vmul.f32 %v12310_v46, %v12310_v46  ;;  %v12328_v47 = vmul.f32 %v6892_v17, %v4204_v9 }
 0x930   : > { %v4773_v5 = vadd.f32 0.18741608, %v4772_v26  ;;  %v3720_v10 = vsub.f32 1.5, %v3719_v57  ;;  %v4809_v15 = vadd.f32 0.0036580483, %v4808_v53  ;;  %v4710_v19 = vmul.f32 %v12269_v34, %v4709_v62 }
 0x931   : > { %15549 = vst [vmem:[#allocation43_spill] sm:$0xff] %v12328_v47  ;;  %v4719_v4 = vor.u32 1.1754944e-38, %v4718_v23  ;;  %v12331_v29 = vmin.f32 %v4924_v60, 16.0  ;;  %v12334_v44 = vmul.f32 0.70710677, %v12313_v51  ;;  %v4734_v38 = vmul.f32 %v4733_v35, %v12041_v21 }
 0x932   : > { %v4749_v12 = vsub.f32 1.0, %v4748_v13  ;;  %v4788_v27 = vmul.f32 %v12321_v20, %v12267_v45  ;;  %v4846_v9 = vmul.f32 2.1237322e-06, %v12228_v55  ;;  %v4825_v17 = vmul.f32 %v4824_v22, %v12137_v58 }
 0x933   : > { %v4862_v26 = vadd.f32 0.112945676, %v4861_v30  ;;  %v4900_v57 = vadd.f32 0.014752088, %v4899_v49  ;;  %v4937_v53 = vmul.f32 3.8918573e-05, %v12331_v29  ;;  %v4774_v23 = vmul.f32 %v4773_v5, %v12043_v2 }
 0x934   : > { %vm12342_vm4 = vcmp.eq.f32.partialorder %v4716_v16, 8.507059e+37  ;;  %v12348_v21 = vmul.f32 %v12237_v41, %v3720_v10  ;;  %v4810_v35 = vmul.f32 %v4809_v15, %v12137_v58  ;;  %v4964_v13 = vmul.f32 %v12334_v44, %v12334_v44 }
 0x935   : > { %v4711_v22 = vadd.f32 %v12269_v34, %v4710_v19  ;;  %vm4713_vm1 = vweird.f32 %v12269_v34  ;;  %v12356_v30 = vmul.f32 0.5, %v12166_v0  ;;  %v4938_v16 = vadd.f32 0.001143296, %v4937_v53 }
 0x936   : > { %v4735_v49 = vadd.f32 1.1283791, %v4734_v38  ;;  %v4750_v60 = vmul.f32 %v12300_v59, %v4749_v12  ;;  %v4789_v2 = vsub.f32 1.0, %v4788_v27  ;;  %v4847_v5 = vadd.f32 0.00028619796, %v4846_v9  ;;  %vm12366_vm5 = vmor %vm4712_vm3, %vm4713_vm1 }
 0x937   : > { %v4756_v10 = vand.u32 2147483647, %v12239_v8  ;;  %v12360_v47 = vadd.f32 1.0, %v4825_v17  ;;  %v4863_v15 = vmul.f32 %v4862_v26, %v12228_v55  ;;  %v4901_v50 = vmul.f32 %v4900_v57, %v12257_v48 }
 0x938   : > { %v4758_v0 = vand.u32 2147483648, %v12239_v8  ;;  %v4811_v38 = vadd.f32 0.05243302, %v4810_v35  ;;  %v4939_v12 = vmul.f32 %v4938_v16, %v12331_v29  ;;  %v12372_v27 = vmin.f32 %v4964_v13, 16.0  ;;  %v4068_v35 = vpop.f32.mrf.mxu1 }
 0x939   : > { %v4715_v9 = vsel %vm12366_vm5, %v12269_v34, %v4711_v22  ;;  %vm4752_vm6 = vweird.f32 %v12239_v8  ;;  %vm4753_vm7 = vweird.f32 %v12300_v59  ;;  %v4775_v11 = vadd.f32 1.1283791, %v4774_v23 }
 0x93a   : > { %vm3723_vm8 = vweird.f32 %v12237_v41  ;;  %v4751_v17 = vadd.f32 %v12300_v59, %v4750_v60  ;;  %v4790_v26 = vmul.f32 %v12321_v20, %v4789_v2  ;;  %v4848_v57 = vmul.f32 %v4847_v5, %v12228_v55  ;;  %vm12398_vm11 = vmor %vm4752_vm6, %vm4753_vm7 }
 0x93b   : > { %v4886_v53 = vmul.f32 2.1237322e-06, %v12257_v48  ;;  %vm3722_vm9 = vweird.f32 %v12179_v63  ;;  %8925 = vrcp.f32 %v12360_v47  ;;  %v4864_v34 = vadd.f32 0.4994258, %v4863_v15 }
 0x93c   : > { %v4902_v13 = vadd.f32 0.112945676, %v4901_v50  ;;  %v4940_v22 = vadd.f32 0.014752088, %v4939_v12  ;;  %vm12386_vm10 = vcmp.eq.f32.partialorder %v4756_v10, 8.507059e+37  ;;  %v4759_v16 = vor.u32 1.1754944e-38, %v4758_v0  ;;  %vm12447_vm0 = vmor %vm3722_vm9, %vm3723_vm8 }
 0x93d   : > { %v4812_v60 = vmul.f32 %v4811_v38, %v12137_v58  ;;  %v4977_v2 = vmul.f32 3.8918573e-05, %v12372_v27  ;;  %v4720_v5 = vsel %vm12342_vm4, %v4719_v4, %v4715_v9  ;;  %vm4793_vm12 = vweird.f32 %v12321_v20 }
 0x93e   : > { %v4796_v50 = vand.u32 2147483647, %v12267_v45  ;;  %v12405_v10 = vadd.f32 %v4068_v35, %v11500_v18  ;;  %v4755_v62 = vsel %vm12398_vm11, %v12300_v59, %v4751_v17  ;;  %v4791_v4 = vadd.f32 %v12321_v20, %v4790_v26  ;;  %v15564_v26 = vld [vmem:[#allocation45_spill] sm:$0xff] }
 0x93f   : > { %v4849_v19 = vadd.f32 0.0036580483, %v4848_v57  ;;  %v4887_v0 = vadd.f32 0.00028619796, %v4886_v53  ;;  %v4798_v8 = vand.u32 2147483648, %v12267_v45  ;;  %v4865_v38 = vmul.f32 %v4864_v34, %v12228_v55 }
 0x940   : > { %v4903_v12 = vmul.f32 %v4902_v13, %v12257_v48  ;;  %v4941_v9 = vmul.f32 %v4940_v22, %v12331_v29  ;;  %v4721_v36 = vmul.f32 %v4720_v5, %v12316_v52  ;;  %vm4792_vm13 = vweird.f32 %v12267_v45 }
 0x941   : > { %v4813_v35 = vadd.f32 0.18741608, %v4812_v60  ;;  %v4978_v3 = vadd.f32 0.001143296, %v4977_v2  ;;  %v12417_v15 = vpop.eup %8925  ;;  %v4736_v59 = vmul.f32 %v4735_v49, %v12009_v31  ;;  %v4760_v17 = vsel %vm12386_vm10, %v4759_v16, %v4755_v62  ;;  %vm12424_vm14 = vmor %vm4792_vm13, %vm4793_vm12  ;;  %v4117_v16 = vpop.f32.mrf.mxu2 }
 0x942   : > { %vm12428_vm15 = vcmp.eq.f32.partialorder %v4796_v50, 8.507059e+37  ;;  %v12433_v45 = vmul.f32 0.70710677, %v12405_v10  ;;  %v4795_v31 = vsel %vm12424_vm14, %v12321_v20, %v4791_v4  ;;  %v4850_v52 = vmul.f32 %v4849_v19, %v12228_v55 }
 0x943   : > { %v4888_v49 = vmul.f32 %v4887_v0, %v12257_v48  ;;  %v4926_v53 = vmul.f32 2.1237322e-06, %v12331_v29  ;;  %v4799_v34 = vor.u32 1.1754944e-38, %v4798_v8  ;;  %v12441_v13 = vadd.f32 1.0, %v4865_v38 }
 0x944   : > { %v4904_v22 = vadd.f32 0.4994258, %v4903_v12  ;;  %v4942_v23 = vadd.f32 0.112945676, %v4941_v9  ;;  %v8115_v60 = vclamps-f32 %v4721_v36, 1.0  ;;  %v4814_v20 = vmul.f32 %v4813_v35, %v12137_v58 }
 0x945   : > { %v4828_v5 = vmul.f32 %v12417_v15, %v12360_v47  ;;  %v4979_v50 = vmul.f32 %v4978_v3, %v12372_v27  ;;  %v4761_v62 = vmul.f32 %v4760_v17, %v4736_v59  ;;  %v4800_v4 = vsel %vm12428_vm15, %v4799_v34, %v4795_v31 }
 0x946   : > { %v3725_v36 = vsel %vm12447_vm0, %v12237_v41, %v12348_v21  ;;  %v5004_v63 = vmul.f32 %v12433_v45, %v12433_v45  ;;  %v4851_v19 = vadd.f32 0.05243302, %v4850_v52  ;;  %v4889_v0 = vadd.f32 0.0036580483, %v4888_v49 }
 0x947   : > { %v4927_v58 = vadd.f32 0.00028619796, %v4926_v53  ;;  %v12464_v8 = vadd.f32 %v4117_v16, %v11520_v32  ;;  %v4776_v3 = vmul.f32 %v4775_v11, %v12012_v24  ;;  %8927 = vrcp.f32 %v12441_v13 }
 0x948   : > { %v4905_v38 = vmul.f32 %v4904_v22, %v12257_v48  ;;  %v4943_v12 = vmul.f32 %v4942_v23, %v12331_v29  ;;  %v6893_v9 = vadd.f32 1.0, %v8115_v60  ;;  %v4815_v35 = vadd.f32 1.1283791, %v4814_v20 }
 0x949   : > { %v4829_v41 = vsub.f32 1.0, %v4828_v5  ;;  %v4980_v21 = vadd.f32 0.014752088, %v4979_v50  ;;  %v8116_v59 = vclamps-f32 %v4761_v62, 1.0  ;;  %v4801_v17 = vmul.f32 %v4800_v4, %v4776_v3  ;;  %v4166_v5 = vpop.f32.mrf.mxu3 }
 0x94a   : > { %v12471_v57 = vmul.f32 %v3725_v36, %v15564_v26  ;;  %v12473_v31 = vmin.f32 %v5004_v63, 16.0  ;;  %v4852_v52 = vmul.f32 %v4851_v19, %v12228_v55  ;;  %v4890_v24 = vmul.f32 %v4889_v0, %v12257_v48 }
 0x94b   : > { %v4928_v11 = vmul.f32 %v4927_v58, %v12331_v29  ;;  %v12479_v49 = vmul.f32 0.70710677, %v12464_v8  ;;  %v12482_v53 = vmul.f32 0.5, %v12190_v54  ;;  %v12484_v34 = vadd.f32 1.0, %v4905_v38 }
 0x94c   : > { %v12487_v22 = vmul.f32 0.5, %v12291_v33  ;;  %v4944_v23 = vadd.f32 0.4994258, %v4943_v12  ;;  %v12490_v16 = vmul.f32 %v6893_v9, %v12285_v42  ;;  %v12493_v60 = vmul.f32 %v4815_v35, %v12080_v37 }
 0x94d   : > { %v4830_v2 = vmul.f32 %v12417_v15, %v4829_v41  ;;  %v4981_v20 = vmul.f32 %v4980_v21, %v12372_v27  ;;  %v12497_v50 = vpop.eup %8927  ;;  %v6894_v54 = vadd.f32 1.0, %v8116_v59  ;;  %v8117_v62 = vclamps-f32 %v4801_v17, 1.0 }
 0x94e   : > { %v4836_v4 = vand.u32 2147483647, %v12360_v47  ;;  %v5017_v33 = vmul.f32 3.8918573e-05, %v12473_v31  ;;  %v4853_v36 = vadd.f32 0.18741608, %v4852_v52  ;;  %v5044_v37 = vmul.f32 %v12479_v49, %v12479_v49  ;;  %v4021_v52 = vpop.f32.mrf.mxu0 }
 0x94f   : > { %v4891_v63 = vadd.f32 0.05243302, %v4890_v24  ;;  %v4929_v42 = vadd.f32 0.0036580483, %v4928_v11  ;;  %8929 = vrcp.f32 %v12484_v34  ;;  %v4945_v19 = vmul.f32 %v4944_v23, %v12331_v29 }
 0x950   : > { %v4966_v0 = vmul.f32 2.1237322e-06, %v12372_v27  ;;  %v12507_v58 = vadd.f32 %v4166_v5, %v11528_v39  ;;  %v4831_v3 = vadd.f32 %v12417_v15, %v4830_v2  ;;  %vm4833_vm2 = vweird.f32 %v12417_v15 }
 0x951   : > { %v4868_v38 = vmul.f32 %v12497_v50, %v12441_v13  ;;  %v4982_v12 = vadd.f32 0.112945676, %v4981_v20  ;;  %vm4832_vm3 = vweird.f32 %v12360_v47  ;;  %v4838_v9 = vand.u32 2147483648, %v12360_v47 }
 0x952   : > { %v5018_v35 = vadd.f32 0.001143296, %v5017_v33  ;;  %v12515_v41 = vmin.f32 %v5044_v37, 16.0  ;;  %v12518_v21 = vmul.f32 %v6894_v54, %v12294_v7  ;;  %vm12520_vm4 = vcmp.eq.f32.partialorder %v4836_v4, 8.507059e+37  ;;  %vm12526_vm1 = vmor %vm4832_vm3, %vm4833_vm2 }
 0x953   : > { %v4892_v17 = vmul.f32 %v4891_v63, %v12257_v48  ;;  %v4930_v26 = vmul.f32 %v4929_v42, %v12331_v29  ;;  %v4854_v47 = vmul.f32 %v4853_v36, %v12228_v55  ;;  %v12531_v11 = vadd.f32 1.0, %v4945_v19 }
 0x954   : > { %15565 = vst [vmem:[#allocation44_spill] sm:$0xff] %v12518_v21  ;;  %v4967_v23 = vadd.f32 0.00028619796, %v4966_v0  ;;  %v12534_v7 = vmul.f32 0.70710677, %v12507_v58  ;;  %v6895_v2 = vadd.f32 1.0, %v8117_v62  ;;  %v4835_v20 = vsel %vm12526_vm1, %v12417_v15, %v4831_v3 }
 0x955   : > { %v4869_v5 = vsub.f32 1.0, %v4868_v38  ;;  %v4983_v54 = vmul.f32 %v4982_v12, %v12372_v27  ;;  %v12540_v4 = vpop.eup %8929  ;;  %v4839_v33 = vor.u32 1.1754944e-38, %v4838_v9  ;;  %v5019_v63 = vmul.f32 %v5018_v35, %v12473_v31  ;;  %v8405_v21 = vld [vmem:[#allocation15 + $0x68] sm:$0xff] }
 0x956   : > { %v5057_v55 = vmul.f32 3.8918573e-05, %v12515_v41  ;;  %v12545_v36 = vadd.f32 %v4021_v52, %v11498_v1  ;;  %v4893_v42 = vadd.f32 0.18741608, %v4892_v17  ;;  %v4931_v37 = vadd.f32 0.05243302, %v4930_v26 }
 0x957   : > { %v12548_v62 = vmul.f32 0.5, %v12313_v51  ;;  %v5084_v15 = vmul.f32 %v12534_v7, %v12534_v7  ;;  %v4840_v19 = vsel %vm12520_vm4, %v4839_v33, %v4835_v20  ;;  %v4855_v0 = vadd.f32 1.1283791, %v4854_v47 }
 0x958   : > { %8931 = vrcp.f32 %v12531_v11  ;;  %v4968_v3 = vmul.f32 %v4967_v23, %v12372_v27  ;;  %v4870_v38 = vmul.f32 %v12497_v50, %v4869_v5  ;;  %v4908_v12 = vmul.f32 %v12540_v4, %v12484_v34 }
 0x959   : > { %v4984_v9 = vadd.f32 0.4994258, %v4983_v54  ;;  %v12559_v35 = vmin.f32 %v5084_v15, 16.0  ;;  %v12562_v51 = vmul.f32 %v6895_v2, %v12298_v6  ;;  %v5020_v17 = vadd.f32 0.014752088, %v5019_v63 }
 0x95a   : > { %v5058_v26 = vadd.f32 0.001143296, %v5057_v55  ;;  %v12565_v59 = vmul.f32 0.70710677, %v12545_v36  ;;  %v4894_v52 = vmul.f32 %v4893_v42, %v12257_v48  ;;  %v4932_v24 = vmul.f32 %v4931_v37, %v12331_v29 }
 0x95b   : > { %v12570_v47 = vmul.f32 0.5, %v12405_v10  ;;  %v5097_v23 = vmul.f32 3.8918573e-05, %v12559_v35  ;;  %v4841_v20 = vmul.f32 %v4840_v19, %v12493_v60  ;;  %v4876_v5 = vand.u32 2147483647, %v12441_v13 }
 0x95c   : > { %v4878_v6 = vand.u32 2147483648, %v12441_v13  ;;  %v4969_v2 = vadd.f32 0.0036580483, %v4968_v3  ;;  %v4856_v54 = vmul.f32 %v4855_v0, %v12187_v61  ;;  %v4871_v33 = vadd.f32 %v12497_v50, %v4870_v38 }
 0x95d   : > { %vm4873_vm5 = vweird.f32 %v12497_v50  ;;  %v4909_v48 = vsub.f32 1.0, %v4908_v12  ;;  %v4985_v10 = vmul.f32 %v4984_v9, %v12372_v27  ;;  %v5021_v55 = vmul.f32 %v5020_v17, %v12473_v31 }
 0x95e   : > { %v12579_v63 = vpop.eup %8931  ;;  %v5059_v60 = vmul.f32 %v5058_v26, %v12515_v41  ;;  %v5124_v42 = vmul.f32 %v12565_v59, %v12565_v59  ;;  %vm4872_vm6 = vweird.f32 %v12441_v13  ;;  %v4895_v37 = vadd.f32 1.1283791, %v4894_v52 }
 0x95f   : > { %v4933_v61 = vadd.f32 0.18741608, %v4932_v24  ;;  %v5098_v15 = vadd.f32 0.001143296, %v5097_v23  ;;  %v8118_v19 = vclamps-f32 %v4841_v20, 1.0  ;;  %vm12587_vm7 = vmor %vm4872_vm6, %vm4873_vm5  ;;  %vm12591_vm8 = vcmp.eq.f32.partialorder %v4876_v5, 8.507059e+37 }
 0x960   : > { %v4879_v38 = vor.u32 1.1754944e-38, %v4878_v6  ;;  %v4970_v12 = vmul.f32 %v4969_v2, %v12372_v27  ;;  %v4875_v9 = vsel %vm12587_vm7, %v12497_v50, %v4871_v33  ;;  %v4910_v13 = vmul.f32 %v12540_v4, %v4909_v48 }
 0x961   : > { %v4948_v17 = vmul.f32 %v12579_v63, %v12531_v11  ;;  %v5006_v26 = vmul.f32 2.1237322e-06, %v12473_v31  ;;  %v12603_v52 = vadd.f32 1.0, %v4985_v10  ;;  %v5022_v24 = vadd.f32 0.112945676, %v5021_v55 }
 0x962   : > { %v5060_v23 = vadd.f32 0.014752088, %v5059_v60  ;;  %v12605_v20 = vmin.f32 %v5124_v42, 16.0  ;;  %v4896_v5 = vmul.f32 %v4895_v37, %v12214_v43  ;;  %v4916_v6 = vand.u32 2147483647, %v12484_v34 }
 0x963   : > { %v4934_v2 = vmul.f32 %v4933_v61, %v12331_v29  ;;  %v5099_v50 = vmul.f32 %v5098_v15, %v12559_v35  ;;  %v6896_v33 = vadd.f32 1.0, %v8118_v19  ;;  %v4880_v48 = vsel %vm12591_vm8, %v4879_v38, %v4875_v9 }
 0x964   : > { %v4918_v0 = vand.u32 2147483648, %v12484_v34  ;;  %v4971_v10 = vadd.f32 0.05243302, %v4970_v12  ;;  %v4911_v55 = vadd.f32 %v12540_v4, %v4910_v13  ;;  %vm4913_vm9 = vweird.f32 %v12540_v4 }
 0x965   : > { %v4949_v60 = vsub.f32 1.0, %v4948_v17  ;;  %v5007_v42 = vadd.f32 0.00028619796, %v5006_v26  ;;  %8933 = vrcp.f32 %v12603_v52  ;;  %v5023_v43 = vmul.f32 %v5022_v24, %v12473_v31  ;;  %v4070_v17 = vpop.f32.mrf.mxu1 }
 0x966   : > { %v5061_v29 = vmul.f32 %v5060_v23, %v12515_v41  ;;  %v5137_v37 = vmul.f32 3.8918573e-05, %v12605_v20  ;;  %v4881_v61 = vmul.f32 %v4880_v48, %v4856_v54  ;;  %vm4912_vm10 = vweird.f32 %v12484_v34 }
 0x967   : > { %v4935_v15 = vadd.f32 1.1283791, %v4934_v2  ;;  %v5100_v19 = vadd.f32 0.014752088, %v5099_v50  ;;  %vm12621_vm11 = vmor %vm4912_vm10, %vm4913_vm9  ;;  %vm12625_vm12 = vcmp.eq.f32.partialorder %v4916_v6, 8.507059e+37  ;;  %v4919_v12 = vor.u32 1.1754944e-38, %v4918_v0 }
 0x968   : > { %v4972_v9 = vmul.f32 %v4971_v10, %v12372_v27  ;;  %v5046_v13 = vmul.f32 2.1237322e-06, %v12515_v41  ;;  %v12632_v54 = vmul.f32 %v6896_v33, %v12303_v25  ;;  %v4915_v34 = vsel %vm12621_vm11, %v12540_v4, %v4911_v55 }
 0x969   : > { %v5008_v26 = vmul.f32 %v5007_v42, %v12473_v31  ;;  %v12639_v24 = vmul.f32 0.5, %v12464_v8  ;;  %v4950_v23 = vmul.f32 %v12579_v63, %v4949_v60  ;;  %v5024_v6 = vadd.f32 0.4994258, %v5023_v43 }
 0x96a   : > { %v5062_v2 = vadd.f32 0.112945676, %v5061_v29  ;;  %v5138_v50 = vadd.f32 0.001143296, %v5137_v37  ;;  %v8119_v48 = vclamps-f32 %v4881_v61, 1.0  ;;  %v4936_v0 = vmul.f32 %v4935_v15, %v12310_v46 }
 0x96b   : > { %v5101_v25 = vmul.f32 %v5100_v19, %v12559_v35  ;;  %v12645_v33 = vadd.f32 %v4070_v17, %v11500_v18  ;;  %v12647_v10 = vpop.eup %8933  ;;  %vm4952_vm13 = vweird.f32 %v12531_v11  ;;  %v4956_v8 = vand.u32 2147483647, %v12531_v11 }
 0x96c   : > { %v4973_v4 = vadd.f32 0.18741608, %v4972_v9  ;;  %v5047_v55 = vadd.f32 0.00028619796, %v5046_v13  ;;  %v4920_v60 = vsel %vm12625_vm12, %v4919_v12, %v4915_v34  ;;  %vm4953_vm14 = vweird.f32 %v12579_v63 }
 0x96d   : > { %v5009_v42 = vadd.f32 0.0036580483, %v5008_v26  ;;  %v5139_v46 = vmul.f32 %v5138_v50, %v12605_v20  ;;  %v4951_v43 = vadd.f32 %v12579_v63, %v4950_v23  ;;  %v5025_v29 = vmul.f32 %v5024_v6, %v12473_v31  ;;  %vm12672_vm15 = vmor %vm4952_vm13, %vm4953_vm14 }
 0x96e   : > { %v5063_v37 = vmul.f32 %v5062_v2, %v12515_v41  ;;  %v5086_v61 = vmul.f32 2.1237322e-06, %v12559_v35  ;;  %v4958_v15 = vand.u32 2147483648, %v12531_v11  ;;  %v4988_v19 = vmul.f32 %v12647_v10, %v12603_v52 }
 0x96f   : > { %v5102_v3 = vadd.f32 0.112945676, %v5101_v25  ;;  %v12663_v38 = vmul.f32 0.70710677, %v12645_v33  ;;  %v12665_v12 = vadd.f32 1.0, %v8119_v48  ;;  %v4921_v9 = vmul.f32 %v4920_v60, %v4896_v5 }
 0x970   : > { %v5048_v13 = vmul.f32 %v5047_v55, %v12515_v41  ;;  %v5140_v17 = vadd.f32 0.014752088, %v5139_v46  ;;  %vm12676_vm0 = vcmp.eq.f32.partialorder %v4956_v8, 8.507059e+37  ;;  %v4974_v23 = vmul.f32 %v4973_v4, %v12372_v27 }
 0x971   : > { %v5010_v6 = vmul.f32 %v5009_v42, %v12473_v31  ;;  %v5164_v5 = vmul.f32 %v12663_v38, %v12663_v38  ;;  %v4955_v2 = vsel %vm12672_vm15, %v12579_v63, %v4951_v43  ;;  %v12687_v11 = vadd.f32 1.0, %v5025_v29 }
 0x972   : > { %v5064_v50 = vadd.f32 0.4994258, %v5063_v37  ;;  %v5087_v48 = vadd.f32 0.00028619796, %v5086_v61  ;;  %v4989_v25 = vsub.f32 1.0, %v4988_v19  ;;  %v5103_v8 = vmul.f32 %v5102_v3, %v12559_v35  ;;  %v4119_v37 = vpop.f32.mrf.mxu2 }
 0x973   : > { %v3767_v55 = vmul.f32 %v12150_v56, %v12275_v14  ;;  %v3768_v27 = vmul.f32 %v12150_v56, %v12279_v28  ;;  %v8120_v4 = vclamps-f32 %v4921_v9, 1.0  ;;  %v4959_v60 = vor.u32 1.1754944e-38, %v4958_v15 }
 0x974   : > { %v5049_v42 = vadd.f32 0.0036580483, %v5048_v13  ;;  %v5141_v46 = vmul.f32 %v5140_v17, %v12605_v20  ;;  %v4975_v34 = vadd.f32 1.1283791, %v4974_v23  ;;  %v5011_v63 = vadd.f32 0.05243302, %v5010_v6 }
 0x975   : > { %v12696_v43 = vmul.f32 0.5, %v12507_v58  ;;  %v12698_v29 = vmin.f32 %v5164_v5, 16.0  ;;  %v4960_v61 = vsel %vm12676_vm0, %v4959_v60, %v4955_v2  ;;  %8935 = vrcp.f32 %v12687_v11 }
 0x976   : > { %v5065_v56 = vmul.f32 %v5064_v50, %v12515_v41  ;;  %v5088_v14 = vmul.f32 %v5087_v48, %v12559_v35  ;;  %v4990_v28 = vmul.f32 %v12647_v10, %v4989_v25  ;;  %v5104_v15 = vadd.f32 0.4994258, %v5103_v8 }
 0x977   : > { %v3786_v19 = vadd.f32 %v12171_v40, %v3767_v55  ;;  %v3787_v58 = vadd.f32 %v12171_v40, %v3768_v27  ;;  %v5050_v3 = vmul.f32 %v5049_v42, %v12515_v41  ;;  %v5142_v9 = vadd.f32 0.112945676, %v5141_v46  ;;  %v4168_v42 = vpop.f32.mrf.mxu3 }
 0x978   : > { %v5177_v13 = vmul.f32 3.8918573e-05, %v12698_v29  ;;  %v12711_v17 = vadd.f32 %v4119_v37, %v11520_v32  ;;  %v12713_v26 = vadd.f32 1.0, %v8120_v4  ;;  %v5012_v23 = vmul.f32 %v5011_v63, %v12473_v31 }
 0x979   : > { %v5126_v6 = vmul.f32 2.1237322e-06, %v12605_v20  ;;  %v3796_v5 = vpack.c.bf16 %v3787_v58, %v3786_v19  ;;  %v4961_v2 = vmul.f32 %v4960_v61, %v4936_v0  ;;  %vm4993_vm2 = vweird.f32 %v12647_v10  ;;  %v8415_v19 = vld [vmem:[#allocation15 + $0xb8] sm:$0xff] }
 0x97a   : > { %v12718_v50 = vadd.f32 1.0, %v5065_v56  ;;  %v5089_v40 = vadd.f32 0.0036580483, %v5088_v14  ;;  %v4991_v48 = vadd.f32 %v12647_v10, %v4990_v28  ;;  %vm4992_vm3 = vweird.f32 %v12603_v52  ;;  %7402 = vmatpush.bf16.msra.mxu2 %v8415_v19 }
 0x97b   : > { %v4998_v25 = vand.u32 2147483648, %v12603_v52  ;;  %v5105_v8 = vmul.f32 %v5104_v15, %v12559_v35  ;;  %4038 = vmatmul.bf16.gmra.mxu0 %v3796_v5  ;;  %v12724_v55 = vpop.eup %8935  ;;  %v5051_v27 = vadd.f32 0.05243302, %v5050_v3  ;;  %v5143_v4 = vmul.f32 %v5142_v9, %v12605_v20  ;;  %4087 = vmatmul.bf16.gmra.mxu1 %v3796_v5  ;;  %vm12733_vm4 = vmor %vm4992_vm3, %vm4993_vm2 }
 0x97c   : > { %v5178_v0 = vadd.f32 0.001143296, %v5177_v13  ;;  %4136 = vmatmul.bf16.gmra.mxu2 %v3796_v5  ;;  %v12728_v60 = vmul.f32 0.70710677, %v12711_v17  ;;  %v4976_v46 = vmul.f32 %v4975_v34, %v12334_v44  ;;  %v4996_v37 = vand.u32 2147483647, %v12603_v52  ;;  %4185 = vmatmul.bf16.gmra.mxu3 %v3796_v5 }
 0x97d   : > { %v5013_v61 = vadd.f32 0.18741608, %v5012_v23  ;;  %v5127_v56 = vadd.f32 0.00028619796, %v5126_v6  ;;  %v8121_v14 = vclamps-f32 %v4961_v2, 1.0  ;;  %8937 = vrcp.f32 %v12718_v50  ;;  %v8399_v44 = vld [vmem:[#allocation15 + $0x38] sm:$0xff] }
 0x97e   : > { %v5090_v28 = vmul.f32 %v5089_v40, %v12559_v35  ;;  %v5204_v15 = vmul.f32 %v12728_v60, %v12728_v60  ;;  %v8407_v34 = vld [vmem:[#allocation15 + $0x78] sm:$0xff]  ;;  %v4995_v58 = vsel %vm12733_vm4, %v12647_v10, %v4991_v48  ;;  %v5028_v52 = vmul.f32 %v12724_v55, %v12687_v11  ;;  %7304 = vmatpush.bf16.msra.mxu0 %v8399_v44  ;;  %v8422_v44 = vld [vmem:[#allocation15 + $0xf0] sm:$0xff] }
 0x97f   : > { %v12747_v3 = vadd.f32 1.0, %v5105_v8  ;;  %v12750_v9 = vadd.f32 %v4168_v42, %v11528_v39  ;;  %v8423_v13 = vld [vmem:[#allocation15 + $0xf8] sm:$0xff]  ;;  %v4999_v23 = vor.u32 1.1754944e-38, %v4998_v25  ;;  %v5052_v6 = vmul.f32 %v5051_v27, %v12515_v41  ;;  %7353 = vmatpush.bf16.msra.mxu1 %v8407_v34  ;;  %v8398_v27 = vld [vmem:[#allocation15 + $0x30] sm:$0xff] }
 0x980   : > { %v5144_v5 = vadd.f32 0.4994258, %v5143_v4  ;;  %v5179_v2 = vmul.f32 %v5178_v0, %v12698_v29  ;;  %vm4997_vm1 = vcmp.eq.f32.partialorder %v4996_v37, 8.507059e+37  ;;  %v5014_v10 = vmul.f32 %v5013_v61, %v12473_v31  ;;  %8425 = vmatpush.bf16.msra.mxu3 %v8423_v13  ;;  %v8406_v4 = vld [vmem:[#allocation15 + $0x70] sm:$0xff] }
 0x981   : > { %v5128_v40 = vmul.f32 %v5127_v56, %v12605_v20  ;;  %v12756_v48 = vmin.f32 %v5204_v15, 16.0  ;;  %v6899_v8 = vadd.f32 1.0, %v8121_v14  ;;  %v5000_v42 = vsel %vm4997_vm1, %v4999_v23, %v4995_v58  ;;  %v8414_v15 = vld [vmem:[#allocation15 + $0xb0] sm:$0xff] }
 0x982   : > { %v5091_v63 = vadd.f32 0.05243302, %v5090_v28  ;;  %v12759_v25 = vmul.f32 0.5, %v12545_v36  ;;  %v5029_v0 = vsub.f32 1.0, %v5028_v52  ;;  %8939 = vrcp.f32 %v12747_v3  ;;  %7305 = vmatpush.bf16.msra.mxu0 %v8398_v27  ;;  %7403 = vmatpush.bf16.msra.mxu2 %v8414_v15 }
 0x983   : > { %v5217_v37 = vmul.f32 3.8918573e-05, %v12756_v48  ;;  %v12764_v31 = vmul.f32 0.70710677, %v12750_v9  ;;  %v12766_v61 = vpop.eup %8937  ;;  %v12770_v56 = vmul.f32 %v12665_v12, %v12356_v30  ;;  %v5053_v14 = vadd.f32 0.18741608, %v5052_v6  ;;  %7354 = vmatpush.bf16.msra.mxu1 %v8406_v4 }
 0x984   : > { %v5145_v36 = vmul.f32 %v5144_v5, %v12605_v20  ;;  %v5180_v28 = vadd.f32 0.014752088, %v5179_v2  ;;  %v5001_v34 = vmul.f32 %v5000_v42, %v4976_v46  ;;  %v5129_v19 = vadd.f32 0.0036580483, %v5128_v40  ;;  %8426 = vmatpush.bf16.msra.mxu3 %v8422_v44 }
 0x985   : > { %v5218_v58 = vadd.f32 0.001143296, %v5217_v37  ;;  %v5244_v52 = vmul.f32 %v12764_v31, %v12764_v31  ;;  %v5015_v13 = vadd.f32 1.1283791, %v5014_v10  ;;  %v5036_v23 = vand.u32 2147483647, %v12687_v11 }
 0x986   : > { %v5038_v30 = vand.u32 2147483648, %v12687_v11  ;;  %v5092_v12 = vmul.f32 %v5091_v63, %v12559_v35  ;;  %v5030_v6 = vmul.f32 %v12724_v55, %v5029_v0  ;;  %v5068_v5 = vmul.f32 %v12766_v61, %v12718_v50 }
 0x987   : > { %v5219_v46 = vmul.f32 %v5218_v58, %v12756_v48  ;;  %v12782_v2 = vmin.f32 %v5244_v52, 16.0  ;;  %vm5032_vm5 = vweird.f32 %v12687_v11  ;;  %v5054_v10 = vmul.f32 %v5053_v14, %v12515_v41  ;;  %v4024_v58 = vpop.f32.mrf.mxu0  ;;  %v8413_v11 = vld [vmem:[#allocation15 + $0xa8] sm:$0xff]  ;;  %7355 = vmatpush.bf16.msra.mxu1 %v8405_v21 }
 0x988   : > { %v12786_v40 = vadd.f32 1.0, %v5145_v36  ;;  %v5181_v42 = vmul.f32 %v5180_v28, %v12698_v29  ;;  %v12789_v63 = vpop.eup %8939  ;;  %v12792_v27 = vmul.f32 %v6899_v8, %v12487_v22  ;;  %v8122_v4 = vclamps-f32 %v5001_v34, 1.0  ;;  %7404 = vmatpush.bf16.msra.mxu2 %v8413_v11 }
 0x989   : > { %v5130_v0 = vmul.f32 %v5129_v19, %v12605_v20  ;;  %v5220_v37 = vadd.f32 0.014752088, %v5219_v46  ;;  %vm12795_vm6 = vcmp.eq.f32.partialorder %v5036_v23, 8.507059e+37  ;;  %v5039_v44 = vor.u32 1.1754944e-38, %v5038_v30 }
 0x98a   : > { %v5166_v41 = vmul.f32 2.1237322e-06, %v12698_v29  ;;  %v5257_v14 = vmul.f32 3.8918573e-05, %v12782_v2  ;;  %v5031_v36 = vadd.f32 %v12724_v55, %v5030_v6  ;;  %vm5033_vm7 = vweird.f32 %v12724_v55 }
 0x98b   : > { %v5069_v28 = vsub.f32 1.0, %v5068_v5  ;;  %v5093_v22 = vadd.f32 0.18741608, %v5092_v12  ;;  %v5055_v8 = vadd.f32 1.1283791, %v5054_v10  ;;  %v5108_v34 = vmul.f32 %v12789_v63, %v12747_v3  ;;  %vm12815_vm8 = vmor %vm5032_vm5, %vm5033_vm7 }
 0x98c   : > { %8941 = vrcp.f32 %v12786_v40  ;;  %v5182_v19 = vadd.f32 0.112945676, %v5181_v42  ;;  %v6900_v52 = vadd.f32 1.0, %v8122_v4  ;;  %v5076_v23 = vand.u32 2147483647, %v12718_v50  ;;  %v8397_v4 = vld [vmem:[#allocation15 + $0x28] sm:$0xff] }
 0x98d   : > { %v5131_v30 = vadd.f32 0.05243302, %v5130_v0  ;;  %v5221_v46 = vmul.f32 %v5220_v37, %v12756_v48  ;;  %v12810_v6 = vmul.f32 %v12713_v26, %v12482_v53  ;;  %v5016_v12 = vmul.f32 %v5015_v13, %v12433_v45  ;;  %v12827_v26 = vld [vmem:[#allocation15 + $0xe8] sm:$0xff]  ;;  %7306 = vmatpush.bf16.msra.mxu0 %v8397_v4 }
 0x98e   : > { %v5167_v10 = vadd.f32 0.00028619796, %v5166_v41  ;;  %v5258_v42 = vadd.f32 0.001143296, %v5257_v14  ;;  %v5035_v0 = vsel %vm12815_vm8, %v12724_v55, %v5031_v36  ;;  %v5070_v37 = vmul.f32 %v12766_v61, %v5069_v28  ;;  %8427 = vmatpush.bf16.msra.mxu3 %v12827_v26 }
 0x98f   : > { %15586 = vst [vmem:[#allocation45_spill] sm:$0xff] %v12810_v6  ;;  %v5094_v53 = vmul.f32 %v5093_v22, %v12559_v35  ;;  %v12825_v45 = vadd.f32 %v4024_v58, %v11498_v1  ;;  %v5078_v41 = vand.u32 2147483648, %v12718_v50  ;;  %v5109_v14 = vsub.f32 1.0, %v5108_v34 }
 0x990   : > { %v5183_v6 = vmul.f32 %v5182_v19, %v12698_v29  ;;  %v12834_v55 = vmul.f32 %v6900_v52, %v12548_v62  ;;  %v5056_v35 = vmul.f32 %v5055_v8, %v12479_v49  ;;  %vm5072_vm9 = vweird.f32 %v12718_v50 }
 0x991   : > { %v5222_v36 = vadd.f32 0.112945676, %v5221_v46  ;;  %v5040_v22 = vsel %vm12795_vm6, %v5039_v44, %v5035_v0  ;;  %vm12843_vm10 = vcmp.eq.f32.partialorder %v5076_v23, 8.507059e+37  ;;  %v5132_v21 = vmul.f32 %v5131_v30, %v12605_v20 }
 0x992   : > { %15589 = vst [vmem:[#allocation56_spill] sm:$0xff] %v12834_v55  ;;  %v12839_v28 = vpop.eup %8941  ;;  %v5168_v62 = vmul.f32 %v5167_v10, %v12698_v29  ;;  %v5259_v49 = vmul.f32 %v5258_v42, %v12782_v2  ;;  %v5071_v8 = vadd.f32 %v12766_v61, %v5070_v37  ;;  %vm5073_vm11 = vweird.f32 %v12766_v61 }
 0x993   : > { %v5095_v19 = vadd.f32 1.1283791, %v5094_v53  ;;  %v12853_v58 = vmul.f32 0.70710677, %v12825_v45  ;;  %v5079_v15 = vor.u32 1.1754944e-38, %v5078_v41  ;;  %v5110_v44 = vmul.f32 %v12789_v63, %v5109_v14  ;;  %vm12867_vm12 = vmor %vm5072_vm9, %vm5073_vm11 }
 0x994   : > { %v5184_v52 = vadd.f32 0.4994258, %v5183_v6  ;;  %v5206_v23 = vmul.f32 2.1237322e-06, %v12756_v48  ;;  %v12857_v46 = vmul.f32 %v5040_v22, %v5016_v12  ;;  %v5148_v30 = vmul.f32 %v12839_v28, %v12786_v40 }
 0x995   : > { %v12862_v5 = vmul.f32 0.5, %v12645_v33  ;;  %v5223_v10 = vmul.f32 %v5222_v36, %v12756_v48  ;;  %v5133_v4 = vadd.f32 0.18741608, %v5132_v21  ;;  %v5169_v6 = vadd.f32 0.0036580483, %v5168_v62  ;;  %v4073_v36 = vpop.f32.mrf.mxu1  ;;  %v3543_v62 = vpop.xlane.xlu1 %3542 }
 0x996   : > { %v5260_v0 = vadd.f32 0.014752088, %v5259_v49  ;;  %v5284_v12 = vmul.f32 %v12853_v58, %v12853_v58  ;;  %v5075_v37 = vsel %vm12867_vm12, %v12766_v61, %v5071_v8  ;;  %v5096_v33 = vmul.f32 %v5095_v19, %v12534_v7 }
 0x997   : > { %vm5113_vm13 = vweird.f32 %v12789_v63  ;;  %v5116_v50 = vand.u32 2147483647, %v12747_v3  ;;  %v5111_v53 = vadd.f32 %v12789_v63, %v5110_v44  ;;  %v5185_v11 = vmul.f32 %v5184_v52, %v12698_v29 }
 0x998   : > { %v5207_v41 = vadd.f32 0.00028619796, %v5206_v23  ;;  %v12881_v14 = vmin.f32 %v5284_v12, 16.0  ;;  %vm5112_vm14 = vweird.f32 %v12747_v3  ;;  %v5118_v22 = vand.u32 2147483648, %v12747_v3 }
 0x999   : > { %v5149_v21 = vsub.f32 1.0, %v5148_v30  ;;  %v5224_v61 = vadd.f32 0.4994258, %v5223_v10  ;;  %v8123_v7 = vclamps-f32 %v12857_v46, 1.0  ;;  %v5134_v49 = vmul.f32 %v5133_v4, %v12605_v20  ;;  %vm12893_vm15 = vmor %vm5112_vm14, %vm5113_vm13 }
 0x99a   : > { %v5170_v8 = vmul.f32 %v5169_v6, %v12698_v29  ;;  %v5261_v19 = vmul.f32 %v5260_v0, %v12782_v2  ;;  %v5080_v44 = vsel %vm12843_vm10, %v5079_v15, %v5075_v37  ;;  %vm5117_vm0 = vcmp.eq.f32.partialorder %v5116_v50, 8.507059e+37  ;;  %v15596_v15 = vld [vmem:[#allocation25_spill] sm:$0xff] }
 0x99b   : > { %v5297_v3 = vmul.f32 3.8918573e-05, %v12881_v14  ;;  %v12899_v23 = vadd.f32 %v4073_v36, %v11500_v18  ;;  %v5115_v20 = vsel %vm12893_vm15, %v12789_v63, %v5111_v53  ;;  %v12904_v46 = vadd.f32 1.0, %v5185_v11 }
 0x99c   : > { %v5208_v34 = vmul.f32 %v5207_v41, %v12756_v48  ;;  %v3559_v30 = vmul.f32 %v3543_v62, %v15596_v15  ;;  %v5119_v10 = vor.u32 1.1754944e-38, %v5118_v22  ;;  %v5150_v42 = vmul.f32 %v12839_v28, %v5149_v21  ;;  %v4122_v21 = vpop.f32.mrf.mxu2 }
 0x99d   : > { %v5225_v4 = vmul.f32 %v5224_v61, %v12756_v48  ;;  %v5298_v6 = vadd.f32 0.001143296, %v5297_v3  ;;  %v5081_v0 = vmul.f32 %v5080_v44, %v5056_v35  ;;  %v5135_v12 = vadd.f32 1.1283791, %v5134_v49  ;;  %v4171_v44 = vpop.f32.mrf.mxu3 }
 0x99e   : > { %v5171_v37 = vadd.f32 0.05243302, %v5170_v8  ;;  %v5262_v50 = vadd.f32 0.112945676, %v5261_v19  ;;  %v5120_v36 = vsel %vm5117_vm0, %v5119_v10, %v5115_v20  ;;  %v5246_v52 = vmul.f32 2.1237322e-06, %v12782_v2 }
 0x99f   : > { %v5299_v63 = vmul.f32 %v5298_v6, %v12881_v14  ;;  %v12913_v53 = vmul.f32 0.70710677, %v12899_v23  ;;  %v5156_v11 = vand.u32 2147483647, %v12786_v40  ;;  %8943 = vrcp.f32 %v12904_v46 }
 0x9a0   : > { %v5209_v41 = vadd.f32 0.0036580483, %v5208_v34  ;;  %v12917_v22 = vadd.f32 1e-05, %v3559_v30  ;;  %v5151_v35 = vadd.f32 %v12839_v28, %v5150_v42  ;;  %vm5152_vm2 = vweird.f32 %v12786_v40 }
 0x9a1   : > { %vm5153_vm3 = vweird.f32 %v12839_v28  ;;  %v12922_v61 = vadd.f32 1.0, %v5225_v4  ;;  %v5121_v62 = vmul.f32 %v5120_v36, %v5096_v33  ;;  %v5158_v49 = vand.u32 2147483648, %v12786_v40 }
 0x9a2   : > { %v5172_v8 = vmul.f32 %v5171_v37, %v12698_v29  ;;  %v5263_v19 = vmul.f32 %v5262_v50, %v12782_v2  ;;  %v5247_v3 = vadd.f32 0.00028619796, %v5246_v52  ;;  %v5300_v20 = vadd.f32 0.014752088, %v5299_v63  ;;  %vm12932_vm4 = vmor %vm5152_vm2, %vm5153_vm3 }
 0x9a3   : > { %v5324_v34 = vmul.f32 %v12913_v53, %v12913_v53  ;;  %v12930_v15 = vadd.f32 %v4122_v21, %v11520_v32  ;;  %v8124_v30 = vclamps-f32 %v5081_v0, 1.0  ;;  %vm12936_vm1 = vcmp.eq.f32.partialorder %v5156_v11, 8.507059e+37 }
 0x9a4   : > { %v5210_v33 = vmul.f32 %v5209_v41, %v12756_v48  ;;  %8945 = vrsqrt.f32 %v12917_v22  ;;  %v5155_v42 = vsel %vm12932_vm4, %v12839_v28, %v5151_v35  ;;  %v12949_v6 = vadd.f32 %v4171_v44, %v11528_v39 }
 0x9a5   : > { %8947 = vrcp.f32 %v12922_v61  ;;  %v12946_v4 = vmin.f32 %v5324_v34, 16.0  ;;  %v12951_v0 = vpop.eup %8943  ;;  %v8125_v37 = vclamps-f32 %v5121_v62, 1.0  ;;  %v5159_v50 = vor.u32 1.1754944e-38, %v5158_v49 }
 0x9a6   : > { %v5173_v36 = vadd.f32 0.18741608, %v5172_v8  ;;  %v5264_v52 = vadd.f32 0.4994258, %v5263_v19  ;;  %v5248_v63 = vmul.f32 %v5247_v3, %v12782_v2  ;;  %v5301_v11 = vmul.f32 %v5300_v20, %v12881_v14 }
 0x9a7   : > { %v5337_v41 = vmul.f32 3.8918573e-05, %v12946_v4  ;;  %v12957_v28 = vmul.f32 0.70710677, %v12930_v15  ;;  %v6901_v21 = vadd.f32 1.0, %v8123_v7  ;;  %v5160_v35 = vsel %vm12936_vm1, %v5159_v50, %v5155_v42 }
 0x9a8   : > { %v12962_v44 = vmul.f32 0.5, %v12711_v17  ;;  %v5211_v62 = vadd.f32 0.05243302, %v5210_v33  ;;  %v5136_v49 = vmul.f32 %v5135_v12, %v12565_v59  ;;  %v5188_v8 = vmul.f32 %v12951_v0, %v12904_v46 }
 0x9a9   : > { %v5338_v19 = vadd.f32 0.001143296, %v5337_v41  ;;  %v12968_v3 = vmul.f32 0.70710677, %v12949_v6  ;;  %v6902_v34 = vadd.f32 1.0, %v8124_v30  ;;  %v6903_v7 = vadd.f32 1.0, %v8125_v37 }
 0x9aa   : > { %v12970_v20 = vpop.eup %8945  ;;  %v5174_v10 = vmul.f32 %v5173_v36, %v12698_v29  ;;  %v5265_v40 = vmul.f32 %v5264_v52, %v12782_v2  ;;  %v5161_v33 = vmul.f32 %v5160_v35, %v5136_v49  ;;  %v5249_v42 = vadd.f32 0.0036580483, %v5248_v63  ;;  %v8396_v37 = vld [vmem:[#allocation15 + $0x20] sm:$0xff] }
 0x9ab   : > { %v12974_v17 = vpop.eup %8947  ;;  %v5302_v59 = vadd.f32 0.112945676, %v5301_v11  ;;  %v5364_v12 = vmul.f32 %v12957_v28, %v12957_v28  ;;  %v12979_v50 = vmul.f32 %v6901_v21, %v12570_v47  ;;  %v5212_v41 = vmul.f32 %v5211_v62, %v12756_v48  ;;  %v8404_v36 = vld [vmem:[#allocation15 + $0x60] sm:$0xff]  ;;  %7307 = vmatpush.bf16.msra.mxu0 %v8396_v37 }
 0x9ac   : > { %v12983_v30 = vmul.f32 0.5, %v12750_v9  ;;  %v5286_v29 = vmul.f32 2.1237322e-06, %v12881_v14  ;;  %v8412_v52 = vld [vmem:[#allocation15 + $0xa0] sm:$0xff]  ;;  %v5189_v13 = vsub.f32 1.0, %v5188_v8  ;;  %v3727_v63 = vmul.f32 %v12970_v20, %v12917_v22  ;;  %7356 = vmatpush.bf16.msra.mxu1 %v8404_v36 }
 0x9ad   : > { %15601 = vst [vmem:[#allocation25_spill] sm:$0xff] %v12979_v50  ;;  %v5339_v11 = vmul.f32 %v5338_v19, %v12946_v4  ;;  %v5404_v47 = vmul.f32 %v12968_v3, %v12968_v3  ;;  %v12992_v21 = vmul.f32 %v6902_v34, %v12639_v24  ;;  %v5175_v35 = vadd.f32 1.1283791, %v5174_v10  ;;  %v12998_v49 = vld [vmem:[#allocation15 + $0xe0] sm:$0xff]  ;;  %7405 = vmatpush.bf16.msra.mxu2 %v8412_v52  ;;  %v4026_v52 = vpop.f32.mrf.mxu0 }
 0x9ae   : > { %v5228_v9 = vmul.f32 %v12974_v17, %v12922_v61  ;;  %v12996_v62 = vadd.f32 1.0, %v5265_v40  ;;  %v13001_v8 = vmul.f32 %v6903_v7, %v12696_v43  ;;  %v8126_v19 = vclamps-f32 %v5161_v33, 1.0  ;;  %8428 = vmatpush.bf16.msra.mxu3 %v12998_v49 }
 0x9af   : > { %15602 = vst [vmem:[#allocation57_spill] sm:$0xff] %v12992_v21  ;;  %v5303_v50 = vmul.f32 %v5302_v59, %v12881_v14  ;;  %v13004_v55 = vmin.f32 %v5364_v12, 16.0  ;;  %v5196_v24 = vand.u32 2147483647, %v12904_v46  ;;  %v5213_v34 = vadd.f32 0.18741608, %v5212_v41 }
 0x9b0   : > { %15603 = vst [vmem:[#allocation58_spill] sm:$0xff] %v13001_v8  ;;  %v5250_v10 = vmul.f32 %v5249_v42, %v12782_v2  ;;  %v5287_v40 = vadd.f32 0.00028619796, %v5286_v29  ;;  %v5190_v37 = vmul.f32 %v12951_v0, %v5189_v13  ;;  %v3728_v36 = vmul.f32 %v12970_v20, %v3727_v63 }
 0x9b1   : > { %v5340_v43 = vadd.f32 0.014752088, %v5339_v11  ;;  %v13011_v7 = vmin.f32 %v5404_v47, 16.0  ;;  %v5176_v33 = vmul.f32 %v5175_v35, %v12663_v38  ;;  %v5198_v59 = vand.u32 2147483648, %v12904_v46 }
 0x9b2   : > { %v5229_v12 = vsub.f32 1.0, %v5228_v9  ;;  %8949 = vrcp.f32 %v12996_v62  ;;  %v6904_v41 = vadd.f32 1.0, %v8126_v19  ;;  %vm5192_vm5 = vweird.f32 %v12904_v46 }
 0x9b3   : > { %v5304_v42 = vadd.f32 0.4994258, %v5303_v50  ;;  %v5377_v29 = vmul.f32 3.8918573e-05, %v13004_v55  ;;  %vm5193_vm6 = vweird.f32 %v12951_v0  ;;  %vm13019_vm7 = vcmp.eq.f32.partialorder %v5196_v24, 8.507059e+37 }
 0x9b4   : > { %v5214_v38 = vmul.f32 %v5213_v34, %v12756_v48  ;;  %v5251_v63 = vadd.f32 0.05243302, %v5250_v10  ;;  %v5288_v11 = vmul.f32 %v5287_v40, %v12881_v14  ;;  %v5191_v47 = vadd.f32 %v12951_v0, %v5190_v37  ;;  %vm13047_vm10 = vmor %vm5192_vm5, %vm5193_vm6 }
 0x9b5   : > { %v3729_v35 = vmul.f32 0.5, %v3728_v36  ;;  %v5341_v9 = vmul.f32 %v5340_v43, %v12946_v4  ;;  %v5417_v50 = vmul.f32 3.8918573e-05, %v13011_v7  ;;  %v5199_v19 = vor.u32 1.1754944e-38, %v5198_v59 }
 0x9b6   : > { %v5230_v21 = vmul.f32 %v12974_v17, %v5229_v12  ;;  %vm3733_vm8 = vweird.f32 %v12970_v20  ;;  %v13031_v24 = vadd.f32 %v4026_v52, %v11498_v1  ;;  %v13034_v48 = vmul.f32 %v6904_v41, %v12759_v25 }
 0x9b7   : > { %vm3732_vm9 = vweird.f32 %v12917_v22  ;;  %v13038_v34 = vmul.f32 0.5, %v12825_v45  ;;  %v5305_v10 = vmul.f32 %v5304_v42, %v12881_v14  ;;  %v5378_v40 = vadd.f32 0.001143296, %v5377_v29 }
 0x9b8   : > { %15606 = vst [vmem:[#allocation59_spill] sm:$0xff] %v13034_v48  ;;  %v13041_v37 = vpop.eup %8949  ;;  %v5215_v25 = vadd.f32 1.1283791, %v5214_v38  ;;  %v5252_v43 = vmul.f32 %v5251_v63, %v12782_v2  ;;  %v5289_v59 = vadd.f32 0.0036580483, %v5288_v11  ;;  %v5195_v45 = vsel %vm13047_vm10, %v12951_v0, %v5191_v47  ;;  %vm13095_vm14 = vmor %vm3732_vm9, %vm3733_vm8 }
 0x9b9   : > { %v5418_v12 = vadd.f32 0.001143296, %v5417_v50  ;;  %vm5232_vm11 = vweird.f32 %v12922_v61  ;;  %v3730_v41 = vsub.f32 1.5, %v3729_v35  ;;  %v5342_v42 = vadd.f32 0.112945676, %v5341_v9 }
 0x9ba   : > { %v5231_v29 = vadd.f32 %v12974_v17, %v5230_v21  ;;  %vm5233_vm12 = vweird.f32 %v12974_v17  ;;  %v5326_v46 = vmul.f32 2.1237322e-06, %v12946_v4  ;;  %v13060_v52 = vmul.f32 0.70710677, %v13031_v24 }
 0x9bb   : > { %v5236_v38 = vand.u32 2147483647, %v12922_v61  ;;  %v5268_v63 = vmul.f32 %v13041_v37, %v12996_v62  ;;  %v13065_v11 = vadd.f32 1.0, %v5305_v10  ;;  %v5379_v0 = vmul.f32 %v5378_v40, %v13004_v55  ;;  %vm13077_vm13 = vmor %vm5232_vm11, %vm5233_vm12 }
 0x9bc   : > { %15609 = vst [vmem:[#allocation60_spill] sm:$0xff] %v13060_v52  ;;  %v5238_v47 = vand.u32 2147483648, %v12922_v61  ;;  %v5290_v21 = vmul.f32 %v5289_v59, %v12881_v14  ;;  %v5419_v35 = vmul.f32 %v5418_v12, %v13011_v7  ;;  %v5444_v9 = vmul.f32 %v13060_v52, %v13060_v52 }
 0x9bd   : > { %v5200_v50 = vsel %vm13019_vm7, %v5199_v19, %v5195_v45  ;;  %v3731_v10 = vmul.f32 %v12970_v20, %v3730_v41  ;;  %v5343_v40 = vmul.f32 %v5342_v42, %v12946_v4  ;;  %v5366_v59 = vmul.f32 2.1237322e-06, %v13004_v55 }
 0x9be   : > { %v5216_v12 = vmul.f32 %v5215_v25, %v12728_v60  ;;  %v5235_v48 = vsel %vm13077_vm13, %v12974_v17, %v5231_v29  ;;  %v5253_v13 = vadd.f32 0.18741608, %v5252_v43  ;;  %v5327_v19 = vadd.f32 0.00028619796, %v5326_v46 }
 0x9bf   : > { %v5269_v45 = vsub.f32 1.0, %v5268_v63  ;;  %8951 = vrcp.f32 %v13065_v11  ;;  %v5380_v61 = vadd.f32 0.014752088, %v5379_v0  ;;  %v13089_v52 = vmin.f32 %v5444_v9, 16.0  ;;  %v4075_v0 = vpop.f32.mrf.mxu1  ;;  %v15614_v9 = vld [vmem:[#allocation46_spill] sm:$0xff] }
 0x9c0   : > { %v5201_v8 = vmul.f32 %v5200_v50, %v5176_v33  ;;  %v5239_v41 = vor.u32 1.1754944e-38, %v5238_v47  ;;  %v5291_v25 = vadd.f32 0.05243302, %v5290_v21  ;;  %v5420_v17 = vadd.f32 0.014752088, %v5419_v35 }
 0x9c1   : > { %vm5237_vm15 = vcmp.eq.f32.partialorder %v5236_v38, 8.507059e+37  ;;  %v3735_v43 = vsel %vm13095_vm14, %v12970_v20, %v3731_v10  ;;  %v5344_v42 = vadd.f32 0.4994258, %v5343_v40  ;;  %v5367_v29 = vadd.f32 0.00028619796, %v5366_v59 }
 0x9c2   : > { %v5240_v46 = vsel %vm5237_vm15, %v5239_v41, %v5235_v48  ;;  %v13103_v33 = vmul.f32 0.5, %v12899_v23  ;;  %v5328_v63 = vmul.f32 %v5327_v19, %v12946_v4  ;;  %v5406_v22 = vmul.f32 2.1237322e-06, %v13011_v7 }
 0x9c3   : > { %v5254_v47 = vmul.f32 %v5253_v13, %v12782_v2  ;;  %v5270_v21 = vmul.f32 %v13041_v37, %v5269_v45  ;;  %v5381_v38 = vmul.f32 %v5380_v61, %v13004_v55  ;;  %v5457_v35 = vmul.f32 3.8918573e-05, %v13089_v52 }
 0x9c4   : > { %v8127_v20 = vclamps-f32 %v5201_v8, 1.0  ;;  %v3751_v50 = vmul.f32 %v3735_v43, %v15614_v9  ;;  %v5292_v48 = vmul.f32 %v5291_v25, %v12881_v14  ;;  %v5421_v23 = vmul.f32 %v5420_v17, %v13011_v7 }
 0x9c5   : > { %v13114_v36 = vpop.eup %8951  ;;  %v5241_v10 = vmul.f32 %v5240_v46, %v5216_v12  ;;  %v5345_v40 = vmul.f32 %v5344_v42, %v12946_v4  ;;  %v5368_v2 = vmul.f32 %v5367_v29, %v13004_v55  ;;  %v13119_v59 = vadd.f32 %v4075_v0, %v11500_v18 }
 0x9c6   : > { %vm5272_vm0 = vweird.f32 %v12996_v62  ;;  %v5276_v8 = vand.u32 2147483647, %v12996_v62  ;;  %v5329_v13 = vadd.f32 0.0036580483, %v5328_v63  ;;  %v5407_v19 = vadd.f32 0.00028619796, %v5406_v22 }
 0x9c7   : > { %v5271_v45 = vadd.f32 %v13041_v37, %v5270_v21  ;;  %vm5273_vm2 = vweird.f32 %v13041_v37  ;;  %v5382_v61 = vadd.f32 0.112945676, %v5381_v38  ;;  %v5458_v41 = vadd.f32 0.001143296, %v5457_v35 }
 0x9c8   : > { %v5278_v12 = vand.u32 2147483648, %v12996_v62  ;;  %v5293_v60 = vadd.f32 0.18741608, %v5292_v48  ;;  %v5308_v25 = vmul.f32 %v13114_v36, %v13065_v11  ;;  %v5422_v17 = vadd.f32 0.112945676, %v5421_v23  ;;  %vm13135_vm3 = vmor %vm5272_vm0, %vm5273_vm2 }
 0x9c9   : > { %v8128_v43 = vclamps-f32 %v5241_v10, 1.0  ;;  %v13128_v42 = vadd.f32 1.0, %v5345_v40  ;;  %v5369_v29 = vadd.f32 0.0036580483, %v5368_v2  ;;  %v13131_v46 = vmul.f32 0.70710677, %v13119_v59 }
 0x9ca   : > { %v6905_v63 = vadd.f32 1.0, %v8127_v20  ;;  %v5255_v22 = vadd.f32 1.1283791, %v5254_v47  ;;  %v5330_v21 = vmul.f32 %v5329_v13, %v12946_v4  ;;  %v5408_v38 = vmul.f32 %v5407_v19, %v13011_v7 }
 0x9cb   : > { %v5275_v35 = vsel %vm13135_vm3, %v13041_v37, %v5271_v45  ;;  %v5383_v9 = vmul.f32 %v5382_v61, %v13004_v55  ;;  %v5459_v48 = vmul.f32 %v5458_v41, %v13089_v52  ;;  %v5484_v47 = vmul.f32 %v13131_v46, %v13131_v46 }
 0x9cc   : > { %vm5277_vm4 = vcmp.eq.f32.partialorder %v5276_v8, 8.507059e+37  ;;  %v5279_v62 = vor.u32 1.1754944e-38, %v5278_v12  ;;  %v5309_v20 = vsub.f32 1.0, %v5308_v25  ;;  %v5423_v23 = vmul.f32 %v5422_v17, %v13011_v7 }
 0x9cd   : > { %v6906_v10 = vadd.f32 1.0, %v8128_v43  ;;  %v5294_v40 = vmul.f32 %v5293_v60, %v12881_v14  ;;  %8953 = vrcp.f32 %v13128_v42  ;;  %v5370_v2 = vmul.f32 %v5369_v29, %v13004_v55 }
 0x9ce   : > { %v5280_v37 = vsel %vm5277_vm4, %v5279_v62, %v5275_v35  ;;  %v5331_v13 = vadd.f32 0.05243302, %v5330_v21  ;;  %v5409_v19 = vadd.f32 0.0036580483, %v5408_v38  ;;  %v13152_v45 = vmin.f32 %v5484_v47, 16.0 }
 0x9cf   : > { %v5256_v61 = vmul.f32 %v5255_v22, %v12764_v31  ;;  %v13156_v8 = vmul.f32 0.5, %v12930_v15  ;;  %v5384_v41 = vadd.f32 0.4994258, %v5383_v9  ;;  %v5460_v12 = vadd.f32 0.014752088, %v5459_v48 }
 0x9d0   : > { %v13159_v25 = vmul.f32 %v6905_v63, %v12862_v5  ;;  %v5310_v14 = vmul.f32 %v13114_v36, %v5309_v20  ;;  %v13163_v60 = vmul.f32 0.5, %v12949_v6  ;;  %v5424_v17 = vadd.f32 0.4994258, %v5423_v23  ;;  %v9033_v5 = vld [vmem:[%s15490_s20] ss:$0 sm:$0xff] }
 0x9d1   : > { %15617 = vst [vmem:[#allocation46_spill] sm:$0xff] %v13156_v8  ;;  %v5281_v43 = vmul.f32 %v5280_v37, %v5256_v61  ;;  %v5295_v29 = vadd.f32 1.1283791, %v5294_v40  ;;  %v5371_v0 = vadd.f32 0.05243302, %v5370_v2  ;;  %v13167_v31 = vmul.f32 %v6906_v10, %v12962_v44  ;;  %v13287_v8 = vld [vmem:[#allocation15 + $0xc0] sm:$0xff] }
 0x9d2   : > { %v5497_v21 = vmul.f32 3.8918573e-05, %v13152_v45  ;;  %v5332_v15 = vmul.f32 %v5331_v13, %v12946_v4  ;;  %v5410_v22 = vmul.f32 %v5409_v19, %v13011_v7  ;;  %v3770_v63 = vmul.f32 %v9033_v5, %v3751_v50  ;;  %v9034_v37 = vld [vmem:[%s15492_s3] ss:$0 sm:$0xff] }
 0x9d3   : > { %v13174_v6 = vpop.eup %8953  ;;  %vm5312_vm1 = vweird.f32 %v13065_v11  ;;  %v5316_v38 = vand.u32 2147483647, %v13065_v11  ;;  %v5385_v35 = vmul.f32 %v5384_v41, %v13004_v55  ;;  %v5461_v44 = vmul.f32 %v5460_v12, %v13089_v52 }
 0x9d4   : > { %v5311_v9 = vadd.f32 %v13114_v36, %v5310_v14  ;;  %vm5313_vm5 = vweird.f32 %v13114_v36  ;;  %v5425_v48 = vmul.f32 %v5424_v17, %v13011_v7  ;;  %v3769_v47 = vmul.f32 %v9033_v5, %v12471_v57  ;;  %v13207_v5 = vld [vmem:[#allocation15 + $0xd8] sm:$0xff] }
 0x9d5   : > { %v8129_v62 = vclamps-f32 %v5281_v43, 1.0  ;;  %v5318_v50 = vand.u32 2147483648, %v13065_v11  ;;  %v5372_v20 = vmul.f32 %v5371_v0, %v13004_v55  ;;  %v5498_v23 = vadd.f32 0.001143296, %v5497_v21  ;;  %vm13194_vm6 = vmor %vm5312_vm1, %vm5313_vm5  ;;  %v8403_v11 = vld [vmem:[#allocation15 + $0x58] sm:$0xff]  ;;  %8429 = vmatpush.bf16.msra.mxu3 %v13207_v5 }
 0x9d6   : > { %v5333_v10 = vadd.f32 0.18741608, %v5332_v15  ;;  %v5348_v40 = vmul.f32 %v13174_v6, %v13128_v42  ;;  %v5411_v2 = vadd.f32 0.05243302, %v5410_v22  ;;  %v3789_v13 = vadd.f32 %v9034_v37, %v3770_v63  ;;  %v8411_v0 = vld [vmem:[#allocation15 + $0x98] sm:$0xff]  ;;  %7357 = vmatpush.bf16.msra.mxu1 %v8403_v11 }
 0x9d7   : > { %v5296_v19 = vmul.f32 %v5295_v29, %v12853_v58  ;;  %v13198_v61 = vadd.f32 1.0, %v5385_v35  ;;  %v5462_v41 = vadd.f32 0.112945676, %v5461_v44  ;;  %v5499_v12 = vmul.f32 %v5498_v23, %v13152_v45  ;;  %v8395_v29 = vld [vmem:[#allocation15 + $0x18] sm:$0xff]  ;;  %7406 = vmatpush.bf16.msra.mxu2 %v8411_v0  ;;  %v8394_v23 = vld [vmem:[#allocation15 + $0x10] sm:$0xff] }
 0x9d8   : > { %v5315_v14 = vsel %vm13194_vm6, %v13114_v36, %v5311_v9  ;;  %v13204_v17 = vadd.f32 1.0, %v5425_v48  ;;  %v5446_v43 = vmul.f32 2.1237322e-06, %v13089_v52  ;;  %v3788_v58 = vadd.f32 %v9034_v37, %v3769_v47  ;;  %v4124_v9 = vpop.f32.mrf.mxu2  ;;  %v4173_v48 = vpop.f32.mrf.mxu3  ;;  %7308 = vmatpush.bf16.msra.mxu0 %v8395_v29 }
 0x9d9   : > { %v6907_v21 = vadd.f32 1.0, %v8129_v62  ;;  %vm5317_vm7 = vcmp.eq.f32.partialorder %v5316_v38, 8.507059e+37  ;;  %v5319_v15 = vor.u32 1.1754944e-38, %v5318_v50  ;;  %v5373_v22 = vadd.f32 0.18741608, %v5372_v20 }
 0x9da   : > { %v5334_v63 = vmul.f32 %v5333_v10, %v12946_v4  ;;  %v5349_v35 = vsub.f32 1.0, %v5348_v40  ;;  %v5412_v44 = vmul.f32 %v5411_v2, %v13011_v7  ;;  %v3797_v36 = vpack.c.bf16 %v3789_v13, %v3788_v58  ;;  %v8402_v10 = vld [vmem:[#allocation15 + $0x50] sm:$0xff] }
 0x9db   : > { %v5320_v47 = vsel %vm5317_vm7, %v5319_v15, %v5315_v14  ;;  %8955 = vrcp.f32 %v13198_v61  ;;  %v5463_v62 = vmul.f32 %v5462_v41, %v13089_v52  ;;  %v5500_v38 = vadd.f32 0.014752088, %v5499_v12  ;;  %v8410_v40 = vld [vmem:[#allocation15 + $0x90] sm:$0xff]  ;;  %7358 = vmatpush.bf16.msra.mxu1 %v8402_v10  ;;  %v8393_v15 = vld [vmem:[#allocation15 + $0x8] sm:$0xff] }
 0x9dc   : > { %8957 = vrcp.f32 %v13204_v17  ;;  %v5447_v4 = vadd.f32 0.00028619796, %v5446_v43  ;;  %4043 = vmatmul.bf16.gmra.mxu0 %v3797_v36  ;;  %4092 = vmatmul.bf16.gmra.mxu1 %v3797_v36  ;;  %v13216_v50 = vadd.f32 %v4124_v9, %v11520_v32  ;;  %v13219_v20 = vadd.f32 %v4173_v48, %v11528_v39  ;;  %v13229_v41 = vld [vmem:[#allocation15 + $0xd0] sm:$0xff]  ;;  %v13254_v9 = vld [vmem:[#allocation15 + $0xc8] sm:$0xff] }
 0x9dd   : > { %v13222_v2 = vmul.f32 %v6907_v21, %v12983_v30  ;;  %v5356_v37 = vand.u32 2147483647, %v13128_v42  ;;  %v5374_v13 = vmul.f32 %v5373_v22, %v13004_v55  ;;  %v13227_v57 = vmul.f32 0.5, %v13031_v24  ;;  %4141 = vmatmul.bf16.gmra.mxu2 %v3797_v36  ;;  %4190 = vmatmul.bf16.gmra.mxu3 %v3797_v36  ;;  %v8401_v22 = vld [vmem:[#allocation15 + $0x48] sm:$0xff] }
 0x9de   : > { %15620 = vst [vmem:[#allocation61_spill] sm:$0xff] %v13216_v50  ;;  %v5335_v12 = vadd.f32 1.1283791, %v5334_v63  ;;  %v5350_v14 = vmul.f32 %v13174_v6, %v5349_v35  ;;  %v13233_v43 = vmul.f32 0.70710677, %v13216_v50  ;;  %7309 = vmatpush.bf16.msra.mxu0 %v8394_v23  ;;  %v5321_v58 = vmul.f32 %v5320_v47, %v5296_v19  ;;  %7407 = vmatpush.bf16.msra.mxu2 %v8410_v40  ;;  %v8409_v36 = vld [vmem:[#allocation15 + $0x88] sm:$0xff] }
 0x9df   : > { %15621 = vst [vmem:[#allocation62_spill] sm:$0xff] %v13227_v57  ;;  %v13236_v30 = vmul.f32 0.70710677, %v13219_v20  ;;  %v5413_v55 = vadd.f32 0.18741608, %v5412_v44  ;;  %v5501_v24 = vmul.f32 %v5500_v38, %v13152_v45  ;;  %8430 = vmatpush.bf16.msra.mxu3 %v13229_v41  ;;  %vm5352_vm8 = vweird.f32 %v13128_v42  ;;  %7359 = vmatpush.bf16.msra.mxu1 %v8401_v22  ;;  %v8408_v22 = vld [vmem:[#allocation15 + $0x80] sm:$0xff] }
 0x9e0   : > { %15622 = vst [vmem:[#allocation63_spill] sm:$0xff] %v13233_v43  ;;  %v5464_v29 = vadd.f32 0.4994258, %v5463_v62  ;;  %v5448_v11 = vmul.f32 %v5447_v4, %v13089_v52  ;;  %v5524_v0 = vmul.f32 %v13233_v43, %v13233_v43  ;;  %vm5353_vm9 = vweird.f32 %v13174_v6 }
 0x9e1   : > { %v5564_v21 = vmul.f32 %v13236_v30, %v13236_v30  ;;  %v13246_v19 = vpop.eup %8955  ;;  %vm13249_vm10 = vcmp.eq.f32.partialorder %v5356_v37, 8.507059e+37  ;;  %v5358_v35 = vand.u32 2147483648, %v13128_v42  ;;  %v5375_v44 = vadd.f32 1.1283791, %v5374_v13  ;;  %vm13271_vm11 = vmor %vm5352_vm8, %vm5353_vm9 }
 0x9e2   : > { %v13256_v48 = vpop.eup %8957  ;;  %v5351_v47 = vadd.f32 %v13174_v6, %v5350_v14  ;;  %v5486_v62 = vmul.f32 2.1237322e-06, %v13152_v45  ;;  %v13260_v38 = vmin.f32 %v5524_v0, 16.0  ;;  %7310 = vmatpush.bf16.msra.mxu0 %v8393_v15  ;;  %v8130_v23 = vclamps-f32 %v5321_v58, 1.0  ;;  %7408 = vmatpush.bf16.msra.mxu2 %v8409_v36  ;;  %v8400_v15 = vld [vmem:[#allocation15 + $0x40] sm:$0xff] }
 0x9e3   : > { %v13262_v4 = vmin.f32 %v5564_v21, 16.0  ;;  %v5414_v10 = vmul.f32 %v5413_v55, %v13011_v7  ;;  %v5465_v40 = vmul.f32 %v5464_v29, %v13089_v52  ;;  %v5502_v37 = vadd.f32 0.112945676, %v5501_v24  ;;  %8431 = vmatpush.bf16.msra.mxu3 %v13254_v9  ;;  %v8392_v21 = vld [vmem:[#allocation15] sm:$0xff]  ;;  %7360 = vmatpush.bf16.msra.mxu1 %v8400_v15 }
 0x9e4   : > { %v5388_v14 = vmul.f32 %v13246_v19, %v13198_v61  ;;  %v5449_v58 = vadd.f32 0.0036580483, %v5448_v11  ;;  %v5537_v7 = vmul.f32 3.8918573e-05, %v13260_v38  ;;  %v5336_v29 = vmul.f32 %v5335_v12, %v12913_v53 }
 0x9e5   : > { %v5566_v55 = vmul.f32 2.1237322e-06, %v13262_v4  ;;  %v5359_v24 = vor.u32 1.1754944e-38, %v5358_v35  ;;  %v5428_v0 = vmul.f32 %v13256_v48, %v13204_v17  ;;  %v5577_v42 = vmul.f32 3.8918573e-05, %v13262_v4 }
 0x9e6   : > { %v5355_v36 = vsel %vm13271_vm11, %v13174_v6, %v5351_v47  ;;  %v5398_v11 = vand.u32 2147483648, %v13198_v61  ;;  %v5487_v57 = vadd.f32 0.00028619796, %v5486_v62  ;;  %v5538_v50 = vadd.f32 0.001143296, %v5537_v7  ;;  %7311 = vmatpush.bf16.msra.mxu0 %v8392_v21  ;;  %7409 = vmatpush.bf16.msra.mxu2 %v8408_v22  ;;  %v9035_v7 = vld [vmem:[#allocation15 + $0xf8] sm:$0xff] }
 0x9e7   : > { %v13289_v53 = vadd.f32 1.0, %v5465_v40  ;;  %v5503_v12 = vmul.f32 %v5502_v37, %v13152_v45  ;;  %v5567_v35 = vadd.f32 0.00028619796, %v5566_v55  ;;  %v5578_v43 = vadd.f32 0.001143296, %v5577_v42  ;;  %8432 = vmatpush.bf16.msra.mxu3 %v13287_v8  ;;  %v15627_v42 = vld [vmem:[#allocation53_spill] sm:$0xff] }
 0x9e8   : > { %v6908_v39 = vadd.f32 1.0, %v8130_v23  ;;  %v13293_v32 = vmul.f32 %v5375_v44, %v12957_v28  ;;  %v5389_v13 = vsub.f32 1.0, %v5388_v14  ;;  %v5415_v6 = vadd.f32 1.1283791, %v5414_v10  ;;  %v15628_v21 = vld [vmem:[#allocation49_spill] sm:$0xff]  ;;  %v15631_v22 = vld [vmem:[#allocation50_spill] sm:$0xff] }
 0x9e9   : > { %v5396_v47 = vand.u32 2147483647, %v13198_v61  ;;  %v5429_v62 = vsub.f32 1.0, %v5428_v0  ;;  %v5450_v40 = vmul.f32 %v5449_v58, %v13089_v52  ;;  %v5539_v37 = vmul.f32 %v5538_v50, %v13260_v38 }
 0x9ea   : > { %7451 = vmatpush.bf16.msrb.mxu0 %v9035_v7  ;;  %v5360_v23 = vsel %vm13249_vm10, %v5359_v24, %v5355_v36  ;;  %vm5392_vm12 = vweird.f32 %v13198_v61  ;;  %v13302_v28 = vor.u32 1.1754944e-38, %v5398_v11  ;;  %v5568_v44 = vmul.f32 %v5567_v35, %v13262_v4  ;;  %v15634_v35 = vld [vmem:[#allocation51_spill] sm:$0xff] }
 0x9eb   : > { %v5579_v10 = vmul.f32 %v5578_v43, %v13262_v4  ;;  %8959 = vrcp.f32 %v13289_v53  ;;  %v5488_v14 = vmul.f32 %v5487_v57, %v13152_v45  ;;  %v5504_v58 = vadd.f32 0.4994258, %v5503_v12  ;;  %v15630_v43 = vld [vmem:[#allocation54_spill] sm:$0xff] }
 0x9ec   : > { %v5540_v55 = vadd.f32 0.014752088, %v5539_v37  ;;  %v13309_v50 = vmul.f32 %v6908_v39, %v13038_v34  ;;  %v5390_v63 = vmul.f32 %v13246_v19, %v5389_v13  ;;  %v13313_v24 = vmul.f32 %v5415_v6, %v12968_v3  ;;  %v15633_v12 = vld [vmem:[#allocation42_spill] sm:$0xff] }
 0x9ed   : > { %v5580_v0 = vadd.f32 0.014752088, %v5579_v10  ;;  %v15629_v15 = vpack.c.bf16 %v15627_v42, %v15628_v21  ;;  %v15632_v36 = vpack.c.bf16 %v15630_v43, %v15631_v22  ;;  %v5430_v57 = vmul.f32 %v13256_v48, %v5429_v62  ;;  %v9036_v7 = vld [vmem:[#allocation15 + $0xf0] sm:$0xff]  ;;  %v4029_v43 = vpop.f32.mrf.mxu0 }
 0x9ee   : > { %v5451_v11 = vadd.f32 0.05243302, %v5450_v40  ;;  %v5526_v39 = vmul.f32 2.1237322e-06, %v13260_v38  ;;  %v5541_v34 = vmul.f32 %v5540_v55, %v13260_v38  ;;  %v15635_v3 = vpack.c.bf16 %v15633_v12, %v15634_v35  ;;  %7452 = vmatpush.bf16.msrb.mxu0 %v9036_v7 }
 0x9ef   : > { %7312 = vmatmul.bf16.vlgmr.msra.gmra.mxu0 %v15629_v15  ;;  %7361 = vmatmul.bf16.vlgmr.msra.gmra.mxu1 %v15632_v36  ;;  %v15636_v13 = vpack.c.bf16 %v12792_v27, %v12562_v51  ;;  %v5361_v6 = vmul.f32 %v5360_v23, %v5336_v29  ;;  %vm5393_vm13 = vweird.f32 %v13246_v19  ;;  %vm13331_vm14 = vcmp.eq.f32.partialorder %v5396_v47, 8.507059e+37 }
 0x9f0   : > { %7410 = vmatmul.bf16.vlgmr.msra.gmra.mxu2 %v15635_v3  ;;  %v5569_v62 = vadd.f32 0.0036580483, %v5568_v44  ;;  %v5581_v40 = vmul.f32 %v5580_v0, %v13262_v4  ;;  %vm5432_vm15 = vweird.f32 %v13204_v17  ;;  %v5436_v10 = vand.u32 2147483647, %v13204_v17  ;;  %vm13354_vm2 = vmor %vm5392_vm12, %vm5393_vm13 }
 0x9f1   : > { %7464 = vmatmul.bf16.vlgmr.msra.gmra.mxu3 %v15636_v13  ;;  %v5489_v55 = vadd.f32 0.0036580483, %v5488_v14  ;;  %v5505_v51 = vmul.f32 %v5504_v58, %v13152_v45  ;;  %v5391_v27 = vadd.f32 %v13246_v19, %v5390_v63  ;;  %v5438_v29 = vand.u32 2147483648, %v13204_v17  ;;  %v13341_v42 = vpop.eup %8959 }
 0x9f2   : > { %v5542_v47 = vadd.f32 0.112945676, %v5541_v34  ;;  %v5582_v23 = vadd.f32 0.112945676, %v5581_v40  ;;  %v5431_v44 = vadd.f32 %v13256_v48, %v5430_v57  ;;  %vm5433_vm0 = vweird.f32 %v13256_v48  ;;  %7453 = vmatpush.bf16.msrb.mxu0 %v12827_v26 }
 0x9f3   : > { %v5452_v0 = vmul.f32 %v5451_v11, %v13089_v52  ;;  %v5527_v21 = vadd.f32 0.00028619796, %v5526_v39  ;;  %v8131_v15 = vclamps-f32 %v5361_v6, 1.0  ;;  %v5570_v58 = vmul.f32 %v5569_v62, %v13262_v4  ;;  %vm13375_vm4 = vmor %vm5432_vm15, %vm5433_vm0 }
 0x9f4   : > { %v5543_v14 = vmul.f32 %v5542_v47, %v13260_v38  ;;  %v5583_v63 = vmul.f32 %v5582_v23, %v13262_v4  ;;  %vm13358_vm3 = vcmp.eq.f32.partialorder %v5436_v10, 8.507059e+37  ;;  %v5490_v57 = vmul.f32 %v5489_v55, %v13152_v45 }
 0x9f5   : > { %v13363_v11 = vadd.f32 1.0, %v5505_v51  ;;  %v13366_v39 = vadd.f32 %v4029_v43, %v11498_v1  ;;  %v5395_v26 = vsel %vm13354_vm2, %v13246_v19, %v5391_v27  ;;  %v5468_v34 = vmul.f32 %v13341_v42, %v13289_v53 }
 0x9f6   : > { %v5544_v12 = vadd.f32 0.4994258, %v5543_v14  ;;  %v5584_v35 = vadd.f32 0.4994258, %v5583_v63  ;;  %v5435_v3 = vsel %vm13375_vm4, %v13256_v48, %v5431_v44  ;;  %v5453_v13 = vadd.f32 0.18741608, %v5452_v0  ;;  %7454 = vmatpush.bf16.msrb.mxu0 %v12998_v49 }
 0x9f7   : > { %v5528_v19 = vmul.f32 %v5527_v21, %v13260_v38  ;;  %v13386_v6 = vmul.f32 0.70710677, %v13366_v39  ;;  %v6909_v17 = vadd.f32 1.0, %v8131_v15  ;;  %v5439_v62 = vor.u32 1.1754944e-38, %v5438_v29  ;;  %v15645_v44 = vld [vmem:[#allocation43_spill] sm:$0xff]  ;;  %v15646_v14 = vld [vmem:[#allocation44_spill] sm:$0xff] }
 0x9f8   : > { %v5571_v40 = vadd.f32 0.05243302, %v5570_v58  ;;  %v5585_v7 = vmul.f32 %v5584_v35, %v13262_v4  ;;  %v5400_v10 = vsel %vm13331_vm14, %v13302_v28, %v5395_v26  ;;  %v5491_v55 = vadd.f32 0.05243302, %v5490_v57  ;;  %v15647_v58 = vld [vmem:[#allocation45_spill] sm:$0xff] }
 0x9f9   : > { %8961 = vrcp.f32 %v13363_v11  ;;  %v5604_v48 = vmul.f32 %v13386_v6, %v13386_v6  ;;  %v5440_v51 = vsel %vm13358_vm3, %v5439_v62, %v5435_v3  ;;  %v5469_v27 = vsub.f32 1.0, %v5468_v34 }
 0x9fa   : > { %v5545_v29 = vmul.f32 %v5544_v12, %v13260_v38  ;;  %v13399_v47 = vadd.f32 1.0, %v5585_v7  ;;  %v5454_v49 = vmul.f32 %v5453_v13, %v13089_v52  ;;  %v5529_v23 = vadd.f32 0.0036580483, %v5528_v19  ;;  %7455 = vmatpush.bf16.msrb.mxu0 %v13207_v5 }
 0x9fb   : > { %v7016_v28 = vpack.c.bf16 %v12632_v54, %v15645_v44  ;;  %v13404_v37 = vmin.f32 %v5604_v48, 16.0  ;;  %v13407_v0 = vmul.f32 %v5400_v10, %v13293_v32  ;;  %v5572_v21 = vmul.f32 %v5571_v40, %v13262_v4  ;;  %v15648_v54 = vld [vmem:[#allocation58_spill] sm:$0xff]  ;;  %v15649_v40 = vld [vmem:[#allocation60_spill] sm:$0xff]  ;;  %v15655_v44 = vld [vmem:[#allocation59_spill] sm:$0xff] }
 0x9fc   : > { %v7017_v15 = vpack.c.bf16 %v12770_v56, %v12490_v16  ;;  %v7018_v63 = vpack.c.bf16 %v15647_v58, %v15646_v14  ;;  %v5441_v52 = vmul.f32 %v5440_v51, %v13313_v24  ;;  %v5492_v43 = vmul.f32 %v5491_v55, %v13152_v45 }
 0x9fd   : > { %8963 = vrcp.f32 %v13399_v47  ;;  %v7023_v32 = vpack.c.bf16 %v13222_v2, %v15648_v54  ;;  %v13421_v22 = vmul.f32 %v6909_v17, %v13103_v33  ;;  %v5470_v36 = vmul.f32 %v13341_v42, %v5469_v27 }
 0x9fe   : > { %v13425_v16 = vmul.f32 0.5, %v13119_v59  ;;  %v13427_v56 = vadd.f32 1.0, %v5545_v29  ;;  %v5455_v24 = vadd.f32 1.1283791, %v5454_v49  ;;  %v5530_v57 = vmul.f32 %v5529_v23, %v13260_v38  ;;  %7456 = vmatpush.bf16.msrb.mxu0 %v13229_v41  ;;  %v15654_v23 = vld [vmem:[#allocation56_spill] sm:$0xff] }
 0x9ff   : > { %7317 = vmatmul.bf16.gmra.mxu0 %v7016_v28  ;;  %7366 = vmatmul.bf16.gmra.mxu1 %v7017_v15  ;;  %v13429_v5 = vpop.eup %8961  ;;  %v5606_v2 = vmul.f32 2.1237322e-06, %v13404_v37  ;;  %v5617_v33 = vmul.f32 3.8918573e-05, %v13404_v37  ;;  %v8132_v26 = vclamps-f32 %v13407_v0, 1.0  ;;  %v5478_v61 = vand.u32 2147483648, %v13289_v53 }
 0xa00   : > { %7415 = vmatmul.bf16.gmra.mxu2 %v7018_v63  ;;  %v5476_v59 = vand.u32 2147483647, %v13289_v53  ;;  %v5573_v34 = vadd.f32 0.18741608, %v5572_v21  ;;  %v8133_v12 = vclamps-f32 %v5441_v52, 1.0  ;;  %vm5473_vm1 = vweird.f32 %v13341_v42  ;;  %v15656_v52 = vld [vmem:[#allocation25_spill] sm:$0xff] }
 0xa01   : > { %7469 = vmatmul.bf16.gmra.mxu3 %v7023_v32  ;;  %v5493_v35 = vadd.f32 0.18741608, %v5492_v43  ;;  %v5618_v3 = vadd.f32 0.001143296, %v5617_v33  ;;  %v5471_v13 = vadd.f32 %v13341_v42, %v5470_v36  ;;  %v5508_v19 = vmul.f32 %v13429_v5, %v13363_v11 }
 0xa02   : > { %8965 = vrcp.f32 %v13427_v56  ;;  %v5607_v17 = vadd.f32 0.00028619796, %v5606_v2  ;;  %v5456_v7 = vmul.f32 %v5455_v24, %v15649_v40  ;;  %vm5472_vm5 = vweird.f32 %v13289_v53  ;;  %7457 = vmatpush.bf16.msrb.mxu0 %v13254_v9  ;;  %v15657_v2 = vld [vmem:[#allocation57_spill] sm:$0xff] }
 0xa03   : > { %v8964_v62 = vpop.eup %8963  ;;  %v5531_v10 = vadd.f32 0.05243302, %v5530_v57  ;;  %v5619_v41 = vmul.f32 %v5618_v3, %v13404_v37  ;;  %vm13446_vm6 = vcmp.eq.f32.partialorder %v5476_v59, 8.507059e+37  ;;  %v5479_v48 = vor.u32 1.1754944e-38, %v5478_v61  ;;  %vm13455_vm7 = vmor %vm5472_vm5, %vm5473_vm1 }
 0xa04   : > { %v5574_v51 = vmul.f32 %v5573_v34, %v13262_v4  ;;  %v5588_v27 = vmul.f32 %v8964_v62, %v13399_v47  ;;  %v6911_v29 = vadd.f32 1.0, %v8133_v12  ;;  %v5494_v53 = vmul.f32 %v5493_v35, %v13152_v45  ;;  %v4078_v12 = vpop.f32.mrf.mxu1 }
 0xa05   : > { %v7020_v28 = vpack.c.bf16 %v15655_v44, %v15654_v23  ;;  %v5620_v21 = vadd.f32 0.014752088, %v5619_v41  ;;  %v5475_v4 = vsel %vm13455_vm7, %v13341_v42, %v5471_v13  ;;  %v5509_v15 = vsub.f32 1.0, %v5508_v19 }
 0xa06   : > { %v5589_v14 = vsub.f32 1.0, %v5588_v27  ;;  %v5608_v9 = vmul.f32 %v5607_v17, %v13404_v37  ;;  %v5532_v58 = vmul.f32 %v5531_v10, %v13260_v38  ;;  %v5598_v63 = vand.u32 2147483648, %v13399_v47  ;;  %7458 = vmatpush.bf16.msrb.mxu0 %v13287_v8 }
 0xa07   : > { %v7021_v43 = vpack.c.bf16 %v13159_v25, %v15656_v52  ;;  %v5621_v45 = vmul.f32 %v5620_v21, %v13404_v37  ;;  %v5575_v32 = vadd.f32 1.1283791, %v5574_v51  ;;  %vm5593_vm8 = vweird.f32 %v8964_v62  ;;  %v4031_v52 = vpop.f32.mrf.mxu0 }
 0xa08   : > { %v13471_v54 = vpop.eup %8965  ;;  %v5590_v36 = vmul.f32 %v8964_v62, %v5589_v14  ;;  %v5596_v42 = vand.u32 2147483647, %v13399_v47  ;;  %v5480_v24 = vsel %vm13446_vm6, %v5479_v48, %v5475_v4  ;;  %v5495_v57 = vadd.f32 1.1283791, %v5494_v53 }
 0xa09   : > { %v7022_v33 = vpack.c.bf16 %v13167_v31, %v15657_v2  ;;  %v5622_v59 = vadd.f32 0.112945676, %v5621_v45  ;;  %v5510_v25 = vmul.f32 %v13429_v5, %v5509_v15  ;;  %vm5592_vm9 = vweird.f32 %v13399_v47  ;;  %v15660_v45 = vld [vmem:[#allocation47_spill] sm:$0xff] }
 0xa0a   : > { %v5591_v61 = vadd.f32 %v8964_v62, %v5590_v36  ;;  %v5609_v34 = vadd.f32 0.0036580483, %v5608_v9  ;;  %v5548_v35 = vmul.f32 %v13471_v54, %v13427_v56  ;;  %vm5594_vm10 = vmor %vm5592_vm9, %vm5593_vm8  ;;  %v5599_v8 = vor.u32 1.1754944e-38, %v5598_v63  ;;  %v15661_v36 = vld [vmem:[#allocation48_spill] sm:$0xff] }
 0xa0b   : > { %v5623_v3 = vmul.f32 %v5622_v59, %v13404_v37  ;;  %v13485_v13 = vadd.f32 %v4078_v12, %v11500_v18  ;;  %v5533_v19 = vadd.f32 0.18741608, %v5532_v58  ;;  %v5576_v31 = vmul.f32 %v5575_v32, %v13236_v30 }
 0xa0c   : > { %v5595_v17 = vsel %vm5594_vm10, %v8964_v62, %v5591_v61  ;;  %vm5597_vm11 = vcmp.eq.f32.partialorder %v5596_v42, 8.507059e+37  ;;  %vm5512_vm12 = vweird.f32 %v13363_v11  ;;  %vm5513_vm13 = vweird.f32 %v13429_v5 }
 0xa0d   : > { %v5600_v47 = vsel %vm5597_vm11, %v5599_v8, %v5595_v17  ;;  %v5624_v40 = vadd.f32 0.4994258, %v5623_v3  ;;  %v5511_v10 = vadd.f32 %v13429_v5, %v5510_v25  ;;  %v5610_v55 = vmul.f32 %v5609_v34, %v13404_v37  ;;  %vm13512_vm14 = vmor %vm5512_vm12, %vm5513_vm13  ;;  %v15662_v34 = vld [vmem:[#allocation63_spill] sm:$0xff] }
 0xa0e   : > { %v5601_v41 = vmul.f32 %v5600_v47, %v5576_v31  ;;  %v13493_v48 = vmul.f32 0.70710677, %v13485_v13  ;;  %v5516_v30 = vand.u32 2147483647, %v13363_v11  ;;  %v5518_v62 = vand.u32 2147483648, %v13363_v11  ;;  %v4176_v11 = vpop.f32.mrf.mxu3 }
 0xa0f   : > { %7322 = vmatmul.bf16.gmra.mxu0 %v7020_v28  ;;  %7371 = vmatmul.bf16.gmra.mxu1 %v7021_v43  ;;  %v5549_v51 = vsub.f32 1.0, %v5548_v35  ;;  %v5625_v27 = vmul.f32 %v5624_v40, %v13404_v37  ;;  %v13498_v49 = vmul.f32 %v5480_v24, %v5456_v7  ;;  %v5534_v53 = vmul.f32 %v5533_v19, %v13260_v38 }
 0xa10   : > { %7420 = vmatmul.bf16.gmra.mxu2 %v7022_v33  ;;  %v8137_v23 = vclamps-f32 %v5601_v41, 1.0  ;;  %v5644_v44 = vmul.f32 %v13493_v48, %v13493_v48  ;;  %v13505_v28 = vadd.f32 1.0, %v8132_v26  ;;  %v6975_v21 = vmul.f32 %v6911_v29, %v13163_v60  ;;  %v4127_v29 = vpop.f32.mrf.mxu2 }
 0xa11   : > { %v4227_v38 = vmul.f32 0.5, %v13219_v20  ;;  %v13517_v7 = vadd.f32 1.0, %v5625_v27  ;;  %v13520_v15 = vmul.f32 %v5495_v57, %v13131_v46  ;;  %v5515_v0 = vsel %vm13512_vm14, %v13429_v5, %v5511_v10 }
 0xa12   : > { %v5611_v60 = vadd.f32 0.05243302, %v5610_v55  ;;  %v13525_v26 = vmin.f32 %v5644_v44, 16.0  ;;  %vm5517_vm15 = vcmp.eq.f32.partialorder %v5516_v30, 8.507059e+37  ;;  %v5519_v14 = vor.u32 1.1754944e-38, %v5518_v62 }
 0xa13   : > { %v5550_v9 = vmul.f32 %v13471_v54, %v5549_v51  ;;  %8967 = vrcp.f32 %v13517_v7  ;;  %v8134_v20 = vclamps-f32 %v13498_v49, 1.0  ;;  %v5535_v58 = vadd.f32 1.1283791, %v5534_v53 }
 0xa14   : > { %v6915_v46 = vadd.f32 1.0, %v8137_v23  ;;  %v5646_v63 = vmul.f32 2.1237322e-06, %v13525_v26  ;;  %v5520_v43 = vsel %vm5517_vm15, %v5519_v14, %v5515_v0  ;;  %v5657_v5 = vmul.f32 3.8918573e-05, %v13525_v26 }
 0xa15   : > { %v13533_v32 = vadd.f32 %v4127_v29, %v15660_v45  ;;  %v13536_v42 = vadd.f32 %v4176_v11, %v15661_v36  ;;  %v5556_v24 = vand.u32 2147483647, %v13427_v56  ;;  %v5612_v57 = vmul.f32 %v5611_v60, %v13404_v37 }
 0xa16   : > { %v5647_v2 = vadd.f32 0.00028619796, %v5646_v63  ;;  %v13541_v33 = vadd.f32 %v4031_v52, %v11498_v1  ;;  %v5551_v59 = vadd.f32 %v13471_v54, %v5550_v9  ;;  %vm5553_vm0 = vweird.f32 %v13471_v54 }
 0xa17   : > { %v5658_v25 = vadd.f32 0.001143296, %v5657_v5  ;;  %v13546_v61 = vmul.f32 0.70710677, %v13533_v32  ;;  %v5536_v12 = vmul.f32 %v5535_v58, %v15662_v34  ;;  %v6979_v35 = vmul.f32 %v6915_v46, %v4227_v38 }
 0xa18   : > { %v5648_v8 = vmul.f32 %v5647_v2, %v13525_v26  ;;  %v13551_v3 = vmul.f32 0.70710677, %v13536_v42  ;;  %vm5552_vm2 = vweird.f32 %v13427_v56  ;;  %v5558_v31 = vand.u32 2147483648, %v13427_v56 }
 0xa19   : > { %v13553_v19 = vpop.eup %8967  ;;  %v5659_v17 = vmul.f32 %v5658_v25, %v13525_v26  ;;  %v5684_v47 = vmul.f32 %v13546_v61, %v13546_v61  ;;  %vm13560_vm3 = vmor %vm5552_vm2, %vm5553_vm0  ;;  %v5613_v10 = vadd.f32 0.18741608, %v5612_v57  ;;  %v13569_v30 = vmul.f32 0.70710677, %v13541_v33 }
 0xa1a   : > { %v5628_v41 = vmul.f32 %v13553_v19, %v13517_v7  ;;  %v5724_v55 = vmul.f32 %v13551_v3, %v13551_v3  ;;  %v5555_v56 = vsel %vm13560_vm3, %v13471_v54, %v5551_v59  ;;  %vm13574_vm4 = vcmp.eq.f32.partialorder %v5556_v24, 8.507059e+37 }
 0xa1b   : > { %v5660_v51 = vadd.f32 0.014752088, %v5659_v17  ;;  %v13578_v27 = vmin.f32 %v5684_v47, 16.0  ;;  %v5649_v23 = vadd.f32 0.0036580483, %v5648_v8  ;;  %v7027_v4 = vpack.c.bf16 %v6979_v35, %v6975_v21  ;;  %v4080_v17 = vpop.f32.mrf.mxu1 }
 0xa1c   : > { %v5629_v53 = vsub.f32 1.0, %v5628_v41  ;;  %v13580_v44 = vmin.f32 %v5724_v55, 16.0  ;;  %v5559_v38 = vor.u32 1.1754944e-38, %v5558_v31  ;;  %v5614_v54 = vmul.f32 %v5613_v10, %v13404_v37 }
 0xa1d   : > { %v5661_v0 = vmul.f32 %v5660_v51, %v13525_v26  ;;  %v5686_v60 = vmul.f32 2.1237322e-06, %v13578_v27  ;;  %v5697_v29 = vmul.f32 3.8918573e-05, %v13578_v27  ;;  %v5764_v9 = vmul.f32 %v13569_v30, %v13569_v30  ;;  %7474 = vmatmul.bf16.gmra.mxu3 %v7027_v4 }
 0xa1e   : > { %v5726_v11 = vmul.f32 2.1237322e-06, %v13580_v44  ;;  %v5737_v14 = vmul.f32 3.8918573e-05, %v13580_v44  ;;  %v5560_v21 = vsel %vm13574_vm4, %v5559_v38, %v5555_v56  ;;  %v5630_v52 = vmul.f32 %v13553_v19, %v5629_v53  ;;  %v15667_v38 = vld [vmem:[#allocation46_spill] sm:$0xff] }
 0xa1f   : > { %v5662_v58 = vadd.f32 0.112945676, %v5661_v0  ;;  %v5687_v46 = vadd.f32 0.00028619796, %v5686_v60  ;;  %v5698_v63 = vadd.f32 0.001143296, %v5697_v29  ;;  %v5650_v5 = vmul.f32 %v5649_v23, %v13525_v26 }
 0xa20   : > { %v5727_v24 = vadd.f32 0.00028619796, %v5726_v11  ;;  %v5738_v37 = vadd.f32 0.001143296, %v5737_v14  ;;  %v5521_v57 = vmul.f32 %v5520_v43, %v13520_v15  ;;  %v5561_v34 = vmul.f32 %v5560_v21, %v5536_v12 }
 0xa21   : > { %v5663_v2 = vmul.f32 %v5662_v58, %v13525_v26  ;;  %v5688_v59 = vmul.f32 %v5687_v46, %v13578_v27  ;;  %v5699_v25 = vmul.f32 %v5698_v63, %v13578_v27  ;;  %v5615_v35 = vadd.f32 1.1283791, %v5614_v54 }
 0xa22   : > { %v5739_v8 = vmul.f32 %v5738_v37, %v13580_v44  ;;  %v13599_v31 = vmin.f32 %v5764_v9, 16.0  ;;  %vm5633_vm1 = vweird.f32 %v13553_v19  ;;  %v5728_v10 = vmul.f32 %v5727_v24, %v13580_v44 }
 0xa23   : > { %v5664_v47 = vadd.f32 0.4994258, %v5663_v2  ;;  %v5700_v40 = vadd.f32 0.014752088, %v5699_v25  ;;  %v5631_v15 = vadd.f32 %v13553_v19, %v5630_v52  ;;  %v5651_v43 = vadd.f32 0.05243302, %v5650_v5 }
 0xa24   : > { %v5689_v41 = vadd.f32 0.0036580483, %v5688_v59  ;;  %v5740_v55 = vadd.f32 0.014752088, %v5739_v8  ;;  %v5638_v56 = vand.u32 2147483648, %v13517_v7  ;;  %v13608_v51 = vadd.f32 %v4080_v17, %v11500_v18  ;;  %v15670_v8 = vld [vmem:[#allocation61_spill] sm:$0xff] }
 0xa25   : > { %v5665_v12 = vmul.f32 %v5664_v47, %v13525_v26  ;;  %v5701_v62 = vmul.f32 %v5700_v40, %v13578_v27  ;;  %vm5632_vm5 = vweird.f32 %v13517_v7  ;;  %v5636_v53 = vand.u32 2147483647, %v13517_v7  ;;  %v15671_v40 = vld [vmem:[#allocation62_spill] sm:$0xff] }
 0xa26   : > { %v5741_v23 = vmul.f32 %v5740_v55, %v13580_v44  ;;  %v5766_v4 = vmul.f32 2.1237322e-06, %v13599_v31  ;;  %v13616_v0 = vmul.f32 %v13505_v28, %v15667_v38  ;;  %vm13620_vm6 = vmor %vm5632_vm5, %vm5633_vm1  ;;  %v5729_v11 = vadd.f32 0.0036580483, %v5728_v10 }
 0xa27   : > { %v13624_v29 = vadd.f32 1.0, %v5665_v12  ;;  %v5702_v54 = vadd.f32 0.112945676, %v5701_v62  ;;  %v5635_v7 = vsel %vm13620_vm6, %v13553_v19, %v5631_v15  ;;  %v5652_v14 = vmul.f32 %v5651_v43, %v13525_v26 }
 0xa28   : > { %v5690_v9 = vmul.f32 %v5689_v41, %v13578_v27  ;;  %v5742_v28 = vadd.f32 0.112945676, %v5741_v23  ;;  %v6912_v21 = vadd.f32 1.0, %v8134_v20  ;;  %v5639_v58 = vor.u32 1.1754944e-38, %v5638_v56 }
 0xa29   : > { %8969 = vrcp.f32 %v13624_v29  ;;  %v13635_v46 = vmul.f32 0.70710677, %v13608_v51  ;;  %v8135_v63 = vclamps-f32 %v5521_v57, 1.0  ;;  %v8136_v52 = vclamps-f32 %v5561_v34, 1.0 }
 0xa2a   : > { %vm5637_vm7 = vcmp.eq.f32.partialorder %v5636_v53, 8.507059e+37  ;;  %v5703_v5 = vmul.f32 %v5702_v54, %v13578_v27  ;;  %v5730_v24 = vmul.f32 %v5729_v11, %v13580_v44  ;;  %v5743_v37 = vmul.f32 %v5742_v28, %v13580_v44 }
 0xa2b   : > { %v5640_v19 = vsel %vm5637_vm7, %v5639_v58, %v5635_v7  ;;  %v5767_v2 = vadd.f32 0.00028619796, %v5766_v4  ;;  %v5616_v49 = vmul.f32 %v5615_v35, %v13386_v6  ;;  %v5653_v20 = vadd.f32 0.18741608, %v5652_v14  ;;  %v4129_v7 = vpop.f32.mrf.mxu2 }
 0xa2c   : > { %v5691_v59 = vadd.f32 0.05243302, %v5690_v9  ;;  %v5704_v25 = vadd.f32 0.4994258, %v5703_v5  ;;  %v4226_v17 = vmul.f32 0.5, %v15670_v8  ;;  %v5804_v34 = vmul.f32 %v13635_v46, %v13635_v46 }
 0xa2d   : > { %v5744_v47 = vadd.f32 0.4994258, %v5743_v37  ;;  %v5777_v57 = vmul.f32 3.8918573e-05, %v13599_v31  ;;  %v13646_v10 = vmul.f32 %v6912_v21, %v15671_v40  ;;  %v6913_v15 = vadd.f32 1.0, %v8135_v63 }
 0xa2e   : > { %v5641_v43 = vmul.f32 %v5640_v19, %v5616_v49  ;;  %v5705_v41 = vmul.f32 %v5704_v25, %v13578_v27  ;;  %v5731_v6 = vadd.f32 0.05243302, %v5730_v24  ;;  %v5768_v56 = vmul.f32 %v5767_v2, %v13599_v31 }
 0xa2f   : > { %v13649_v55 = vpop.eup %8969  ;;  %v5745_v35 = vmul.f32 %v5744_v47, %v13580_v44  ;;  %v5778_v12 = vadd.f32 0.001143296, %v5777_v57  ;;  %v6914_v62 = vadd.f32 1.0, %v8136_v52  ;;  %v5654_v53 = vmul.f32 %v5653_v20, %v13525_v26 }
 0xa30   : > { %v5692_v23 = vmul.f32 %v5691_v59, %v13578_v27  ;;  %v13655_v4 = vadd.f32 1.0, %v5705_v41  ;;  %v5668_v38 = vmul.f32 %v13649_v55, %v13624_v29  ;;  %v13662_v11 = vmin.f32 %v5804_v34, 16.0  ;;  %v4178_v59 = vpop.f32.mrf.mxu3 }
 0xa31   : > { %v13659_v60 = vadd.f32 1.0, %v5745_v35  ;;  %v5779_v54 = vmul.f32 %v5778_v12, %v13599_v31  ;;  %v13665_v14 = vmul.f32 %v6913_v15, %v13425_v16  ;;  %v4228_v9 = vmul.f32 0.5, %v13366_v39 }
 0xa32   : > { %v8138_v26 = vclamps-f32 %v5641_v43, 1.0  ;;  %8971 = vrcp.f32 %v13655_v4  ;;  %v13670_v28 = vmul.f32 0.5, %v13485_v13  ;;  %v5732_v21 = vmul.f32 %v5731_v6, %v13580_v44 }
 0xa33   : > { %8973 = vrcp.f32 %v13659_v60  ;;  %v5769_v58 = vadd.f32 0.0036580483, %v5768_v56  ;;  %v13674_v63 = vmul.f32 %v6914_v62, %v4226_v17  ;;  %v5655_v52 = vadd.f32 1.1283791, %v5654_v53 }
 0xa34   : > { %v5693_v5 = vadd.f32 0.18741608, %v5692_v23  ;;  %v4130_v16 = vadd.f32 %v4129_v7, %v15660_v45  ;;  %v5669_v19 = vsub.f32 1.0, %v5668_v38  ;;  %v13678_v39 = vmul.f32 0.5, %v13533_v32 }
 0xa35   : > { %v5780_v24 = vadd.f32 0.014752088, %v5779_v54  ;;  %v5806_v37 = vmul.f32 2.1237322e-06, %v13662_v11  ;;  %v6916_v13 = vadd.f32 1.0, %v8138_v26  ;;  %v13682_v2 = vmul.f32 0.5, %v13536_v42 }
 0xa36   : > { %v13685_v49 = vmul.f32 0.5, %v13541_v33  ;;  %v13688_v20 = vmul.f32 0.5, %v13608_v51  ;;  %v5733_v25 = vadd.f32 0.18741608, %v5732_v21  ;;  %v5770_v8 = vmul.f32 %v5769_v58, %v13599_v31 }
 0xa37   : > { %v5781_v32 = vmul.f32 %v5780_v24, %v13599_v31  ;;  %v5817_v17 = vmul.f32 3.8918573e-05, %v13662_v11  ;;  %v13696_v57 = vmul.f32 %v5655_v52, %v13493_v48  ;;  %v5676_v42 = vand.u32 2147483647, %v13624_v29 }
 0xa38   : > { %v13693_v47 = vpop.eup %8971  ;;  %v5694_v33 = vmul.f32 %v5693_v5, %v13578_v27  ;;  %v13700_v34 = vmul.f32 0.70710677, %v4130_v16  ;;  %v5670_v40 = vmul.f32 %v13649_v55, %v5669_v19  ;;  %vm5672_vm8 = vweird.f32 %v13624_v29 }
 0xa39   : > { %v13702_v51 = vpop.eup %8973  ;;  %v5807_v15 = vadd.f32 0.00028619796, %v5806_v37  ;;  %v13707_v43 = vadd.f32 %v4178_v59, %v15661_v36  ;;  %v13709_v41 = vmul.f32 %v6916_v13, %v4228_v9  ;;  %v5678_v48 = vand.u32 2147483648, %v13624_v29 }
 0xa3a   : > { %v5708_v6 = vmul.f32 %v13693_v47, %v13655_v4  ;;  %v5782_v27 = vadd.f32 0.112945676, %v5781_v32  ;;  %v5734_v35 = vmul.f32 %v5733_v25, %v13580_v44  ;;  %v5748_v56 = vmul.f32 %v13702_v51, %v13659_v60 }
 0xa3b   : > { %v5771_v12 = vadd.f32 0.05243302, %v5770_v8  ;;  %v5818_v62 = vadd.f32 0.001143296, %v5817_v17  ;;  %vm5673_vm9 = vweird.f32 %v13649_v55  ;;  %vm13718_vm10 = vcmp.eq.f32.partialorder %v5676_v42, 8.507059e+37 }
 0xa3c   : > { %v5695_v23 = vadd.f32 1.1283791, %v5694_v33  ;;  %v5783_v38 = vmul.f32 %v5782_v27, %v13599_v31  ;;  %v5844_v54 = vmul.f32 %v13700_v34, %v13700_v34  ;;  %v5671_v7 = vadd.f32 %v13649_v55, %v5670_v40  ;;  %vm13739_vm11 = vmor %vm5672_vm8, %vm5673_vm9 }
 0xa3d   : > { %v5808_v44 = vmul.f32 %v5807_v15, %v13662_v11  ;;  %v5819_v9 = vmul.f32 %v5818_v62, %v13662_v11  ;;  %v13729_v26 = vmul.f32 0.70710677, %v13707_v43  ;;  %v5679_v21 = vor.u32 1.1754944e-38, %v5678_v48 }
 0xa3e   : > { %v5709_v58 = vsub.f32 1.0, %v5708_v6  ;;  %v5784_v52 = vadd.f32 0.4994258, %v5783_v38  ;;  %v13731_v5 = vmin.f32 %v5844_v54, 16.0  ;;  %v5735_v19 = vadd.f32 1.1283791, %v5734_v35 }
 0xa3f   : > { %v5749_v24 = vsub.f32 1.0, %v5748_v56  ;;  %v5820_v37 = vadd.f32 0.014752088, %v5819_v9  ;;  %v13733_v13 = vmul.f32 0.5, %v4130_v16  ;;  %v13744_v25 = vmul.f32 %v5695_v23, %v13546_v61 }
 0xa40   : > { %vm5712_vm12 = vweird.f32 %v13655_v4  ;;  %v5772_v8 = vmul.f32 %v5771_v12, %v13599_v31  ;;  %v5785_v32 = vmul.f32 %v5784_v52, %v13599_v31  ;;  %v5675_v16 = vsel %vm13739_vm11, %v13649_v55, %v5671_v7 }
 0xa41   : > { %v5809_v17 = vadd.f32 0.0036580483, %v5808_v44  ;;  %v5821_v29 = vmul.f32 %v5820_v37, %v13662_v11  ;;  %v5884_v42 = vmul.f32 %v13729_v26, %v13729_v26  ;;  %v5710_v33 = vmul.f32 %v13693_v47, %v5709_v58 }
 0xa42   : > { %v13756_v61 = vadd.f32 1.0, %v5785_v32  ;;  %v5846_v40 = vmul.f32 2.1237322e-06, %v13731_v5  ;;  %v5857_v15 = vmul.f32 3.8918573e-05, %v13731_v5  ;;  %v5718_v6 = vand.u32 2147483648, %v13655_v4 }
 0xa43   : > { %v5716_v48 = vand.u32 2147483647, %v13655_v4  ;;  %v5750_v55 = vmul.f32 %v13702_v51, %v5749_v24  ;;  %v5822_v27 = vadd.f32 0.112945676, %v5821_v29  ;;  %vm5752_vm13 = vweird.f32 %v13659_v60 }
 0xa44   : > { %v5758_v35 = vand.u32 2147483648, %v13659_v60  ;;  %v5773_v56 = vadd.f32 0.18741608, %v5772_v8  ;;  %8975 = vrcp.f32 %v13756_v61  ;;  %v5680_v12 = vsel %vm13718_vm10, %v5679_v21, %v5675_v16 }
 0xa45   : > { %vm5713_vm14 = vweird.f32 %v13693_v47  ;;  %v5823_v62 = vmul.f32 %v5822_v27, %v13662_v11  ;;  %v13770_v23 = vmin.f32 %v5884_v42, 16.0  ;;  %v5711_v38 = vadd.f32 %v13693_v47, %v5710_v33 }
 0xa46   : > { %v5810_v54 = vmul.f32 %v5809_v17, %v13662_v11  ;;  %v5847_v7 = vadd.f32 0.00028619796, %v5846_v40  ;;  %v5858_v44 = vadd.f32 0.001143296, %v5857_v15  ;;  %v5751_v9 = vadd.f32 %v13702_v51, %v5750_v55  ;;  %vm13787_vm2 = vmor %vm5712_vm12, %vm5713_vm14 }
 0xa47   : > { %vm5753_vm15 = vweird.f32 %v13702_v51  ;;  %v5756_v58 = vand.u32 2147483647, %v13659_v60  ;;  %v5824_v53 = vadd.f32 0.4994258, %v5823_v62  ;;  %v5681_v21 = vmul.f32 %v5680_v12, %v13696_v57 }
 0xa48   : > { %vm13778_vm0 = vcmp.eq.f32.partialorder %v5716_v48, 8.507059e+37  ;;  %v5719_v24 = vor.u32 1.1754944e-38, %v5718_v6  ;;  %v5859_v37 = vmul.f32 %v5858_v44, %v13731_v5  ;;  %v5759_v8 = vor.u32 1.1754944e-38, %v5758_v35  ;;  %vm13801_vm3 = vmor %vm5752_vm13, %vm5753_vm15 }
 0xa49   : > { %v5774_v32 = vmul.f32 %v5773_v56, %v13599_v31  ;;  %v5825_v57 = vmul.f32 %v5824_v53, %v13662_v11  ;;  %v5897_v16 = vmul.f32 3.8918573e-05, %v13770_v23  ;;  %v5715_v29 = vsel %vm13787_vm2, %v13693_v47, %v5711_v38 }
 0xa4a   : > { %v13794_v17 = vpop.eup %8975  ;;  %v5811_v42 = vadd.f32 0.05243302, %v5810_v54  ;;  %v5848_v33 = vmul.f32 %v5847_v7, %v13731_v5  ;;  %v5860_v31 = vadd.f32 0.014752088, %v5859_v37  ;;  %v5755_v40 = vsel %vm13801_vm3, %v13702_v51, %v5751_v9  ;;  %v4034_v7 = vpop.f32.mrf.mxu0 }
 0xa4b   : > { %v5788_v15 = vmul.f32 %v13794_v17, %v13756_v61  ;;  %v13811_v48 = vadd.f32 1.0, %v5825_v57  ;;  %v5898_v47 = vadd.f32 0.001143296, %v5897_v16  ;;  %v8139_v6 = vclamps-f32 %v5681_v21, 1.0 }
 0xa4c   : > { %v5861_v60 = vmul.f32 %v5860_v31, %v13731_v5  ;;  %v5886_v55 = vmul.f32 2.1237322e-06, %v13770_v23  ;;  %v7024_v27 = vpack.c.bf16 %v13646_v10, %v13309_v50  ;;  %v5720_v35 = vsel %vm13778_vm0, %v5719_v24, %v5715_v29 }
 0xa4d   : > { %v5736_v56 = vmul.f32 %v5735_v19, %v13551_v3  ;;  %vm5757_vm4 = vcmp.eq.f32.partialorder %v5756_v58, 8.507059e+37  ;;  %v5775_v51 = vadd.f32 1.1283791, %v5774_v32  ;;  %v5812_v62 = vmul.f32 %v5811_v42, %v13662_v11 }
 0xa4e   : > { %v5760_v12 = vsel %vm5757_vm4, %v5759_v8, %v5755_v40  ;;  %v5849_v38 = vadd.f32 0.0036580483, %v5848_v33  ;;  %v5862_v54 = vadd.f32 0.112945676, %v5861_v60  ;;  %7327 = vmatmul.bf16.gmra.mxu0 %v7024_v27  ;;  %v5789_v44 = vsub.f32 1.0, %v5788_v15 }
 0xa4f   : > { %8977 = vrcp.f32 %v13811_v48  ;;  %v5899_v9 = vmul.f32 %v5898_v47, %v13770_v23  ;;  %v7025_v50 = vpack.c.bf16 %v13665_v14, %v13421_v22  ;;  %v6917_v10 = vadd.f32 1.0, %v8139_v6 }
 0xa50   : > { %v5721_v3 = vmul.f32 %v5720_v35, %v13744_v25  ;;  %v5863_v19 = vmul.f32 %v5862_v54, %v13731_v5  ;;  %v5887_v58 = vadd.f32 0.00028619796, %v5886_v55  ;;  %v13828_v53 = vmul.f32 0.5, %v13707_v43  ;;  %v4083_v25 = vpop.f32.mrf.mxu1 }
 0xa51   : > { %v5900_v21 = vadd.f32 0.014752088, %v5899_v9  ;;  %7376 = vmatmul.bf16.gmra.mxu1 %v7025_v50  ;;  %v7026_v52 = vpack.c.bf16 %v13674_v63, %v13616_v0  ;;  %v13833_v24 = vadd.f32 %v4034_v7, %v11498_v1  ;;  %v5761_v37 = vmul.f32 %v5760_v12, %v5736_v56  ;;  %v4132_v9 = vpop.f32.mrf.mxu2 }
 0xa52   : > { %v5813_v59 = vadd.f32 0.18741608, %v5812_v62  ;;  %v5850_v22 = vmul.f32 %v5849_v38, %v13731_v5  ;;  %v5864_v14 = vadd.f32 0.4994258, %v5863_v19  ;;  %v5776_v8 = vmul.f32 %v5775_v51, %v13569_v30 }
 0xa53   : > { %v5790_v32 = vmul.f32 %v13794_v17, %v5789_v44  ;;  %v5901_v43 = vmul.f32 %v5900_v21, %v13770_v23  ;;  %7425 = vmatmul.bf16.gmra.mxu2 %v7026_v52  ;;  %v13840_v57 = vmul.f32 0.70710677, %v13833_v24  ;;  %v13843_v0 = vmul.f32 %v6917_v10, %v13670_v28 }
 0xa54   : > { %v8140_v63 = vclamps-f32 %v5721_v3, 1.0  ;;  %v5796_v16 = vand.u32 2147483647, %v13756_v61  ;;  %v5888_v29 = vmul.f32 %v5887_v58, %v13770_v23  ;;  %v5798_v30 = vand.u32 2147483648, %v13756_v61 }
 0xa55   : > { %v13847_v4 = vpop.eup %8977  ;;  %v5865_v42 = vmul.f32 %v5864_v14, %v13731_v5  ;;  %v5902_v33 = vadd.f32 0.112945676, %v5901_v43  ;;  %v13852_v31 = vadd.f32 %v4083_v25, %v11500_v18  ;;  %v8141_v40 = vclamps-f32 %v5761_v37, 1.0 }
 0xa56   : > { %v5814_v15 = vmul.f32 %v5813_v59, %v13662_v11  ;;  %v5851_v28 = vadd.f32 0.05243302, %v5850_v22  ;;  %v5924_v47 = vmul.f32 %v13840_v57, %v13840_v57  ;;  %v5791_v6 = vadd.f32 %v13794_v17, %v5790_v32 }
 0xa57   : > { %vm5793_vm1 = vweird.f32 %v13794_v17  ;;  %v13859_v60 = vadd.f32 1.0, %v5865_v42  ;;  %v5903_v55 = vmul.f32 %v5902_v33, %v13770_v23  ;;  %v6918_v27 = vadd.f32 1.0, %v8140_v63 }
 0xa58   : > { %v5828_v35 = vmul.f32 %v13847_v4, %v13811_v48  ;;  %v5889_v56 = vadd.f32 0.0036580483, %v5888_v29  ;;  %v13864_v51 = vmin.f32 %v5924_v47, 16.0  ;;  %vm5792_vm5 = vweird.f32 %v13756_v61 }
 0xa59   : > { %vm13867_vm6 = vcmp.eq.f32.partialorder %v5796_v16, 8.507059e+37  ;;  %8979 = vrcp.f32 %v13859_v60  ;;  %v13873_v12 = vmul.f32 0.70710677, %v13852_v31  ;;  %vm13875_vm7 = vmor %vm5792_vm5, %vm5793_vm1  ;;  %v5799_v38 = vor.u32 1.1754944e-38, %v5798_v30 }
 0xa5a   : > { %v5815_v54 = vadd.f32 1.1283791, %v5814_v15  ;;  %v5852_v7 = vmul.f32 %v5851_v28, %v13731_v5  ;;  %v5904_v44 = vadd.f32 0.4994258, %v5903_v55  ;;  %v6919_v61 = vadd.f32 1.0, %v8141_v40 }
 0xa5b   : > { %v5795_v50 = vsel %vm13875_vm7, %v13794_v17, %v5791_v6  ;;  %v5926_v10 = vmul.f32 2.1237322e-06, %v13864_v51  ;;  %v5937_v3 = vmul.f32 3.8918573e-05, %v13864_v51  ;;  %v13886_v19 = vmul.f32 %v6918_v27, %v13678_v39 }
 0xa5c   : > { %v5829_v58 = vsub.f32 1.0, %v5828_v35  ;;  %v5890_v21 = vmul.f32 %v5889_v56, %v13770_v23  ;;  %v5905_v52 = vmul.f32 %v5904_v44, %v13770_v23  ;;  %v5964_v22 = vmul.f32 %v13873_v12, %v13873_v12 }
 0xa5d   : > { %v5927_v37 = vadd.f32 0.00028619796, %v5926_v10  ;;  %v5938_v59 = vadd.f32 0.001143296, %v5937_v3  ;;  %v13893_v14 = vadd.f32 %v4132_v9, %v15660_v45  ;;  %v5800_v17 = vsel %vm13867_vm6, %v5799_v38, %v5795_v50 }
 0xa5e   : > { %v13898_v25 = vmul.f32 %v5815_v54, %v13635_v46  ;;  %v5853_v39 = vadd.f32 0.18741608, %v5852_v7  ;;  %v13900_v32 = vadd.f32 1.0, %v5905_v52  ;;  %v5836_v63 = vand.u32 2147483647, %v13811_v48 }
 0xa5f   : > { %v13902_v43 = vpop.eup %8979  ;;  %v5838_v16 = vand.u32 2147483648, %v13811_v48  ;;  %v5939_v29 = vmul.f32 %v5938_v59, %v13864_v51  ;;  %v13907_v30 = vmin.f32 %v5964_v22, 16.0  ;;  %v5891_v33 = vadd.f32 0.05243302, %v5890_v21 }
 0xa60   : > { %v5868_v42 = vmul.f32 %v13902_v43, %v13859_v60  ;;  %8981 = vrcp.f32 %v13900_v32  ;;  %v5928_v46 = vmul.f32 %v5927_v37, %v13864_v51  ;;  %v13914_v40 = vmul.f32 %v6919_v61, %v13682_v2 }
 0xa61   : > { %v5801_v15 = vmul.f32 %v5800_v17, %v5776_v8  ;;  %v5830_v28 = vmul.f32 %v13847_v4, %v5829_v58  ;;  %v13918_v47 = vmul.f32 0.70710677, %v13893_v14  ;;  %vm5832_vm8 = vweird.f32 %v13811_v48 }
 0xa62   : > { %v5854_v6 = vmul.f32 %v5853_v39, %v13731_v5  ;;  %v5940_v55 = vadd.f32 0.014752088, %v5939_v29  ;;  %v5966_v27 = vmul.f32 2.1237322e-06, %v13907_v30  ;;  %vm5833_vm9 = vweird.f32 %v13847_v4 }
 0xa63   : > { %vm13924_vm10 = vcmp.eq.f32.partialorder %v5836_v63, 8.507059e+37  ;;  %v5839_v2 = vor.u32 1.1754944e-38, %v5838_v16  ;;  %v5869_v8 = vsub.f32 1.0, %v5868_v42  ;;  %v5977_v56 = vmul.f32 3.8918573e-05, %v13907_v30  ;;  %vm13951_vm11 = vmor %vm5832_vm8, %vm5833_vm9 }
 0xa64   : > { %v5892_v11 = vmul.f32 %v5891_v33, %v13770_v23  ;;  %v5929_v62 = vadd.f32 0.0036580483, %v5928_v46  ;;  %v5941_v38 = vmul.f32 %v5940_v55, %v13864_v51  ;;  %v5967_v54 = vadd.f32 0.00028619796, %v5966_v27 }
 0xa65   : > { %v8142_v5 = vclamps-f32 %v5801_v15, 1.0  ;;  %v5831_v7 = vadd.f32 %v13847_v4, %v5830_v28  ;;  %v5978_v44 = vadd.f32 0.001143296, %v5977_v56  ;;  %v6004_v9 = vmul.f32 %v13918_v47, %v13918_v47 }
 0xa66   : > { %v13934_v61 = vpop.eup %8981  ;;  %v5855_v50 = vadd.f32 1.1283791, %v5854_v6  ;;  %v13937_v10 = vmul.f32 0.5, %v13833_v24  ;;  %v5942_v3 = vadd.f32 0.112945676, %v5941_v38  ;;  %v5968_v58 = vmul.f32 %v5967_v54, %v13907_v30 }
 0xa67   : > { %v5870_v21 = vmul.f32 %v13902_v43, %v5869_v8  ;;  %v5908_v52 = vmul.f32 %v13934_v61, %v13900_v32  ;;  %v13944_v37 = vmul.f32 0.5, %v13852_v31  ;;  %v5979_v59 = vmul.f32 %v5978_v44, %v13907_v30 }
 0xa68   : > { %v5893_v22 = vadd.f32 0.18741608, %v5892_v11  ;;  %v5930_v17 = vmul.f32 %v5929_v62, %v13864_v51  ;;  %v5943_v39 = vmul.f32 %v5942_v3, %v13864_v51  ;;  %v13957_v63 = vmin.f32 %v6004_v9, 16.0 }
 0xa69   : > { %v13959_v16 = vadd.f32 1.0, %v8142_v5  ;;  %v5835_v31 = vsel %vm13951_vm11, %v13847_v4, %v5831_v7  ;;  %v5909_v29 = vsub.f32 1.0, %v5908_v52  ;;  %v5980_v42 = vadd.f32 0.014752088, %v5979_v59  ;;  %v4181_v7 = vpop.f32.mrf.mxu3 }
 0xa6a   : > { %v5856_v48 = vmul.f32 %v5855_v50, %v13700_v34  ;;  %v5876_v33 = vand.u32 2147483647, %v13859_v60  ;;  %v5944_v46 = vadd.f32 0.4994258, %v5943_v39  ;;  %v5969_v15 = vadd.f32 0.0036580483, %v5968_v58 }
 0xa6b   : > { %v5871_v28 = vadd.f32 %v13902_v43, %v5870_v21  ;;  %vm5873_vm12 = vweird.f32 %v13902_v43  ;;  %v5981_v6 = vmul.f32 %v5980_v42, %v13907_v30  ;;  %v6017_v55 = vmul.f32 3.8918573e-05, %v13957_v63 }
 0xa6c   : > { %v5840_v27 = vsel %vm13924_vm10, %v5839_v2, %v5835_v31  ;;  %v5878_v4 = vand.u32 2147483648, %v13859_v60  ;;  %v5931_v8 = vadd.f32 0.05243302, %v5930_v17  ;;  %v5945_v34 = vmul.f32 %v5944_v46, %v13864_v51 }
 0xa6d   : > { %vm5872_vm13 = vweird.f32 %v13859_v60  ;;  %v5910_v56 = vmul.f32 %v13934_v61, %v5909_v29  ;;  %v5982_v11 = vadd.f32 0.112945676, %v5981_v6  ;;  %v6018_v62 = vadd.f32 0.001143296, %v6017_v55  ;;  %v4036_v29 = vpop.f32.mrf.mxu0  ;;  %v4085_v6 = vpop.f32.mrf.mxu1 }
 0xa6e   : > { %vm13976_vm14 = vmor %vm5872_vm13, %vm5873_vm12  ;;  %vm13980_vm15 = vcmp.eq.f32.partialorder %v5876_v33, 8.507059e+37  ;;  %v5894_v35 = vmul.f32 %v5893_v22, %v13770_v23  ;;  %v13985_v2 = vadd.f32 1.0, %v5945_v34  ;;  %v5970_v5 = vmul.f32 %v5969_v15, %v13907_v30 }
 0xa6f   : > { %v5841_v60 = vmul.f32 %v5840_v27, %v13898_v25  ;;  %v5875_v44 = vsel %vm13976_vm14, %v13902_v43, %v5871_v28  ;;  %v5983_v9 = vmul.f32 %v5982_v11, %v13907_v30  ;;  %v6019_v50 = vmul.f32 %v6018_v62, %v13957_v63 }
 0xa70   : > { %v5879_v3 = vor.u32 1.1754944e-38, %v5878_v4  ;;  %v5932_v58 = vmul.f32 %v5931_v8, %v13864_v51  ;;  %8983 = vrcp.f32 %v13985_v2  ;;  %v6006_v23 = vmul.f32 2.1237322e-06, %v13957_v63 }
 0xa71   : > { %v5911_v21 = vadd.f32 %v13934_v61, %v5910_v56  ;;  %vm5913_vm0 = vweird.f32 %v13934_v61  ;;  %v5918_v25 = vand.u32 2147483648, %v13900_v32  ;;  %v14001_v52 = vadd.f32 %v4181_v7, %v15661_v36 }
 0xa72   : > { %v5880_v43 = vsel %vm13980_vm15, %v5879_v3, %v5875_v44  ;;  %v5971_v59 = vadd.f32 0.05243302, %v5970_v5  ;;  %v5984_v24 = vadd.f32 0.4994258, %v5983_v9  ;;  %v6020_v22 = vadd.f32 0.014752088, %v6019_v50 }
 0xa73   : > { %v8143_v17 = vclamps-f32 %v5841_v60, 1.0  ;;  %v5895_v39 = vadd.f32 1.1283791, %v5894_v35  ;;  %vm5912_vm2 = vweird.f32 %v13900_v32  ;;  %v5916_v31 = vand.u32 2147483647, %v13900_v32 }
 0xa74   : > { %vm14007_vm3 = vmor %vm5912_vm2, %vm5913_vm0  ;;  %v5933_v33 = vadd.f32 0.18741608, %v5932_v58  ;;  %v5985_v46 = vmul.f32 %v5984_v24, %v13907_v30  ;;  %v6007_v15 = vadd.f32 0.00028619796, %v6006_v23  ;;  %v6021_v28 = vmul.f32 %v6020_v22, %v13957_v63 }
 0xa75   : > { %v5881_v55 = vmul.f32 %v5880_v43, %v5856_v48  ;;  %v5915_v27 = vsel %vm14007_vm3, %v13934_v61, %v5911_v21  ;;  %v5919_v4 = vor.u32 1.1754944e-38, %v5918_v25  ;;  %v14017_v32 = vmul.f32 0.70710677, %v14001_v52 }
 0xa76   : > { %v14019_v8 = vpop.eup %8983  ;;  %v5972_v34 = vmul.f32 %v5971_v59, %v13907_v30  ;;  %v14022_v56 = vadd.f32 1.0, %v5985_v46  ;;  %v6022_v11 = vadd.f32 0.112945676, %v6021_v28  ;;  %v14025_v62 = vadd.f32 %v4036_v29, %v11498_v1 }
 0xa77   : > { %v6921_v38 = vadd.f32 1.0, %v8143_v17  ;;  %v5896_v48 = vmul.f32 %v5895_v39, %v13729_v26  ;;  %vm5917_vm4 = vcmp.eq.f32.partialorder %v5916_v31, 8.507059e+37  ;;  %v4086_v61 = vadd.f32 %v4085_v6, %v11500_v18 }
 0xa78   : > { %v5920_v54 = vsel %vm5917_vm4, %v5919_v4, %v5915_v27  ;;  %v5934_v35 = vmul.f32 %v5933_v33, %v13864_v51  ;;  %8985 = vrcp.f32 %v14022_v56  ;;  %v6008_v5 = vmul.f32 %v6007_v15, %v13957_v63 }
 0xa79   : > { %v8144_v7 = vclamps-f32 %v5881_v55, 1.0  ;;  %v5948_v60 = vmul.f32 %v14019_v8, %v13985_v2  ;;  %v6023_v44 = vmul.f32 %v6022_v11, %v13957_v63  ;;  %v6044_v9 = vmul.f32 %v14017_v32, %v14017_v32 }
 0xa7a   : > { %v14039_v26 = vmul.f32 %v13959_v16, %v13685_v49  ;;  %v5973_v50 = vadd.f32 0.18741608, %v5972_v34  ;;  %v14042_v51 = vmul.f32 0.5, %v13893_v14  ;;  %v14045_v3 = vmul.f32 0.70710677, %v14025_v62 }
 0xa7b   : > { %v5921_v58 = vmul.f32 %v5920_v54, %v5896_v48  ;;  %v6024_v23 = vadd.f32 0.4994258, %v6023_v44  ;;  %v14047_v21 = vmin.f32 %v6044_v9, 16.0  ;;  %v14049_v25 = vmul.f32 0.70710677, %v4086_v61 }
 0xa7c   : > { %v14052_v43 = vmul.f32 %v6921_v38, %v13688_v20  ;;  %v5935_v59 = vadd.f32 1.1283791, %v5934_v35  ;;  %v6009_v24 = vadd.f32 0.0036580483, %v6008_v5  ;;  %v6084_v49 = vmul.f32 %v14045_v3, %v14045_v3 }
 0xa7d   : > { %v6922_v16 = vadd.f32 1.0, %v8144_v7  ;;  %v5949_v14 = vsub.f32 1.0, %v5948_v60  ;;  %v6025_v22 = vmul.f32 %v6024_v23, %v13957_v63  ;;  %v6046_v17 = vmul.f32 2.1237322e-06, %v14047_v21 }
 0xa7e   : > { %v14058_v39 = vpop.eup %8985  ;;  %v5956_v31 = vand.u32 2147483647, %v13985_v2  ;;  %v5958_v29 = vand.u32 2147483648, %v13985_v2  ;;  %v6057_v20 = vmul.f32 3.8918573e-05, %v14047_v21  ;;  %v14063_v42 = vmin.f32 %v6084_v49, 16.0 }
 0xa7f   : > { %v8145_v33 = vclamps-f32 %v5921_v58, 1.0  ;;  %v5974_v46 = vmul.f32 %v5973_v50, %v13907_v30  ;;  %v5988_v15 = vmul.f32 %v14058_v39, %v14022_v56  ;;  %v6124_v28 = vmul.f32 %v14049_v25, %v14049_v25 }
 0xa80   : > { %v6010_v6 = vmul.f32 %v6009_v24, %v13957_v63  ;;  %v14071_v55 = vadd.f32 1.0, %v6025_v22  ;;  %v6047_v27 = vadd.f32 0.00028619796, %v6046_v17  ;;  %v6058_v4 = vadd.f32 0.001143296, %v6057_v20 }
 0xa81   : > { %v14074_v34 = vmul.f32 %v6922_v16, %v13733_v13  ;;  %v14077_v11 = vmul.f32 %v5935_v59, %v13840_v57  ;;  %v5950_v30 = vmul.f32 %v14019_v8, %v5949_v14  ;;  %v6086_v38 = vmul.f32 2.1237322e-06, %v14063_v42 }
 0xa82   : > { %vm5952_vm1 = vweird.f32 %v13985_v2  ;;  %v5959_v48 = vor.u32 1.1754944e-38, %v5958_v29  ;;  %v5989_v54 = vsub.f32 1.0, %v5988_v15  ;;  %8987 = vrcp.f32 %v14071_v55 }
 0xa83   : > { %v6923_v35 = vadd.f32 1.0, %v8145_v33  ;;  %v14084_v5 = vmul.f32 0.5, %v14001_v52  ;;  %v6059_v13 = vmul.f32 %v6058_v4, %v14047_v21  ;;  %v14087_v7 = vmin.f32 %v6124_v28, 16.0  ;;  %v4134_v4 = vpop.f32.mrf.mxu2 }
 0xa84   : > { %vm14089_vm5 = vcmp.eq.f32.partialorder %v5956_v31, 8.507059e+37  ;;  %v5975_v60 = vadd.f32 1.1283791, %v5974_v46  ;;  %v6011_v44 = vadd.f32 0.05243302, %v6010_v6  ;;  %v6048_v9 = vmul.f32 %v6047_v27, %v14047_v21 }
 0xa85   : > { %v6097_v50 = vmul.f32 3.8918573e-05, %v14063_v42  ;;  %v5951_v58 = vadd.f32 %v14019_v8, %v5950_v30  ;;  %vm5953_vm6 = vweird.f32 %v14019_v8  ;;  %v6060_v52 = vadd.f32 0.014752088, %v6059_v13 }
 0xa86   : > { %v6087_v23 = vadd.f32 0.00028619796, %v6086_v38  ;;  %v5990_v59 = vmul.f32 %v14058_v39, %v5989_v54  ;;  %v14099_v24 = vmul.f32 0.5, %v14025_v62  ;;  %v14101_v16 = vmul.f32 0.5, %v4086_v61  ;;  %vm14113_vm7 = vmor %vm5952_vm1, %vm5953_vm6 }
 0xa87   : > { %v6098_v49 = vadd.f32 0.001143296, %v6097_v50  ;;  %v14104_v14 = vmul.f32 %v6923_v35, %v13828_v53  ;;  %v6061_v22 = vmul.f32 %v6060_v52, %v14047_v21  ;;  %v6126_v17 = vmul.f32 2.1237322e-06, %v14087_v7 }
 0xa88   : > { %v6137_v31 = vmul.f32 3.8918573e-05, %v14087_v7  ;;  %v14109_v29 = vpop.eup %8987  ;;  %v5976_v62 = vmul.f32 %v5975_v60, %v13873_v12  ;;  %v6012_v61 = vmul.f32 %v6011_v44, %v13957_v63  ;;  %v6049_v53 = vadd.f32 0.0036580483, %v6048_v9 }
 0xa89   : > { %v6099_v33 = vmul.f32 %v6098_v49, %v14063_v42  ;;  %v5955_v46 = vsel %vm14113_vm7, %v14019_v8, %v5951_v58  ;;  %vm5993_vm8 = vweird.f32 %v14058_v39  ;;  %v5996_v15 = vand.u32 2147483647, %v14022_v56 }
 0xa8a   : > { %v6088_v2 = vmul.f32 %v6087_v23, %v14063_v42  ;;  %v5991_v28 = vadd.f32 %v14058_v39, %v5990_v59  ;;  %v6028_v12 = vmul.f32 %v14109_v29, %v14071_v55  ;;  %v6062_v6 = vadd.f32 0.112945676, %v6061_v22 }
 0xa8b   : > { %v6100_v27 = vadd.f32 0.014752088, %v6099_v33  ;;  %vm5992_vm9 = vweird.f32 %v14022_v56  ;;  %v5998_v30 = vand.u32 2147483648, %v14022_v56  ;;  %v6127_v38 = vadd.f32 0.00028619796, %v6126_v17 }
 0xa8c   : > { %v6138_v8 = vadd.f32 0.001143296, %v6137_v31  ;;  %v6013_v54 = vadd.f32 0.18741608, %v6012_v61  ;;  %v6050_v35 = vmul.f32 %v6049_v53, %v14047_v21  ;;  %v6063_v13 = vmul.f32 %v6062_v6, %v14047_v21  ;;  %vm14138_vm10 = vmor %vm5992_vm9, %vm5993_vm8  ;;  %v4183_v53 = vpop.f32.mrf.mxu3 }
 0xa8d   : > { %v6101_v60 = vmul.f32 %v6100_v27, %v14063_v42  ;;  %v5960_v44 = vsel %vm14089_vm5, %v5959_v48, %v5955_v46  ;;  %v6089_v50 = vadd.f32 0.0036580483, %v6088_v2  ;;  %v4135_v58 = vadd.f32 %v4134_v4, %v15660_v45 }
 0xa8e   : > { %v6139_v56 = vmul.f32 %v6138_v8, %v14087_v7  ;;  %v5995_v52 = vsel %vm14138_vm10, %v14058_v39, %v5991_v28  ;;  %v6029_v23 = vsub.f32 1.0, %v6028_v12  ;;  %v6064_v59 = vadd.f32 0.4994258, %v6063_v13 }
 0xa8f   : > { %v6102_v49 = vadd.f32 0.112945676, %v6101_v60  ;;  %vm5997_vm11 = vcmp.eq.f32.partialorder %v5996_v15, 8.507059e+37  ;;  %v5999_v48 = vor.u32 1.1754944e-38, %v5998_v30  ;;  %v6128_v57 = vmul.f32 %v6127_v38, %v14087_v7 }
 0xa90   : > { %v6140_v22 = vadd.f32 0.014752088, %v6139_v56  ;;  %v6014_v17 = vmul.f32 %v6013_v54, %v13957_v63  ;;  %v6051_v31 = vadd.f32 0.05243302, %v6050_v35  ;;  %v6065_v20 = vmul.f32 %v6064_v59, %v14047_v21 }
 0xa91   : > { %v6103_v61 = vmul.f32 %v6102_v49, %v14063_v42  ;;  %v5961_v33 = vmul.f32 %v5960_v44, %v14077_v11  ;;  %v6000_v46 = vsel %vm5997_vm11, %v5999_v48, %v5995_v52  ;;  %v6090_v39 = vmul.f32 %v6089_v50, %v14063_v42 }
 0xa92   : > { %v6141_v2 = vmul.f32 %v6140_v22, %v14087_v7  ;;  %v6030_v15 = vmul.f32 %v14109_v29, %v6029_v23  ;;  %v14155_v28 = vadd.f32 1.0, %v6065_v20  ;;  %v14157_v6 = vmul.f32 0.70710677, %v4135_v58 }
 0xa93   : > { %v6104_v12 = vadd.f32 0.4994258, %v6103_v61  ;;  %v6129_v63 = vadd.f32 0.0036580483, %v6128_v57  ;;  %v14159_v4 = vmul.f32 0.5, %v4135_v58  ;;  %v14162_v30 = vadd.f32 %v4183_v53, %v15661_v36 }
 0xa94   : > { %v6142_v27 = vadd.f32 0.112945676, %v6141_v2  ;;  %v6001_v11 = vmul.f32 %v6000_v46, %v5976_v62  ;;  %v6015_v38 = vadd.f32 1.1283791, %v6014_v17  ;;  %v6052_v8 = vmul.f32 %v6051_v31, %v14047_v21 }
 0xa95   : > { %8989 = vrcp.f32 %v14155_v28  ;;  %v8146_v54 = vclamps-f32 %v5961_v33, 1.0  ;;  %vm6033_vm12 = vweird.f32 %v14109_v29  ;;  %v6036_v35 = vand.u32 2147483647, %v14071_v55 }
 0xa96   : > { %v6105_v13 = vmul.f32 %v6104_v12, %v14063_v42  ;;  %v6031_v60 = vadd.f32 %v14109_v29, %v6030_v15  ;;  %v6091_v44 = vadd.f32 0.05243302, %v6090_v39  ;;  %v6143_v9 = vmul.f32 %v6142_v27, %v14087_v7  ;;  %v4039_v15 = vpop.f32.mrf.mxu0 }
 0xa97   : > { %v6164_v62 = vmul.f32 %v14157_v6, %v14157_v6  ;;  %vm6032_vm13 = vweird.f32 %v14071_v55  ;;  %v6038_v50 = vand.u32 2147483648, %v14071_v55  ;;  %v6130_v58 = vmul.f32 %v6129_v63, %v14087_v7 }
 0xa98   : > { %v14175_v56 = vadd.f32 1.0, %v6105_v13  ;;  %v8147_v52 = vclamps-f32 %v6001_v11, 1.0  ;;  %v6053_v23 = vadd.f32 0.18741608, %v6052_v8  ;;  %v6144_v59 = vadd.f32 0.4994258, %v6143_v9  ;;  %vm14182_vm14 = vmor %vm6032_vm13, %vm6033_vm12 }
 0xa99   : > { %v14178_v49 = vmin.f32 %v6164_v62, 16.0  ;;  %v6924_v48 = vadd.f32 1.0, %v8146_v54  ;;  %vm14186_vm15 = vcmp.eq.f32.partialorder %v6036_v35, 8.507059e+37  ;;  %v14192_v55 = vmul.f32 0.70710677, %v14162_v30 }
 0xa9a   : > { %8991 = vrcp.f32 %v14175_v56  ;;  %v6035_v31 = vsel %vm14182_vm14, %v14109_v29, %v6031_v60  ;;  %v6092_v20 = vmul.f32 %v6091_v44, %v14063_v42  ;;  %v6145_v61 = vmul.f32 %v6144_v59, %v14087_v7 }
 0xa9b   : > { %v14194_v17 = vpop.eup %8989  ;;  %v6166_v53 = vmul.f32 2.1237322e-06, %v14178_v49  ;;  %v6039_v33 = vor.u32 1.1754944e-38, %v6038_v50  ;;  %v6131_v39 = vadd.f32 0.05243302, %v6130_v58  ;;  %v6925_v12 = vadd.f32 1.0, %v8147_v52 }
 0xa9c   : > { %v6068_v46 = vmul.f32 %v14194_v17, %v14155_v28  ;;  %v6177_v2 = vmul.f32 3.8918573e-05, %v14178_v49  ;;  %v6054_v63 = vmul.f32 %v6053_v23, %v14047_v21  ;;  %v14206_v27 = vadd.f32 1.0, %v6145_v61 }
 0xa9d   : > { %v6167_v29 = vadd.f32 0.00028619796, %v6166_v53  ;;  %v6040_v11 = vsel %vm14186_vm15, %v6039_v33, %v6035_v31  ;;  %v6204_v35 = vmul.f32 %v14192_v55, %v14192_v55  ;;  %v14213_v13 = vmul.f32 %v6924_v48, %v13937_v10 }
 0xa9e   : > { %v6069_v8 = vsub.f32 1.0, %v6068_v46  ;;  %v6178_v54 = vadd.f32 0.001143296, %v6177_v2  ;;  %v6016_v60 = vmul.f32 %v6015_v38, %v13918_v47  ;;  %v6093_v44 = vadd.f32 0.18741608, %v6092_v20 }
 0xa9f   : > { %v14217_v9 = vadd.f32 %v4039_v15, %v11498_v1  ;;  %v6132_v62 = vmul.f32 %v6131_v39, %v14087_v7  ;;  %v6168_v50 = vmul.f32 %v6167_v29, %v14178_v49  ;;  %v14224_v52 = vmin.f32 %v6204_v35, 16.0 }
 0xaa0   : > { %v14219_v21 = vpop.eup %8991  ;;  %v6179_v58 = vmul.f32 %v6178_v54, %v14178_v49  ;;  %v6041_v23 = vmul.f32 %v6040_v11, %v6016_v60  ;;  %v6055_v59 = vadd.f32 1.1283791, %v6054_v63  ;;  %8993 = vrcp.f32 %v14206_v27 }
 0xaa1   : > { %v6108_v10 = vmul.f32 %v14219_v21, %v14175_v56  ;;  %v14230_v47 = vmul.f32 %v6925_v12, %v13944_v37  ;;  %v6070_v38 = vmul.f32 %v14194_v17, %v6069_v8  ;;  %v6169_v48 = vadd.f32 0.0036580483, %v6168_v50 }
 0xaa2   : > { %v6180_v57 = vadd.f32 0.014752088, %v6179_v58  ;;  %v6094_v22 = vmul.f32 %v6093_v44, %v14063_v42  ;;  %v6217_v20 = vmul.f32 3.8918573e-05, %v14224_v52  ;;  %v14236_v61 = vmul.f32 0.70710677, %v14217_v9 }
 0xaa3   : > { %v6109_v31 = vsub.f32 1.0, %v6108_v10  ;;  %v6076_v53 = vand.u32 2147483647, %v14155_v28  ;;  %v6078_v33 = vand.u32 2147483648, %v14155_v28  ;;  %v6133_v46 = vadd.f32 0.18741608, %v6132_v62 }
 0xaa4   : > { %v6181_v37 = vmul.f32 %v6180_v57, %v14178_v49  ;;  %v8148_v39 = vclamps-f32 %v6041_v23, 1.0  ;;  %v6056_v2 = vmul.f32 %v6055_v59, %v14017_v32  ;;  %v6218_v15 = vadd.f32 0.001143296, %v6217_v20 }
 0xaa5   : > { %v6244_v42 = vmul.f32 %v14236_v61, %v14236_v61  ;;  %v6071_v12 = vadd.f32 %v14194_v17, %v6070_v38  ;;  %vm6072_vm0 = vweird.f32 %v14155_v28  ;;  %vm6073_vm2 = vweird.f32 %v14194_v17 }
 0xaa6   : > { %v6206_v63 = vmul.f32 2.1237322e-06, %v14224_v52  ;;  %v14248_v29 = vpop.eup %8993  ;;  %v6110_v11 = vmul.f32 %v14219_v21, %v6109_v31  ;;  %v6170_v8 = vmul.f32 %v6169_v48, %v14178_v49  ;;  %v6182_v54 = vadd.f32 0.112945676, %v6181_v37  ;;  %vm14258_vm4 = vmor %vm6072_vm0, %vm6073_vm2 }
 0xaa7   : > { %v6219_v32 = vmul.f32 %v6218_v15, %v14224_v52  ;;  %vm14253_vm3 = vcmp.eq.f32.partialorder %v6076_v53, 8.507059e+37  ;;  %v6079_v60 = vor.u32 1.1754944e-38, %v6078_v33  ;;  %v6095_v44 = vadd.f32 1.1283791, %v6094_v22 }
 0xaa8   : > { %v6134_v28 = vmul.f32 %v6133_v46, %v14087_v7  ;;  %v6926_v62 = vadd.f32 1.0, %v8148_v39  ;;  %v6183_v58 = vmul.f32 %v6182_v54, %v14178_v49  ;;  %v14263_v59 = vmin.f32 %v6244_v42, 16.0 }
 0xaa9   : > { %v6220_v23 = vadd.f32 0.014752088, %v6219_v32  ;;  %v6075_v10 = vsel %vm14258_vm4, %v14194_v17, %v6071_v12  ;;  %vm6113_vm1 = vweird.f32 %v14219_v21  ;;  %v6148_v38 = vmul.f32 %v14248_v29, %v14206_v27 }
 0xaaa   : > { %v6207_v7 = vadd.f32 0.00028619796, %v6206_v63  ;;  %v6111_v48 = vadd.f32 %v14219_v21, %v6110_v11  ;;  %v6171_v57 = vadd.f32 0.05243302, %v6170_v8  ;;  %v6184_v22 = vadd.f32 0.4994258, %v6183_v58 }
 0xaab   : > { %v6221_v31 = vmul.f32 %v6220_v23, %v14224_v52  ;;  %vm6112_vm5 = vweird.f32 %v14175_v56  ;;  %v6116_v20 = vand.u32 2147483647, %v14175_v56  ;;  %v6118_v53 = vand.u32 2147483648, %v14175_v56 }
 0xaac   : > { %v6135_v33 = vadd.f32 1.1283791, %v6134_v28  ;;  %v6080_v17 = vsel %vm14253_vm3, %v6079_v60, %v6075_v10  ;;  %v6185_v46 = vmul.f32 %v6184_v22, %v14178_v49  ;;  %v6246_v39 = vmul.f32 2.1237322e-06, %v14263_v59  ;;  %vm14283_vm6 = vmor %vm6112_vm5, %vm6113_vm1 }
 0xaad   : > { %v6222_v37 = vadd.f32 0.112945676, %v6221_v31  ;;  %v6096_v15 = vmul.f32 %v6095_v44, %v14045_v3  ;;  %v6149_v12 = vsub.f32 1.0, %v6148_v38  ;;  %v14288_v56 = vmul.f32 0.5, %v14162_v30  ;;  %v4088_v44 = vpop.f32.mrf.mxu1 }
 0xaae   : > { %v6208_v63 = vmul.f32 %v6207_v7, %v14224_v52  ;;  %v6115_v11 = vsel %vm14283_vm6, %v14219_v21, %v6111_v48  ;;  %v6172_v8 = vmul.f32 %v6171_v57, %v14178_v49  ;;  %v14295_v54 = vadd.f32 1.0, %v6185_v46  ;;  %v4137_v57 = vpop.f32.mrf.mxu2 }
 0xaaf   : > { %v6257_v3 = vmul.f32 3.8918573e-05, %v14263_v59  ;;  %v14299_v32 = vmul.f32 %v6926_v62, %v14042_v51  ;;  %v6081_v35 = vmul.f32 %v6080_v17, %v6056_v2  ;;  %v6119_v60 = vor.u32 1.1754944e-38, %v6118_v53 }
 0xab0   : > { %v6223_v30 = vmul.f32 %v6222_v37, %v14224_v52  ;;  %vm6117_vm7 = vcmp.eq.f32.partialorder %v6116_v20, 8.507059e+37  ;;  %v14303_v28 = vmul.f32 %v6135_v33, %v14049_v25  ;;  %8995 = vrcp.f32 %v14295_v54 }
 0xab1   : > { %15712 = vst [vmem:[#allocation53_spill] sm:$0xff] %v14299_v32  ;;  %v6247_v21 = vadd.f32 0.00028619796, %v6246_v39  ;;  %v6120_v50 = vsel %vm6117_vm7, %v6119_v60, %v6115_v11  ;;  %v6150_v58 = vmul.f32 %v14248_v29, %v6149_v12  ;;  %v6209_v23 = vadd.f32 0.0036580483, %v6208_v63 }
 0xab2   : > { %v6224_v10 = vadd.f32 0.4994258, %v6223_v30  ;;  %vm6152_vm8 = vweird.f32 %v14206_v27  ;;  %v6173_v51 = vadd.f32 0.18741608, %v6172_v8  ;;  %v6258_v2 = vadd.f32 0.001143296, %v6257_v3  ;;  %v4186_v3 = vpop.f32.mrf.mxu3 }
 0xab3   : > { %v14309_v62 = vadd.f32 %v4088_v44, %v11500_v18  ;;  %v8149_v38 = vclamps-f32 %v6081_v35, 1.0  ;;  %v6156_v7 = vand.u32 2147483647, %v14206_v27  ;;  %v6158_v25 = vand.u32 2147483648, %v14206_v27 }
 0xab4   : > { %v6225_v48 = vmul.f32 %v6224_v10, %v14224_v52  ;;  %v6121_v22 = vmul.f32 %v6120_v50, %v6096_v15  ;;  %v6248_v31 = vmul.f32 %v6247_v21, %v14263_v59  ;;  %v6259_v20 = vmul.f32 %v6258_v2, %v14263_v59 }
 0xab5   : > { %v14317_v53 = vmul.f32 0.70710677, %v14309_v62  ;;  %v6151_v33 = vadd.f32 %v14248_v29, %v6150_v58  ;;  %vm6153_vm9 = vweird.f32 %v14248_v29  ;;  %v6210_v17 = vmul.f32 %v6209_v23, %v14224_v52 }
 0xab6   : > { %v14322_v46 = vadd.f32 1.0, %v6225_v48  ;;  %v14324_v37 = vpop.eup %8995  ;;  %v6174_v39 = vmul.f32 %v6173_v51, %v14178_v49  ;;  %v6260_v15 = vadd.f32 0.014752088, %v6259_v20  ;;  %v14330_v12 = vadd.f32 %v4137_v57, %v15660_v45  ;;  %vm14341_vm11 = vmor %vm6152_vm8, %vm6153_vm9 }
 0xab7   : > { %v6284_v42 = vmul.f32 %v14317_v53, %v14317_v53  ;;  %v6927_v63 = vadd.f32 1.0, %v8149_v38  ;;  %vm14332_vm10 = vcmp.eq.f32.partialorder %v6156_v7, 8.507059e+37  ;;  %v6188_v8 = vmul.f32 %v14324_v37, %v14295_v54 }
 0xab8   : > { %8997 = vrcp.f32 %v14322_v46  ;;  %v8150_v35 = vclamps-f32 %v6121_v22, 1.0  ;;  %v6159_v60 = vor.u32 1.1754944e-38, %v6158_v25  ;;  %v14346_v30 = vmul.f32 0.5, %v14217_v9 }
 0xab9   : > { %v6249_v44 = vadd.f32 0.0036580483, %v6248_v31  ;;  %v6155_v21 = vsel %vm14341_vm11, %v14248_v29, %v6151_v33  ;;  %v6211_v50 = vadd.f32 0.05243302, %v6210_v17  ;;  %v6261_v58 = vmul.f32 %v6260_v15, %v14263_v59 }
 0xaba   : > { %v14352_v23 = vmin.f32 %v6284_v42, 16.0  ;;  %v6175_v10 = vadd.f32 1.1283791, %v6174_v39  ;;  %v6189_v27 = vsub.f32 1.0, %v6188_v8  ;;  %v14355_v51 = vmul.f32 0.70710677, %v14330_v12 }
 0xabb   : > { %v14358_v2 = vadd.f32 %v4186_v3, %v15661_v36  ;;  %v14361_v9 = vmul.f32 %v6927_v63, %v14084_v5  ;;  %v6262_v38 = vadd.f32 0.112945676, %v6261_v58  ;;  %v6928_v25 = vadd.f32 1.0, %v8150_v35 }
 0xabc   : > { %v6286_v7 = vmul.f32 2.1237322e-06, %v14352_v23  ;;  %v6297_v29 = vmul.f32 3.8918573e-05, %v14352_v23  ;;  %v6160_v48 = vsel %vm14332_vm10, %v6159_v60, %v6155_v21  ;;  %v6250_v57 = vmul.f32 %v6249_v44, %v14263_v59 }
 0xabd   : > { %15717 = vst [vmem:[#allocation49_spill] sm:$0xff] %v14361_v9  ;;  %v6324_v22 = vmul.f32 %v14355_v51, %v14355_v51  ;;  %v6212_v20 = vmul.f32 %v6211_v50, %v14224_v52  ;;  %v6263_v5 = vmul.f32 %v6262_v38, %v14263_v59  ;;  %v6190_v39 = vmul.f32 %v14324_v37, %v6189_v27 }
 0xabe   : > { %v14370_v31 = vpop.eup %8997  ;;  %v6287_v33 = vadd.f32 0.00028619796, %v6286_v7  ;;  %v6298_v17 = vadd.f32 0.001143296, %v6297_v29  ;;  %v14380_v63 = vmul.f32 0.70710677, %v14358_v2  ;;  %v14383_v11 = vmul.f32 %v6160_v48, %v14303_v28 }
 0xabf   : > { %v6228_v15 = vmul.f32 %v14370_v31, %v14322_v46  ;;  %v14377_v42 = vmin.f32 %v6324_v22, 16.0  ;;  %v6176_v8 = vmul.f32 %v6175_v10, %v14157_v6  ;;  %v6264_v3 = vadd.f32 0.4994258, %v6263_v5 }
 0xac0   : > { %v6299_v35 = vmul.f32 %v6298_v17, %v14352_v23  ;;  %v14388_v49 = vmul.f32 %v6928_v25, %v14099_v24  ;;  %v6251_v44 = vadd.f32 0.05243302, %v6250_v57  ;;  %v6288_v21 = vmul.f32 %v6287_v33, %v14352_v23  ;;  %v4041_v17 = vpop.f32.mrf.mxu0 }
 0xac1   : > { %v6229_v60 = vsub.f32 1.0, %v6228_v15  ;;  %v6198_v50 = vand.u32 2147483648, %v14295_v54  ;;  %v6213_v58 = vadd.f32 0.18741608, %v6212_v20  ;;  %v6265_v27 = vmul.f32 %v6264_v3, %v14263_v59 }
 0xac2   : > { %v6300_v38 = vadd.f32 0.014752088, %v6299_v35  ;;  %v6191_v28 = vadd.f32 %v14324_v37, %v6190_v39  ;;  %vm6193_vm12 = vweird.f32 %v14324_v37  ;;  %v6337_v6 = vmul.f32 3.8918573e-05, %v14377_v42 }
 0xac3   : > { %v6364_v24 = vmul.f32 %v14380_v63, %v14380_v63  ;;  %v6230_v10 = vmul.f32 %v14370_v31, %v6229_v60  ;;  %v14399_v7 = vadd.f32 1.0, %v6265_v27  ;;  %v6326_v25 = vmul.f32 2.1237322e-06, %v14377_v42 }
 0xac4   : > { %v6301_v29 = vmul.f32 %v6300_v38, %v14352_v23  ;;  %vm6192_vm13 = vweird.f32 %v14295_v54  ;;  %v6196_v48 = vand.u32 2147483647, %v14295_v54  ;;  %v6252_v57 = vmul.f32 %v6251_v44, %v14263_v59 }
 0xac5   : > { %v6289_v22 = vadd.f32 0.0036580483, %v6288_v21  ;;  %v8151_v20 = vclamps-f32 %v14383_v11, 1.0  ;;  %8999 = vrcp.f32 %v14399_v7  ;;  %v6338_v5 = vadd.f32 0.001143296, %v6337_v6  ;;  %vm14412_vm14 = vmor %vm6192_vm13, %vm6193_vm12 }
 0xac6   : > { %v14408_v33 = vmin.f32 %v6364_v24, 16.0  ;;  %v6199_v39 = vor.u32 1.1754944e-38, %v6198_v50  ;;  %v6214_v15 = vmul.f32 %v6213_v58, %v14224_v52  ;;  %v6236_v54 = vand.u32 2147483647, %v14322_v46 }
 0xac7   : > { %v6302_v3 = vadd.f32 0.112945676, %v6301_v29  ;;  %v6195_v11 = vsel %vm14412_vm14, %v14324_v37, %v6191_v28  ;;  %v6231_v35 = vadd.f32 %v14370_v31, %v6230_v10  ;;  %vm6233_vm15 = vweird.f32 %v14370_v31 }
 0xac8   : > { %v6327_v60 = vadd.f32 0.00028619796, %v6326_v25  ;;  %v6238_v44 = vand.u32 2147483648, %v14322_v46  ;;  %v6253_v21 = vadd.f32 0.18741608, %v6252_v57  ;;  %v6290_v27 = vmul.f32 %v6289_v22, %v14352_v23 }
 0xac9   : > { %v6303_v50 = vmul.f32 %v6302_v3, %v14352_v23  ;;  %vm6197_vm0 = vcmp.eq.f32.partialorder %v6196_v48, 8.507059e+37  ;;  %vm6232_vm2 = vweird.f32 %v14322_v46  ;;  %v6339_v52 = vmul.f32 %v6338_v5, %v14377_v42 }
 0xaca   : > { %v6366_v58 = vmul.f32 2.1237322e-06, %v14408_v33  ;;  %v6200_v37 = vsel %vm6197_vm0, %v6199_v39, %v6195_v11  ;;  %v6215_v38 = vadd.f32 1.1283791, %v6214_v15  ;;  %vm14429_vm3 = vmor %vm6232_vm2, %vm6233_vm15  ;;  %v6377_v24 = vmul.f32 3.8918573e-05, %v14408_v33 }
 0xacb   : > { %v6304_v6 = vadd.f32 0.4994258, %v6303_v50  ;;  %v14434_v10 = vpop.eup %8999  ;;  %v6235_v29 = vsel %vm14429_vm3, %v14370_v31, %v6231_v35  ;;  %vm6237_vm4 = vcmp.eq.f32.partialorder %v6236_v54, 8.507059e+37  ;;  %v6328_v46 = vmul.f32 %v6327_v60, %v14377_v42 }
 0xacc   : > { %v6340_v25 = vadd.f32 0.014752088, %v6339_v52  ;;  %v6239_v48 = vor.u32 1.1754944e-38, %v6238_v44  ;;  %v6254_v57 = vmul.f32 %v6253_v21, %v14263_v59  ;;  %v6268_v22 = vmul.f32 %v14434_v10, %v14399_v7 }
 0xacd   : > { %v6291_v5 = vadd.f32 0.05243302, %v6290_v27  ;;  %v6201_v39 = vmul.f32 %v6200_v37, %v6176_v8  ;;  %v6305_v15 = vmul.f32 %v6304_v6, %v14352_v23  ;;  %v6367_v11 = vadd.f32 0.00028619796, %v6366_v58 }
 0xace   : > { %v6341_v3 = vmul.f32 %v6340_v25, %v14377_v42  ;;  %v6929_v50 = vadd.f32 1.0, %v8151_v20  ;;  %v6216_v31 = vmul.f32 %v6215_v38, %v14192_v55  ;;  %v6240_v54 = vsel %vm6237_vm4, %v6239_v48, %v6235_v29  ;;  %v4090_v48 = vpop.f32.mrf.mxu1 }
 0xacf   : > { %v6378_v35 = vadd.f32 0.001143296, %v6377_v24  ;;  %v14446_v60 = vadd.f32 1.0, %v6305_v15  ;;  %v6329_v44 = vadd.f32 0.0036580483, %v6328_v46  ;;  %v14449_v21 = vadd.f32 %v4041_v17, %v11498_v1 }
 0xad0   : > { %v6342_v59 = vadd.f32 0.112945676, %v6341_v3  ;;  %v6255_v27 = vadd.f32 1.1283791, %v6254_v57  ;;  %v6269_v52 = vsub.f32 1.0, %v6268_v22  ;;  %v6292_v8 = vmul.f32 %v6291_v5, %v14352_v23 }
 0xad1   : > { %v6379_v37 = vmul.f32 %v6378_v35, %v14408_v33  ;;  %v8152_v28 = vclamps-f32 %v6201_v39, 1.0  ;;  %v14454_v20 = vmul.f32 0.5, %v14309_v62  ;;  %9001 = vrcp.f32 %v14446_v60 }
 0xad2   : > { %v6368_v55 = vmul.f32 %v6367_v11, %v14408_v33  ;;  %v14459_v58 = vmul.f32 %v6929_v50, %v14101_v16  ;;  %v6241_v38 = vmul.f32 %v6240_v54, %v6216_v31  ;;  %v14462_v6 = vmul.f32 0.5, %v14330_v12 }
 0xad3   : > { %v6343_v24 = vmul.f32 %v6342_v59, %v14377_v42  ;;  %v6330_v29 = vmul.f32 %v6329_v44, %v14377_v42  ;;  %v14467_v46 = vmul.f32 0.5, %v14358_v2  ;;  %v6380_v62 = vadd.f32 0.014752088, %v6379_v37 }
 0xad4   : > { %v14470_v25 = vmul.f32 0.70710677, %v14449_v21  ;;  %v14473_v57 = vmul.f32 %v6255_v27, %v14236_v61  ;;  %v6270_v16 = vmul.f32 %v14434_v10, %v6269_v52  ;;  %v6293_v22 = vadd.f32 0.18741608, %v6292_v8 }
 0xad5   : > { %v6344_v12 = vadd.f32 0.4994258, %v6343_v24  ;;  %v6930_v5 = vadd.f32 1.0, %v8152_v28  ;;  %v6369_v17 = vadd.f32 0.0036580483, %v6368_v55  ;;  %v6381_v39 = vmul.f32 %v6380_v62, %v14408_v33 }
 0xad6   : > { %v6404_v2 = vmul.f32 %v14470_v25, %v14470_v25  ;;  %v8153_v15 = vclamps-f32 %v6241_v38, 1.0  ;;  %v6276_v3 = vand.u32 2147483647, %v14399_v7  ;;  %v14482_v50 = vadd.f32 %v4090_v48, %v11500_v18 }
 0xad7   : > { %v6345_v11 = vmul.f32 %v6344_v12, %v14377_v42  ;;  %v14484_v61 = vpop.eup %9001  ;;  %vm6273_vm1 = vweird.f32 %v14434_v10  ;;  %v6331_v31 = vadd.f32 0.05243302, %v6330_v29  ;;  %v6382_v54 = vadd.f32 0.112945676, %v6381_v39 }
 0xad8   : > { %v14487_v35 = vmin.f32 %v6404_v2, 16.0  ;;  %v6271_v44 = vadd.f32 %v14434_v10, %v6270_v16  ;;  %v6294_v59 = vmul.f32 %v6293_v22, %v14352_v23  ;;  %v6308_v27 = vmul.f32 %v14484_v61, %v14446_v60  ;;  %v4139_v16 = vpop.f32.mrf.mxu2 }
 0xad9   : > { %v14493_v52 = vadd.f32 1.0, %v6345_v11  ;;  %v6370_v8 = vmul.f32 %v6369_v17, %v14408_v33  ;;  %v6383_v37 = vmul.f32 %v6382_v54, %v14408_v33  ;;  %vm6272_vm5 = vweird.f32 %v14399_v7 }
 0xada   : > { %v6406_v28 = vmul.f32 2.1237322e-06, %v14487_v35  ;;  %v6417_v55 = vmul.f32 3.8918573e-05, %v14487_v35  ;;  %v6278_v38 = vand.u32 2147483648, %v14399_v7  ;;  %v14506_v24 = vmul.f32 %v6930_v5, %v14159_v4  ;;  %vm14511_vm6 = vmor %vm6272_vm5, %vm6273_vm1 }
 0xadb   : > { %9003 = vrcp.f32 %v14493_v52  ;;  %v14503_v23 = vmul.f32 0.70710677, %v14482_v50  ;;  %v6931_v29 = vadd.f32 1.0, %v8153_v15  ;;  %v6332_v62 = vmul.f32 %v6331_v31, %v14377_v42 }
 0xadc   : > { %15722 = vst [vmem:[#allocation54_spill] sm:$0xff] %v14506_v24  ;;  %v6384_v48 = vadd.f32 0.4994258, %v6383_v37  ;;  %vm14515_vm7 = vcmp.eq.f32.partialorder %v6276_v3, 8.507059e+37  ;;  %v6309_v12 = vsub.f32 1.0, %v6308_v27  ;;  %v6275_v4 = vsel %vm14511_vm6, %v14434_v10, %v6271_v44 }
 0xadd   : > { %v6407_v17 = vadd.f32 0.00028619796, %v6406_v28  ;;  %v6418_v39 = vadd.f32 0.001143296, %v6417_v55  ;;  %v6295_v5 = vadd.f32 1.1283791, %v6294_v59  ;;  %v6444_v3 = vmul.f32 %v14503_v23, %v14503_v23 }
 0xade   : > { %v6371_v2 = vadd.f32 0.05243302, %v6370_v8  ;;  %v6385_v15 = vmul.f32 %v6384_v48, %v14408_v33  ;;  %v14528_v54 = vadd.f32 %v4139_v16, %v15660_v45  ;;  %v14531_v27 = vmul.f32 %v6931_v29, %v14288_v56 }
 0xadf   : > { %v6408_v11 = vmul.f32 %v6407_v17, %v14487_v35  ;;  %v6419_v31 = vmul.f32 %v6418_v39, %v14487_v35  ;;  %v6279_v37 = vor.u32 1.1754944e-38, %v6278_v38  ;;  %v6333_v28 = vadd.f32 0.18741608, %v6332_v62 }
 0xae0   : > { %15727 = vst [vmem:[#allocation50_spill] sm:$0xff] %v14531_v27  ;;  %v14533_v10 = vadd.f32 1.0, %v6385_v15  ;;  %v6310_v59 = vmul.f32 %v14484_v61, %v6309_v12  ;;  %v14539_v8 = vmul.f32 0.5, %v14449_v21  ;;  %v14541_v48 = vmin.f32 %v6444_v3, 16.0 }
 0xae1   : > { %v14535_v44 = vpop.eup %9003  ;;  %v6420_v55 = vadd.f32 0.014752088, %v6419_v31  ;;  %v6280_v16 = vsel %vm14515_vm7, %v6279_v37, %v6275_v4  ;;  %v6372_v38 = vmul.f32 %v6371_v2, %v14408_v33  ;;  %v6409_v29 = vadd.f32 0.0036580483, %v6408_v11 }
 0xae2   : > { %v6348_v56 = vmul.f32 %v14535_v44, %v14493_v52  ;;  %v6296_v62 = vmul.f32 %v6295_v5, %v14317_v53  ;;  %v6316_v22 = vand.u32 2147483647, %v14446_v60  ;;  %v6318_v12 = vand.u32 2147483648, %v14446_v60 }
 0xae3   : > { %v14552_v21 = vmul.f32 0.70710677, %v14528_v54  ;;  %v6334_v17 = vmul.f32 %v6333_v28, %v14377_v42  ;;  %9005 = vrcp.f32 %v14533_v10  ;;  %v6421_v7 = vmul.f32 %v6420_v55, %v14487_v35 }
 0xae4   : > { %v6349_v39 = vsub.f32 1.0, %v6348_v56  ;;  %v6281_v4 = vmul.f32 %v6280_v16, %v14473_v57  ;;  %v6311_v2 = vadd.f32 %v14484_v61, %v6310_v59  ;;  %vm6313_vm8 = vweird.f32 %v14484_v61 }
 0xae5   : > { %v6457_v53 = vmul.f32 3.8918573e-05, %v14541_v48  ;;  %vm6312_vm9 = vweird.f32 %v14446_v60  ;;  %v6373_v5 = vadd.f32 0.18741608, %v6372_v38  ;;  %v6410_v15 = vmul.f32 %v6409_v29, %v14487_v35 }
 0xae6   : > { %v6422_v11 = vadd.f32 0.112945676, %v6421_v7  ;;  %v6350_v42 = vmul.f32 %v14535_v44, %v6349_v39  ;;  %v6446_v31 = vmul.f32 2.1237322e-06, %v14541_v48  ;;  %v6484_v57 = vmul.f32 %v14552_v21, %v14552_v21  ;;  %vm14567_vm10 = vmor %vm6312_vm9, %vm6313_vm8 }
 0xae7   : > { %v6458_v3 = vadd.f32 0.001143296, %v6457_v53  ;;  %vm14571_vm11 = vcmp.eq.f32.partialorder %v6316_v22, 8.507059e+37  ;;  %v6319_v60 = vor.u32 1.1754944e-38, %v6318_v12  ;;  %v6335_v59 = vadd.f32 1.1283791, %v6334_v17 }
 0xae8   : > { %v6423_v55 = vmul.f32 %v6422_v11, %v14487_v35  ;;  %v8154_v16 = vclamps-f32 %v6281_v4, 1.0  ;;  %v6315_v56 = vsel %vm14567_vm10, %v14484_v61, %v6311_v2  ;;  %vm6352_vm12 = vweird.f32 %v14493_v52 }
 0xae9   : > { %v6459_v38 = vmul.f32 %v6458_v3, %v14541_v48  ;;  %v14581_v29 = vpop.eup %9005  ;;  %vm6353_vm13 = vweird.f32 %v14535_v44  ;;  %v6374_v22 = vmul.f32 %v6373_v5, %v14408_v33  ;;  %v6411_v39 = vadd.f32 0.05243302, %v6410_v15 }
 0xaea   : > { %v6424_v12 = vadd.f32 0.4994258, %v6423_v55  ;;  %v6351_v17 = vadd.f32 %v14535_v44, %v6350_v42  ;;  %v6447_v7 = vadd.f32 0.00028619796, %v6446_v31  ;;  %v14586_v53 = vmin.f32 %v6484_v57, 16.0  ;;  %vm14602_vm14 = vmor %vm6352_vm12, %vm6353_vm13  ;;  %v4188_v55 = vpop.f32.mrf.mxu3 }
 0xaeb   : > { %v6460_v4 = vadd.f32 0.014752088, %v6459_v38  ;;  %v6320_v61 = vsel %vm14571_vm11, %v6319_v60, %v6315_v56  ;;  %v6356_v2 = vand.u32 2147483647, %v14493_v52  ;;  %v6358_v11 = vand.u32 2147483648, %v14493_v52 }
 0xaec   : > { %v6425_v3 = vmul.f32 %v6424_v12, %v14487_v35  ;;  %v6388_v33 = vmul.f32 %v14581_v29, %v14533_v10  ;;  %v6486_v15 = vmul.f32 2.1237322e-06, %v14586_v53  ;;  %v6497_v42 = vmul.f32 3.8918573e-05, %v14586_v53 }
 0xaed   : > { %v6461_v5 = vmul.f32 %v6460_v4, %v14541_v48  ;;  %v6932_v31 = vadd.f32 1.0, %v8154_v16  ;;  %v6412_v37 = vmul.f32 %v6411_v39, %v14487_v35  ;;  %v14610_v60 = vmul.f32 0.5, %v14482_v50 }
 0xaee   : > { %v14607_v28 = vadd.f32 1.0, %v6425_v3  ;;  %v6355_v16 = vsel %vm14602_vm14, %v14535_v44, %v6351_v17  ;;  %v6375_v56 = vadd.f32 1.1283791, %v6374_v22  ;;  %v6448_v38 = vmul.f32 %v6447_v7, %v14541_v48 }
 0xaef   : > { %v6462_v52 = vadd.f32 0.112945676, %v6461_v5  ;;  %v6321_v12 = vmul.f32 %v6320_v61, %v6296_v62  ;;  %v6359_v4 = vor.u32 1.1754944e-38, %v6358_v11  ;;  %v6487_v27 = vadd.f32 0.00028619796, %v6486_v15 }
 0xaf0   : > { %v6498_v9 = vadd.f32 0.001143296, %v6497_v42  ;;  %v6336_v39 = vmul.f32 %v6335_v59, %v14355_v51  ;;  %vm6357_vm15 = vcmp.eq.f32.partialorder %v6356_v2, 8.507059e+37  ;;  %v6389_v3 = vsub.f32 1.0, %v6388_v33 }
 0xaf1   : > { %v14618_v50 = vadd.f32 %v4188_v55, %v15661_v36  ;;  %v6360_v24 = vsel %vm6357_vm15, %v6359_v4, %v6355_v16  ;;  %v6413_v32 = vadd.f32 0.18741608, %v6412_v37  ;;  %9007 = vrcp.f32 %v14607_v28  ;;  %v4044_v37 = vpop.f32.mrf.mxu0 }
 0xaf2   : > { %v6463_v44 = vmul.f32 %v6462_v52, %v14541_v48  ;;  %v14623_v22 = vmul.f32 %v6932_v31, %v14346_v30  ;;  %v14626_v62 = vmul.f32 %v6375_v56, %v14380_v63  ;;  %v6396_v17 = vand.u32 2147483647, %v14533_v10 }
 0xaf3   : > { %v6449_v51 = vadd.f32 0.0036580483, %v6448_v38  ;;  %v8155_v59 = vclamps-f32 %v6321_v12, 1.0  ;;  %v6488_v61 = vmul.f32 %v6487_v27, %v14586_v53  ;;  %v6499_v2 = vmul.f32 %v6498_v9, %v14586_v53 }
 0xaf4   : > { %v6464_v7 = vadd.f32 0.4994258, %v6463_v44  ;;  %v6361_v11 = vmul.f32 %v6360_v24, %v6336_v39  ;;  %v6390_v33 = vmul.f32 %v14581_v29, %v6389_v3  ;;  %v14633_v5 = vmul.f32 0.70710677, %v14618_v50 }
 0xaf5   : > { %v7028_v30 = vpack.c.bf16 %v14039_v26, %v13709_v41  ;;  %v6414_v63 = vmul.f32 %v6413_v32, %v14487_v35  ;;  %v6500_v42 = vadd.f32 0.014752088, %v6499_v2  ;;  %v7029_v31 = vpack.c.bf16 %v14052_v43, %v13843_v0 }
 0xaf6   : > { %v6465_v15 = vmul.f32 %v6464_v7, %v14541_v48  ;;  %vm6392_vm0 = vweird.f32 %v14533_v10  ;;  %v6398_v9 = vand.u32 2147483648, %v14533_v10  ;;  %v6450_v24 = vmul.f32 %v6449_v51, %v14541_v48 }
 0xaf7   : > { %v14645_v27 = vmul.f32 0.5, %v14528_v54  ;;  %7332 = vmatmul.bf16.gmra.mxu0 %v7028_v30  ;;  %v14647_v57 = vpop.eup %9007  ;;  %v6489_v26 = vadd.f32 0.0036580483, %v6488_v61  ;;  %v6501_v32 = vmul.f32 %v6500_v42, %v14586_v53  ;;  %v6524_v0 = vmul.f32 %v14633_v5, %v14633_v5  ;;  %7381 = vmatmul.bf16.gmra.mxu1 %v7029_v31 }
 0xaf8   : > { %v14649_v41 = vadd.f32 1.0, %v6465_v15  ;;  %v6933_v43 = vadd.f32 1.0, %v8155_v59  ;;  %v6391_v35 = vadd.f32 %v14581_v29, %v6390_v33  ;;  %vm6393_vm2 = vweird.f32 %v14581_v29 }
 0xaf9   : > { %v7030_v54 = vpack.c.bf16 %v14074_v34, %v13886_v19  ;;  %v8156_v55 = vclamps-f32 %v6361_v11, 1.0  ;;  %vm14658_vm3 = vcmp.eq.f32.partialorder %v6396_v17, 8.507059e+37  ;;  %v6415_v56 = vadd.f32 1.1283791, %v6414_v63  ;;  %vm14669_vm4 = vmor %vm6392_vm0, %vm6393_vm2 }
 0xafa   : > { %9009 = vrcp.f32 %v14649_v41  ;;  %v6428_v38 = vmul.f32 %v14647_v57, %v14607_v28  ;;  %v6451_v52 = vadd.f32 0.05243302, %v6450_v24  ;;  %v6502_v12 = vadd.f32 0.112945676, %v6501_v32 }
 0xafb   : > { %v14665_v4 = vmin.f32 %v6524_v0, 16.0  ;;  %7430 = vmatmul.bf16.gmra.mxu2 %v7030_v54  ;;  %v6399_v34 = vor.u32 1.1754944e-38, %v6398_v9  ;;  %v6490_v39 = vmul.f32 %v6489_v26, %v14586_v53  ;;  %v7031_v3 = vpack.c.bf16 %v14104_v14, %v13914_v40 }
 0xafc   : > { %v14677_v44 = vadd.f32 %v4044_v37, %v11498_v1  ;;  %v14680_v17 = vmul.f32 %v6933_v43, %v14454_v20  ;;  %v6395_v10 = vsel %vm14669_vm4, %v14581_v29, %v6391_v35  ;;  %v6503_v51 = vmul.f32 %v6502_v12, %v14586_v53  ;;  %v4093_v20 = vpop.f32.mrf.mxu1 }
 0xafd   : > { %v6526_v59 = vmul.f32 2.1237322e-06, %v14665_v4  ;;  %v6934_v7 = vadd.f32 1.0, %v8156_v55  ;;  %v14688_v61 = vmul.f32 %v6415_v56, %v14470_v25  ;;  %v6537_v40 = vmul.f32 3.8918573e-05, %v14665_v4  ;;  %7479 = vmatmul.bf16.gmra.mxu3 %v7031_v3 }
 0xafe   : > { %v14692_v14 = vmul.f32 0.70710677, %v14677_v44  ;;  %v6429_v2 = vsub.f32 1.0, %v6428_v38  ;;  %v6436_v11 = vand.u32 2147483647, %v14607_v28  ;;  %v6452_v29 = vmul.f32 %v6451_v52, %v14541_v48 }
 0xaff   : > { %v6504_v33 = vadd.f32 0.4994258, %v6503_v51  ;;  %v6400_v63 = vsel %vm14658_vm3, %v6399_v34, %v6395_v10  ;;  %v6491_v25 = vadd.f32 0.05243302, %v6490_v39  ;;  %v6538_v15 = vadd.f32 0.001143296, %v6537_v40 }
 0xb00   : > { %v14696_v30 = vpop.eup %9009  ;;  %v6564_v42 = vmul.f32 %v14692_v14, %v14692_v14  ;;  %v6438_v31 = vand.u32 2147483648, %v14607_v28  ;;  %v6527_v24 = vadd.f32 0.00028619796, %v6526_v59  ;;  %v14706_v26 = vadd.f32 %v4093_v20, %v11500_v18 }
 0xb01   : > { %v6468_v9 = vmul.f32 %v14696_v30, %v14649_v41  ;;  %v14709_v32 = vmul.f32 %v6934_v7, %v14462_v6  ;;  %vm6432_vm1 = vweird.f32 %v14607_v28  ;;  %v6505_v0 = vmul.f32 %v6504_v33, %v14586_v53 }
 0xb02   : > { %v6539_v43 = vmul.f32 %v6538_v15, %v14665_v4  ;;  %v14714_v35 = vmin.f32 %v6564_v42, 16.0  ;;  %v14717_v54 = vmul.f32 %v6400_v63, %v14626_v62  ;;  %v6430_v37 = vmul.f32 %v14647_v57, %v6429_v2 }
 0xb03   : > { %v6453_v55 = vadd.f32 0.18741608, %v6452_v29  ;;  %v6469_v16 = vsub.f32 1.0, %v6468_v9  ;;  %v6492_v56 = vmul.f32 %v6491_v25, %v14586_v53  ;;  %v14721_v38 = vadd.f32 1.0, %v6505_v0 }
 0xb04   : > { %v6540_v6 = vadd.f32 0.014752088, %v6539_v43  ;;  %v7032_v52 = vpack.c.bf16 %v14388_v49, %v14213_v13  ;;  %v6528_v12 = vmul.f32 %v6527_v24, %v14665_v4  ;;  %v6566_v19 = vmul.f32 2.1237322e-06, %v14714_v35 }
 0xb05   : > { %v6577_v34 = vmul.f32 3.8918573e-05, %v14714_v35  ;;  %v14729_v62 = vmul.f32 0.70710677, %v14706_v26  ;;  %vm14731_vm5 = vcmp.eq.f32.partialorder %v6436_v11, 8.507059e+37  ;;  %v6439_v3 = vor.u32 1.1754944e-38, %v6438_v31 }
 0xb06   : > { %v6470_v10 = vmul.f32 %v14696_v30, %v6469_v16  ;;  %9011 = vrcp.f32 %v14721_v38  ;;  %vm6433_vm6 = vweird.f32 %v14647_v57  ;;  %v6454_v13 = vmul.f32 %v6453_v55, %v14541_v48 }
 0xb07   : > { %v6478_v49 = vand.u32 2147483648, %v14649_v41  ;;  %v6541_v51 = vmul.f32 %v6540_v6, %v14665_v4  ;;  %7337 = vmatmul.bf16.gmra.mxu0 %v7032_v52  ;;  %v6431_v59 = vadd.f32 %v14647_v57, %v6430_v37  ;;  %v6493_v7 = vadd.f32 0.18741608, %v6492_v56  ;;  %vm14755_vm8 = vmor %vm6432_vm1, %vm6433_vm6 }
 0xb08   : > { %v6567_v40 = vadd.f32 0.00028619796, %v6566_v19  ;;  %v6578_v20 = vadd.f32 0.001143296, %v6577_v34  ;;  %vm6473_vm7 = vweird.f32 %v14696_v30  ;;  %v6529_v2 = vadd.f32 0.0036580483, %v6528_v12 }
 0xb09   : > { %v6542_v11 = vadd.f32 0.112945676, %v6541_v51  ;;  %v6604_v29 = vmul.f32 %v14729_v62, %v14729_v62  ;;  %v6471_v33 = vadd.f32 %v14696_v30, %v6470_v10  ;;  %v7033_v25 = vpack.c.bf16 %v14459_v58, %v14230_v47 }
 0xb0a   : > { %v6568_v48 = vmul.f32 %v6567_v40, %v14714_v35  ;;  %v6579_v63 = vmul.f32 %v6578_v20, %v14714_v35  ;;  %v8157_v15 = vclamps-f32 %v14717_v54, 1.0  ;;  %v6455_v31 = vadd.f32 1.1283791, %v6454_v13  ;;  %v4191_v40 = vpop.f32.mrf.mxu3 }
 0xb0b   : > { %v6543_v9 = vmul.f32 %v6542_v11, %v14665_v4  ;;  %v14760_v24 = vmin.f32 %v6604_v29, 16.0  ;;  %v6435_v47 = vsel %vm14755_vm8, %v14647_v57, %v6431_v59  ;;  %vm6472_vm9 = vweird.f32 %v14649_v41  ;;  %7386 = vmatmul.bf16.gmra.mxu1 %v7033_v25 }
 0xb0c   : > { %v14762_v0 = vpop.eup %9011  ;;  %v6476_v58 = vand.u32 2147483647, %v14649_v41  ;;  %v6580_v28 = vadd.f32 0.014752088, %v6579_v63  ;;  %vm14771_vm10 = vmor %vm6472_vm9, %vm6473_vm7  ;;  %v6479_v54 = vor.u32 1.1754944e-38, %v6478_v49  ;;  %v6494_v37 = vmul.f32 %v6493_v7, %v14586_v53  ;;  %v4142_v7 = vpop.f32.mrf.mxu2 }
 0xb0d   : > { %v6508_v55 = vmul.f32 %v14762_v0, %v14721_v38  ;;  %v6530_v57 = vmul.f32 %v6529_v2, %v14665_v4  ;;  %v6475_v41 = vsel %vm14771_vm10, %v14696_v30, %v6471_v33  ;;  %v6544_v16 = vadd.f32 0.4994258, %v6543_v9 }
 0xb0e   : > { %v6569_v56 = vadd.f32 0.0036580483, %v6568_v48  ;;  %v6581_v6 = vmul.f32 %v6580_v28, %v14714_v35  ;;  %v6440_v52 = vsel %vm14731_vm5, %v6439_v3, %v6435_v47  ;;  %v6606_v19 = vmul.f32 2.1237322e-06, %v14760_v24 }
 0xb0f   : > { %v6509_v12 = vsub.f32 1.0, %v6508_v55  ;;  %v6617_v53 = vmul.f32 3.8918573e-05, %v14760_v24  ;;  %v6456_v34 = vmul.f32 %v6455_v31, %v14503_v23  ;;  %vm6477_vm11 = vcmp.eq.f32.partialorder %v6476_v58, 8.507059e+37 }
 0xb10   : > { %v6545_v10 = vmul.f32 %v6544_v16, %v14665_v4  ;;  %v6582_v13 = vadd.f32 0.112945676, %v6581_v6  ;;  %v6480_v49 = vsel %vm6477_vm11, %v6479_v54, %v6475_v41  ;;  %v6531_v51 = vadd.f32 0.05243302, %v6530_v57 }
 0xb11   : > { %v6510_v30 = vmul.f32 %v14762_v0, %v6509_v12  ;;  %v6618_v59 = vadd.f32 0.001143296, %v6617_v53  ;;  %v6441_v39 = vmul.f32 %v6440_v52, %v14688_v61  ;;  %v6570_v20 = vmul.f32 %v6569_v56, %v14714_v35 }
 0xb12   : > { %v14791_v3 = vadd.f32 1.0, %v6545_v10  ;;  %v6583_v2 = vmul.f32 %v6582_v13, %v14714_v35  ;;  %v6495_v23 = vadd.f32 1.1283791, %v6494_v37  ;;  %v6518_v11 = vand.u32 2147483648, %v14721_v38 }
 0xb13   : > { %v6607_v29 = vadd.f32 0.00028619796, %v6606_v19  ;;  %v6619_v33 = vmul.f32 %v6618_v59, %v14760_v24  ;;  %v6481_v48 = vmul.f32 %v6480_v49, %v6456_v34  ;;  %v14799_v63 = vadd.f32 %v4142_v7, %v15660_v45 }
 0xb14   : > { %9013 = vrcp.f32 %v14791_v3  ;;  %v14802_v61 = vadd.f32 %v4191_v40, %v15661_v36  ;;  %v6511_v25 = vadd.f32 %v14762_v0, %v6510_v30  ;;  %vm6513_vm12 = vweird.f32 %v14762_v0 }
 0xb15   : > { %v6532_v42 = vmul.f32 %v6531_v51, %v14665_v4  ;;  %v6584_v31 = vadd.f32 0.4994258, %v6583_v2  ;;  %v6935_v9 = vadd.f32 1.0, %v8157_v15  ;;  %v8158_v47 = vclamps-f32 %v6441_v39, 1.0 }
 0xb16   : > { %15744 = vst [vmem:[#allocation42_spill] sm:$0xff] %v14802_v61  ;;  %v6571_v58 = vadd.f32 0.05243302, %v6570_v20  ;;  %v6620_v28 = vadd.f32 0.014752088, %v6619_v33  ;;  %vm6512_vm13 = vweird.f32 %v14721_v38  ;;  %v6608_v37 = vmul.f32 %v6607_v29, %v14760_v24 }
 0xb17   : > { %v6516_v43 = vand.u32 2147483647, %v14721_v38  ;;  %v6585_v54 = vmul.f32 %v6584_v31, %v14714_v35  ;;  %v8159_v55 = vclamps-f32 %v6481_v48, 1.0  ;;  %vm14811_vm14 = vmor %vm6512_vm13, %vm6513_vm12  ;;  %v14817_v15 = vmul.f32 0.70710677, %v14799_v63 }
 0xb18   : > { %v6621_v41 = vmul.f32 %v6620_v28, %v14760_v24  ;;  %v14820_v16 = vmul.f32 0.70710677, %v14802_v61  ;;  %v6515_v38 = vsel %vm14811_vm14, %v14762_v0, %v6511_v25  ;;  %v6519_v56 = vor.u32 1.1754944e-38, %v6518_v11 }
 0xb19   : > { %v6533_v6 = vadd.f32 0.18741608, %v6532_v42  ;;  %v14825_v52 = vadd.f32 1.0, %v6585_v54  ;;  %v6572_v19 = vmul.f32 %v6571_v58, %v14714_v35  ;;  %v6644_v34 = vmul.f32 %v14817_v15, %v14817_v15 }
 0xb1a   : > { %v14827_v12 = vpop.eup %9013  ;;  %v6622_v53 = vadd.f32 0.112945676, %v6621_v41  ;;  %v6684_v10 = vmul.f32 %v14820_v16, %v14820_v16  ;;  %v6936_v13 = vadd.f32 1.0, %v8158_v47  ;;  %vm6517_vm15 = vcmp.eq.f32.partialorder %v6516_v43, 8.507059e+37  ;;  %v15747_v43 = vld [vmem:[#allocation53_spill] sm:$0xff] }
 0xb1b   : > { %v14835_v49 = vmul.f32 0.5, %v14618_v50  ;;  %v6609_v0 = vadd.f32 0.0036580483, %v6608_v37  ;;  %v6937_v30 = vadd.f32 1.0, %v8159_v55  ;;  %v6520_v51 = vsel %vm6517_vm15, %v6519_v56, %v6515_v38  ;;  %v4046_v38 = vpop.f32.mrf.mxu0 }
 0xb1c   : > { %v6548_v59 = vmul.f32 %v14827_v12, %v14791_v3  ;;  %9015 = vrcp.f32 %v14825_v52  ;;  %v14841_v7 = vmul.f32 %v6935_v9, %v14467_v46  ;;  %v6496_v40 = vmul.f32 %v6495_v23, %v14552_v21 }
 0xb1d   : > { %v6534_v39 = vmul.f32 %v6533_v6, %v14665_v4  ;;  %v6623_v20 = vmul.f32 %v6622_v53, %v14760_v24  ;;  %v14847_v50 = vmul.f32 0.5, %v14677_v44  ;;  %v6573_v2 = vadd.f32 0.18741608, %v6572_v19 }
 0xb1e   : > { %v14849_v11 = vmin.f32 %v6644_v34, 16.0  ;;  %v14851_v29 = vmin.f32 %v6684_v10, 16.0  ;;  %v6521_v33 = vmul.f32 %v6520_v51, %v6496_v40  ;;  %v14854_v48 = vmul.f32 0.5, %v14706_v26 }
 0xb1f   : > { %v6610_v46 = vmul.f32 %v6609_v0, %v14760_v24  ;;  %v6624_v25 = vadd.f32 0.4994258, %v6623_v20  ;;  %v14858_v21 = vmul.f32 %v6936_v13, %v14539_v8  ;;  %v14861_v4 = vmul.f32 %v6937_v30, %v14610_v60  ;;  %v15748_v60 = vld [vmem:[#allocation54_spill] sm:$0xff]  ;;  %v4095_v0 = vpop.f32.mrf.mxu1 }
 0xb20   : > { %v6549_v44 = vsub.f32 1.0, %v6548_v59  ;;  %v6657_v23 = vmul.f32 3.8918573e-05, %v14849_v11  ;;  %v6535_v42 = vadd.f32 1.1283791, %v6534_v39  ;;  %v6574_v8 = vmul.f32 %v6573_v2, %v14714_v35 }
 0xb21   : > { %v6625_v31 = vmul.f32 %v6624_v25, %v14760_v24  ;;  %v6646_v9 = vmul.f32 2.1237322e-06, %v14849_v11  ;;  %v6686_v26 = vmul.f32 2.1237322e-06, %v14851_v29  ;;  %v6556_v58 = vand.u32 2147483647, %v14791_v3 }
 0xb22   : > { %v14867_v47 = vpop.eup %9015  ;;  %v6658_v28 = vadd.f32 0.001143296, %v6657_v23  ;;  %v7034_v54 = vpack.c.bf16 %v15748_v60, %v15747_v43  ;;  %v8160_v37 = vclamps-f32 %v6521_v33, 1.0  ;;  %v6558_v55 = vand.u32 2147483648, %v14791_v3 }
 0xb23   : > { %v6588_v57 = vmul.f32 %v14867_v47, %v14825_v52  ;;  %v6611_v41 = vadd.f32 0.05243302, %v6610_v46  ;;  %v6550_v56 = vmul.f32 %v14827_v12, %v6549_v44  ;;  %v14877_v6 = vadd.f32 1.0, %v6625_v31 }
 0xb24   : > { %v6659_v19 = vmul.f32 %v6658_v28, %v14849_v11  ;;  %v6697_v35 = vmul.f32 3.8918573e-05, %v14851_v29  ;;  %7435 = vmatmul.bf16.gmra.mxu2 %v7034_v54  ;;  %v14882_v53 = vmul.f32 %v6535_v42, %v14633_v5  ;;  %v6647_v10 = vadd.f32 0.00028619796, %v6646_v9 }
 0xb25   : > { %v6589_v34 = vsub.f32 1.0, %v6588_v57  ;;  %v6687_v13 = vadd.f32 0.00028619796, %v6686_v26  ;;  %vm6552_vm0 = vweird.f32 %v14791_v3  ;;  %v6575_v30 = vadd.f32 1.1283791, %v6574_v8 }
 0xb26   : > { %9017 = vrcp.f32 %v14877_v6  ;;  %v14887_v51 = vadd.f32 %v4046_v38, %v11498_v1  ;;  %vm14889_vm2 = vcmp.eq.f32.partialorder %v6556_v58, 8.507059e+37  ;;  %v6559_v40 = vor.u32 1.1754944e-38, %v6558_v55 }
 0xb27   : > { %v6612_v5 = vmul.f32 %v6611_v41, %v14760_v24  ;;  %v6660_v39 = vadd.f32 0.014752088, %v6659_v19  ;;  %v14894_v20 = vadd.f32 1.0, %v8160_v37  ;;  %v6551_v2 = vadd.f32 %v14827_v12, %v6550_v56 }
 0xb28   : > { %vm6553_vm3 = vweird.f32 %v14827_v12  ;;  %v6698_v33 = vadd.f32 0.001143296, %v6697_v35  ;;  %v6590_v46 = vmul.f32 %v14867_v47, %v6589_v34  ;;  %v6648_v1 = vmul.f32 %v6647_v10, %v14849_v11 }
 0xb29   : > { %v6661_v25 = vmul.f32 %v6660_v39, %v14849_v11  ;;  %v6688_v44 = vmul.f32 %v6687_v13, %v14851_v29  ;;  %v6576_v23 = vmul.f32 %v6575_v30, %v14692_v14  ;;  %vm6592_vm4 = vweird.f32 %v14825_v52  ;;  %vm14910_vm1 = vmor %vm6552_vm0, %vm6553_vm3  ;;  %v14918_v14 = vpop.f32.mrf.mxu2  ;;  %v14939_v13 = vpop.f32.mrf.mxu0 }
 0xb2a   : > { %v6699_v42 = vmul.f32 %v6698_v33, %v14851_v29  ;;  %v14906_v31 = vmul.f32 0.70710677, %v14887_v51  ;;  %v6598_v26 = vand.u32 2147483648, %v14825_v52  ;;  %v6613_v58 = vadd.f32 0.18741608, %v6612_v5 }
 0xb2b   : > { %v6662_v8 = vadd.f32 0.112945676, %v6661_v25  ;;  %v14916_v28 = vadd.f32 %v4095_v0, %v11500_v18  ;;  %v6555_v60 = vsel %vm14910_vm1, %v14827_v12, %v6551_v2  ;;  %vm6593_vm5 = vweird.f32 %v14867_v47  ;;  %v14941_v0 = vpop.f32.mrf.mxu1 }
 0xb2c   : > { %v14920_v43 = vpop.eup %9017  ;;  %v6700_v3 = vadd.f32 0.014752088, %v6699_v42  ;;  %v6724_v54 = vmul.f32 %v14906_v31, %v14906_v31  ;;  %v6591_v37 = vadd.f32 %v14867_v47, %v6590_v46  ;;  %v6649_v55 = vadd.f32 0.0036580483, %v6648_v1  ;;  %vm14947_vm6 = vmor %vm6592_vm4, %vm6593_vm5 }
 0xb2d   : > { %v6628_v18 = vmul.f32 %v14920_v43, %v14877_v6  ;;  %v6689_v57 = vadd.f32 0.0036580483, %v6688_v44  ;;  %v6596_v41 = vand.u32 2147483647, %v14825_v52  ;;  %v6663_v38 = vmul.f32 %v6662_v8, %v14849_v11 }
 0xb2e   : > { %v6701_v56 = vmul.f32 %v6700_v3, %v14851_v29  ;;  %v14934_v12 = vmin.f32 %v6724_v54, 16.0  ;;  %v6560_v19 = vsel %vm14889_vm2, %v6559_v40, %v6555_v60  ;;  %v6599_v35 = vor.u32 1.1754944e-38, %v6598_v26  ;;  %v15755_v40 = vld [vmem:[#allocation49_spill] sm:$0xff] }
 0xb2f   : > { %v6614_v34 = vmul.f32 %v6613_v58, %v14760_v24  ;;  %v6629_v10 = vsub.f32 1.0, %v6628_v18  ;;  %v6664_v5 = vadd.f32 0.4994258, %v6663_v38  ;;  %v14952_v59 = vmul.f32 0.70710677, %v14916_v28  ;;  %v15756_v24 = vld [vmem:[#allocation50_spill] sm:$0xff] }
 0xb30   : > { %v6702_v39 = vadd.f32 0.112945676, %v6701_v56  ;;  %v7035_v2 = vpack.c.bf16 %v15756_v24, %v15755_v40  ;;  %v6595_v33 = vsel %vm14947_vm6, %v14867_v47, %v6591_v37  ;;  %v6650_v46 = vmul.f32 %v6649_v55, %v14849_v11  ;;  %v14971_v37 = vpop.f32.mrf.mxu3 }
 0xb31   : > { %v6690_v52 = vmul.f32 %v6689_v57, %v14851_v29  ;;  %v6726_v1 = vmul.f32 2.1237322e-06, %v14934_v12  ;;  %v6630_v25 = vmul.f32 %v14920_v43, %v6629_v10  ;;  %v6665_v44 = vmul.f32 %v6664_v5, %v14849_v11  ;;  %v14974_v56 = vpop.f32.mrf.mxu2  ;;  %v14986_v10 = vpop.f32.mrf.mxu0 }
 0xb32   : > { %v6703_v42 = vmul.f32 %v6702_v39, %v14851_v29  ;;  %v6737_v9 = vmul.f32 3.8918573e-05, %v14934_v12  ;;  %7484 = vmatmul.bf16.gmra.mxu3 %v7035_v2  ;;  %v6561_v26 = vmul.f32 %v6560_v19, %v14882_v53  ;;  %vm6597_vm7 = vcmp.eq.f32.partialorder %v6596_v41, 8.507059e+37 }
 0xb33   : > { %v6615_v58 = vadd.f32 1.1283791, %v6614_v34  ;;  %v6727_v47 = vadd.f32 0.00028619796, %v6726_v1  ;;  %v6600_v8 = vsel %vm6597_vm7, %v6599_v35, %v6595_v33  ;;  %v14967_v60 = vadd.f32 1.0, %v6665_v44  ;;  %v14988_v30 = vpop.f32.mrf.mxu1 }
 0xb34   : > { %v6704_v3 = vadd.f32 0.4994258, %v6703_v42  ;;  %v6764_v54 = vmul.f32 %v14952_v59, %v14952_v59  ;;  %v6651_v18 = vadd.f32 0.05243302, %v6650_v46  ;;  %v6691_v55 = vadd.f32 0.05243302, %v6690_v52 }
 0xb35   : > { %v6728_v57 = vmul.f32 %v6727_v47, %v14934_v12  ;;  %v6738_v38 = vadd.f32 0.001143296, %v6737_v9  ;;  %v14978_v53 = vmul.f32 %v14894_v20, %v14645_v27  ;;  %v6631_v41 = vadd.f32 %v14920_v43, %v6630_v25 }
 0xb36   : > { %vm6633_vm8 = vweird.f32 %v14920_v43  ;;  %9019 = vrcp.f32 %v14967_v60  ;;  %v6601_v19 = vmul.f32 %v6600_v8, %v6576_v23  ;;  %vm6632_vm9 = vweird.f32 %v14877_v6 }
 0xb37   : > { %v6636_v35 = vand.u32 2147483647, %v14877_v6  ;;  %v6638_v34 = vand.u32 2147483648, %v14877_v6  ;;  %v6705_v27 = vmul.f32 %v6704_v3, %v14851_v29  ;;  %v6729_v20 = vadd.f32 0.0036580483, %v6728_v57  ;;  %vm14995_vm10 = vmor %vm6632_vm9, %vm6633_vm8 }
 0xb38   : > { %v6739_v5 = vmul.f32 %v6738_v38, %v14934_v12  ;;  %v14992_v39 = vmin.f32 %v6764_v54, 16.0  ;;  %v8161_v40 = vclamps-f32 %v6561_v26, 1.0  ;;  %v6616_v23 = vmul.f32 %v6615_v58, %v14729_v62  ;;  %v15021_v38 = vpop.f32.mrf.mxu3 }
 0xb39   : > { %v6652_v6 = vmul.f32 %v6651_v18, %v14849_v11  ;;  %v6692_v2 = vmul.f32 %v6691_v55, %v14851_v29  ;;  %v6635_v33 = vsel %vm14995_vm10, %v14920_v43, %v6631_v41  ;;  %v6730_v46 = vmul.f32 %v6729_v20, %v14934_v12  ;;  %v15018_v18 = vpop.f32.mrf.mxu2 }
 0xb3a   : > { %v6740_v52 = vadd.f32 0.014752088, %v6739_v5  ;;  %v6766_v1 = vmul.f32 2.1237322e-06, %v14992_v39  ;;  %v8162_v25 = vclamps-f32 %v6601_v19, 1.0  ;;  %v6639_v44 = vor.u32 1.1754944e-38, %v6638_v34 }
 0xb3b   : > { %v6777_v62 = vmul.f32 3.8918573e-05, %v14992_v39  ;;  %v15009_v42 = vadd.f32 %v14918_v14, %v15660_v45  ;;  %vm6637_vm11 = vcmp.eq.f32.partialorder %v6636_v35, 8.507059e+37  ;;  %v15013_v26 = vadd.f32 1.0, %v6705_v27  ;;  %v15026_v27 = vpop.f32.mrf.mxu0  ;;  %v15028_v20 = vpop.f32.mrf.mxu1 }
 0xb3c   : > { %v15011_v9 = vpop.eup %9019  ;;  %v6741_v43 = vmul.f32 %v6740_v52, %v14934_v12  ;;  %v6767_v58 = vadd.f32 0.00028619796, %v6766_v1  ;;  %v6939_v47 = vadd.f32 1.0, %v8161_v40  ;;  %v6640_v8 = vsel %vm6637_vm11, %v6639_v44, %v6635_v33 }
 0xb3d   : > { %v6653_v3 = vadd.f32 0.18741608, %v6652_v6  ;;  %v6668_v54 = vmul.f32 %v15011_v9, %v14967_v60  ;;  %v6693_v55 = vadd.f32 0.18741608, %v6692_v2  ;;  %v6731_v57 = vadd.f32 0.05243302, %v6730_v46 }
 0xb3e   : > { %v6742_v45 = vadd.f32 0.112945676, %v6741_v43  ;;  %v6768_v14 = vmul.f32 %v6767_v58, %v14992_v39  ;;  %v6940_v41 = vadd.f32 1.0, %v8162_v25  ;;  %v6778_v35 = vadd.f32 0.001143296, %v6777_v62 }
 0xb3f   : > { %v6669_v19 = vsub.f32 1.0, %v6668_v54  ;;  %v15024_v34 = vmul.f32 0.70710677, %v15009_v42  ;;  %v6641_v5 = vmul.f32 %v6640_v8, %v6616_v23  ;;  %9021 = vrcp.f32 %v15013_v26  ;;  %v15055_v8 = vld [vmem:[#allocation17] ss:$0 sm:$0xff] }
 0xb40   : > { %v6743_v40 = vmul.f32 %v6742_v45, %v14934_v12  ;;  %v6769_v24 = vadd.f32 0.0036580483, %v6768_v14  ;;  %v6654_v6 = vmul.f32 %v6653_v3, %v14849_v11  ;;  %v15034_v2 = vmul.f32 0.5, %v14887_v51 }
 0xb41   : > { %v6779_v33 = vmul.f32 %v6778_v35, %v14992_v39  ;;  %v6804_v46 = vmul.f32 %v15024_v34, %v15024_v34  ;;  %v15040_v52 = vmul.f32 %v6939_v47, %v14835_v49  ;;  %v6732_v23 = vmul.f32 %v6731_v57, %v14934_v12  ;;  %v15059_v45 = vpop.f32.mrf.mxu2 }
 0xb42   : > { %v6744_v1 = vadd.f32 0.4994258, %v6743_v40  ;;  %v15044_v25 = vmul.f32 0.5, %v14916_v28  ;;  %v6670_v44 = vmul.f32 %v15011_v9, %v6669_v19  ;;  %v6770_v11 = vmul.f32 %v6769_v24, %v14992_v39 }
 0xb43   : > { %v6780_v51 = vadd.f32 0.014752088, %v6779_v33  ;;  %v15048_v62 = vmin.f32 %v6804_v46, 16.0  ;;  %v15051_v43 = vmul.f32 %v6940_v41, %v14847_v50  ;;  %v8163_v58 = vclamps-f32 %v6641_v5, 1.0  ;;  %v15069_v40 = vpop.f32.mrf.mxu0  ;;  %v15071_v24 = vpop.f32.mrf.mxu1 }
 0xb44   : > { %v6694_v49 = vmul.f32 %v6693_v55, %v14851_v29  ;;  %v6745_v47 = vmul.f32 %v6744_v1, %v14934_v12  ;;  %v6655_v3 = vadd.f32 1.1283791, %v6654_v6  ;;  %v6771_v28 = vadd.f32 0.05243302, %v6770_v11  ;;  %v15085_v11 = vpop.f32.mrf.mxu3 }
 0xb45   : > { %v6781_v54 = vmul.f32 %v6780_v51, %v14992_v39  ;;  %v6806_v57 = vmul.f32 2.1237322e-06, %v15048_v62  ;;  %v15061_v14 = vpop.eup %9021  ;;  %v6676_v50 = vand.u32 2147483647, %v14967_v60  ;;  %v6678_v41 = vand.u32 2147483648, %v14967_v60 }
 0xb46   : > { %v6733_v19 = vadd.f32 0.18741608, %v6732_v23  ;;  %v15065_v29 = vadd.f32 1.0, %v6745_v47  ;;  %v6671_v55 = vadd.f32 %v15011_v9, %v6670_v44  ;;  %vm6673_vm12 = vweird.f32 %v15011_v9 }
 0xb47   : > { %v6782_v35 = vadd.f32 0.112945676, %v6781_v54  ;;  %v6807_v5 = vadd.f32 0.00028619796, %v6806_v57  ;;  %v6941_v6 = vadd.f32 1.0, %v8163_v58  ;;  %vm6672_vm13 = vweird.f32 %v14967_v60 }
 0xb48   : > { %9023 = vrcp.f32 %v15065_v29  ;;  %v6772_v33 = vmul.f32 %v6771_v28, %v14992_v39  ;;  %v6708_v46 = vmul.f32 %v15061_v14, %v15013_v26  ;;  %v15081_v1 = vadd.f32 %v14971_v37, %v15661_v36  ;;  %vm15087_vm14 = vmor %vm6672_vm13, %vm6673_vm12 }
 0xb49   : > { %v6783_v23 = vmul.f32 %v6782_v35, %v14992_v39  ;;  %v7314_v44 = vadd.f32 %v15055_v8, %v14939_v13  ;;  %vm15091_vm15 = vcmp.eq.f32.partialorder %v6676_v50, 8.507059e+37  ;;  %v15095_v58 = vadd.f32 1.1283791, %v6694_v49 }
 0xb4a   : > { %v6734_v47 = vmul.f32 %v6733_v19, %v14934_v12  ;;  %v6817_v36 = vmul.f32 3.8918573e-05, %v15048_v62  ;;  %v6675_v13 = vsel %vm15087_vm14, %v15011_v9, %v6671_v55  ;;  %v6679_v37 = vor.u32 1.1754944e-38, %v6678_v41  ;;  %v15114_v41 = vpop.f32.mrf.mxu2 }
 0xb4b   : > { %v6808_v54 = vmul.f32 %v6807_v5, %v15048_v62  ;;  %v15105_v57 = vmul.f32 %v6655_v3, %v14817_v15  ;;  %v6773_v50 = vadd.f32 0.18741608, %v6772_v33  ;;  %v6784_v35 = vadd.f32 0.4994258, %v6783_v23  ;;  %v15126_v23 = vpop.f32.mrf.mxu0 }
 0xb4c   : > { %v6818_v49 = vadd.f32 0.001143296, %v6817_v36  ;;  %v15108_v61 = vmul.f32 %v6941_v6, %v14854_v48  ;;  %v6709_v12 = vsub.f32 1.0, %v6708_v46  ;;  %v15111_v19 = vmul.f32 0.70710677, %v15081_v1 }
 0xb4d   : > { %v7363_v9 = vadd.f32 %v14941_v0, %v7314_v44  ;;  %v15118_v5 = vsel %vm15091_vm15, %v6679_v37, %v6675_v13  ;;  %v6735_v15 = vadd.f32 1.1283791, %v6734_v47  ;;  %v6785_v3 = vmul.f32 %v6784_v35, %v14992_v39  ;;  %v15128_v44 = vpop.f32.mrf.mxu1 }
 0xb4e   : > { %v9024_v55 = vpop.eup %9023  ;;  %v6819_v33 = vmul.f32 %v6818_v49, %v15048_v62  ;;  %v6756_v6 = vand.u32 2147483647, %v15065_v29  ;;  %v6809_v46 = vadd.f32 0.0036580483, %v6808_v54  ;;  %v6844_v0 = vmul.f32 %v15111_v19, %v15111_v19 }
 0xb4f   : > { %v6748_v48 = vmul.f32 %v9024_v55, %v15065_v29  ;;  %v6758_v60 = vand.u32 2147483648, %v15065_v29  ;;  %v6774_v51 = vmul.f32 %v6773_v50, %v14992_v39  ;;  %v15132_v47 = vadd.f32 1.0, %v6785_v3 }
 0xb50   : > { %v6820_v36 = vadd.f32 0.014752088, %v6819_v33  ;;  %v15134_v37 = vmin.f32 %v6844_v0, 16.0  ;;  %v7036_v54 = vpack.c.bf16 %v14858_v21, %v14623_v22  ;;  %v7037_v35 = vpack.c.bf16 %v14861_v4, %v14680_v17  ;;  %v15148_v22 = vpop.f32.mrf.mxu3 }
 0xb51   : > { %v6749_v13 = vsub.f32 1.0, %v6748_v48  ;;  %v15141_v49 = vmul.f32 %v15061_v14, %v6709_v12  ;;  %v6736_v28 = vmul.f32 %v6735_v15, %v14906_v31  ;;  %vm6752_vm0 = vweird.f32 %v15065_v29 }
 0xb52   : > { %9025 = vrcp.f32 %v15132_v47  ;;  %vm6753_vm2 = vweird.f32 %v9024_v55  ;;  %v6810_v50 = vmul.f32 %v6809_v46, %v15048_v62  ;;  %v6821_v3 = vmul.f32 %v6820_v36, %v15048_v62  ;;  %7342 = vmatmul.bf16.gmra.mxu0 %v7036_v54  ;;  %7391 = vmatmul.bf16.gmra.mxu1 %v7037_v35  ;;  %v15159_v46 = vpop.f32.mrf.mxu2 }
 0xb53   : > { %v6750_v39 = vmul.f32 %v9024_v55, %v6749_v13  ;;  %vm15150_vm3 = vcmp.eq.f32.partialorder %v6756_v6, 8.507059e+37  ;;  %v6846_v21 = vmul.f32 2.1237322e-06, %v15134_v37  ;;  %v6857_v4 = vmul.f32 3.8918573e-05, %v15134_v37  ;;  %vm6754_vm4 = vmor %vm6752_vm0, %vm6753_vm2  ;;  %v7325_v54 = vpop.f32.mrf.mxu0 }
 0xb54   : > { %v15157_v31 = vadd.f32 %v14974_v56, %v7363_v9  ;;  %v6759_v15 = vor.u32 1.1754944e-38, %v6758_v60  ;;  %v6775_v33 = vadd.f32 1.1283791, %v6774_v51  ;;  %v6822_v48 = vadd.f32 0.112945676, %v6821_v3 }
 0xb55   : > { %v6751_v12 = vadd.f32 %v9024_v55, %v6750_v39  ;;  %v6847_v6 = vadd.f32 0.00028619796, %v6846_v21  ;;  %v6858_v0 = vadd.f32 0.001143296, %v6857_v4  ;;  %v7316_v36 = vadd.f32 %v15055_v8, %v14986_v10  ;;  %v15171_v35 = vpop.f32.mrf.mxu1 }
 0xb56   : > { %v7038_v13 = vpack.c.bf16 %v14978_v53, %v14709_v32  ;;  %v6811_v9 = vadd.f32 0.05243302, %v6810_v50  ;;  %v6823_v60 = vmul.f32 %v6822_v48, %v15048_v62  ;;  %v7039_v51 = vpack.c.bf16 %v15040_v52, %v14841_v7 }
 0xb57   : > { %v6755_v56 = vsel %vm6754_vm4, %v9024_v55, %v6751_v12  ;;  %v6848_v3 = vmul.f32 %v6847_v6, %v15134_v37  ;;  %v6859_v10 = vmul.f32 %v6858_v0, %v15134_v37  ;;  %v7365_v32 = vadd.f32 %v14988_v30, %v7316_v36 }
 0xb58   : > { %v9026_v29 = vpop.eup %9025  ;;  %v6760_v39 = vsel %vm15150_vm3, %v6759_v15, %v6755_v56  ;;  %7440 = vmatmul.bf16.gmra.mxu2 %v7038_v13  ;;  %v6776_v55 = vmul.f32 %v6775_v33, %v14952_v59  ;;  %v6796_v7 = vand.u32 2147483647, %v15132_v47  ;;  %7489 = vmatmul.bf16.gmra.mxu3 %v7039_v51  ;;  %v6798_v52 = vand.u32 2147483648, %v15132_v47  ;;  %v15193_v13 = vpop.f32.mrf.mxu3 }
 0xb59   : > { %v6761_v53 = vmul.f32 %v6760_v39, %v6736_v28  ;;  %v6788_v50 = vmul.f32 %v9026_v29, %v15132_v47  ;;  %v6824_v21 = vadd.f32 0.4994258, %v6823_v60  ;;  %v6860_v17 = vadd.f32 0.014752088, %v6859_v10  ;;  %v15769_v39 = vld [vmem:[#allocation27_spill] sm:$0xff] }
 0xb5a   : > { %v15183_v4 = vadd.f32 %v15018_v18, %v7365_v32  ;;  %v6849_v48 = vadd.f32 0.0036580483, %v6848_v3  ;;  %v7319_v30 = vadd.f32 %v15055_v8, %v15026_v27  ;;  %v6812_v59 = vmul.f32 %v6811_v9, %v15048_v62  ;;  %v7423_v56 = vpop.f32.mrf.mxu2 }
 0xb5b   : > { %v8166_v12 = vclamps-f32 %v6761_v53, 1.0  ;;  %v6789_v15 = vsub.f32 1.0, %v6788_v50  ;;  %v6825_v28 = vmul.f32 %v6824_v21, %v15048_v62  ;;  %v6861_v33 = vmul.f32 %v6860_v17, %v15134_v37  ;;  %v7328_v3 = vpop.f32.mrf.mxu0 }
 0xb5c   : > { %v7321_v6 = vadd.f32 %v15055_v8, %v15069_v40  ;;  %vm6793_vm1 = vweird.f32 %v9026_v29  ;;  %v7368_v18 = vadd.f32 %v15028_v20, %v7319_v30  ;;  %vm6792_vm5 = vweird.f32 %v15132_v47 }
 0xb5d   : > { %v6944_v0 = vadd.f32 1.0, %v8166_v12  ;;  %v6790_v36 = vmul.f32 %v9026_v29, %v6789_v15  ;;  %v15196_v27 = vadd.f32 1.0, %v6825_v28  ;;  %v6862_v9 = vadd.f32 0.112945676, %v6861_v33  ;;  %vm6794_vm7 = vmor %vm6792_vm5, %vm6793_vm1  ;;  %v7377_v21 = vpop.f32.mrf.mxu1  ;;  %v15767_v15 = vld [vmem:[#allocation32_spill] sm:$0xff]  ;;  %v15768_v33 = vld [vmem:[#allocation26_spill] sm:$0xff] }
 0xb5e   : > { %v7324_v60 = vadd.f32 %v15055_v8, %v15126_v23  ;;  %vm15200_vm6 = vcmp.eq.f32.partialorder %v6796_v7, 8.507059e+37  ;;  %v6850_v40 = vmul.f32 %v6849_v48, %v15134_v37  ;;  %v7417_v20 = vadd.f32 %v15059_v45, %v7368_v18 }
 0xb5f   : > { %v6791_v51 = vadd.f32 %v9026_v29, %v6790_v36  ;;  %v6799_v10 = vor.u32 1.1754944e-38, %v6798_v52  ;;  %v6813_v32 = vadd.f32 0.18741608, %v6812_v59  ;;  %9027 = vrcp.f32 %v15196_v27 }
 0xb60   : > { %v7370_v47 = vadd.f32 %v15071_v24, %v7321_v6  ;;  %v7008_v53 = vmul.f32 %v6944_v0, %v15034_v2  ;;  %v6863_v50 = vmul.f32 %v6862_v9, %v15134_v37  ;;  %v7466_v7 = vadd.f32 %v15021_v38, %v7417_v20 }
 0xb61   : > { %v6795_v23 = vsel %vm6794_vm7, %v9026_v29, %v6791_v51  ;;  %v15213_v17 = vmul.f32 %v15118_v5, %v15105_v57  ;;  %vm6713_vm8 = vweird.f32 %v15061_v14  ;;  %v7373_v2 = vadd.f32 %v15128_v44, %v7324_v60  ;;  %v7475_v44 = vpop.f32.mrf.mxu3 }
 0xb62   : > { %v6800_v45 = vsel %vm15200_vm6, %v6799_v10, %v6795_v23  ;;  %v7419_v24 = vadd.f32 %v15114_v41, %v7370_v47  ;;  %v6851_v52 = vadd.f32 0.05243302, %v6850_v40  ;;  %v6864_v12 = vadd.f32 0.4994258, %v6863_v50 }
 0xb63   : > { %v6801_v29 = vmul.f32 %v6800_v45, %v6776_v55  ;;  %v7502_v38 = vadd.f32 %v7466_v7, %v15767_v15  ;;  %v7422_v57 = vadd.f32 %v15159_v46, %v7373_v2  ;;  %v7326_v5 = vadd.f32 %v15055_v8, %v7325_v54  ;;  %v7426_v55 = vpop.f32.mrf.mxu2 }
 0xb64   : > { %v7468_v48 = vadd.f32 %v15085_v11, %v7419_v24  ;;  %v7329_v30 = vadd.f32 %v15055_v8, %v7328_v3  ;;  %v6814_v28 = vmul.f32 %v6813_v32, %v15048_v62  ;;  %v6865_v41 = vmul.f32 %v6864_v12, %v15134_v37 }
 0xb65   : > { %v8167_v59 = vclamps-f32 %v6801_v29, 1.0  ;;  %7518 = vst [vmem:[%s15229_s30 + $0x10] sm:$0xff] %v7502_v38  ;;  %v7040_v11 = vpack.c.bf16 %v7008_v53, %v15051_v43  ;;  %v9028_v46 = vpop.eup %9027  ;;  %v7471_v6 = vadd.f32 %v15148_v22, %v7422_v57  ;;  %v7375_v0 = vadd.f32 %v15171_v35, %v7326_v5  ;;  %v7330_v43 = vpop.f32.mrf.mxu0  ;;  %v15773_v29 = vld [vmem:[#allocation28_spill] sm:$0xff] }
 0xb66   : > { %v7503_v54 = vadd.f32 %v7468_v48, %v15768_v33  ;;  %v7378_v62 = vadd.f32 %v7377_v21, %v7329_v30  ;;  %v6711_v36 = vadd.f32 %v15061_v14, %v15141_v49  ;;  %v6828_v9 = vmul.f32 %v9028_v46, %v15196_v27  ;;  %v7379_v7 = vpop.f32.mrf.mxu1 }
 0xb67   : > { %v6945_v18 = vadd.f32 1.0, %v8167_v59  ;;  %v6852_v60 = vmul.f32 %v6851_v52, %v15134_v37  ;;  %7347 = vmatmul.bf16.gmra.mxu0 %v7040_v11  ;;  %v15240_v51 = vadd.f32 1.0, %v6865_v41  ;;  %v7504_v40 = vadd.f32 %v7471_v6, %v15769_v39 }
 0xb68   : > { %7519 = vst [vmem:[%s15229_s30 + $0x18] sm:$0xff] %v7503_v54  ;;  %v7424_v22 = vadd.f32 %v7423_v56, %v7375_v0  ;;  %v7427_v20 = vadd.f32 %v7426_v55, %v7378_v62  ;;  %v6815_v3 = vadd.f32 1.1283791, %v6814_v28  ;;  %v6829_v10 = vsub.f32 1.0, %v6828_v9  ;;  %v15775_v54 = vld [vmem:[#allocation52_spill] sm:$0xff] }
 0xb69   : > { %v7009_v35 = vmul.f32 %v6945_v18, %v15044_v25  ;;  %v7331_v49 = vadd.f32 %v15055_v8, %v7330_v43  ;;  %vm6833_vm9 = vweird.f32 %v9028_v46  ;;  %v6836_v32 = vand.u32 2147483647, %v15196_v27  ;;  %7520 = vst [vmem:[%s15229_s30 + $0x20] sm:$0xff] %v7504_v40  ;;  %v7477_v28 = vpop.f32.mrf.mxu3 }
 0xb6a   : > { %v6838_v47 = vand.u32 2147483648, %v15196_v27  ;;  %9029 = vrcp.f32 %v15240_v51  ;;  %v6830_v53 = vmul.f32 %v9028_v46, %v6829_v10  ;;  %v7473_v23 = vadd.f32 %v15193_v13, %v7424_v22  ;;  %v15772_v13 = vld [vmem:[#allocation30_spill] sm:$0xff] }
 0xb6b   : > { %v7041_v56 = vpack.c.bf16 %v7009_v35, %v15108_v61  ;;  %v7476_v50 = vadd.f32 %v7475_v44, %v7427_v20  ;;  %vm6712_vm10 = vweird.f32 %v15013_v26  ;;  %v6716_v25 = vand.u32 2147483647, %v15013_v26  ;;  %v7428_v12 = vpop.f32.mrf.mxu2 }
 0xb6c   : > { %v6853_v21 = vadd.f32 0.18741608, %v6852_v60  ;;  %v7380_v45 = vadd.f32 %v7379_v7, %v7331_v49  ;;  %vm15256_vm11 = vmor %vm6712_vm10, %vm6713_vm8  ;;  %v6831_v2 = vadd.f32 %v9028_v46, %v6830_v53  ;;  %vm6832_vm12 = vweird.f32 %v15196_v27 }
 0xb6d   : > { %v7505_v61 = vadd.f32 %v7473_v23, %v15772_v13  ;;  %7396 = vmatmul.bf16.gmra.mxu1 %v7041_v56  ;;  %v7506_v52 = vadd.f32 %v7476_v50, %v15773_v29  ;;  %v6715_v15 = vsel %vm15256_vm11, %v15061_v14, %v6711_v36  ;;  %v15774_v38 = vand.u32 2147483648, %v15013_v26  ;;  %vm6834_vm13 = vmor %vm6832_vm12, %vm6833_vm9 }
 0xb6e   : > { %v6839_v57 = vor.u32 1.1754944e-38, %v6838_v47  ;;  %v7429_v5 = vadd.f32 %v7428_v12, %v7380_v45  ;;  %v8164_v27 = vclamps-f32 %v15213_v17, 1.0  ;;  %v6816_v30 = vmul.f32 %v6815_v3, %v15024_v34  ;;  %v15776_v17 = vld [vmem:[#allocation55_spill] sm:$0xff]  ;;  %v15778_v45 = vld [vmem:[#allocation42_spill] sm:$0xff] }
 0xb6f   : > { %v6719_v48 = vor.u32 1.1754944e-38, %v15774_v38  ;;  %v6835_v59 = vsel %vm6834_vm13, %v9028_v46, %v6831_v2  ;;  %vm6837_vm14 = vcmp.eq.f32.partialorder %v6836_v32, 8.507059e+37  ;;  %7521 = vst [vmem:[%s15229_s30 + $0x28] sm:$0xff] %v7505_v61  ;;  %vm6717_vm15 = vcmp.eq.f32.partialorder %v6716_v25, 8.507059e+37  ;;  %v15777_v46 = vld [vmem:[#allocation29_spill] sm:$0xff] }
 0xb70   : > { %v9030_v41 = vpop.eup %9029  ;;  %v6840_v44 = vsel %vm6837_vm14, %v6839_v57, %v6835_v59  ;;  %v6854_v14 = vmul.f32 %v6853_v21, %v15134_v37  ;;  %7522 = vst [vmem:[%s15229_s30 + $0x30] sm:$0xff] %v7506_v52  ;;  %v7478_v26 = vadd.f32 %v7477_v28, %v7429_v5  ;;  %v7015_v6 = vpack.c.bf16 %v15776_v17, %v15775_v54  ;;  %v15779_v57 = vld [vmem:[#allocation34_spill] sm:$0xff] }
 0xb71   : > { %v6720_v11 = vsel %vm6717_vm15, %v6719_v48, %v6715_v15  ;;  %v6841_v55 = vmul.f32 %v6840_v44, %v6816_v30  ;;  %v6868_v33 = vmul.f32 %v9030_v41, %v15240_v51  ;;  %v6696_v34 = vmul.f32 %v15095_v58, %v14820_v16 }
 0xb72   : > { %v7507_v0 = vadd.f32 %v7478_v26, %v15777_v46  ;;  %v4254_v62 = vmul.f32 0.5, %v14799_v63  ;;  %v6942_v36 = vadd.f32 1.0, %v8164_v27  ;;  %v4258_v60 = vmul.f32 0.5, %v15009_v42 }
 0xb73   : > { %v8168_v18 = vclamps-f32 %v6841_v55, 1.0  ;;  %v6869_v37 = vsub.f32 1.0, %v6868_v33  ;;  %v6721_v9 = vmul.f32 %v6720_v11, %v6696_v34  ;;  %v6855_v43 = vadd.f32 1.1283791, %v6854_v14 }
 0xb74   : > { %v6878_v39 = vand.u32 2147483648, %v15240_v51  ;;  %7523 = vst [vmem:[%s15229_s30 + $0x38] sm:$0xff] %v7507_v0  ;;  %v7333_v40 = vpop.f32.mrf.mxu0  ;;  %vm6873_vm0 = vweird.f32 %v9030_v41  ;;  %v6876_v16 = vand.u32 2147483647, %v15240_v51  ;;  %v7006_v58 = vmul.f32 %v6942_v36, %v4254_v62  ;;  %v7382_v23 = vpop.f32.mrf.mxu1 }
 0xb75   : > { %v6946_v22 = vadd.f32 1.0, %v8168_v18  ;;  %v6870_v20 = vmul.f32 %v9030_v41, %v6869_v37  ;;  %vm6872_vm2 = vweird.f32 %v15240_v51  ;;  %v8165_v63 = vclamps-f32 %v6721_v9, 1.0  ;;  %v15781_v18 = vld [vmem:[#allocation36_spill] sm:$0xff] }
 0xb76   : > { %v6856_v10 = vmul.f32 %v6855_v43, %v15111_v19  ;;  %vm6874_vm3 = vmor %vm6872_vm2, %vm6873_vm0  ;;  %v6879_v42 = vor.u32 1.1754944e-38, %v6878_v39  ;;  %vm6877_vm4 = vcmp.eq.f32.partialorder %v6876_v16, 8.507059e+37  ;;  %v7334_v47 = vadd.f32 %v15055_v8, %v7333_v40  ;;  %v15782_v39 = vld [vmem:[#allocation37_spill] sm:$0xff] }
 0xb77   : > { %v7010_v35 = vmul.f32 %v6946_v22, %v4258_v60  ;;  %v6871_v3 = vadd.f32 %v9030_v41, %v6870_v20  ;;  %7459 = vmatmul.bf16.vlgmr.msrb.gmra.mxu0 %v7015_v6  ;;  %v6943_v50 = vadd.f32 1.0, %v8165_v63  ;;  %v4255_v24 = vmul.f32 0.5, %v15778_v45 }
 0xb78   : > { %v7383_v25 = vadd.f32 %v7382_v23, %v7334_v47  ;;  %v4259_v19 = vmul.f32 0.5, %v15081_v1 }
 0xb79   : > { %v6875_v49 = vsel %vm6874_vm3, %v9030_v41, %v6871_v3  ;;  %v7042_v32 = vpack.c.bf16 %v7010_v35, %v7006_v58  ;;  %v7007_v61 = vmul.f32 %v6943_v50, %v4255_v24  ;;  %v15780_v41 = vld [vmem:[#allocation35_spill] sm:$0xff] }
 0xb7a   : > { %v6880_v53 = vsel %vm6877_vm4, %v6879_v42, %v6875_v49 }
 0xb7b   : > { %v6881_v56 = vmul.f32 %v6880_v53, %v6856_v10  ;;  %7445 = vmatmul.bf16.gmra.mxu2 %v7042_v32  ;;  %v15783_v32 = vld [vmem:[#allocation38_spill] sm:$0xff] }
 0xb7c   : > { %v7335_v21 = vpop.f32.mrf.mxu0  ;;  %v7384_v48 = vpop.f32.mrf.mxu1 }
 0xb7d   : > { %v8169_v7 = vclamps-f32 %v6881_v56, 1.0  ;;  %v7336_v52 = vadd.f32 %v15055_v8, %v7335_v21 }
 0xb7e   : > { %v7431_v51 = vpop.f32.mrf.mxu2 }
 0xb7f   : > { %v6947_v2 = vadd.f32 1.0, %v8169_v7  ;;  %v7432_v13 = vadd.f32 %v7431_v51, %v7383_v25  ;;  %v7385_v27 = vadd.f32 %v7384_v48, %v7336_v52  ;;  %v15784_v51 = vld [vmem:[#allocation39_spill] sm:$0xff] }
 0xb80   : > { %v7480_v12 = vpop.f32.mrf.mxu3 }
 0xb81   : > { %v7011_v29 = vmul.f32 %v6947_v2, %v4259_v19  ;;  %v7481_v15 = vadd.f32 %v7480_v12, %v7432_v13  ;;  %v15785_v13 = vld [vmem:[#allocation31_spill] sm:$0xff] }
 0xb83   : > { %v7043_v38 = vpack.c.bf16 %v7011_v29, %v7007_v61  ;;  %v7508_v5 = vadd.f32 %v7481_v15, %v15779_v57  ;;  %v15786_v15 = vld [vmem:[#allocation33_spill] sm:$0xff] }
 0xb84   : > { %v7338_v14 = vpop.f32.mrf.mxu0 }
 0xb85   : > { %7494 = vmatmul.bf16.gmra.mxu3 %v7043_v38  ;;  %7524 = vst [vmem:[%s15229_s30 + $0x40] sm:$0xff] %v7508_v5  ;;  %v7339_v26 = vadd.f32 %v15055_v8, %v7338_v14 }
 0xb86   : > { %v7433_v30 = vpop.f32.mrf.mxu2 }
 0xb87   : > { %v7434_v59 = vadd.f32 %v7433_v30, %v7385_v27 }
 0xb88   : > { %v7482_v28 = vpop.f32.mrf.mxu3  ;;  %v7387_v11 = vpop.f32.mrf.mxu1 }
 0xb89   : > { %v7483_v1 = vadd.f32 %v7482_v28, %v7434_v59  ;;  %v7388_v33 = vadd.f32 %v7387_v11, %v7339_v26  ;;  %v15789_v11 = vld [vmem:[#allocation41_spill] sm:$0xff] }
 0xb8b   : > { %v7509_v44 = vadd.f32 %v7483_v1, %v15780_v41  ;;  %v15787_v41 = vld [vmem:[#allocation40_spill] sm:$0xff] }
 0xb8c   : > { %v7340_v54 = vpop.f32.mrf.mxu0 }
 0xb8d   : > { %7525 = vst [vmem:[%s15229_s30 + $0x48] sm:$0xff] %v7509_v44  ;;  %v7341_v6 = vadd.f32 %v15055_v8, %v7340_v54 }
 0xb90   : > { %v7389_v0 = vpop.f32.mrf.mxu1 }
 0xb91   : > { %v7390_v36 = vadd.f32 %v7389_v0, %v7341_v6 }
 0xba7   : > { %v7436_v55 = vpop.f32.mrf.mxu2 }
 0xba8   : > { %v7437_v17 = vadd.f32 %v7436_v55, %v7388_v33 }
 0xbaf   : > { %v7438_v62 = vpop.f32.mrf.mxu2 }
 0xbb0   : > { %v7439_v9 = vadd.f32 %v7438_v62, %v7390_v36 }
 0xbb5   : > { %v7485_v34 = vpop.f32.mrf.mxu3 }
 0xbb6   : > { %v7486_v46 = vadd.f32 %v7485_v34, %v7437_v17 }
 0xbb8   : > { %v7510_v37 = vadd.f32 %v7486_v46, %v15781_v18 }
 0xbba   : > { %7526 = vst [vmem:[%s15229_s30 + $0x50] sm:$0xff] %v7510_v37 }
 0xbbd   : > { %v7487_v60 = vpop.f32.mrf.mxu3 }
 0xbbe   : > { %v7488_v43 = vadd.f32 %v7487_v60, %v7439_v9 }
 0xbc0   : > { %v7511_v40 = vadd.f32 %v7488_v43, %v15782_v39 }
 0xbc2   : > { %7527 = vst [vmem:[%s15229_s30 + $0x58] sm:$0xff] %v7511_v40 }
 0xbcf   : > { %v7343_v22 = vpop.f32.mrf.mxu0  ;;  %v7392_v16 = vpop.f32.mrf.mxu1 }
 0xbd0   : > { %v7344_v20 = vadd.f32 %v15055_v8, %v7343_v22 }
 0xbd2   : > { %v7393_v58 = vadd.f32 %v7392_v16, %v7344_v20 }
 0xbd7   : > { %v7345_v35 = vpop.f32.mrf.mxu0  ;;  %v7394_v53 = vpop.f32.mrf.mxu1 }
 0xbd8   : > { %v7346_v42 = vadd.f32 %v15055_v8, %v7345_v35 }
 0xbda   : > { %v7395_v23 = vadd.f32 %v7394_v53, %v7346_v42 }
 0xbdb   : > { %v7441_v3 = vpop.f32.mrf.mxu2  ;;  %v7490_v10 = vpop.f32.mrf.mxu3 }
 0xbdc   : > { %v7442_v63 = vadd.f32 %v7441_v3, %v7393_v58 }
 0xbde   : > { %v7491_v49 = vadd.f32 %v7490_v10, %v7442_v63 }
 0xbe0   : > { %v7512_v47 = vadd.f32 %v7491_v49, %v15783_v32 }
 0xbe2   : > { %7528 = vst [vmem:[%s15229_s30 + $0x60] sm:$0xff] %v7512_v47 }
 0xbe3   : > { %v7443_v56 = vpop.f32.mrf.mxu2  ;;  %v7492_v25 = vpop.f32.mrf.mxu3 }
 0xbe4   : > { %v7444_v50 = vadd.f32 %v7443_v56, %v7395_v23  ;;  %v7348_v7 = vpop.f32.mrf.mxu0 }
 0xbe5   : > { %v7349_v12 = vadd.f32 %v15055_v8, %v7348_v7 }
 0xbe6   : > { %v7493_v21 = vadd.f32 %v7492_v25, %v7444_v50 }
 0xbe8   : > { %v7513_v45 = vadd.f32 %v7493_v21, %v15784_v51 }
 0xbea   : > { %7529 = vst [vmem:[%s15229_s30 + $0x68] sm:$0xff] %v7513_v45  ;;  %v7397_v48 = vpop.f32.mrf.mxu1 }
 0xbeb   : > { %v7398_v5 = vadd.f32 %v7397_v48, %v7349_v12 }
 0xbec   : > { %v7350_v24 = vpop.f32.mrf.mxu0 }
 0xbed   : > { %v7351_v30 = vadd.f32 %v15055_v8, %v7350_v24 }
 0xbf2   : > { %v7399_v28 = vpop.f32.mrf.mxu1 }
 0xbf3   : > { %v7400_v1 = vadd.f32 %v7399_v28, %v7351_v30 }
 0xbf4   : > { %v7460_v19 = vpop.f32.mrf.mxu0 }
 0xbf5   : > { %v7461_v2 = vadd.f32 %v7460_v19, %v15157_v31 }
 0xbf7   : > { %v7500_v61 = vadd.f32 %v7461_v2, %v15785_v13 }
 0xbf9   : > { %7516 = vst [vmem:[%s15229_s30] sm:$0xff] %v7500_v61 }
 0xbfc   : > { %v7462_v29 = vpop.f32.mrf.mxu0 }
 0xbfd   : > { %v7463_v52 = vadd.f32 %v7462_v29, %v15183_v4 }
 0xbfe   : > { %v7446_v57 = vpop.f32.mrf.mxu2 }
 0xbff   : > { %v7501_v38 = vadd.f32 %v7463_v52, %v15786_v15  ;;  %v7447_v27 = vadd.f32 %v7446_v57, %v7398_v5 }
 0xc01   : > { %7517 = vst [vmem:[%s15229_s30 + $0x8] sm:$0xff] %v7501_v38 }
 0xc06   : > { %v7448_v4 = vpop.f32.mrf.mxu2 }
 0xc07   : > { %v7449_v14 = vadd.f32 %v7448_v4, %v7400_v1 }
 0xc08   : > { %v7495_v31 = vpop.f32.mrf.mxu3 }
 0xc09   : > { %v7496_v59 = vadd.f32 %v7495_v31, %v7447_v27 }
 0xc0b   : > { %v7514_v44 = vadd.f32 %v7496_v59, %v15787_v41 }
 0xc0d   : > { %7530 = vst [vmem:[%s15229_s30 + $0x70] sm:$0xff] %v7514_v44 }
 0xc10   : > { %v7497_v8 = vpop.f32.mrf.mxu3 }
 0xc11   : > { %v7498_v26 = vadd.f32 %v7497_v8, %v7449_v14 }
 0xc13   : > { %v7515_v55 = vadd.f32 %v7498_v26, %v15789_v11 }
 0xc15   : > { %7531 = vst [vmem:[%s15229_s30 + $0x78] sm:$0xff] %v7515_v55 }
 0xc16   : > { %9334 = shalt.err (!%p9331_p9)
}
 0xc17   : > { %s9412_s17 = smov 128   ;;  %s9413_s30 = smov 8  }
 0xc18   : > { %8467 = dma.vmem_to_hbm [thread:$0]  (%p9591_p5), %s7546_s16, 2048, %s7548_s22, %s7533_s15, %s9412_s17, %s9412_s17, %s9413_s30  }
 0xc19 PF: > { %s7562_s14 = sand.u32 1, %s9377_s25   ;;  %p15790_p10 = scmp.ge.s32.totalorder %s9389_s28, 2 }
 0xc1a   : > { %s7563_s29 = scalar_lea.sflag [#allocation5], %s7562_s14 }
 0xc1b   : > { %p8499_p13 = pnand %p15790_p10, %p9595_p6 }
 0xc1d   : > { %p8500_p11 = pneg %p8499_p13 }
 0xc1f   : > { %9372 = dma.done.wait (%p8500_p11), %s7563_s29, 2048  }
 0xc20   : > { %9374 = vsyncadd (%p8500_p11), %s7563_s29, 4294965248  ;;  %p30_p0 = scmp.ge.s32.totalorder %s9565_s8, 4   ;;  %s15791_s25 = smov %s9381_s26 }
 0xc21   : > { %s15792_s26 = smov %s9385_s27  ;;  %s15793_s27 = smov %s9576_s7 }
 0xc22   : > { %s15794_s28 = smov %s9565_s8  ;;  %32 = sbr.rel (!%p30_p0) target bundleno = 18 (0x12), region = 149 }
 0xc27   :  { %7569 = vsyncpa [#allocation4], 1 }
 0xc28   :  { %7571 = vsyncpa [#allocation4 + $0x1], 1 }
 0xc29   :  { %7572 = vsyncpa [#allocation7], 1 }
 0xc2a   :  { %7573 = vsyncpa [#allocation10], 1 }
 0xc2b   :  { %7574 = vsyncpa [#allocation13], 1 }
 0xc2c   :  { %7575 = vsyncpa [#allocation16], 1 }
 0xc2d   :  { %7576 = vsyncpa [#allocation5], 1 }
 0xc2e   :  { %7578 = vsyncpa [#allocation5 + $0x1], 1 }

</bundles_post_ra>
